<compile_context>
chip_gen: v7x
topology: tpu7x:2x2x1
jax: 0.10.0
libtpu: 0.0.40
codegen_flags: <defaults>
</compile_context>

<pallas_src>
import numpy as np
import jax
import jax.numpy as jnp
from jax.experimental import pallas as pl
from jax.experimental.pallas import tpu as pltpu


_SQRT1_2 = 0.7071067811865476
_PAD = 2  # halo width of the shared stencil scratch (supports up to 5x5)


# ------------------------------ in-kernel math ------------------------------

def _gelu_erf(x):
    """Exact-erf GELU via the Abramowitz&Stegun 7.1.26 polynomial (|err|~1e-7).

    exp() and the approximate reciprocal run on the EUP slot, which is free
    while the kernel is VALU-bound on the stencil FMAs.
    """
    a1, a2, a3 = 0.254829592, -0.284496736, 1.421413741
    a4, a5, p = -1.453152027, 1.061405429, 0.3275911
    s = jnp.where(x >= 0.0, 1.0, -1.0)
    z = jnp.abs(x) * _SQRT1_2
    t = pl.reciprocal(1.0 + p * z, approx=True)
    poly = ((((a5 * t + a4) * t + a3) * t + a2) * t + a1) * t
    erf = s * (1.0 - poly * jnp.exp(-z * z))
    return 0.5 * x * (1.0 + erf)


# --------------------------------- kernel -----------------------------------

def _make_kernel(Hs, Ws, C2, mxu_dtype):
    WC2 = Ws * C2  # packed lane width of every stencil intermediate

    def kernel(x_ref, wpin_ref, t3_ref, t5_ref, tA_ref, tB_ref, qblk_ref,
               wout_ref, o_ref, pad_ref):
        # Zero the whole halo scratch each grid step (cheap: (Hs+4)x(Ws+4)*C2
        # f32).  The interior is fully overwritten before every stencil read,
        # and per-step zeroing keeps it correct under megacore "parallel"
        # splitting of the batch grid axis.
        pad_ref[...] = jnp.zeros_like(pad_ref)

        # ---- project_in: 1x1 conv as a block-diagonal MXU matmul ------------
        #      (Hs, Ws*C) @ (Ws*C, Ws*C2) -> packed y (Hs, Ws*C2), f32 acc.
        x = x_ref[0].astype(mxu_dtype)
        y = jnp.dot(x, wpin_ref[...], preferred_element_type=jnp.float32)

        def store_interior(v):
            pad_ref[_PAD:_PAD + Hs, _PAD * C2:_PAD * C2 + WC2] = v

        def col(dx):
            # Full-height window at W-offset dx: a static lane-offset slice of
            # dx*C2 lanes (Mosaic lowers the shift on the XLU slot).  Hoisted
            # out of the dy loop so there are only 5 lane shifts per stencil.
            return pad_ref[:, dx * C2:dx * C2 + WC2]

        def stencil3_and_5():
            # Fused depthwise 3x3 + 5x5 'same' convs over the scratch interior;
            # every window load feeds both accumulators.  Taps are per-channel,
            # pre-tiled across W host-side so they broadcast on the packed lanes.
            acc3 = jnp.zeros((Hs, WC2), jnp.float32)
            acc5 = jnp.zeros((Hs, WC2), jnp.float32)
            for dx in range(5):
                cdx = col(dx)
                for dy in range(5):
                    win = cdx[dy:dy + Hs, :]
                    i5 = dy * 5 + dx
                    acc5 = acc5 + t5_ref[i5:i5 + 1, :] * win
                    if 1 <= dy <= 3 and 1 <= dx <= 3:
                        i3 = (dy - 1) * 3 + (dx - 1)
                        acc3 = acc3 + t3_ref[i3:i3 + 1, :] * win
            return acc3, acc5

        def stencil5(taps_ref):
            acc = jnp.zeros((Hs, WC2), jnp.float32)
            for dx in range(5):
                cdx = col(dx)
                for dy in range(5):
                    i5 = dy * 5 + dx
                    acc = acc + taps_ref[i5:i5 + 1, :] * cdx[dy:dy + Hs, :]
            return acc

        # ---- stage 1: depthwise 3x3 & 5x5 over y (shared windows) + ReLU ----
        store_interior(y)
        a3, a5 = stencil3_and_5()
        a3 = jnp.maximum(a3, 0.0)
        a5 = jnp.maximum(a5, 0.0)

        # ---- stage 2: grouped 3x3_1 / 5x5_1 folded into one per-channel 5x5
        #      stencil per source (host-permuted taps).  The scratch is reused;
        #      correctness relies on Pallas preserving program order of Ref
        #      reads/writes: z3 is fully materialized BEFORE a5 overwrites the
        #      interior.
        store_interior(a3)
        z3 = stencil5(tA_ref)
        store_interior(a5)
        z5 = stencil5(tB_ref)

        # ---- chunk/cat + per-group pair-sum: ONE merged block-diag matmul ---
        zcat = jnp.concatenate([z3, z5], axis=-1).astype(mxu_dtype)
        v = jnp.dot(zcat, qblk_ref[...], preferred_element_type=jnp.float32)

        # ---- exact-erf GELU, then project_out (block-diag matmul) -----------
        g = _gelu_erf(v).astype(mxu_dtype)
        out = jnp.dot(g, wout_ref[...], preferred_element_type=jnp.float32)
        o_ref[0] = out.astype(o_ref.dtype)

    return kernel


# ----------------------- glue: weight re-packing (host) ---------------------

def _prep_weights(params, Ws, mxu_dtype):
    """Repack torch-layout weights into the lane-packed kernel layout."""
    w_pin = np.asarray(params['w_pin'], np.float32)    # (2Hf, C, 1, 1)
    w_dw3 = np.asarray(params['w_dw3'], np.float32)    # (2Hf, 1, 3, 3)
    w_dw5 = np.asarray(params['w_dw5'], np.float32)    # (2Hf, 1, 5, 5)
    w_dw31 = np.asarray(params['w_dw31'], np.float32)  # (Hf, 2, 3, 3)
    w_dw51 = np.asarray(params['w_dw51'], np.float32)  # (Hf, 2, 5, 5)
    w_pout = np.asarray(params['w_pout'], np.float32)  # (C, 2Hf, 1, 1)
    C2 = w_pin.shape[0]
    Hf = w_dw31.shape[0]
    eye = np.eye(Ws, dtype=np.float32)

    def tile_w(t):   # (k, k, C2) per-channel taps -> (k*k, Ws*C2) packed taps
        k = t.shape[0]
        t = t.reshape(k * k, 1, C2)
        return np.tile(t, (1, Ws, 1)).reshape(k * k, Ws * C2)

    # project_in / project_out as block-diagonal matrices on the packed layout.
    wpin_blk = np.kron(eye, w_pin[:, :, 0, 0].T)        # (Ws*C, Ws*C2)
    wout_blk = np.kron(eye, w_pout[:, :, 0, 0].T)       # (Ws*C2, Ws*C)

    # stage-1 depthwise taps (per channel), tiled across W.
    t3 = tile_w(np.transpose(w_dw3[:, 0], (1, 2, 0)))   # (9,  Ws*C2)
    t5 = tile_w(np.transpose(w_dw5[:, 0], (1, 2, 0)))   # (25, Ws*C2)

    # stage-2: fold chunk/cat + grouped convs into per-channel 5x5 taps over
    # a3 (tA) and a5 (tB): 3x3 taps zero-padded to 5x5 where the channel
    # belongs to dwconv3x3_1, plus a 0/1 pair-reduction matrix (qblk).
    flat31 = w_dw31.reshape(C2, 3, 3)
    flat51 = w_dw51.reshape(C2, 5, 5)
    pad31 = np.pad(flat31, ((0, 0), (1, 1), (1, 1)))
    tA = np.concatenate([pad31[:Hf], flat51[:Hf]], axis=0)   # a3 channel taps
    tB = np.concatenate([pad31[Hf:], flat51[Hf:]], axis=0)   # a5 channel taps
    tA = tile_w(np.transpose(tA, (1, 2, 0)))
    tB = tile_w(np.transpose(tB, (1, 2, 0)))

    q3 = np.zeros((C2, C2), np.float32)
    q5 = np.zeros((C2, C2), np.float32)
    for c in range(Hf):
        q3[c, c // 2] = 1.0                  # a3[c] (c<Hf)  -> out1[c//2]
        q5[c, (Hf + c) // 2] = 1.0           # a5[c] (c<Hf)  -> out1[(Hf+c)//2]
    for c in range(Hf, C2):
        q3[c, Hf + (c - Hf) // 2] = 1.0      # a3[c] (c>=Hf) -> out2[(c-Hf)//2]
        q5[c, Hf + c // 2] = 1.0             # a5[c] (c>=Hf) -> out2[c//2]
    # merged [z3 | z5] -> v mixing matrix, block-diagonal over W.
    qblk = np.concatenate([np.kron(eye, q3), np.kron(eye, q5)], axis=0)

    f32 = lambda a: jnp.asarray(a, jnp.float32)
    mxu = lambda a: jnp.asarray(a, mxu_dtype)
    return (mxu(wpin_blk), f32(t3), f32(t5), f32(tA), f32(tB),
            mxu(qblk), mxu(wout_blk))


# ----------------------------- VMEM bookkeeping ------------------------------

def _padded_vmem_bytes(shape, dtype):
    """Bytes of one VMEM buffer including TPU (sublane, lane) tile padding."""
    itemsize = np.dtype(dtype).itemsize
    shape = tuple(int(s) for s in shape)
    if not shape:
        return 4
    lanes = -(-shape[-1] // 128) * 128
    if len(shape) == 1:
        return lanes * itemsize
    sub_g = 8 * max(1, 4 // itemsize)          # sub-32-bit dtypes pack sublanes
    subl = -(-shape[-2] // sub_g) * sub_g
    lead = int(np.prod(shape[:-2], dtype=np.int64)) if len(shape) > 2 else 1
    return lead * subl * lanes * itemsize


def _vmem_limit_bytes(est_bytes):
    """Generation-aware limit: ceiling at ~75% of physical VMEM per core."""
    cap = 64 * 2 ** 20                          # conservative fallback (v7x TC)
    try:
        cap = int(getattr(pltpu.get_tpu_info(), "vmem_capacity_bytes", cap))
    except Exception:
        pass
    ceiling = (3 * cap) // 4
    return int(max(16 * 2 ** 20, min(ceiling, max(32 * 2 ** 20, 2 * est_bytes))))


# --------------------------------- wrappers ----------------------------------

def feedforward_pallas_packed(x_packed, params, mxu_dtype=jnp.bfloat16):
    """Core entry: x_packed is (B, H, W*C), channels-last, W-major / C-minor."""
    B, Hs, WC = x_packed.shape
    C = params['w_pin'].shape[1]
    Hf = params['w_dw31'].shape[0]
    C2 = 2 * Hf
    if WC % C != 0:
        raise ValueError(f"packed width {WC} is not a multiple of C={C}")
    Ws = WC // C
    WC2 = Ws * C2

    weights = _prep_weights(params, Ws, mxu_dtype)
    kernel = _make_kernel(Hs, Ws, C2, mxu_dtype)

    def _full(a):
        nd = a.ndim
        return pl.BlockSpec(a.shape, lambda b, _nd=nd: (0,) * _nd)

    # VMEM estimate WITH (8,128) tile padding: double-buffered I/O blocks,
    # (double-buffered) weight blocks, halo scratch and ~12 live packed f32
    # intermediates (y/a3/a5/z3/z5/zcat/v/g/accs + headroom).
    io = 2 * 2 * _padded_vmem_bytes((1, Hs, WC), x_packed.dtype)
    wts = 2 * sum(_padded_vmem_bytes(w.shape, w.dtype) for w in weights)
    scratch = _padded_vmem_bytes((Hs + 2 * _PAD, (Ws + 2 * _PAD) * C2), jnp.float32)
    live = 12 * _padded_vmem_bytes((Hs, WC2), jnp.float32)
    vmem_limit = _vmem_limit_bytes(io + wts + scratch + live)

    out = pl.pallas_call(
        kernel,
        out_shape=jax.ShapeDtypeStruct((B, Hs, WC), x_packed.dtype),
        grid_spec=pltpu.PrefetchScalarGridSpec(
            num_scalar_prefetch=0,
            grid=(B,),
            in_specs=[pl.BlockSpec((1, Hs, WC), lambda b: (b, 0, 0))]
                     + [_full(w) for w in weights],
            out_specs=pl.BlockSpec((1, Hs, WC), lambda b: (b, 0, 0)),
            scratch_shapes=[
                pltpu.VMEM((Hs + 2 * _PAD, (Ws + 2 * _PAD) * C2), jnp.float32),
            ],
        ),
        compiler_params=pltpu.CompilerParams(
            dimension_semantics=("parallel",),
            vmem_limit_bytes=vmem_limit,
        ),
    )(x_packed, *weights)
    return out


def feedforward_pallas_nhwc(x_nhwc, params, mxu_dtype=jnp.bfloat16):
    """Channels-last entry: (B, H, W, C) -> (B, H, W, C) (reshapes are free)."""
    B, Hs, Ws, C = x_nhwc.shape
    out = feedforward_pallas_packed(x_nhwc.reshape(B, Hs, Ws * C), params,
                                    mxu_dtype=mxu_dtype)
    return out.reshape(B, Hs, Ws, C)


def feedforward_pallas(x_nchw, params, mxu_dtype=jnp.bfloat16):
    """PyTorch NCHW convention: (B, C, H, W) -> (B, C, H, W)."""
    x = jnp.transpose(x_nchw, (0, 2, 3, 1))                    # NCHW -> NHWC
    out = feedforward_pallas_nhwc(x, params, mxu_dtype=mxu_dtype)
    return jnp.transpose(out, (0, 3, 1, 2))                    # NHWC -> NCHW


# ----------------------------- pure-JAX reference ---------------------------

def feedforward_ref(x_nchw, params):
    Hf = params['w_pin'].shape[0] // 2
    hp = jax.lax.Precision.HIGHEST

    def conv(x, w, groups=1, pad=0):
        return jax.lax.conv_general_dilated(
            x, w, window_strides=(1, 1), padding=[(pad, pad), (pad, pad)],
            dimension_numbers=('NCHW', 'OIHW', 'NCHW'),
            feature_group_count=groups, precision=hp)

    y = conv(x_nchw, params['w_pin'])
    a3 = jax.nn.relu(conv(y, params['w_dw3'], groups=2 * Hf, pad=1))
    a5 = jax.nn.relu(conv(y, params['w_dw5'], groups=2 * Hf, pad=2))
    x1 = jnp.concatenate([a3[:, :Hf], a5[:, :Hf]], axis=1)
    x2 = jnp.concatenate([a3[:, Hf:], a5[:, Hf:]], axis=1)
    b1 = jax.nn.gelu(conv(x1, params['w_dw31'], groups=Hf, pad=1), approximate=False)
    b2 = jax.nn.gelu(conv(x2, params['w_dw51'], groups=Hf, pad=2), approximate=False)
    z = jnp.concatenate([b1, b2], axis=1)
    return conv(z, params['w_pout'])


# ------------------------------------ main -----------------------------------

def init_params(key, in_features, hidden_features):
    Hf = hidden_features
    ks = jax.random.split(key, 6)

    def w(k, shape):
        fan_in = shape[1] * shape[2] * shape[3]
        return jax.random.normal(k, shape, jnp.float32) / np.sqrt(fan_in)

    return {
        'w_pin':  w(ks[0], (2 * Hf, in_features, 1, 1)),   # project_in
        'w_dw3':  w(ks[1], (2 * Hf, 1, 3, 3)),             # dwconv3x3
        'w_dw5':  w(ks[2], (2 * Hf, 1, 5, 5)),             # dwconv5x5
        'w_dw31': w(ks[3], (Hf, 2, 3, 3)),                 # dwconv3x3_1 (groups=Hf)
        'w_dw51': w(ks[4], (Hf, 2, 5, 5)),                 # dwconv5x5_1 (groups=Hf)
        'w_pout': w(ks[5], (in_features, 2 * Hf, 1, 1)),   # project_out
    }


if __name__ == "__main__":
    B, C, Hs, Ws = 2, 4, 16, 16
    hidden_features = 8

    key = jax.random.PRNGKey(0)
    kx, kp = jax.random.split(key)
    x = jax.random.normal(kx, (B, C, Hs, Ws), jnp.float32)
    params = init_params(kp, C, hidden_features)

    ref = feedforward_ref(x, params)

    # strict check of the full-f32 path (same semantics as torch's f32 forward)
    out_f32 = jax.block_until_ready(feedforward_pallas(x, params, mxu_dtype=jnp.float32))
    assert out_f32.shape == (B, C, Hs, Ws)
    err_f32 = float(jnp.max(jnp.abs(out_f32 - ref)))
    assert err_f32 < 5e-3, f"f32 path: max abs error vs reference too large: {err_f32}"

    # default perf path: bf16 MXU operands, f32 accumulation (looser tolerance
    # reflects the deliberate bf16 cast of matmul operands only).
    out_bf16 = jax.block_until_ready(feedforward_pallas(x, params))
    assert out_bf16.shape == (B, C, Hs, Ws)
    err_bf16 = float(jnp.max(jnp.abs(out_bf16 - ref)))
    assert err_bf16 < 5e-2, f"bf16-MXU path: max abs error vs reference too large: {err_bf16}"

    print("KERNEL_OK")
</pallas_src>

<mosaic_0001>
module attributes {stable_mosaic.version = 11 : i64} {
  func.func @kernel(%arg0: i32, %arg1: memref<1x16x64xf32, #tpu.memory_space<vmem>>, %arg2: memref<64x256xf32, #tpu.memory_space<vmem>>, %arg3: memref<9x256xf32, #tpu.memory_space<vmem>>, %arg4: memref<25x256xf32, #tpu.memory_space<vmem>>, %arg5: memref<25x256xf32, #tpu.memory_space<vmem>>, %arg6: memref<25x256xf32, #tpu.memory_space<vmem>>, %arg7: memref<512x256xf32, #tpu.memory_space<vmem>>, %arg8: memref<256x64xf32, #tpu.memory_space<vmem>>, %arg9: memref<1x16x64xf32, #tpu.memory_space<vmem>>, %arg10: memref<20x320xf32, #tpu.memory_space<vmem>>) attributes {dimension_semantics = [#tpu.dimension_semantics<parallel>], iteration_bounds = array<i64: 2>, scalar_prefetch = 0 : i64, scratch_operands = 1 : i64, tpu.core_type = #tpu.core_type<tc>, window_params = [{transform_indices = @transform_0, window_bounds = array<i64: 1, 16, 64>}, {pipeline_mode = #tpu.pipeline_mode<synchronous>, transform_indices = @transform_1, window_bounds = array<i64: 64, 256>}, {pipeline_mode = #tpu.pipeline_mode<synchronous>, transform_indices = @transform_2, window_bounds = array<i64: 9, 256>}, {pipeline_mode = #tpu.pipeline_mode<synchronous>, transform_indices = @transform_3, window_bounds = array<i64: 25, 256>}, {pipeline_mode = #tpu.pipeline_mode<synchronous>, transform_indices = @transform_4, window_bounds = array<i64: 25, 256>}, {pipeline_mode = #tpu.pipeline_mode<synchronous>, transform_indices = @transform_5, window_bounds = array<i64: 25, 256>}, {pipeline_mode = #tpu.pipeline_mode<synchronous>, transform_indices = @transform_6, window_bounds = array<i64: 512, 256>}, {pipeline_mode = #tpu.pipeline_mode<synchronous>, transform_indices = @transform_7, window_bounds = array<i64: 256, 64>}, {transform_indices = @transform_8, window_bounds = array<i64: 1, 16, 64>}]} {
    %cst = arith.constant 0.000000e+00 : f32
    %0 = vector.broadcast %cst : f32 to vector<20x320xf32>
    %c0 = arith.constant 0 : index
    %c0_0 = arith.constant 0 : index
    %1 = vector.load %arg10[%c0, %c0_0] : memref<20x320xf32, #tpu.memory_space<vmem>>, vector<20x320xf32>
    tpu.vector_store %arg10[%c0, %c0_0], %0 {strides = array<i32>} : memref<20x320xf32, #tpu.memory_space<vmem>>, vector<20x320xf32>,
    %c0_1 = arith.constant 0 : index
    %c0_2 = arith.constant 0 : index
    %c0_3 = arith.constant 0 : index
    %2 = vector.load %arg1[%c0_1, %c0_2, %c0_3] : memref<1x16x64xf32, #tpu.memory_space<vmem>>, vector<1x16x64xf32>
    %3 = vector.shape_cast %2 : vector<1x16x64xf32> to vector<16x64xf32>
    %c0_4 = arith.constant 0 : index
    %c0_5 = arith.constant 0 : index
    %4 = vector.load %arg2[%c0_4, %c0_5] : memref<64x256xf32, #tpu.memory_space<vmem>>, vector<64x256xf32>
    %cst_6 = arith.constant dense<0.000000e+00> : vector<16x256xf32>
    %5 = tpu.matmul %3, %4, %cst_6 {dimension_numbers = #tpu.dot_dimension_numbers<[1], [0], [0], [1], [0, 0, 1, 1], [], []>} : vector<16x64xf32>, vector<64x256xf32>, vector<16x256xf32> -> vector<16x256xf32>
    %c2 = arith.constant 2 : index
    %c32 = arith.constant 32 : index
    %6 = vector.load %arg10[%c2, %c32] : memref<20x320xf32, #tpu.memory_space<vmem>>, vector<16x256xf32>
    tpu.vector_store %arg10[%c2, %c32], %5 {strides = array<i32>} : memref<20x320xf32, #tpu.memory_space<vmem>>, vector<16x256xf32>,
    %cst_7 = arith.constant 0.000000e+00 : f32
    %7 = vector.broadcast %cst_7 : f32 to vector<16x256xf32>
    %cst_8 = arith.constant 0.000000e+00 : f32
    %8 = vector.broadcast %cst_8 : f32 to vector<16x256xf32>
    %c0_9 = arith.constant 0 : index
    %c0_10 = arith.constant 0 : index
    %9 = vector.load %arg10[%c0_9, %c0_10] : memref<20x320xf32, #tpu.memory_space<vmem>>, vector<20x256xf32>
    %10 = vector.extract_strided_slice %9 {offsets = [0, 0], sizes = [16, 256], strides = [1, 1]} : vector<20x256xf32> to vector<16x256xf32>
    %c0_11 = arith.constant 0 : index
    %c0_12 = arith.constant 0 : index
    %11 = vector.load %arg4[%c0_11, %c0_12] : memref<25x256xf32, #tpu.memory_space<vmem>>, vector<1x256xf32>
    %12 = vector.broadcast %11 : vector<1x256xf32> to vector<16x256xf32>
    %13 = arith.mulf %12, %10 : vector<16x256xf32>
    %14 = arith.addf %8, %13 : vector<16x256xf32>
    %15 = vector.extract_strided_slice %9 {offsets = [1, 0], sizes = [16, 256], strides = [1, 1]} : vector<20x256xf32> to vector<16x256xf32>
    %c5 = arith.constant 5 : index
    %c0_13 = arith.constant 0 : index
    %16 = vector.load %arg4[%c5, %c0_13] : memref<25x256xf32, #tpu.memory_space<vmem>>, vector<1x256xf32>
    %17 = vector.broadcast %16 : vector<1x256xf32> to vector<16x256xf32>
    %18 = arith.mulf %17, %15 : vector<16x256xf32>
    %19 = arith.addf %14, %18 : vector<16x256xf32>
    %20 = vector.extract_strided_slice %9 {offsets = [2, 0], sizes = [16, 256], strides = [1, 1]} : vector<20x256xf32> to vector<16x256xf32>
    %c10 = arith.constant 10 : index
    %c0_14 = arith.constant 0 : index
    %21 = vector.load %arg4[%c10, %c0_14] : memref<25x256xf32, #tpu.memory_space<vmem>>, vector<1x256xf32>
    %22 = vector.broadcast %21 : vector<1x256xf32> to vector<16x256xf32>
    %23 = arith.mulf %22, %20 : vector<16x256xf32>
    %24 = arith.addf %19, %23 : vector<16x256xf32>
    %25 = vector.extract_strided_slice %9 {offsets = [3, 0], sizes = [16, 256], strides = [1, 1]} : vector<20x256xf32> to vector<16x256xf32>
    %c15 = arith.constant 15 : index
    %c0_15 = arith.constant 0 : index
    %26 = vector.load %arg4[%c15, %c0_15] : memref<25x256xf32, #tpu.memory_space<vmem>>, vector<1x256xf32>
    %27 = vector.broadcast %26 : vector<1x256xf32> to vector<16x256xf32>
    %28 = arith.mulf %27, %25 : vector<16x256xf32>
    %29 = arith.addf %24, %28 : vector<16x256xf32>
    %30 = vector.extract_strided_slice %9 {offsets = [4, 0], sizes = [16, 256], strides = [1, 1]} : vector<20x256xf32> to vector<16x256xf32>
    %c20 = arith.constant 20 : index
    %c0_16 = arith.constant 0 : index
    %31 = vector.load %arg4[%c20, %c0_16] : memref<25x256xf32, #tpu.memory_space<vmem>>, vector<1x256xf32>
    %32 = vector.broadcast %31 : vector<1x256xf32> to vector<16x256xf32>
    %33 = arith.mulf %32, %30 : vector<16x256xf32>
    %34 = arith.addf %29, %33 : vector<16x256xf32>
    %c0_17 = arith.constant 0 : index
    %c16 = arith.constant 16 : index
    %35 = vector.load %arg10[%c0_17, %c16] : memref<20x320xf32, #tpu.memory_space<vmem>>, vector<20x256xf32>
    %36 = vector.extract_strided_slice %35 {offsets = [0, 0], sizes = [16, 256], strides = [1, 1]} : vector<20x256xf32> to vector<16x256xf32>
    %c1 = arith.constant 1 : index
    %c0_18 = arith.constant 0 : index
    %37 = vector.load %arg4[%c1, %c0_18] : memref<25x256xf32, #tpu.memory_space<vmem>>, vector<1x256xf32>
    %38 = vector.broadcast %37 : vector<1x256xf32> to vector<16x256xf32>
    %39 = arith.mulf %38, %36 : vector<16x256xf32>
    %40 = arith.addf %34, %39 : vector<16x256xf32>
    %41 = vector.extract_strided_slice %35 {offsets = [1, 0], sizes = [16, 256], strides = [1, 1]} : vector<20x256xf32> to vector<16x256xf32>
    %c6 = arith.constant 6 : index
    %c0_19 = arith.constant 0 : index
    %42 = vector.load %arg4[%c6, %c0_19] : memref<25x256xf32, #tpu.memory_space<vmem>>, vector<1x256xf32>
    %43 = vector.broadcast %42 : vector<1x256xf32> to vector<16x256xf32>
    %44 = arith.mulf %43, %41 : vector<16x256xf32>
    %45 = arith.addf %40, %44 : vector<16x256xf32>
    %c0_20 = arith.constant 0 : index
    %c0_21 = arith.constant 0 : index
    %46 = vector.load %arg3[%c0_20, %c0_21] : memref<9x256xf32, #tpu.memory_space<vmem>>, vector<1x256xf32>
    %47 = vector.broadcast %46 : vector<1x256xf32> to vector<16x256xf32>
    %48 = arith.mulf %47, %41 : vector<16x256xf32>
    %49 = arith.addf %7, %48 : vector<16x256xf32>
    %50 = vector.extract_strided_slice %35 {offsets = [2, 0], sizes = [16, 256], strides = [1, 1]} : vector<20x256xf32> to vector<16x256xf32>
    %c11 = arith.constant 11 : index
    %c0_22 = arith.constant 0 : index
    %51 = vector.load %arg4[%c11, %c0_22] : memref<25x256xf32, #tpu.memory_space<vmem>>, vector<1x256xf32>
    %52 = vector.broadcast %51 : vector<1x256xf32> to vector<16x256xf32>
    %53 = arith.mulf %52, %50 : vector<16x256xf32>
    %54 = arith.addf %45, %53 : vector<16x256xf32>
    %c3 = arith.constant 3 : index
    %c0_23 = arith.constant 0 : index
    %55 = vector.load %arg3[%c3, %c0_23] : memref<9x256xf32, #tpu.memory_space<vmem>>, vector<1x256xf32>
    %56 = vector.broadcast %55 : vector<1x256xf32> to vector<16x256xf32>
    %57 = arith.mulf %56, %50 : vector<16x256xf32>
    %58 = arith.addf %49, %57 : vector<16x256xf32>
    %59 = vector.extract_strided_slice %35 {offsets = [3, 0], sizes = [16, 256], strides = [1, 1]} : vector<20x256xf32> to vector<16x256xf32>
    %c16_24 = arith.constant 16 : index
    %c0_25 = arith.constant 0 : index
    %60 = vector.load %arg4[%c16_24, %c0_25] : memref<25x256xf32, #tpu.memory_space<vmem>>, vector<1x256xf32>
    %61 = vector.broadcast %60 : vector<1x256xf32> to vector<16x256xf32>
    %62 = arith.mulf %61, %59 : vector<16x256xf32>
    %63 = arith.addf %54, %62 : vector<16x256xf32>
    %c6_26 = arith.constant 6 : index
    %c0_27 = arith.constant 0 : index
    %64 = vector.load %arg3[%c6_26, %c0_27] : memref<9x256xf32, #tpu.memory_space<vmem>>, vector<1x256xf32>
    %65 = vector.broadcast %64 : vector<1x256xf32> to vector<16x256xf32>
    %66 = arith.mulf %65, %59 : vector<16x256xf32>
    %67 = arith.addf %58, %66 : vector<16x256xf32>
    %68 = vector.extract_strided_slice %35 {offsets = [4, 0], sizes = [16, 256], strides = [1, 1]} : vector<20x256xf32> to vector<16x256xf32>
    %c21 = arith.constant 21 : index
    %c0_28 = arith.constant 0 : index
    %69 = vector.load %arg4[%c21, %c0_28] : memref<25x256xf32, #tpu.memory_space<vmem>>, vector<1x256xf32>
    %70 = vector.broadcast %69 : vector<1x256xf32> to vector<16x256xf32>
    %71 = arith.mulf %70, %68 : vector<16x256xf32>
    %72 = arith.addf %63, %71 : vector<16x256xf32>
    %c0_29 = arith.constant 0 : index
    %c32_30 = arith.constant 32 : index
    %73 = vector.load %arg10[%c0_29, %c32_30] : memref<20x320xf32, #tpu.memory_space<vmem>>, vector<20x256xf32>
    %74 = vector.extract_strided_slice %73 {offsets = [0, 0], sizes = [16, 256], strides = [1, 1]} : vector<20x256xf32> to vector<16x256xf32>
    %c2_31 = arith.constant 2 : index
    %c0_32 = arith.constant 0 : index
    %75 = vector.load %arg4[%c2_31, %c0_32] : memref<25x256xf32, #tpu.memory_space<vmem>>, vector<1x256xf32>
    %76 = vector.broadcast %75 : vector<1x256xf32> to vector<16x256xf32>
    %77 = arith.mulf %76, %74 : vector<16x256xf32>
    %78 = arith.addf %72, %77 : vector<16x256xf32>
    %79 = vector.extract_strided_slice %73 {offsets = [1, 0], sizes = [16, 256], strides = [1, 1]} : vector<20x256xf32> to vector<16x256xf32>
    %c7 = arith.constant 7 : index
    %c0_33 = arith.constant 0 : index
    %80 = vector.load %arg4[%c7, %c0_33] : memref<25x256xf32, #tpu.memory_space<vmem>>, vector<1x256xf32>
    %81 = vector.broadcast %80 : vector<1x256xf32> to vector<16x256xf32>
    %82 = arith.mulf %81, %79 : vector<16x256xf32>
    %83 = arith.addf %78, %82 : vector<16x256xf32>
    %c1_34 = arith.constant 1 : index
    %c0_35 = arith.constant 0 : index
    %84 = vector.load %arg3[%c1_34, %c0_35] : memref<9x256xf32, #tpu.memory_space<vmem>>, vector<1x256xf32>
    %85 = vector.broadcast %84 : vector<1x256xf32> to vector<16x256xf32>
    %86 = arith.mulf %85, %79 : vector<16x256xf32>
    %87 = arith.addf %67, %86 : vector<16x256xf32>
    %88 = vector.extract_strided_slice %73 {offsets = [2, 0], sizes = [16, 256], strides = [1, 1]} : vector<20x256xf32> to vector<16x256xf32>
    %c12 = arith.constant 12 : index
    %c0_36 = arith.constant 0 : index
    %89 = vector.load %arg4[%c12, %c0_36] : memref<25x256xf32, #tpu.memory_space<vmem>>, vector<1x256xf32>
    %90 = vector.broadcast %89 : vector<1x256xf32> to vector<16x256xf32>
    %91 = arith.mulf %90, %88 : vector<16x256xf32>
    %92 = arith.addf %83, %91 : vector<16x256xf32>
    %c4 = arith.constant 4 : index
    %c0_37 = arith.constant 0 : index
    %93 = vector.load %arg3[%c4, %c0_37] : memref<9x256xf32, #tpu.memory_space<vmem>>, vector<1x256xf32>
    %94 = vector.broadcast %93 : vector<1x256xf32> to vector<16x256xf32>
    %95 = arith.mulf %94, %88 : vector<16x256xf32>
    %96 = arith.addf %87, %95 : vector<16x256xf32>
    %97 = vector.extract_strided_slice %73 {offsets = [3, 0], sizes = [16, 256], strides = [1, 1]} : vector<20x256xf32> to vector<16x256xf32>
    %c17 = arith.constant 17 : index
    %c0_38 = arith.constant 0 : index
    %98 = vector.load %arg4[%c17, %c0_38] : memref<25x256xf32, #tpu.memory_space<vmem>>, vector<1x256xf32>
    %99 = vector.broadcast %98 : vector<1x256xf32> to vector<16x256xf32>
    %100 = arith.mulf %99, %97 : vector<16x256xf32>
    %101 = arith.addf %92, %100 : vector<16x256xf32>
    %c7_39 = arith.constant 7 : index
    %c0_40 = arith.constant 0 : index
    %102 = vector.load %arg3[%c7_39, %c0_40] : memref<9x256xf32, #tpu.memory_space<vmem>>, vector<1x256xf32>
    %103 = vector.broadcast %102 : vector<1x256xf32> to vector<16x256xf32>
    %104 = arith.mulf %103, %97 : vector<16x256xf32>
    %105 = arith.addf %96, %104 : vector<16x256xf32>
    %106 = vector.extract_strided_slice %73 {offsets = [4, 0], sizes = [16, 256], strides = [1, 1]} : vector<20x256xf32> to vector<16x256xf32>
    %c22 = arith.constant 22 : index
    %c0_41 = arith.constant 0 : index
    %107 = vector.load %arg4[%c22, %c0_41] : memref<25x256xf32, #tpu.memory_space<vmem>>, vector<1x256xf32>
    %108 = vector.broadcast %107 : vector<1x256xf32> to vector<16x256xf32>
    %109 = arith.mulf %108, %106 : vector<16x256xf32>
    %110 = arith.addf %101, %109 : vector<16x256xf32>
    %c0_42 = arith.constant 0 : index
    %c48 = arith.constant 48 : index
    %111 = vector.load %arg10[%c0_42, %c48] : memref<20x320xf32, #tpu.memory_space<vmem>>, vector<20x256xf32>
    %112 = vector.extract_strided_slice %111 {offsets = [0, 0], sizes = [16, 256], strides = [1, 1]} : vector<20x256xf32> to vector<16x256xf32>
    %c3_43 = arith.constant 3 : index
    %c0_44 = arith.constant 0 : index
    %113 = vector.load %arg4[%c3_43, %c0_44] : memref<25x256xf32, #tpu.memory_space<vmem>>, vector<1x256xf32>
    %114 = vector.broadcast %113 : vector<1x256xf32> to vector<16x256xf32>
    %115 = arith.mulf %114, %112 : vector<16x256xf32>
    %116 = arith.addf %110, %115 : vector<16x256xf32>
    %117 = vector.extract_strided_slice %111 {offsets = [1, 0], sizes = [16, 256], strides = [1, 1]} : vector<20x256xf32> to vector<16x256xf32>
    %c8 = arith.constant 8 : index
    %c0_45 = arith.constant 0 : index
    %118 = vector.load %arg4[%c8, %c0_45] : memref<25x256xf32, #tpu.memory_space<vmem>>, vector<1x256xf32>
    %119 = vector.broadcast %118 : vector<1x256xf32> to vector<16x256xf32>
    %120 = arith.mulf %119, %117 : vector<16x256xf32>
    %121 = arith.addf %116, %120 : vector<16x256xf32>
    %c2_46 = arith.constant 2 : index
    %c0_47 = arith.constant 0 : index
    %122 = vector.load %arg3[%c2_46, %c0_47] : memref<9x256xf32, #tpu.memory_space<vmem>>, vector<1x256xf32>
    %123 = vector.broadcast %122 : vector<1x256xf32> to vector<16x256xf32>
    %124 = arith.mulf %123, %117 : vector<16x256xf32>
    %125 = arith.addf %105, %124 : vector<16x256xf32>
    %126 = vector.extract_strided_slice %111 {offsets = [2, 0], sizes = [16, 256], strides = [1, 1]} : vector<20x256xf32> to vector<16x256xf32>
    %c13 = arith.constant 13 : index
    %c0_48 = arith.constant 0 : index
    %127 = vector.load %arg4[%c13, %c0_48] : memref<25x256xf32, #tpu.memory_space<vmem>>, vector<1x256xf32>
    %128 = vector.broadcast %127 : vector<1x256xf32> to vector<16x256xf32>
    %129 = arith.mulf %128, %126 : vector<16x256xf32>
    %130 = arith.addf %121, %129 : vector<16x256xf32>
    %c5_49 = arith.constant 5 : index
    %c0_50 = arith.constant 0 : index
    %131 = vector.load %arg3[%c5_49, %c0_50] : memref<9x256xf32, #tpu.memory_space<vmem>>, vector<1x256xf32>
    %132 = vector.broadcast %131 : vector<1x256xf32> to vector<16x256xf32>
    %133 = arith.mulf %132, %126 : vector<16x256xf32>
    %134 = arith.addf %125, %133 : vector<16x256xf32>
    %135 = vector.extract_strided_slice %111 {offsets = [3, 0], sizes = [16, 256], strides = [1, 1]} : vector<20x256xf32> to vector<16x256xf32>
    %c18 = arith.constant 18 : index
    %c0_51 = arith.constant 0 : index
    %136 = vector.load %arg4[%c18, %c0_51] : memref<25x256xf32, #tpu.memory_space<vmem>>, vector<1x256xf32>
    %137 = vector.broadcast %136 : vector<1x256xf32> to vector<16x256xf32>
    %138 = arith.mulf %137, %135 : vector<16x256xf32>
    %139 = arith.addf %130, %138 : vector<16x256xf32>
    %c8_52 = arith.constant 8 : index
    %c0_53 = arith.constant 0 : index
    %140 = vector.load %arg3[%c8_52, %c0_53] : memref<9x256xf32, #tpu.memory_space<vmem>>, vector<1x256xf32>
    %141 = vector.broadcast %140 : vector<1x256xf32> to vector<16x256xf32>
    %142 = arith.mulf %141, %135 : vector<16x256xf32>
    %143 = arith.addf %134, %142 : vector<16x256xf32>
    %144 = vector.extract_strided_slice %111 {offsets = [4, 0], sizes = [16, 256], strides = [1, 1]} : vector<20x256xf32> to vector<16x256xf32>
    %c23 = arith.constant 23 : index
    %c0_54 = arith.constant 0 : index
    %145 = vector.load %arg4[%c23, %c0_54] : memref<25x256xf32, #tpu.memory_space<vmem>>, vector<1x256xf32>
    %146 = vector.broadcast %145 : vector<1x256xf32> to vector<16x256xf32>
    %147 = arith.mulf %146, %144 : vector<16x256xf32>
    %148 = arith.addf %139, %147 : vector<16x256xf32>
    %c0_55 = arith.constant 0 : index
    %c64 = arith.constant 64 : index
    %149 = vector.load %arg10[%c0_55, %c64] : memref<20x320xf32, #tpu.memory_space<vmem>>, vector<20x256xf32>
    %150 = vector.extract_strided_slice %149 {offsets = [0, 0], sizes = [16, 256], strides = [1, 1]} : vector<20x256xf32> to vector<16x256xf32>
    %c4_56 = arith.constant 4 : index
    %c0_57 = arith.constant 0 : index
    %151 = vector.load %arg4[%c4_56, %c0_57] : memref<25x256xf32, #tpu.memory_space<vmem>>, vector<1x256xf32>
    %152 = vector.broadcast %151 : vector<1x256xf32> to vector<16x256xf32>
    %153 = arith.mulf %152, %150 : vector<16x256xf32>
    %154 = arith.addf %148, %153 : vector<16x256xf32>
    %155 = vector.extract_strided_slice %149 {offsets = [1, 0], sizes = [16, 256], strides = [1, 1]} : vector<20x256xf32> to vector<16x256xf32>
    %c9 = arith.constant 9 : index
    %c0_58 = arith.constant 0 : index
    %156 = vector.load %arg4[%c9, %c0_58] : memref<25x256xf32, #tpu.memory_space<vmem>>, vector<1x256xf32>
    %157 = vector.broadcast %156 : vector<1x256xf32> to vector<16x256xf32>
    %158 = arith.mulf %157, %155 : vector<16x256xf32>
    %159 = arith.addf %154, %158 : vector<16x256xf32>
    %160 = vector.extract_strided_slice %149 {offsets = [2, 0], sizes = [16, 256], strides = [1, 1]} : vector<20x256xf32> to vector<16x256xf32>
    %c14 = arith.constant 14 : index
    %c0_59 = arith.constant 0 : index
    %161 = vector.load %arg4[%c14, %c0_59] : memref<25x256xf32, #tpu.memory_space<vmem>>, vector<1x256xf32>
    %162 = vector.broadcast %161 : vector<1x256xf32> to vector<16x256xf32>
    %163 = arith.mulf %162, %160 : vector<16x256xf32>
    %164 = arith.addf %159, %163 : vector<16x256xf32>
    %165 = vector.extract_strided_slice %149 {offsets = [3, 0], sizes = [16, 256], strides = [1, 1]} : vector<20x256xf32> to vector<16x256xf32>
    %c19 = arith.constant 19 : index
    %c0_60 = arith.constant 0 : index
    %166 = vector.load %arg4[%c19, %c0_60] : memref<25x256xf32, #tpu.memory_space<vmem>>, vector<1x256xf32>
    %167 = vector.broadcast %166 : vector<1x256xf32> to vector<16x256xf32>
    %168 = arith.mulf %167, %165 : vector<16x256xf32>
    %169 = arith.addf %164, %168 : vector<16x256xf32>
    %170 = vector.extract_strided_slice %149 {offsets = [4, 0], sizes = [16, 256], strides = [1, 1]} : vector<20x256xf32> to vector<16x256xf32>
    %c24 = arith.constant 24 : index
    %c0_61 = arith.constant 0 : index
    %171 = vector.load %arg4[%c24, %c0_61] : memref<25x256xf32, #tpu.memory_space<vmem>>, vector<1x256xf32>
    %172 = vector.broadcast %171 : vector<1x256xf32> to vector<16x256xf32>
    %173 = arith.mulf %172, %170 : vector<16x256xf32>
    %174 = arith.addf %169, %173 : vector<16x256xf32>
    %cst_62 = arith.constant 0.000000e+00 : f32
    %175 = vector.broadcast %cst_62 : f32 to vector<16x256xf32>
    %176 = arith.maximumf %143, %175 : vector<16x256xf32>
    %cst_63 = arith.constant 0.000000e+00 : f32
    %177 = vector.broadcast %cst_63 : f32 to vector<16x256xf32>
    %178 = arith.maximumf %174, %177 : vector<16x256xf32>
    %c2_64 = arith.constant 2 : index
    %c32_65 = arith.constant 32 : index
    %179 = vector.load %arg10[%c2_64, %c32_65] : memref<20x320xf32, #tpu.memory_space<vmem>>, vector<16x256xf32>
    tpu.vector_store %arg10[%c2_64, %c32_65], %176 {strides = array<i32>} : memref<20x320xf32, #tpu.memory_space<vmem>>, vector<16x256xf32>,
    %cst_66 = arith.constant 0.000000e+00 : f32
    %180 = vector.broadcast %cst_66 : f32 to vector<16x256xf32>
    %c0_67 = arith.constant 0 : index
    %c0_68 = arith.constant 0 : index
    %181 = vector.load %arg10[%c0_67, %c0_68] : memref<20x320xf32, #tpu.memory_space<vmem>>, vector<20x256xf32>
    %c0_69 = arith.constant 0 : index
    %c0_70 = arith.constant 0 : index
    %182 = vector.load %arg5[%c0_69, %c0_70] : memref<25x256xf32, #tpu.memory_space<vmem>>, vector<1x256xf32>
    %183 = vector.extract_strided_slice %181 {offsets = [0, 0], sizes = [16, 256], strides = [1, 1]} : vector<20x256xf32> to vector<16x256xf32>
    %184 = vector.broadcast %182 : vector<1x256xf32> to vector<16x256xf32>
    %185 = arith.mulf %184, %183 : vector<16x256xf32>
    %186 = arith.addf %180, %185 : vector<16x256xf32>
    %c5_71 = arith.constant 5 : index
    %c0_72 = arith.constant 0 : index
    %187 = vector.load %arg5[%c5_71, %c0_72] : memref<25x256xf32, #tpu.memory_space<vmem>>, vector<1x256xf32>
    %188 = vector.extract_strided_slice %181 {offsets = [1, 0], sizes = [16, 256], strides = [1, 1]} : vector<20x256xf32> to vector<16x256xf32>
    %189 = vector.broadcast %187 : vector<1x256xf32> to vector<16x256xf32>
    %190 = arith.mulf %189, %188 : vector<16x256xf32>
    %191 = arith.addf %186, %190 : vector<16x256xf32>
    %c10_73 = arith.constant 10 : index
    %c0_74 = arith.constant 0 : index
    %192 = vector.load %arg5[%c10_73, %c0_74] : memref<25x256xf32, #tpu.memory_space<vmem>>, vector<1x256xf32>
    %193 = vector.extract_strided_slice %181 {offsets = [2, 0], sizes = [16, 256], strides = [1, 1]} : vector<20x256xf32> to vector<16x256xf32>
    %194 = vector.broadcast %192 : vector<1x256xf32> to vector<16x256xf32>
    %195 = arith.mulf %194, %193 : vector<16x256xf32>
    %196 = arith.addf %191, %195 : vector<16x256xf32>
    %c15_75 = arith.constant 15 : index
    %c0_76 = arith.constant 0 : index
    %197 = vector.load %arg5[%c15_75, %c0_76] : memref<25x256xf32, #tpu.memory_space<vmem>>, vector<1x256xf32>
    %198 = vector.extract_strided_slice %181 {offsets = [3, 0], sizes = [16, 256], strides = [1, 1]} : vector<20x256xf32> to vector<16x256xf32>
    %199 = vector.broadcast %197 : vector<1x256xf32> to vector<16x256xf32>
    %200 = arith.mulf %199, %198 : vector<16x256xf32>
    %201 = arith.addf %196, %200 : vector<16x256xf32>
    %c20_77 = arith.constant 20 : index
    %c0_78 = arith.constant 0 : index
    %202 = vector.load %arg5[%c20_77, %c0_78] : memref<25x256xf32, #tpu.memory_space<vmem>>, vector<1x256xf32>
    %203 = vector.extract_strided_slice %181 {offsets = [4, 0], sizes = [16, 256], strides = [1, 1]} : vector<20x256xf32> to vector<16x256xf32>
    %204 = vector.broadcast %202 : vector<1x256xf32> to vector<16x256xf32>
    %205 = arith.mulf %204, %203 : vector<16x256xf32>
    %206 = arith.addf %201, %205 : vector<16x256xf32>
    %c0_79 = arith.constant 0 : index
    %c16_80 = arith.constant 16 : index
    %207 = vector.load %arg10[%c0_79, %c16_80] : memref<20x320xf32, #tpu.memory_space<vmem>>, vector<20x256xf32>
    %c1_81 = arith.constant 1 : index
    %c0_82 = arith.constant 0 : index
    %208 = vector.load %arg5[%c1_81, %c0_82] : memref<25x256xf32, #tpu.memory_space<vmem>>, vector<1x256xf32>
    %209 = vector.extract_strided_slice %207 {offsets = [0, 0], sizes = [16, 256], strides = [1, 1]} : vector<20x256xf32> to vector<16x256xf32>
    %210 = vector.broadcast %208 : vector<1x256xf32> to vector<16x256xf32>
    %211 = arith.mulf %210, %209 : vector<16x256xf32>
    %212 = arith.addf %206, %211 : vector<16x256xf32>
    %c6_83 = arith.constant 6 : index
    %c0_84 = arith.constant 0 : index
    %213 = vector.load %arg5[%c6_83, %c0_84] : memref<25x256xf32, #tpu.memory_space<vmem>>, vector<1x256xf32>
    %214 = vector.extract_strided_slice %207 {offsets = [1, 0], sizes = [16, 256], strides = [1, 1]} : vector<20x256xf32> to vector<16x256xf32>
    %215 = vector.broadcast %213 : vector<1x256xf32> to vector<16x256xf32>
    %216 = arith.mulf %215, %214 : vector<16x256xf32>
    %217 = arith.addf %212, %216 : vector<16x256xf32>
    %c11_85 = arith.constant 11 : index
    %c0_86 = arith.constant 0 : index
    %218 = vector.load %arg5[%c11_85, %c0_86] : memref<25x256xf32, #tpu.memory_space<vmem>>, vector<1x256xf32>
    %219 = vector.extract_strided_slice %207 {offsets = [2, 0], sizes = [16, 256], strides = [1, 1]} : vector<20x256xf32> to vector<16x256xf32>
    %220 = vector.broadcast %218 : vector<1x256xf32> to vector<16x256xf32>
    %221 = arith.mulf %220, %219 : vector<16x256xf32>
    %222 = arith.addf %217, %221 : vector<16x256xf32>
    %c16_87 = arith.constant 16 : index
    %c0_88 = arith.constant 0 : index
    %223 = vector.load %arg5[%c16_87, %c0_88] : memref<25x256xf32, #tpu.memory_space<vmem>>, vector<1x256xf32>
    %224 = vector.extract_strided_slice %207 {offsets = [3, 0], sizes = [16, 256], strides = [1, 1]} : vector<20x256xf32> to vector<16x256xf32>
    %225 = vector.broadcast %223 : vector<1x256xf32> to vector<16x256xf32>
    %226 = arith.mulf %225, %224 : vector<16x256xf32>
    %227 = arith.addf %222, %226 : vector<16x256xf32>
    %c21_89 = arith.constant 21 : index
    %c0_90 = arith.constant 0 : index
    %228 = vector.load %arg5[%c21_89, %c0_90] : memref<25x256xf32, #tpu.memory_space<vmem>>, vector<1x256xf32>
    %229 = vector.extract_strided_slice %207 {offsets = [4, 0], sizes = [16, 256], strides = [1, 1]} : vector<20x256xf32> to vector<16x256xf32>
    %230 = vector.broadcast %228 : vector<1x256xf32> to vector<16x256xf32>
    %231 = arith.mulf %230, %229 : vector<16x256xf32>
    %232 = arith.addf %227, %231 : vector<16x256xf32>
    %c0_91 = arith.constant 0 : index
    %c32_92 = arith.constant 32 : index
    %233 = vector.load %arg10[%c0_91, %c32_92] : memref<20x320xf32, #tpu.memory_space<vmem>>, vector<20x256xf32>
    %c2_93 = arith.constant 2 : index
    %c0_94 = arith.constant 0 : index
    %234 = vector.load %arg5[%c2_93, %c0_94] : memref<25x256xf32, #tpu.memory_space<vmem>>, vector<1x256xf32>
    %235 = vector.extract_strided_slice %233 {offsets = [0, 0], sizes = [16, 256], strides = [1, 1]} : vector<20x256xf32> to vector<16x256xf32>
    %236 = vector.broadcast %234 : vector<1x256xf32> to vector<16x256xf32>
    %237 = arith.mulf %236, %235 : vector<16x256xf32>
    %238 = arith.addf %232, %237 : vector<16x256xf32>
    %c7_95 = arith.constant 7 : index
    %c0_96 = arith.constant 0 : index
    %239 = vector.load %arg5[%c7_95, %c0_96] : memref<25x256xf32, #tpu.memory_space<vmem>>, vector<1x256xf32>
    %240 = vector.extract_strided_slice %233 {offsets = [1, 0], sizes = [16, 256], strides = [1, 1]} : vector<20x256xf32> to vector<16x256xf32>
    %241 = vector.broadcast %239 : vector<1x256xf32> to vector<16x256xf32>
    %242 = arith.mulf %241, %240 : vector<16x256xf32>
    %243 = arith.addf %238, %242 : vector<16x256xf32>
    %c12_97 = arith.constant 12 : index
    %c0_98 = arith.constant 0 : index
    %244 = vector.load %arg5[%c12_97, %c0_98] : memref<25x256xf32, #tpu.memory_space<vmem>>, vector<1x256xf32>
    %245 = vector.extract_strided_slice %233 {offsets = [2, 0], sizes = [16, 256], strides = [1, 1]} : vector<20x256xf32> to vector<16x256xf32>
    %246 = vector.broadcast %244 : vector<1x256xf32> to vector<16x256xf32>
    %247 = arith.mulf %246, %245 : vector<16x256xf32>
    %248 = arith.addf %243, %247 : vector<16x256xf32>
    %c17_99 = arith.constant 17 : index
    %c0_100 = arith.constant 0 : index
    %249 = vector.load %arg5[%c17_99, %c0_100] : memref<25x256xf32, #tpu.memory_space<vmem>>, vector<1x256xf32>
    %250 = vector.extract_strided_slice %233 {offsets = [3, 0], sizes = [16, 256], strides = [1, 1]} : vector<20x256xf32> to vector<16x256xf32>
    %251 = vector.broadcast %249 : vector<1x256xf32> to vector<16x256xf32>
    %252 = arith.mulf %251, %250 : vector<16x256xf32>
    %253 = arith.addf %248, %252 : vector<16x256xf32>
    %c22_101 = arith.constant 22 : index
    %c0_102 = arith.constant 0 : index
    %254 = vector.load %arg5[%c22_101, %c0_102] : memref<25x256xf32, #tpu.memory_space<vmem>>, vector<1x256xf32>
    %255 = vector.extract_strided_slice %233 {offsets = [4, 0], sizes = [16, 256], strides = [1, 1]} : vector<20x256xf32> to vector<16x256xf32>
    %256 = vector.broadcast %254 : vector<1x256xf32> to vector<16x256xf32>
    %257 = arith.mulf %256, %255 : vector<16x256xf32>
    %258 = arith.addf %253, %257 : vector<16x256xf32>
    %c0_103 = arith.constant 0 : index
    %c48_104 = arith.constant 48 : index
    %259 = vector.load %arg10[%c0_103, %c48_104] : memref<20x320xf32, #tpu.memory_space<vmem>>, vector<20x256xf32>
    %c3_105 = arith.constant 3 : index
    %c0_106 = arith.constant 0 : index
    %260 = vector.load %arg5[%c3_105, %c0_106] : memref<25x256xf32, #tpu.memory_space<vmem>>, vector<1x256xf32>
    %261 = vector.extract_strided_slice %259 {offsets = [0, 0], sizes = [16, 256], strides = [1, 1]} : vector<20x256xf32> to vector<16x256xf32>
    %262 = vector.broadcast %260 : vector<1x256xf32> to vector<16x256xf32>
    %263 = arith.mulf %262, %261 : vector<16x256xf32>
    %264 = arith.addf %258, %263 : vector<16x256xf32>
    %c8_107 = arith.constant 8 : index
    %c0_108 = arith.constant 0 : index
    %265 = vector.load %arg5[%c8_107, %c0_108] : memref<25x256xf32, #tpu.memory_space<vmem>>, vector<1x256xf32>
    %266 = vector.extract_strided_slice %259 {offsets = [1, 0], sizes = [16, 256], strides = [1, 1]} : vector<20x256xf32> to vector<16x256xf32>
    %267 = vector.broadcast %265 : vector<1x256xf32> to vector<16x256xf32>
    %268 = arith.mulf %267, %266 : vector<16x256xf32>
    %269 = arith.addf %264, %268 : vector<16x256xf32>
    %c13_109 = arith.constant 13 : index
    %c0_110 = arith.constant 0 : index
    %270 = vector.load %arg5[%c13_109, %c0_110] : memref<25x256xf32, #tpu.memory_space<vmem>>, vector<1x256xf32>
    %271 = vector.extract_strided_slice %259 {offsets = [2, 0], sizes = [16, 256], strides = [1, 1]} : vector<20x256xf32> to vector<16x256xf32>
    %272 = vector.broadcast %270 : vector<1x256xf32> to vector<16x256xf32>
    %273 = arith.mulf %272, %271 : vector<16x256xf32>
    %274 = arith.addf %269, %273 : vector<16x256xf32>
    %c18_111 = arith.constant 18 : index
    %c0_112 = arith.constant 0 : index
    %275 = vector.load %arg5[%c18_111, %c0_112] : memref<25x256xf32, #tpu.memory_space<vmem>>, vector<1x256xf32>
    %276 = vector.extract_strided_slice %259 {offsets = [3, 0], sizes = [16, 256], strides = [1, 1]} : vector<20x256xf32> to vector<16x256xf32>
    %277 = vector.broadcast %275 : vector<1x256xf32> to vector<16x256xf32>
    %278 = arith.mulf %277, %276 : vector<16x256xf32>
    %279 = arith.addf %274, %278 : vector<16x256xf32>
    %c23_113 = arith.constant 23 : index
    %c0_114 = arith.constant 0 : index
    %280 = vector.load %arg5[%c23_113, %c0_114] : memref<25x256xf32, #tpu.memory_space<vmem>>, vector<1x256xf32>
    %281 = vector.extract_strided_slice %259 {offsets = [4, 0], sizes = [16, 256], strides = [1, 1]} : vector<20x256xf32> to vector<16x256xf32>
    %282 = vector.broadcast %280 : vector<1x256xf32> to vector<16x256xf32>
    %283 = arith.mulf %282, %281 : vector<16x256xf32>
    %284 = arith.addf %279, %283 : vector<16x256xf32>
    %c0_115 = arith.constant 0 : index
    %c64_116 = arith.constant 64 : index
    %285 = vector.load %arg10[%c0_115, %c64_116] : memref<20x320xf32, #tpu.memory_space<vmem>>, vector<20x256xf32>
    %c4_117 = arith.constant 4 : index
    %c0_118 = arith.constant 0 : index
    %286 = vector.load %arg5[%c4_117, %c0_118] : memref<25x256xf32, #tpu.memory_space<vmem>>, vector<1x256xf32>
    %287 = vector.extract_strided_slice %285 {offsets = [0, 0], sizes = [16, 256], strides = [1, 1]} : vector<20x256xf32> to vector<16x256xf32>
    %288 = vector.broadcast %286 : vector<1x256xf32> to vector<16x256xf32>
    %289 = arith.mulf %288, %287 : vector<16x256xf32>
    %290 = arith.addf %284, %289 : vector<16x256xf32>
    %c9_119 = arith.constant 9 : index
    %c0_120 = arith.constant 0 : index
    %291 = vector.load %arg5[%c9_119, %c0_120] : memref<25x256xf32, #tpu.memory_space<vmem>>, vector<1x256xf32>
    %292 = vector.extract_strided_slice %285 {offsets = [1, 0], sizes = [16, 256], strides = [1, 1]} : vector<20x256xf32> to vector<16x256xf32>
    %293 = vector.broadcast %291 : vector<1x256xf32> to vector<16x256xf32>
    %294 = arith.mulf %293, %292 : vector<16x256xf32>
    %295 = arith.addf %290, %294 : vector<16x256xf32>
    %c14_121 = arith.constant 14 : index
    %c0_122 = arith.constant 0 : index
    %296 = vector.load %arg5[%c14_121, %c0_122] : memref<25x256xf32, #tpu.memory_space<vmem>>, vector<1x256xf32>
    %297 = vector.extract_strided_slice %285 {offsets = [2, 0], sizes = [16, 256], strides = [1, 1]} : vector<20x256xf32> to vector<16x256xf32>
    %298 = vector.broadcast %296 : vector<1x256xf32> to vector<16x256xf32>
    %299 = arith.mulf %298, %297 : vector<16x256xf32>
    %300 = arith.addf %295, %299 : vector<16x256xf32>
    %c19_123 = arith.constant 19 : index
    %c0_124 = arith.constant 0 : index
    %301 = vector.load %arg5[%c19_123, %c0_124] : memref<25x256xf32, #tpu.memory_space<vmem>>, vector<1x256xf32>
    %302 = vector.extract_strided_slice %285 {offsets = [3, 0], sizes = [16, 256], strides = [1, 1]} : vector<20x256xf32> to vector<16x256xf32>
    %303 = vector.broadcast %301 : vector<1x256xf32> to vector<16x256xf32>
    %304 = arith.mulf %303, %302 : vector<16x256xf32>
    %305 = arith.addf %300, %304 : vector<16x256xf32>
    %c24_125 = arith.constant 24 : index
    %c0_126 = arith.constant 0 : index
    %306 = vector.load %arg5[%c24_125, %c0_126] : memref<25x256xf32, #tpu.memory_space<vmem>>, vector<1x256xf32>
    %307 = vector.extract_strided_slice %285 {offsets = [4, 0], sizes = [16, 256], strides = [1, 1]} : vector<20x256xf32> to vector<16x256xf32>
    %308 = vector.broadcast %306 : vector<1x256xf32> to vector<16x256xf32>
    %309 = arith.mulf %308, %307 : vector<16x256xf32>
    %310 = arith.addf %305, %309 : vector<16x256xf32>
    %c2_127 = arith.constant 2 : index
    %c32_128 = arith.constant 32 : index
    %311 = vector.load %arg10[%c2_127, %c32_128] : memref<20x320xf32, #tpu.memory_space<vmem>>, vector<16x256xf32>
    tpu.vector_store %arg10[%c2_127, %c32_128], %178 {strides = array<i32>} : memref<20x320xf32, #tpu.memory_space<vmem>>, vector<16x256xf32>,
    %cst_129 = arith.constant 0.000000e+00 : f32
    %312 = vector.broadcast %cst_129 : f32 to vector<16x256xf32>
    %c0_130 = arith.constant 0 : index
    %c0_131 = arith.constant 0 : index
    %313 = vector.load %arg10[%c0_130, %c0_131] : memref<20x320xf32, #tpu.memory_space<vmem>>, vector<20x256xf32>
    %c0_132 = arith.constant 0 : index
    %c0_133 = arith.constant 0 : index
    %314 = vector.load %arg6[%c0_132, %c0_133] : memref<25x256xf32, #tpu.memory_space<vmem>>, vector<1x256xf32>
    %315 = vector.extract_strided_slice %313 {offsets = [0, 0], sizes = [16, 256], strides = [1, 1]} : vector<20x256xf32> to vector<16x256xf32>
    %316 = vector.broadcast %314 : vector<1x256xf32> to vector<16x256xf32>
    %317 = arith.mulf %316, %315 : vector<16x256xf32>
    %318 = arith.addf %312, %317 : vector<16x256xf32>
    %c5_134 = arith.constant 5 : index
    %c0_135 = arith.constant 0 : index
    %319 = vector.load %arg6[%c5_134, %c0_135] : memref<25x256xf32, #tpu.memory_space<vmem>>, vector<1x256xf32>
    %320 = vector.extract_strided_slice %313 {offsets = [1, 0], sizes = [16, 256], strides = [1, 1]} : vector<20x256xf32> to vector<16x256xf32>
    %321 = vector.broadcast %319 : vector<1x256xf32> to vector<16x256xf32>
    %322 = arith.mulf %321, %320 : vector<16x256xf32>
    %323 = arith.addf %318, %322 : vector<16x256xf32>
    %c10_136 = arith.constant 10 : index
    %c0_137 = arith.constant 0 : index
    %324 = vector.load %arg6[%c10_136, %c0_137] : memref<25x256xf32, #tpu.memory_space<vmem>>, vector<1x256xf32>
    %325 = vector.extract_strided_slice %313 {offsets = [2, 0], sizes = [16, 256], strides = [1, 1]} : vector<20x256xf32> to vector<16x256xf32>
    %326 = vector.broadcast %324 : vector<1x256xf32> to vector<16x256xf32>
    %327 = arith.mulf %326, %325 : vector<16x256xf32>
    %328 = arith.addf %323, %327 : vector<16x256xf32>
    %c15_138 = arith.constant 15 : index
    %c0_139 = arith.constant 0 : index
    %329 = vector.load %arg6[%c15_138, %c0_139] : memref<25x256xf32, #tpu.memory_space<vmem>>, vector<1x256xf32>
    %330 = vector.extract_strided_slice %313 {offsets = [3, 0], sizes = [16, 256], strides = [1, 1]} : vector<20x256xf32> to vector<16x256xf32>
    %331 = vector.broadcast %329 : vector<1x256xf32> to vector<16x256xf32>
    %332 = arith.mulf %331, %330 : vector<16x256xf32>
    %333 = arith.addf %328, %332 : vector<16x256xf32>
    %c20_140 = arith.constant 20 : index
    %c0_141 = arith.constant 0 : index
    %334 = vector.load %arg6[%c20_140, %c0_141] : memref<25x256xf32, #tpu.memory_space<vmem>>, vector<1x256xf32>
    %335 = vector.extract_strided_slice %313 {offsets = [4, 0], sizes = [16, 256], strides = [1, 1]} : vector<20x256xf32> to vector<16x256xf32>
    %336 = vector.broadcast %334 : vector<1x256xf32> to vector<16x256xf32>
    %337 = arith.mulf %336, %335 : vector<16x256xf32>
    %338 = arith.addf %333, %337 : vector<16x256xf32>
    %c0_142 = arith.constant 0 : index
    %c16_143 = arith.constant 16 : index
    %339 = vector.load %arg10[%c0_142, %c16_143] : memref<20x320xf32, #tpu.memory_space<vmem>>, vector<20x256xf32>
    %c1_144 = arith.constant 1 : index
    %c0_145 = arith.constant 0 : index
    %340 = vector.load %arg6[%c1_144, %c0_145] : memref<25x256xf32, #tpu.memory_space<vmem>>, vector<1x256xf32>
    %341 = vector.extract_strided_slice %339 {offsets = [0, 0], sizes = [16, 256], strides = [1, 1]} : vector<20x256xf32> to vector<16x256xf32>
    %342 = vector.broadcast %340 : vector<1x256xf32> to vector<16x256xf32>
    %343 = arith.mulf %342, %341 : vector<16x256xf32>
    %344 = arith.addf %338, %343 : vector<16x256xf32>
    %c6_146 = arith.constant 6 : index
    %c0_147 = arith.constant 0 : index
    %345 = vector.load %arg6[%c6_146, %c0_147] : memref<25x256xf32, #tpu.memory_space<vmem>>, vector<1x256xf32>
    %346 = vector.extract_strided_slice %339 {offsets = [1, 0], sizes = [16, 256], strides = [1, 1]} : vector<20x256xf32> to vector<16x256xf32>
    %347 = vector.broadcast %345 : vector<1x256xf32> to vector<16x256xf32>
    %348 = arith.mulf %347, %346 : vector<16x256xf32>
    %349 = arith.addf %344, %348 : vector<16x256xf32>
    %c11_148 = arith.constant 11 : index
    %c0_149 = arith.constant 0 : index
    %350 = vector.load %arg6[%c11_148, %c0_149] : memref<25x256xf32, #tpu.memory_space<vmem>>, vector<1x256xf32>
    %351 = vector.extract_strided_slice %339 {offsets = [2, 0], sizes = [16, 256], strides = [1, 1]} : vector<20x256xf32> to vector<16x256xf32>
    %352 = vector.broadcast %350 : vector<1x256xf32> to vector<16x256xf32>
    %353 = arith.mulf %352, %351 : vector<16x256xf32>
    %354 = arith.addf %349, %353 : vector<16x256xf32>
    %c16_150 = arith.constant 16 : index
    %c0_151 = arith.constant 0 : index
    %355 = vector.load %arg6[%c16_150, %c0_151] : memref<25x256xf32, #tpu.memory_space<vmem>>, vector<1x256xf32>
    %356 = vector.extract_strided_slice %339 {offsets = [3, 0], sizes = [16, 256], strides = [1, 1]} : vector<20x256xf32> to vector<16x256xf32>
    %357 = vector.broadcast %355 : vector<1x256xf32> to vector<16x256xf32>
    %358 = arith.mulf %357, %356 : vector<16x256xf32>
    %359 = arith.addf %354, %358 : vector<16x256xf32>
    %c21_152 = arith.constant 21 : index
    %c0_153 = arith.constant 0 : index
    %360 = vector.load %arg6[%c21_152, %c0_153] : memref<25x256xf32, #tpu.memory_space<vmem>>, vector<1x256xf32>
    %361 = vector.extract_strided_slice %339 {offsets = [4, 0], sizes = [16, 256], strides = [1, 1]} : vector<20x256xf32> to vector<16x256xf32>
    %362 = vector.broadcast %360 : vector<1x256xf32> to vector<16x256xf32>
    %363 = arith.mulf %362, %361 : vector<16x256xf32>
    %364 = arith.addf %359, %363 : vector<16x256xf32>
    %c0_154 = arith.constant 0 : index
    %c32_155 = arith.constant 32 : index
    %365 = vector.load %arg10[%c0_154, %c32_155] : memref<20x320xf32, #tpu.memory_space<vmem>>, vector<20x256xf32>
    %c2_156 = arith.constant 2 : index
    %c0_157 = arith.constant 0 : index
    %366 = vector.load %arg6[%c2_156, %c0_157] : memref<25x256xf32, #tpu.memory_space<vmem>>, vector<1x256xf32>
    %367 = vector.extract_strided_slice %365 {offsets = [0, 0], sizes = [16, 256], strides = [1, 1]} : vector<20x256xf32> to vector<16x256xf32>
    %368 = vector.broadcast %366 : vector<1x256xf32> to vector<16x256xf32>
    %369 = arith.mulf %368, %367 : vector<16x256xf32>
    %370 = arith.addf %364, %369 : vector<16x256xf32>
    %c7_158 = arith.constant 7 : index
    %c0_159 = arith.constant 0 : index
    %371 = vector.load %arg6[%c7_158, %c0_159] : memref<25x256xf32, #tpu.memory_space<vmem>>, vector<1x256xf32>
    %372 = vector.extract_strided_slice %365 {offsets = [1, 0], sizes = [16, 256], strides = [1, 1]} : vector<20x256xf32> to vector<16x256xf32>
    %373 = vector.broadcast %371 : vector<1x256xf32> to vector<16x256xf32>
    %374 = arith.mulf %373, %372 : vector<16x256xf32>
    %375 = arith.addf %370, %374 : vector<16x256xf32>
    %c12_160 = arith.constant 12 : index
    %c0_161 = arith.constant 0 : index
    %376 = vector.load %arg6[%c12_160, %c0_161] : memref<25x256xf32, #tpu.memory_space<vmem>>, vector<1x256xf32>
    %377 = vector.extract_strided_slice %365 {offsets = [2, 0], sizes = [16, 256], strides = [1, 1]} : vector<20x256xf32> to vector<16x256xf32>
    %378 = vector.broadcast %376 : vector<1x256xf32> to vector<16x256xf32>
    %379 = arith.mulf %378, %377 : vector<16x256xf32>
    %380 = arith.addf %375, %379 : vector<16x256xf32>
    %c17_162 = arith.constant 17 : index
    %c0_163 = arith.constant 0 : index
    %381 = vector.load %arg6[%c17_162, %c0_163] : memref<25x256xf32, #tpu.memory_space<vmem>>, vector<1x256xf32>
    %382 = vector.extract_strided_slice %365 {offsets = [3, 0], sizes = [16, 256], strides = [1, 1]} : vector<20x256xf32> to vector<16x256xf32>
    %383 = vector.broadcast %381 : vector<1x256xf32> to vector<16x256xf32>
    %384 = arith.mulf %383, %382 : vector<16x256xf32>
    %385 = arith.addf %380, %384 : vector<16x256xf32>
    %c22_164 = arith.constant 22 : index
    %c0_165 = arith.constant 0 : index
    %386 = vector.load %arg6[%c22_164, %c0_165] : memref<25x256xf32, #tpu.memory_space<vmem>>, vector<1x256xf32>
    %387 = vector.extract_strided_slice %365 {offsets = [4, 0], sizes = [16, 256], strides = [1, 1]} : vector<20x256xf32> to vector<16x256xf32>
    %388 = vector.broadcast %386 : vector<1x256xf32> to vector<16x256xf32>
    %389 = arith.mulf %388, %387 : vector<16x256xf32>
    %390 = arith.addf %385, %389 : vector<16x256xf32>
    %c0_166 = arith.constant 0 : index
    %c48_167 = arith.constant 48 : index
    %391 = vector.load %arg10[%c0_166, %c48_167] : memref<20x320xf32, #tpu.memory_space<vmem>>, vector<20x256xf32>
    %c3_168 = arith.constant 3 : index
    %c0_169 = arith.constant 0 : index
    %392 = vector.load %arg6[%c3_168, %c0_169] : memref<25x256xf32, #tpu.memory_space<vmem>>, vector<1x256xf32>
    %393 = vector.extract_strided_slice %391 {offsets = [0, 0], sizes = [16, 256], strides = [1, 1]} : vector<20x256xf32> to vector<16x256xf32>
    %394 = vector.broadcast %392 : vector<1x256xf32> to vector<16x256xf32>
    %395 = arith.mulf %394, %393 : vector<16x256xf32>
    %396 = arith.addf %390, %395 : vector<16x256xf32>
    %c8_170 = arith.constant 8 : index
    %c0_171 = arith.constant 0 : index
    %397 = vector.load %arg6[%c8_170, %c0_171] : memref<25x256xf32, #tpu.memory_space<vmem>>, vector<1x256xf32>
    %398 = vector.extract_strided_slice %391 {offsets = [1, 0], sizes = [16, 256], strides = [1, 1]} : vector<20x256xf32> to vector<16x256xf32>
    %399 = vector.broadcast %397 : vector<1x256xf32> to vector<16x256xf32>
    %400 = arith.mulf %399, %398 : vector<16x256xf32>
    %401 = arith.addf %396, %400 : vector<16x256xf32>
    %c13_172 = arith.constant 13 : index
    %c0_173 = arith.constant 0 : index
    %402 = vector.load %arg6[%c13_172, %c0_173] : memref<25x256xf32, #tpu.memory_space<vmem>>, vector<1x256xf32>
    %403 = vector.extract_strided_slice %391 {offsets = [2, 0], sizes = [16, 256], strides = [1, 1]} : vector<20x256xf32> to vector<16x256xf32>
    %404 = vector.broadcast %402 : vector<1x256xf32> to vector<16x256xf32>
    %405 = arith.mulf %404, %403 : vector<16x256xf32>
    %406 = arith.addf %401, %405 : vector<16x256xf32>
    %c18_174 = arith.constant 18 : index
    %c0_175 = arith.constant 0 : index
    %407 = vector.load %arg6[%c18_174, %c0_175] : memref<25x256xf32, #tpu.memory_space<vmem>>, vector<1x256xf32>
    %408 = vector.extract_strided_slice %391 {offsets = [3, 0], sizes = [16, 256], strides = [1, 1]} : vector<20x256xf32> to vector<16x256xf32>
    %409 = vector.broadcast %407 : vector<1x256xf32> to vector<16x256xf32>
    %410 = arith.mulf %409, %408 : vector<16x256xf32>
    %411 = arith.addf %406, %410 : vector<16x256xf32>
    %c23_176 = arith.constant 23 : index
    %c0_177 = arith.constant 0 : index
    %412 = vector.load %arg6[%c23_176, %c0_177] : memref<25x256xf32, #tpu.memory_space<vmem>>, vector<1x256xf32>
    %413 = vector.extract_strided_slice %391 {offsets = [4, 0], sizes = [16, 256], strides = [1, 1]} : vector<20x256xf32> to vector<16x256xf32>
    %414 = vector.broadcast %412 : vector<1x256xf32> to vector<16x256xf32>
    %415 = arith.mulf %414, %413 : vector<16x256xf32>
    %416 = arith.addf %411, %415 : vector<16x256xf32>
    %c0_178 = arith.constant 0 : index
    %c64_179 = arith.constant 64 : index
    %417 = vector.load %arg10[%c0_178, %c64_179] : memref<20x320xf32, #tpu.memory_space<vmem>>, vector<20x256xf32>
    %c4_180 = arith.constant 4 : index
    %c0_181 = arith.constant 0 : index
    %418 = vector.load %arg6[%c4_180, %c0_181] : memref<25x256xf32, #tpu.memory_space<vmem>>, vector<1x256xf32>
    %419 = vector.extract_strided_slice %417 {offsets = [0, 0], sizes = [16, 256], strides = [1, 1]} : vector<20x256xf32> to vector<16x256xf32>
    %420 = vector.broadcast %418 : vector<1x256xf32> to vector<16x256xf32>
    %421 = arith.mulf %420, %419 : vector<16x256xf32>
    %422 = arith.addf %416, %421 : vector<16x256xf32>
    %c9_182 = arith.constant 9 : index
    %c0_183 = arith.constant 0 : index
    %423 = vector.load %arg6[%c9_182, %c0_183] : memref<25x256xf32, #tpu.memory_space<vmem>>, vector<1x256xf32>
    %424 = vector.extract_strided_slice %417 {offsets = [1, 0], sizes = [16, 256], strides = [1, 1]} : vector<20x256xf32> to vector<16x256xf32>
    %425 = vector.broadcast %423 : vector<1x256xf32> to vector<16x256xf32>
    %426 = arith.mulf %425, %424 : vector<16x256xf32>
    %427 = arith.addf %422, %426 : vector<16x256xf32>
    %c14_184 = arith.constant 14 : index
    %c0_185 = arith.constant 0 : index
    %428 = vector.load %arg6[%c14_184, %c0_185] : memref<25x256xf32, #tpu.memory_space<vmem>>, vector<1x256xf32>
    %429 = vector.extract_strided_slice %417 {offsets = [2, 0], sizes = [16, 256], strides = [1, 1]} : vector<20x256xf32> to vector<16x256xf32>
    %430 = vector.broadcast %428 : vector<1x256xf32> to vector<16x256xf32>
    %431 = arith.mulf %430, %429 : vector<16x256xf32>
    %432 = arith.addf %427, %431 : vector<16x256xf32>
    %c19_186 = arith.constant 19 : index
    %c0_187 = arith.constant 0 : index
    %433 = vector.load %arg6[%c19_186, %c0_187] : memref<25x256xf32, #tpu.memory_space<vmem>>, vector<1x256xf32>
    %434 = vector.extract_strided_slice %417 {offsets = [3, 0], sizes = [16, 256], strides = [1, 1]} : vector<20x256xf32> to vector<16x256xf32>
    %435 = vector.broadcast %433 : vector<1x256xf32> to vector<16x256xf32>
    %436 = arith.mulf %435, %434 : vector<16x256xf32>
    %437 = arith.addf %432, %436 : vector<16x256xf32>
    %c24_188 = arith.constant 24 : index
    %c0_189 = arith.constant 0 : index
    %438 = vector.load %arg6[%c24_188, %c0_189] : memref<25x256xf32, #tpu.memory_space<vmem>>, vector<1x256xf32>
    %439 = vector.extract_strided_slice %417 {offsets = [4, 0], sizes = [16, 256], strides = [1, 1]} : vector<20x256xf32> to vector<16x256xf32>
    %440 = vector.broadcast %438 : vector<1x256xf32> to vector<16x256xf32>
    %441 = arith.mulf %440, %439 : vector<16x256xf32>
    %442 = arith.addf %437, %441 : vector<16x256xf32>
    %443 = tpu.concatenate %310, %442 in 1 : vector<16x256xf32>, vector<16x256xf32> -> vector<16x512xf32>
    %c0_190 = arith.constant 0 : index
    %c0_191 = arith.constant 0 : index
    %444 = vector.load %arg7[%c0_190, %c0_191] : memref<512x256xf32, #tpu.memory_space<vmem>>, vector<512x256xf32>
    %cst_192 = arith.constant dense<0.000000e+00> : vector<16x256xf32>
    %445 = tpu.matmul %443, %444, %cst_192 {dimension_numbers = #tpu.dot_dimension_numbers<[1], [0], [0], [1], [0, 0, 1, 1], [], []>} : vector<16x512xf32>, vector<512x256xf32>, vector<16x256xf32> -> vector<16x256xf32>
    %cst_193 = arith.constant 0.000000e+00 : f32
    %446 = vector.broadcast %cst_193 : f32 to vector<16x256xf32>
    %447 = arith.cmpf oge, %445, %446 : vector<16x256xf32>
    %cst_194 = arith.constant 1.000000e+00 : f32
    %cst_195 = arith.constant -1.000000e+00 : f32
    %448 = vector.broadcast %cst_194 : f32 to vector<16x256xf32>
    %449 = vector.broadcast %cst_195 : f32 to vector<16x256xf32>
    %450 = arith.select %447, %448, %449 : vector<16x256xi1>, vector<16x256xf32>
    %451 = math.absf %445 : vector<16x256xf32>
    %cst_196 = arith.constant 0.707106769 : f32
    %452 = vector.broadcast %cst_196 : f32 to vector<16x256xf32>
    %453 = arith.mulf %451, %452 : vector<16x256xf32>
    %cst_197 = arith.constant 0.327591091 : f32
    %454 = vector.broadcast %cst_197 : f32 to vector<16x256xf32>
    %455 = arith.mulf %454, %453 : vector<16x256xf32>
    %cst_198 = arith.constant 1.000000e+00 : f32
    %456 = vector.broadcast %cst_198 : f32 to vector<16x256xf32>
    %457 = arith.addf %456, %455 : vector<16x256xf32>
    %458 = tpu.reciprocal %457 {approx = true} : vector<16x256xf32> -> vector<16x256xf32>
    %cst_199 = arith.constant 1.06140542 : f32
    %459 = vector.broadcast %cst_199 : f32 to vector<16x256xf32>
    %460 = arith.mulf %459, %458 : vector<16x256xf32>
    %cst_200 = arith.constant -1.45315206 : f32
    %461 = vector.broadcast %cst_200 : f32 to vector<16x256xf32>
    %462 = arith.addf %460, %461 : vector<16x256xf32>
    %463 = arith.mulf %462, %458 : vector<16x256xf32>
    %cst_201 = arith.constant 1.42141378 : f32
    %464 = vector.broadcast %cst_201 : f32 to vector<16x256xf32>
    %465 = arith.addf %463, %464 : vector<16x256xf32>
    %466 = arith.mulf %465, %458 : vector<16x256xf32>
    %cst_202 = arith.constant -0.284496725 : f32
    %467 = vector.broadcast %cst_202 : f32 to vector<16x256xf32>
    %468 = arith.addf %466, %467 : vector<16x256xf32>
    %469 = arith.mulf %468, %458 : vector<16x256xf32>
    %cst_203 = arith.constant 0.254829586 : f32
    %470 = vector.broadcast %cst_203 : f32 to vector<16x256xf32>
    %471 = arith.addf %469, %470 : vector<16x256xf32>
    %472 = arith.mulf %471, %458 : vector<16x256xf32>
    %cst_204 = arith.constant 0.000000e+00 : f32
    %473 = vector.broadcast %cst_204 : f32 to vector<16x256xf32>
    %474 = arith.subf %473, %453 : vector<16x256xf32>
    %475 = arith.mulf %474, %453 : vector<16x256xf32>
    %476 = math.exp %475 : vector<16x256xf32>
    %477 = arith.mulf %472, %476 : vector<16x256xf32>
    %cst_205 = arith.constant 1.000000e+00 : f32
    %478 = vector.broadcast %cst_205 : f32 to vector<16x256xf32>
    %479 = arith.subf %478, %477 : vector<16x256xf32>
    %480 = arith.mulf %450, %479 : vector<16x256xf32>
    %cst_206 = arith.constant 5.000000e-01 : f32
    %481 = vector.broadcast %cst_206 : f32 to vector<16x256xf32>
    %482 = arith.mulf %481, %445 : vector<16x256xf32>
    %cst_207 = arith.constant 1.000000e+00 : f32
    %483 = vector.broadcast %cst_207 : f32 to vector<16x256xf32>
    %484 = arith.addf %483, %480 : vector<16x256xf32>
    %485 = arith.mulf %482, %484 : vector<16x256xf32>
    %c0_208 = arith.constant 0 : index
    %c0_209 = arith.constant 0 : index
    %486 = vector.load %arg8[%c0_208, %c0_209] : memref<256x64xf32, #tpu.memory_space<vmem>>, vector<256x64xf32>
    %cst_210 = arith.constant dense<0.000000e+00> : vector<16x64xf32>
    %487 = tpu.matmul %485, %486, %cst_210 {dimension_numbers = #tpu.dot_dimension_numbers<[1], [0], [0], [1], [0, 0, 1, 1], [], []>} : vector<16x256xf32>, vector<256x64xf32>, vector<16x64xf32> -> vector<16x64xf32>
    %c0_211 = arith.constant 0 : index
    %c0_212 = arith.constant 0 : index
    %c0_213 = arith.constant 0 : index
    %488 = vector.load %arg9[%c0_211, %c0_212, %c0_213] : memref<1x16x64xf32, #tpu.memory_space<vmem>>, vector<1x16x64xf32>
    %489 = vector.shape_cast %488 : vector<1x16x64xf32> to vector<16x64xf32>
    %490 = vector.shape_cast %487 : vector<16x64xf32> to vector<1x16x64xf32>
    tpu.vector_store %arg9[%c0_211, %c0_212, %c0_213], %490 {strides = array<i32>} : memref<1x16x64xf32, #tpu.memory_space<vmem>>, vector<1x16x64xf32>,
    return
  }
  func.func @transform_0(%arg0: i32) -> (i32, i32, i32) {
    %c0_i32 = arith.constant 0 : i32
    %c0_i32_0 = arith.constant 0 : i32
    %c0_i32_1 = arith.constant 0 : i32
    return %arg0, %c0_i32, %c0_i32_0 : i32, i32, i32
  }
  func.func @transform_1(%arg0: i32) -> (i32, i32) {
    %c0_i32 = arith.constant 0 : i32
    %c0_i32_0 = arith.constant 0 : i32
    %c0_i32_1 = arith.constant 0 : i32
    return %c0_i32, %c0_i32_0 : i32, i32
  }
  func.func @transform_2(%arg0: i32) -> (i32, i32) {
    %c0_i32 = arith.constant 0 : i32
    %c0_i32_0 = arith.constant 0 : i32
    %c0_i32_1 = arith.constant 0 : i32
    return %c0_i32, %c0_i32_0 : i32, i32
  }
  func.func @transform_3(%arg0: i32) -> (i32, i32) {
    %c0_i32 = arith.constant 0 : i32
    %c0_i32_0 = arith.constant 0 : i32
    %c0_i32_1 = arith.constant 0 : i32
    return %c0_i32, %c0_i32_0 : i32, i32
  }
  func.func @transform_4(%arg0: i32) -> (i32, i32) {
    %c0_i32 = arith.constant 0 : i32
    %c0_i32_0 = arith.constant 0 : i32
    %c0_i32_1 = arith.constant 0 : i32
    return %c0_i32, %c0_i32_0 : i32, i32
  }
  func.func @transform_5(%arg0: i32) -> (i32, i32) {
    %c0_i32 = arith.constant 0 : i32
    %c0_i32_0 = arith.constant 0 : i32
    %c0_i32_1 = arith.constant 0 : i32
    return %c0_i32, %c0_i32_0 : i32, i32
  }
  func.func @transform_6(%arg0: i32) -> (i32, i32) {
    %c0_i32 = arith.constant 0 : i32
    %c0_i32_0 = arith.constant 0 : i32
    %c0_i32_1 = arith.constant 0 : i32
    return %c0_i32, %c0_i32_0 : i32, i32
  }
  func.func @transform_7(%arg0: i32) -> (i32, i32) {
    %c0_i32 = arith.constant 0 : i32
    %c0_i32_0 = arith.constant 0 : i32
    %c0_i32_1 = arith.constant 0 : i32
    return %c0_i32, %c0_i32_0 : i32, i32
  }
  func.func @transform_8(%arg0: i32) -> (i32, i32, i32) {
    %c0_i32 = arith.constant 0 : i32
    %c0_i32_0 = arith.constant 0 : i32
    %c0_i32_1 = arith.constant 0 : i32
    return %arg0, %c0_i32, %c0_i32_0 : i32, i32, i32
  }
}

</mosaic_0001>

<bundles_post_ra>
// kernel: tpu_custom_call.1
= control target key start
LH: loop header
LB: loop body
LE: loop exit
PB: predicated region body
PF: predicated region fallthrough
CT: control target
= control target key end

     0   :  { %13 = vsyncpa [#allocation4], 0  ;;  %s9072_s0 = inlined_call_operand.vmem [shape: f32[2,16,64], index: 0, kind: input, shape index: {}]   ;;  %s9073_s1 = inlined_call_operand.vmem [shape: f32[64,256], index: 1, kind: input, shape index: {}]   ;;  %s9074_s2 = inlined_call_operand.vmem [shape: f32[9,256], index: 2, kind: input, shape index: {}]   ;;  %s9075_s3 = inlined_call_operand.vmem [shape: f32[25,256], index: 3, kind: input, shape index: {}]   ;;  %s9076_s4 = inlined_call_operand.vmem [shape: f32[25,256], index: 4, kind: input, shape index: {}]   ;;  %s9077_s5 = inlined_call_operand.vmem [shape: f32[25,256], index: 5, kind: input, shape index: {}]   ;;  %s9078_s6 = inlined_call_operand.hbm [shape: f32[512,256], index: 6, kind: input, shape index: {}]   ;;  %s9079_s7 = inlined_call_operand.vmem [shape: f32[256,64], index: 7, kind: input, shape index: {}]   ;;  %s9080_s8 = inlined_call_operand.hbm [shape: f32[2,16,64], index: 8, kind: output, shape index: {}]  }
   0x1   :  { %14 = vsyncpa [#allocation5], 0 }
   0x2   :  { %16 = vsyncpa [#allocation5 + $0x1], 0  ;;  %s5176_s27 = smov 0   ;;  %s5178_s28 = smov 0  }
   0x3   :  { %s5180_s29 = smov 0   ;;  %s5182_s30 = smov 0  }
   0x4 LB: > { %s5197_s9 = sadd.s32 4294967295, %s5116_s30   ;;  %s4623_s10 = sadd.s32 4294967294, %s5116_s30   ;;  %s5116_s30 = sphi %s5182_s30, %s9819_s30   ;;  %s5112_s29 = sphi %s5180_s29, %s9818_s29   ;;  %s5108_s28 = sphi %s5178_s28, %s9817_s28   ;;  %s5104_s27 = sphi %s5176_s27, %s9816_s27  }
   0x5   : > { %s5201_s11 = sadd.s32 1, %s5116_s30   ;;  %s202_s12 = sadd.s32 1, %s5112_s29 }
   0x6   : > { %s199_s13 = ssub.s32 %s5116_s30, %s5201_s11  ;;  %p212_p0 = scmp.ne.s32.totalorder %s5112_s29, %s5108_s28 }
   0x7   : > { %p200_p1 = scmp.eq.s32.totalorder %s199_s13, 0  ;;  %p213_p2 = scmp.eq.s32.totalorder %s5197_s9, 1 }
   0x8   : > { %p218_p3 = scmp.ne.s32.totalorder %s5108_s28, %s5104_s27  ;;  %p219_p4 = scmp.eq.s32.totalorder %s4623_s10, 1 }
   0x9   : > { %s5212_s14 = scalar_select %p200_p1, %s5112_s29, %s202_s12  }
   0xa   : > { %p5214_p5 = por %p213_p2, %p212_p0  ;;  %p5218_p6 = por %p219_p4, %p218_p3 }
   0xb   : > { %p4624_p7 = scmp.ge.s32.totalorder %s5116_s30, 1  ;;  %p226_p8 = scmp.lt.s32.totalorder %s5116_s30, 3 }
   0xc   : > { %s9203_s15 = scalar_select %p5214_p5, 1, 0 }
   0xd   : > { %s9204_s16 = scalar_select %p5218_p6, 1, 0 }
   0xe   : > { %p9081_p9 = scmp.eq.s32.totalorder %s5197_s9, 0  ;;  %p5225_p10 = pnand %p4624_p7, %p226_p8 }
   0xf   : > { %s5118_s18 = smov [#allocation3]   ;;  %s5022_s23 = scalar_lea.hbm %s9078_s6, 16384 }
  0x10   : > { %s9205_s17 = scalar_select %p5225_p10, 1, 0 }
  0x11   : > { %s253_s19 = sshll.u32 %s5118_s18, 4  ;;  %p4945_p11 = pneg %p5225_p10  ;;  %s254_s19 = int_to_ptr.vmem [resolvable:$true] %s253_s19 }
  0x12   : > { %p5023_p13 = scmp.ne.s32.totalorder %s9078_s6, %s5022_s23  ;;  %p5029_p3 = scmp.lt.u32.totalorder %s5022_s23, %s9078_s6 }
  0x13   : > { %p5233_p12 = pnand %p9081_p9, %p4945_p11 }
  0x15   : > { %p5024_p0 = pneg %p5233_p12 }
  0x17   : > { %p5025_p1 = pnand %p5024_p0, %p5023_p13 }
  0x19   : > { %p5026_p2 = pneg %p5025_p1 }
  0x1b   : > { %p5031_p4 = pnand %p5029_p3, %p5026_p2 }
  0x1d   : > { %5034 = shalt.err (!%p5031_p4)
}
  0x1e   : > { %s5035_s12 = scalar_lea.vmem %s254_s19, 16384  ;;  %p5043_p9 = scmp.lt.s32.totalorder %s254_s19, %s254_s19 }
  0x1f   : > { %p5036_p7 = scmp.ne.s32.totalorder %s254_s19, %s5035_s12  ;;  %p5044_p6 = scmp.lt.s32.totalorder %s5035_s12, %s5035_s12 }
  0x21   : > { %p5038_p8 = pnand %p5036_p7, %p5024_p0  ;;  %p5045_p5 = por %p5044_p6, %p5043_p9 }
  0x23   : > { %p5039_p11 = pneg %p5038_p8 }
  0x25   : > { %p5046_p10 = pnand %p5045_p5, %p5039_p11 }
  0x27   : > { %5049 = shalt.err (!%p5046_p10)
}
  0x28   : > { %s5119_s13 = smov 256   ;;  %s5120_s18 = smov 16  }
  0x29   : > { %4948 = dma.hbm_to_vmem [thread:$0]  (!%p5233_p12), %s9078_s6, 16384, %s254_s19, [#allocation4], %s5119_s13, %s5119_s13, %s5120_s18  }
  0x2a   : > { %p9207_p13 = scmp.ne.s32.totalorder %s9205_s17, 0 }
  0x2c   : > { %280 = sbr.rel (%p9207_p13) target bundleno = 1978 (0x7ba), region = 52 }
  0x33   : > { %p9208_p1 = scmp.eq.s32.totalorder %s5197_s9, 0 }
  0x35   : > { %5095 = dma.done.wait (%p9208_p1), [#allocation4], 16384   ;;  %p9209_p0 = pmov %p9208_p1 }
  0x36   : > { %vm321_vm0 = vcmask 523264   ;;  %v5121_v0 = vmov 0.0   ;;  %v333_v1 = vld [vmem:[%s9073_s1 + $0x8] sm:$0xff]  ;;  %v335_v2 = vld [vmem:[%s9073_s1 + $0x18] sm:$0xff]  ;;  %v332_v3 = vld [vmem:[%s9073_s1] sm:$0xff]  ;;  %p314_p5 = scmp.lt.s32.totalorder %s5197_s9, 1 }
  0x37   : > { %5097 = vsyncadd (%p9209_p0), [#allocation4], 4294950912  ;;  %418 = vmatprep.mubr.f32.mxu1 %v5121_v0  ;;  %319 = vst [vmem:[#allocation2] sm:$0xff] %v5121_v0  ;;  %v4759_v4 = vpack.c.bf16 %v335_v2, %v333_v1  ;;  %v334_v5 = vld [vmem:[%s9073_s1 + $0x10] sm:$0xff]  ;;  %v337_v6 = vld [vmem:[%s9073_s1 + $0x28] sm:$0xff]  ;;  %vm328_vm1 = vcmask 519168  }
  0x38   : > { %320 = vst [vmem:[#allocation2 + $0x8] sm:$0xff] %v5121_v0  ;;  %323 = vst [vmem:[#allocation2 + $0x18] sm:$0xff] %v5121_v0  ;;  %v339_v7 = vld [vmem:[%s9073_s1 + $0x38] sm:$0xff]  ;;  %v4761_v8 = vpack.c.bf16 %v334_v5, %v332_v3  ;;  %v336_v10 = vld [vmem:[%s9073_s1 + $0x20] sm:$0xff]  ;;  %s315_s20 = scalar_select %p314_p5, %s5197_s9, 1  ;;  %vm435_vm2 = vcmask 1041408  }
  0x39   : > { %326 = vst [vmem:[#allocation2 + $0x30] sm:$0xf] %v5121_v0  ;;  %327 = vst [vmem:[#allocation2 + $0x38] sm:$0xf] %v5121_v0  ;;  %v4763_v9 = vpack.c.bf16 %v339_v7, %v337_v6  ;;  %v338_v11 = vld [vmem:[%s9073_s1 + $0x30] sm:$0xff]  ;;  %v341_v12 = vld [vmem:[%s9073_s1 + $0x48] sm:$0xff]  ;;  %4760 = vmatprep.subr.bf16.mxu1 %v4759_v4 }
  0x3a   : > { %322 = vst.msk [vmem:[#allocation2 + $0x10] sm:$0xff] %vm321_vm0, %v5121_v0  ;;  %325 = vst.msk [vmem:[#allocation2 + $0x28] sm:$0xff] %vm321_vm0, %v5121_v0  ;;  %v343_v13 = vld [vmem:[%s9073_s1 + $0x58] sm:$0xff]  ;;  %4762 = vmatpush1.bf16.msra.mxu1 %v4761_v8  ;;  %v4765_v14 = vpack.c.bf16 %v338_v11, %v336_v10  ;;  %v340_v16 = vld [vmem:[%s9073_s1 + $0x40] sm:$0xff]  ;;  %s4719_s10 = sshll.u32 %s315_s20, 4  ;;  %s5122_s21 = smov 32  }
  0x3b   : > { %4764 = vmatprep.subr.bf16.mxu1 %v4763_v9  ;;  %v4767_v15 = vpack.c.bf16 %v343_v13, %v341_v12  ;;  %v342_v17 = vld [vmem:[%s9073_s1 + $0x50] sm:$0xff]  ;;  %v345_v18 = vld [vmem:[%s9073_s1 + $0x68] sm:$0xff]  ;;  %v347_v19 = vld [vmem:[%s9073_s1 + $0x78] sm:$0xff]  ;;  %s318_s18 = scalar_lea.vmem %s9072_s0, %s4719_s10  ;;  %329 = vst.msk [vmem:[#allocation2 + $0x40] sm:$0xf] %vm328_vm1, %v5121_v0  ;;  %vm467_vm3 = vcmask 1047810  }
  0x3c   : > { %v4769_v20 = vpack.c.bf16 %v342_v17, %v340_v16  ;;  %v4771_v21 = vpack.c.bf16 %v347_v19, %v345_v18  ;;  %v344_v22 = vld [vmem:[%s9073_s1 + $0x60] sm:$0xff]  ;;  %v346_v23 = vld [vmem:[%s9073_s1 + $0x70] sm:$0xff]  ;;  %v331_v26 = vld [vmem:[%s318_s18 + $0x8] sm:$0xff]  ;;  %vm454_vm4 = vcmask 261120   ;;  %vm470_vm5 = vcmask 261122   ;;  %s5123_s22 = smov 112  }
  0x3d   : > { %v4773_v24 = vpack.c.bf16 %v346_v23, %v344_v22  ;;  %v330_v25 = vld [vmem:[%s318_s18] sm:$0xff]  ;;  %vm472_vm6 = vcmask 1047808   ;;  %vm476_vm7 = vcmask 1041664   ;;  %vm479_vm8 = vcmask 254976   ;;  %s5124_s17 = smov 96   ;;  %s5125_s19 = smov 80  }
  0x3e   : > { %4766 = vmatpush1.bf16.msra.mxu1 %v4765_v14  ;;  %s5126_s20 = smov 64   ;;  %vm532_vm9 = vcmask 1046528   ;;  %vm576_vm10 = vcmask 1045504   ;;  %vm620_vm11 = vcmask 1044480   ;;  %vm664_vm12 = vcmask 1043456   ;;  %s4720_s12 = sshll.u32 %s5197_s9, 8 }
  0x3f   : > { %4768 = vmatprep.subr.bf16.mxu1 %v4767_v15  ;;  %vm717_vm13 = vcmask 916480   ;;  %vm1048_vm14 = vcmask 785408   ;;  %vm1317_vm15 = vcmask 654336   ;;  %s9028_s23 = scalar_lea.hbm %s9080_s8, %s4720_s12  ;;  %p9814_p9 = scmp.ne.s32.totalorder %s9203_s15, 0 }
  0x40   : > { %s5128_s9 = smov [#allocation6]  }
  0x41   : > { %s5054_s25 = sshll.u32 %s5128_s9, 4  ;;  %s5055_s25 = int_to_ptr.vmem [resolvable:$false] %s5054_s25 }
  0x42   : > { %4770 = vmatpush1.bf16.msra.mxu1 %v4769_v20  ;;  %s5056_s26 = scalar_lea.vmem %s5055_s25, 512 }
  0x43   : > { %4772 = vmatprep.subr.bf16.mxu1 %v4771_v21 }
  0x46   : > { %4774 = vmatpush1.bf16.msra.mxu1 %v4773_v24 }
  0x49   : > { %4632 = vmatmul.mubr.msk.f32.vlgmr.msra.gmra.mrb[0].mxu1 %vm321_vm0, %v330_v25 }
  0x4a   : > { %424 = vmatprep.mubr.f32.mxu1 %v5121_v0 }
  0x4d   : > { %4633 = vmatmul.mubr.msk.f32.gmra.mrb[2].mxu1 %vm321_vm0, %v331_v26 }
 0x11c   : > { %v420_v27 = vpop.f32.mrb[0].mxu1 }
 0x11d   : > { %v436_v28 = vrot.slane %v420_v27, 6  ;;  %v422_v29 = vpop.f32.mrb[1].mxu1 }
 0x11e   : > { %v437_v31 = vrot.slane %v422_v29, 6 }
 0x11f   : > { %442 = vrot.lane.b32.xlu0 %v436_v28, %s5122_s21 }
 0x120   : > { %v426_v30 = vpop.f32.mrb[2].mxu1 }
 0x121   : > { %v438_v32 = vrot.slane %v426_v30, 6  ;;  %v428_v33 = vpop.f32.mrb[3].mxu1 }
 0x122   : > { %v440_v34 = vrot.slane %v428_v33, 6 }
 0x123   : > { %444 = vrot.lane.b32.xlu0 %v437_v31, %s5122_s21  ;;  %v439_v35 = vsel %vm435_vm2, %v436_v28, %v438_v32 }
 0x124   : > { %446 = vrot.lane.b32.xlu1 %v439_v35, %s5122_s21  ;;  %v441_v36 = vsel %vm435_vm2, %v437_v31, %v440_v34 }
 0x127   : > { %450 = vrot.lane.b32.xlu0 %v438_v32, %s5122_s21 }
 0x128   : > { %452 = vrot.lane.b32.xlu1 %v440_v34, %s5122_s21 }
 0x12c   : > { %448 = vrot.lane.b32.xlu1 %v441_v36, %s5122_s21 }
 0x191   : > { %v443_v37 = vpop.permute.xlu0 %442 }
 0x192   : > { %468 = vst.msk [vmem:[#allocation2] sm:$0xfc] %vm467_vm3, %v443_v37 }
 0x195   : > { %v445_v38 = vpop.permute.xlu0 %444 }
 0x196   : > { %v455_v39 = vsel %vm454_vm4, %v443_v37, %v445_v38  ;;  %471 = vst.msk [vmem:[#allocation2 + $0x10] sm:$0xfc] %vm470_vm5, %v445_v38  ;;  %v447_v40 = vpop.permute.xlu1 %446 }
 0x197   : > { %469 = vst [vmem:[#allocation2 + $0x8] sm:$0xfc] %v455_v39  ;;  %473 = vst.msk [vmem:[#allocation2 + $0x18] sm:$0xff] %vm472_vm6, %v447_v40 }
 0x199   : > { %v5328_v41 = vld [vmem:[#allocation2] sm:$0xff]  ;;  %v451_v42 = vpop.permute.xlu0 %450 }
 0x19a   : > { %477 = vst.msk [vmem:[#allocation2 + $0x30] sm:$0x3] %vm476_vm7, %v451_v42  ;;  %v453_v43 = vpop.permute.xlu1 %452  ;;  %705 = vrot.lane.b32.xlu0 %v5328_v41, %s5123_s22  ;;  %v750_v52 = vrot.slane %v5328_v41, 1  ;;  %v826_v57 = vrot.slane %v5328_v41, 2  ;;  %v903_v62 = vrot.slane %v5328_v41, 3  ;;  %v980_v3 = vrot.slane %v5328_v41, 4 }
 0x19b   : > { %v457_v44 = vsel %vm454_vm4, %v451_v42, %v453_v43  ;;  %480 = vst.msk [vmem:[#allocation2 + $0x40] sm:$0x3] %vm479_vm8, %v453_v43 }
 0x19c   : > { %478 = vst [vmem:[#allocation2 + $0x38] sm:$0x3] %v457_v44 }
 0x19d   : > { %v5350_v47 = vld [vmem:[#allocation2 + $0x10] sm:$0xff] }
 0x19e   : > { %v5335_v45 = vld [vmem:[#allocation2 + $0x8] sm:$0xff]  ;;  %v449_v46 = vpop.permute.xlu1 %448  ;;  %1036 = vrot.lane.b32.xlu0 %v5328_v41, %s5124_s17  ;;  %v5356_v48 = vld [vmem:[#allocation2 + $0x18] sm:$0xff]  ;;  %v756_v9 = vrot.slane %v5350_v47, 1  ;;  %v832_v14 = vrot.slane %v5350_v47, 2  ;;  %v909_v20 = vrot.slane %v5350_v47, 3  ;;  %v986_v27 = vrot.slane %v5350_v47, 4 }
 0x19f   : > { %475 = vst.msk [vmem:[#allocation2 + $0x28] sm:$0xff] %vm454_vm4, %v449_v46  ;;  %707 = vrot.lane.b32.xlu1 %v5335_v45, %s5123_s22  ;;  %v5371_v49 = vsel %vm454_vm4, %v447_v40, %v449_v46  ;;  %v751_v51 = vrot.slane %v5356_v48, 1  ;;  %v827_v55 = vrot.slane %v5356_v48, 2  ;;  %v904_v59 = vrot.slane %v5356_v48, 3 }
 0x1a0   : > { %v981_v0 = vrot.slane %v5356_v48, 4 }
 0x1a1   : > { %v5393_v53 = vld [vmem:[#allocation2 + $0x30] sm:$0xf]  ;;  %v752_v54 = vsel %vm532_vm9, %v750_v52, %v751_v51  ;;  %v828_v58 = vsel %vm576_vm10, %v826_v57, %v827_v55  ;;  %v905_v63 = vsel %vm620_vm11, %v903_v62, %v904_v59 }
 0x1a2   : > { %1305 = vrot.lane.b32.xlu0 %v5328_v41, %s5125_s19  ;;  %v759_v56 = vrot.slane %v5393_v53, 1  ;;  %v835_v61 = vrot.slane %v5393_v53, 2  ;;  %v912_v2 = vrot.slane %v5393_v53, 3  ;;  %v982_v4 = vsel %vm664_vm12, %v980_v3, %v981_v0  ;;  %v685_v10 = vld [vmem:[#allocation2 + $0x40] sm:$0xf] }
 0x1a3   : > { %1038 = vrot.lane.b32.xlu1 %v5335_v45, %s5124_s17  ;;  %v989_v6 = vrot.slane %v5393_v53, 4  ;;  %v763_v13 = vrot.slane %v685_v10, 1  ;;  %v839_v19 = vrot.slane %v685_v10, 2  ;;  %v916_v26 = vrot.slane %v685_v10, 3 }
 0x1a4   : > { %v760_v60 = vsel %vm532_vm9, %v751_v51, %v759_v56  ;;  %v836_v1 = vsel %vm576_vm10, %v827_v55, %v835_v61  ;;  %v913_v5 = vsel %vm620_vm11, %v904_v59, %v912_v2  ;;  %v993_v32 = vrot.slane %v685_v10, 4  ;;  %v5550_v61 = vld [vmem:[#allocation2 + $0x38] sm:$0xf] }
 0x1a5   : > { %v990_v7 = vsel %vm664_vm12, %v981_v0, %v989_v6  ;;  %v761_v0 = vrot.slane %v5550_v61, 1  ;;  %v753_v6 = vrot.slane %v5335_v45, 1 }
 0x1a6   : > { %1574 = vrot.lane.b32.xlu0 %v5328_v41, %s5126_s20  ;;  %v5379_v50 = vld [vmem:[#allocation2 + $0x28] sm:$0xff] }
 0x1a7   : > { %1307 = vrot.lane.b32.xlu1 %v5335_v45, %s5125_s19  ;;  %v757_v8 = vrot.slane %v5379_v50, 1  ;;  %v833_v12 = vrot.slane %v5379_v50, 2  ;;  %v910_v17 = vrot.slane %v5379_v50, 3  ;;  %v987_v24 = vrot.slane %v5379_v50, 4 }
 0x1a9   : > { %v5449_v11 = vsel %vm532_vm9, %v756_v9, %v757_v8  ;;  %v834_v16 = vsel %vm576_vm10, %v832_v14, %v833_v12  ;;  %v764_v18 = vsel %vm532_vm9, %v757_v8, %v763_v13  ;;  %v911_v23 = vsel %vm620_vm11, %v909_v20, %v910_v17 }
 0x1aa   : > { %709 = vrot.lane.b32.xlu0 %v5350_v47, %s5123_s22  ;;  %v840_v25 = vsel %vm576_vm10, %v833_v12, %v839_v19  ;;  %v988_v30 = vsel %vm664_vm12, %v986_v27, %v987_v24  ;;  %v917_v31 = vsel %vm620_vm11, %v910_v17, %v916_v26  ;;  %v994_v35 = vsel %vm664_vm12, %v987_v24, %v993_v32 }
 0x1ab   : > { %1576 = vrot.lane.b32.xlu1 %v5335_v45, %s5126_s20  ;;  %v829_v13 = vrot.slane %v5335_v45, 2  ;;  %v907_v14 = vrot.slane %v5371_v49, 3  ;;  %v991_v19 = vrot.slane %v5550_v61, 4  ;;  %v984_v24 = vrot.slane %v5371_v49, 4 }
 0x1ad   : > { %v992_v27 = vsel %vm664_vm12, %v984_v24, %v991_v19 }
 0x1ae   : > { %1040 = vrot.lane.b32.xlu0 %v5350_v47, %s5124_s17 }
 0x1af   : > { %711 = vrot.lane.b32.xlu1 %v5356_v48, %s5123_s22 }
 0x1b2   : > { %1309 = vrot.lane.b32.xlu0 %v5350_v47, %s5125_s19 }
 0x1b3   : > { %1042 = vrot.lane.b32.xlu1 %v5356_v48, %s5124_s17 }
 0x1b6   : > { %1578 = vrot.lane.b32.xlu0 %v5350_v47, %s5126_s20 }
 0x1b7   : > { %1311 = vrot.lane.b32.xlu1 %v5356_v48, %s5125_s19 }
 0x1ba   : > { %713 = vrot.lane.b32.xlu0 %v5371_v49, %s5123_s22 }
 0x1bb   : > { %1580 = vrot.lane.b32.xlu1 %v5356_v48, %s5126_s20 }
 0x1be   : > { %1044 = vrot.lane.b32.xlu0 %v5371_v49, %s5124_s17 }
 0x1bf   : > { %715 = vrot.lane.b32.xlu1 %v5379_v50, %s5123_s22 }
 0x1c2   : > { %1313 = vrot.lane.b32.xlu0 %v5371_v49, %s5125_s19 }
 0x1c3   : > { %1046 = vrot.lane.b32.xlu1 %v5379_v50, %s5124_s17 }
 0x1c6   : > { %1582 = vrot.lane.b32.xlu0 %v5371_v49, %s5126_s20 }
 0x1c7   : > { %1315 = vrot.lane.b32.xlu1 %v5379_v50, %s5125_s19 }
 0x1ca   : > { %765 = vrot.lane.b32.xlu0 %v752_v54, %s5123_s22 }
 0x1cb   : > { %1584 = vrot.lane.b32.xlu1 %v5379_v50, %s5126_s20 }
 0x1ce   : > { %841 = vrot.lane.b32.xlu0 %v828_v58, %s5123_s22 }
 0x1cf   : > { %771 = vrot.lane.b32.xlu1 %v760_v60, %s5123_s22 }
 0x1d2   : > { %918 = vrot.lane.b32.xlu0 %v905_v63, %s5123_s22 }
 0x1d3   : > { %847 = vrot.lane.b32.xlu1 %v836_v1, %s5123_s22 }
 0x1d6   : > { %995 = vrot.lane.b32.xlu0 %v982_v4, %s5123_s22 }
 0x1d7   : > { %924 = vrot.lane.b32.xlu1 %v913_v5, %s5123_s22 }
 0x1da   : > { %1078 = vrot.lane.b32.xlu0 %v752_v54, %s5124_s17 }
 0x1db   : > { %1001 = vrot.lane.b32.xlu1 %v990_v7, %s5123_s22 }
 0x1de   : > { %1140 = vrot.lane.b32.xlu0 %v828_v58, %s5124_s17 }
 0x1df   : > { %1084 = vrot.lane.b32.xlu1 %v760_v60, %s5124_s17 }
 0x1e2   : > { %1202 = vrot.lane.b32.xlu0 %v905_v63, %s5124_s17 }
 0x1e3   : > { %1146 = vrot.lane.b32.xlu1 %v836_v1, %s5124_s17 }
 0x1e6   : > { %1264 = vrot.lane.b32.xlu0 %v982_v4, %s5124_s17 }
 0x1e7   : > { %1208 = vrot.lane.b32.xlu1 %v913_v5, %s5124_s17 }
 0x1ea   : > { %1347 = vrot.lane.b32.xlu0 %v752_v54, %s5125_s19 }
 0x1eb   : > { %1270 = vrot.lane.b32.xlu1 %v990_v7, %s5124_s17 }
 0x1ee   : > { %1409 = vrot.lane.b32.xlu0 %v828_v58, %s5125_s19 }
 0x1ef   : > { %1353 = vrot.lane.b32.xlu1 %v760_v60, %s5125_s19 }
 0x1f2   : > { %1471 = vrot.lane.b32.xlu0 %v905_v63, %s5125_s19 }
 0x1f3   : > { %1415 = vrot.lane.b32.xlu1 %v836_v1, %s5125_s19 }
 0x1f6   : > { %1533 = vrot.lane.b32.xlu0 %v982_v4, %s5125_s19 }
 0x1f7   : > { %1477 = vrot.lane.b32.xlu1 %v913_v5, %s5125_s19 }
 0x1fa   : > { %1615 = vrot.lane.b32.xlu0 %v752_v54, %s5126_s20 }
 0x1fb   : > { %1539 = vrot.lane.b32.xlu1 %v990_v7, %s5125_s19 }
 0x1fe   : > { %1656 = vrot.lane.b32.xlu0 %v828_v58, %s5126_s20 }
 0x1ff   : > { %1621 = vrot.lane.b32.xlu1 %v760_v60, %s5126_s20 }
 0x202   : > { %1697 = vrot.lane.b32.xlu0 %v905_v63, %s5126_s20 }
 0x203   : > { %1662 = vrot.lane.b32.xlu1 %v836_v1, %s5126_s20  ;;  %v754_v1 = vrot.slane %v5371_v49, 1 }
 0x205   : > { %v755_v12 = vsel %vm532_vm9, %v753_v6, %v754_v1 }
 0x206   : > { %1738 = vrot.lane.b32.xlu0 %v982_v4, %s5126_s20  ;;  %v5567_v4 = vsel %vm532_vm9, %v754_v1, %v761_v0 }
 0x207   : > { %1703 = vrot.lane.b32.xlu1 %v913_v5, %s5126_s20  ;;  %v837_v5 = vrot.slane %v5550_v61, 2 }
 0x20a   : > { %769 = vrot.lane.b32.xlu0 %v5449_v11, %s5123_s22 }
 0x20b   : > { %1744 = vrot.lane.b32.xlu1 %v990_v7, %s5126_s20  ;;  %v830_v7 = vrot.slane %v5371_v49, 2 }
 0x20c   : > { %v5456_v15 = vpop.permute.xlu0 %705 }
 0x20d   : > { %v838_v10 = vsel %vm576_vm10, %v830_v7, %v837_v5  ;;  %v831_v20 = vsel %vm576_vm10, %v829_v13, %v830_v7 }
 0x20e   : > { %845 = vrot.lane.b32.xlu0 %v834_v16, %s5123_s22 }
 0x20f   : > { %775 = vrot.lane.b32.xlu1 %v764_v18, %s5123_s22 }
 0x210   : > { %v5464_v21 = vpop.permute.xlu0 %1036 }
 0x211   : > { %v5466_v22 = vpop.permute.xlu1 %707 }
 0x212   : > { %922 = vrot.lane.b32.xlu0 %v911_v23, %s5123_s22 }
 0x213   : > { %851 = vrot.lane.b32.xlu1 %v840_v25, %s5123_s22 }
 0x214   : > { %v5474_v28 = vpop.permute.xlu0 %1305 }
 0x215   : > { %v5476_v29 = vpop.permute.xlu1 %1038 }
 0x216   : > { %999 = vrot.lane.b32.xlu0 %v988_v30, %s5123_s22 }
 0x217   : > { %928 = vrot.lane.b32.xlu1 %v917_v31, %s5123_s22 }
 0x218   : > { %v5482_v33 = vpop.permute.xlu0 %1574 }
 0x219   : > { %v5484_v34 = vpop.permute.xlu1 %1307 }
 0x21a   : > { %1082 = vrot.lane.b32.xlu0 %v5449_v11, %s5124_s17 }
 0x21b   : > { %1005 = vrot.lane.b32.xlu1 %v994_v35, %s5123_s22 }
 0x21c   : > { %v5490_v36 = vpop.permute.xlu0 %709 }
 0x21d   : > { %v5492_v37 = vpop.permute.xlu1 %1576 }
 0x21e   : > { %1144 = vrot.lane.b32.xlu0 %v834_v16, %s5124_s17 }
 0x21f   : > { %1088 = vrot.lane.b32.xlu1 %v764_v18, %s5124_s17 }
 0x220   : > { %v5496_v38 = vpop.permute.xlu0 %1040 }
 0x221   : > { %v5498_v39 = vpop.permute.xlu1 %711 }
 0x222   : > { %1206 = vrot.lane.b32.xlu0 %v911_v23, %s5124_s17 }
 0x223   : > { %1150 = vrot.lane.b32.xlu1 %v840_v25, %s5124_s17 }
 0x224   : > { %v5502_v40 = vpop.permute.xlu0 %1309 }
 0x225   : > { %v5504_v42 = vpop.permute.xlu1 %1042 }
 0x226   : > { %9210 = vst [vmem:[#allocation9_spill] sm:$0xff] %v5504_v42  ;;  %1268 = vrot.lane.b32.xlu0 %v988_v30, %s5124_s17 }
 0x227   : > { %1212 = vrot.lane.b32.xlu1 %v917_v31, %s5124_s17 }
 0x228   : > { %v5508_v43 = vpop.permute.xlu0 %1578 }
 0x229   : > { %v5510_v44 = vpop.permute.xlu1 %1311 }
 0x22a   : > { %9211 = vst [vmem:[#allocation10_spill] sm:$0xff] %v5510_v44  ;;  %1351 = vrot.lane.b32.xlu0 %v5449_v11, %s5125_s19 }
 0x22b   : > { %1274 = vrot.lane.b32.xlu1 %v994_v35, %s5124_s17 }
 0x22c   : > { %v5515_v46 = vpop.permute.xlu0 %713 }
 0x22d   : > { %v5517_v47 = vpop.permute.xlu1 %1580 }
 0x22e   : > { %9212 = vst [vmem:[#allocation11_spill] sm:$0xff] %v5517_v47  ;;  %1413 = vrot.lane.b32.xlu0 %v834_v16, %s5125_s19 }
 0x22f   : > { %1357 = vrot.lane.b32.xlu1 %v764_v18, %s5125_s19 }
 0x230   : > { %v5521_v50 = vpop.permute.xlu0 %1044 }
 0x231   : > { %v5523_v51 = vpop.permute.xlu1 %715 }
 0x232   : > { %1475 = vrot.lane.b32.xlu0 %v911_v23, %s5125_s19 }
 0x233   : > { %1419 = vrot.lane.b32.xlu1 %v840_v25, %s5125_s19 }
 0x234   : > { %v5527_v52 = vpop.permute.xlu0 %1313 }
 0x235   : > { %9213 = vst [vmem:[#allocation12_spill] sm:$0xff] %v5527_v52  ;;  %v5529_v54 = vpop.permute.xlu1 %1046 }
 0x236   : > { %9214 = vst [vmem:[#allocation13_spill] sm:$0xff] %v5529_v54  ;;  %1537 = vrot.lane.b32.xlu0 %v988_v30, %s5125_s19 }
 0x237   : > { %1481 = vrot.lane.b32.xlu1 %v917_v31, %s5125_s19 }
 0x238   : > { %v5533_v55 = vpop.permute.xlu0 %1582 }
 0x239   : > { %9215 = vst [vmem:[#allocation14_spill] sm:$0xff] %v5533_v55  ;;  %v5535_v56 = vpop.permute.xlu1 %1315 }
 0x23a   : > { %9216 = vst [vmem:[#allocation15_spill] sm:$0xff] %v5535_v56  ;;  %1619 = vrot.lane.b32.xlu0 %v5449_v11, %s5126_s20  ;;  %v914_v11 = vrot.slane %v5550_v61, 3 }
 0x23b   : > { %1543 = vrot.lane.b32.xlu1 %v994_v35, %s5125_s19 }
 0x23c   : > { %v5540_v57 = vpop.permute.xlu0 %765 }
 0x23d   : > { %9217 = vst [vmem:[#allocation16_spill] sm:$0xff] %v5540_v57  ;;  %v5542_v58 = vpop.permute.xlu1 %1584 }
 0x23e   : > { %9218 = vst [vmem:[#allocation17_spill] sm:$0xff] %v5542_v58  ;;  %1660 = vrot.lane.b32.xlu0 %v834_v16, %s5126_s20 }
 0x23f   : > { %1625 = vrot.lane.b32.xlu1 %v764_v18, %s5126_s20  ;;  %v915_v18 = vsel %vm620_vm11, %v907_v14, %v914_v11 }
 0x240   : > { %v5546_v59 = vpop.permute.xlu0 %841 }
 0x241   : > { %9219 = vst [vmem:[#allocation18_spill] sm:$0xff] %v5546_v59  ;;  %v5548_v60 = vpop.permute.xlu1 %771 }
 0x242   : > { %9220 = vst [vmem:[#allocation19_spill] sm:$0xff] %v5548_v60  ;;  %1701 = vrot.lane.b32.xlu0 %v911_v23, %s5126_s20  ;;  %v906_v23 = vrot.slane %v5335_v45, 3 }
 0x243   : > { %1666 = vrot.lane.b32.xlu1 %v840_v25, %s5126_s20 }
 0x244   : > { %v5554_v62 = vpop.permute.xlu0 %918 }
 0x245   : > { %9221 = vst [vmem:[#allocation20_spill] sm:$0xff] %v5554_v62  ;;  %v5556_v63 = vpop.permute.xlu1 %847 }
 0x246   : > { %9222 = vst [vmem:[#allocation21_spill] sm:$0xff] %v5556_v63  ;;  %1742 = vrot.lane.b32.xlu0 %v988_v30, %s5126_s20  ;;  %v908_v30 = vsel %vm620_vm11, %v906_v23, %v907_v14 }
 0x247   : > { %1707 = vrot.lane.b32.xlu1 %v917_v31, %s5126_s20  ;;  %v983_v31 = vrot.slane %v5335_v45, 4 }
 0x248   : > { %v5562_v2 = vpop.permute.xlu0 %995 }
 0x249   : > { %9223 = vst [vmem:[#allocation22_spill] sm:$0xff] %v5562_v2  ;;  %v5564_v3 = vpop.permute.xlu1 %924  ;;  %v985_v0 = vsel %vm664_vm12, %v983_v31, %v984_v24 }
 0x24a   : > { %9224 = vst [vmem:[#allocation23_spill] sm:$0xff] %v5564_v3  ;;  %773 = vrot.lane.b32.xlu0 %v5567_v4, %s5123_s22 }
 0x24b   : > { %1748 = vrot.lane.b32.xlu1 %v994_v35, %s5126_s20 }
 0x24c   : > { %v5575_v8 = vpop.permute.xlu0 %1078 }
 0x24d   : > { %9225 = vst [vmem:[#allocation24_spill] sm:$0xff] %v5575_v8  ;;  %v5577_v9 = vpop.permute.xlu1 %1001  ;;  %v4637_v8 = vld [vmem:[%s9075_s3 + $0x24] ss:$8 sm:$0x3] }
 0x24e   : > { %9226 = vst [vmem:[#allocation25_spill] sm:$0xff] %v5577_v9  ;;  %849 = vrot.lane.b32.xlu0 %v838_v10, %s5123_s22 }
 0x24f   : > { %767 = vrot.lane.b32.xlu1 %v755_v12, %s5123_s22 }
 0x250   : > { %v5586_v16 = vpop.permute.xlu0 %1140 }
 0x251   : > { %9227 = vst [vmem:[#allocation26_spill] sm:$0xff] %v5586_v16  ;;  %v5588_v17 = vpop.permute.xlu1 %1084 }
 0x252   : > { %9228 = vst [vmem:[#allocation27_spill] sm:$0xff] %v5588_v17  ;;  %926 = vrot.lane.b32.xlu0 %v915_v18, %s5123_s22 }
 0x253   : > { %843 = vrot.lane.b32.xlu1 %v831_v20, %s5123_s22 }
 0x254   : > { %v5597_v25 = vpop.permute.xlu0 %1202 }
 0x255   : > { %9229 = vst [vmem:[#allocation28_spill] sm:$0xff] %v5597_v25  ;;  %v5599_v26 = vpop.permute.xlu1 %1146 }
 0x256   : > { %9230 = vst [vmem:[#allocation29_spill] sm:$0xff] %v5599_v26  ;;  %1003 = vrot.lane.b32.xlu0 %v992_v27, %s5123_s22 }
 0x257   : > { %920 = vrot.lane.b32.xlu1 %v908_v30, %s5123_s22 }
 0x258   : > { %v5606_v32 = vpop.permute.xlu0 %1264 }
 0x259   : > { %9231 = vst [vmem:[#allocation30_spill] sm:$0xff] %v5606_v32  ;;  %v5608_v35 = vpop.permute.xlu1 %1208  ;;  %v487_v32 = vld [vmem:[%s9075_s3] ss:$8 sm:$0x3] }
 0x25a   : > { %9232 = vst [vmem:[#allocation31_spill] sm:$0xff] %v5608_v35  ;;  %1086 = vrot.lane.b32.xlu0 %v5567_v4, %s5124_s17 }
 0x25b   : > { %997 = vrot.lane.b32.xlu1 %v985_v0, %s5123_s22 }
 0x25c   : > { %v5614_v1 = vpop.permute.xlu0 %1347 }
 0x25d   : > { %9233 = vst [vmem:[#allocation32_spill] sm:$0xff] %v5614_v1  ;;  %v5616_v5 = vpop.permute.xlu1 %1270 }
 0x25e   : > { %9234 = vst [vmem:[#allocation33_spill] sm:$0xff] %v5616_v5  ;;  %1148 = vrot.lane.b32.xlu0 %v838_v10, %s5124_s17 }
 0x25f   : > { %1080 = vrot.lane.b32.xlu1 %v755_v12, %s5124_s17 }
 0x260   : > { %v5620_v6 = vpop.permute.xlu0 %1409 }
 0x261   : > { %9235 = vst [vmem:[#allocation34_spill] sm:$0xff] %v5620_v6  ;;  %v5622_v7 = vpop.permute.xlu1 %1353 }
 0x262   : > { %9236 = vst [vmem:[#allocation35_spill] sm:$0xff] %v5622_v7  ;;  %1210 = vrot.lane.b32.xlu0 %v915_v18, %s5124_s17 }
 0x263   : > { %1142 = vrot.lane.b32.xlu1 %v831_v20, %s5124_s17 }
 0x264   : > { %v5626_v11 = vpop.permute.xlu0 %1471 }
 0x265   : > { %9237 = vst [vmem:[#allocation36_spill] sm:$0xff] %v5626_v11  ;;  %v5628_v13 = vpop.permute.xlu1 %1415 }
 0x266   : > { %9238 = vst [vmem:[#allocation37_spill] sm:$0xff] %v5628_v13  ;;  %1272 = vrot.lane.b32.xlu0 %v992_v27, %s5124_s17  ;;  %v4635_v13 = vld [vmem:[%s9075_s3 + $0x12] ss:$8 sm:$0x3] }
 0x267   : > { %1204 = vrot.lane.b32.xlu1 %v908_v30, %s5124_s17 }
 0x268   : > { %v5632_v14 = vpop.permute.xlu0 %1533 }
 0x269   : > { %9239 = vst [vmem:[#allocation38_spill] sm:$0xff] %v5632_v14  ;;  %v5634_v19 = vpop.permute.xlu1 %1477 }
 0x26a   : > { %9240 = vst [vmem:[#allocation39_spill] sm:$0xff] %v5634_v19  ;;  %1355 = vrot.lane.b32.xlu0 %v5567_v4, %s5125_s19 }
 0x26b   : > { %1266 = vrot.lane.b32.xlu1 %v985_v0, %s5124_s17 }
 0x26c   : > { %v5639_v23 = vpop.permute.xlu0 %1615 }
 0x26d   : > { %9241 = vst [vmem:[#allocation40_spill] sm:$0xff] %v5639_v23  ;;  %v5641_v24 = vpop.permute.xlu1 %1539 }
 0x26e   : > { %9242 = vst [vmem:[#allocation41_spill] sm:$0xff] %v5641_v24  ;;  %1417 = vrot.lane.b32.xlu0 %v838_v10, %s5125_s19 }
 0x26f   : > { %1349 = vrot.lane.b32.xlu1 %v755_v12, %s5125_s19 }
 0x270   : > { %v5645_v31 = vpop.permute.xlu0 %1656 }
 0x271   : > { %9243 = vst [vmem:[#allocation42_spill] sm:$0xff] %v5645_v31  ;;  %v5647_v11 = vpop.permute.xlu1 %1621 }
 0x272   : > { %9244 = vst [vmem:[#allocation43_spill] sm:$0xff] %v5647_v11  ;;  %1479 = vrot.lane.b32.xlu0 %v915_v18, %s5125_s19 }
 0x273   : > { %1411 = vrot.lane.b32.xlu1 %v831_v20, %s5125_s19 }
 0x274   : > { %v5651_v14 = vpop.permute.xlu0 %1697 }
 0x275   : > { %9245 = vst [vmem:[#allocation44_spill] sm:$0xff] %v5651_v14  ;;  %v5653_v6 = vpop.permute.xlu1 %1662  ;;  %v489_v14 = vlaneseq }
 0x276   : > { %9246 = vst [vmem:[#allocation45_spill] sm:$0xff] %v5653_v6  ;;  %1541 = vrot.lane.b32.xlu0 %v992_v27, %s5125_s19 }
 0x277   : > { %1473 = vrot.lane.b32.xlu1 %v908_v30, %s5125_s19 }
 0x278   : > { %v5657_v23 = vpop.permute.xlu0 %1738 }
 0x279   : > { %9247 = vst [vmem:[#allocation46_spill] sm:$0xff] %v5657_v23  ;;  %v5659_v24 = vpop.permute.xlu1 %1703  ;;  %v490_v23 = vshrl.u32 %v489_v14, 7 }
 0x27a   : > { %9248 = vst [vmem:[#allocation47_spill] sm:$0xff] %v5659_v24  ;;  %1623 = vrot.lane.b32.xlu0 %v5567_v4, %s5126_s20 }
 0x27b   : > { %1535 = vrot.lane.b32.xlu1 %v985_v0, %s5125_s19  ;;  %v5693_v14 = vsub.s32 1, %v490_v23 }
 0x27c   : > { %v5664_v31 = vpop.permute.xlu0 %769 }
 0x27d   : > { %9249 = vst [vmem:[#allocation48_spill] sm:$0xff] %v5664_v31  ;;  %v5666_v11 = vpop.permute.xlu1 %1744  ;;  %9258 = vst [vmem:[#allocation57_spill] sm:$0xff] %v5693_v14  ;;  %v649_v3 = vrot.slane %v4637_v8, %v5693_v14 }
 0x27e   : > { %9250 = vst [vmem:[#allocation49_spill] sm:$0xff] %v5666_v11  ;;  %1664 = vrot.lane.b32.xlu0 %v838_v10, %s5126_s20  ;;  %v5681_v11 = vsub.s32 0, %v490_v23  ;;  %v4634_v10 = vld [vmem:[%s9075_s3 + $0x5] ss:$8 sm:$0x3] }
 0x27f   : > { %1617 = vrot.lane.b32.xlu1 %v755_v12, %s5126_s20  ;;  %v517_v23 = vrot.slane %v4634_v10, %v5693_v14 }
 0x280   : > { %v5670_v6 = vpop.permute.xlu0 %845  ;;  %9255 = vst [vmem:[#allocation54_spill] sm:$0xff] %v5681_v11  ;;  %v557_v16 = vrot.slane %v4635_v13, %v5681_v11 }
 0x281   : > { %9251 = vst [vmem:[#allocation50_spill] sm:$0xff] %v5670_v6  ;;  %v5672_v19 = vpop.permute.xlu1 %775  ;;  %v561_v6 = vrot.slane %v4635_v13, %v5693_v14 }
 0x282   : > { %9252 = vst [vmem:[#allocation51_spill] sm:$0xff] %v5672_v19  ;;  %1705 = vrot.lane.b32.xlu0 %v915_v18, %s5126_s20  ;;  %v5724_v26 = vmul.f32 %v557_v16, %v5356_v48 }
 0x283   : > { %1658 = vrot.lane.b32.xlu1 %v831_v20, %s5126_s20  ;;  %v513_v20 = vrot.slane %v4634_v10, %v5681_v11  ;;  %v569_v58 = vmul.f32 %v561_v6, %v5550_v61 }
 0x284   : > { %v5676_v4 = vpop.permute.xlu0 %922 }
 0x285   : > { %9253 = vst [vmem:[#allocation52_spill] sm:$0xff] %v5676_v4  ;;  %v5678_v24 = vpop.permute.xlu1 %851  ;;  %v520_v7 = vmul.f32 %v513_v20, %v5328_v41  ;;  %v564_v4 = vmul.f32 %v557_v16, %v5328_v41  ;;  %v524_v62 = vmul.f32 %v513_v20, %v5393_v53  ;;  %v585_v42 = vrot.slane %v569_v58, 2 }
 0x286   : > { %9254 = vst [vmem:[#allocation53_spill] sm:$0xff] %v5678_v24  ;;  %1746 = vrot.lane.b32.xlu0 %v992_v27, %s5126_s20  ;;  %v5698_v27 = vmul.f32 %v513_v20, %v5356_v48  ;;  %v525_v20 = vmul.f32 %v517_v23, %v5550_v61  ;;  %v653_v58 = vmul.f32 %v649_v3, %v5335_v45 }
 0x287   : > { %1699 = vrot.lane.b32.xlu1 %v908_v30, %s5126_s20  ;;  %v533_v10 = vrot.slane %v520_v7, 1  ;;  %v5742_v7 = vld [vmem:[%s9075_s3 + $0x1] ss:$8 sm:$0x3]  ;;  %v577_v13 = vrot.slane %v564_v4, 2 }
 0x288   : > { %v5687_v12 = vpop.permute.xlu0 %999  ;;  %v534_v5 = vrot.slane %v5698_v27, 1  ;;  %v523_v27 = vmul.f32 %v517_v23, %v5371_v49 }
 0x289   : > { %9256 = vst [vmem:[#allocation55_spill] sm:$0xff] %v5687_v12  ;;  %v5689_v18 = vpop.permute.xlu1 %928 }
 0x28a   : > { %9257 = vst [vmem:[#allocation56_spill] sm:$0xff] %v5689_v18  ;;  %v535_v17 = vsel %vm532_vm9, %v533_v10, %v534_v5  ;;  %v496_v10 = vrot.slane %v487_v32, %v5693_v14  ;;  %v537_v63 = vrot.slane %v523_v27, 1 }
 0x28b   : > { %1740 = vrot.lane.b32.xlu1 %v985_v0, %s5126_s20  ;;  %v4636_v0 = vld [vmem:[%s9075_s3 + $0x17] ss:$8 sm:$0x3] }
 0x28c   : > { %v5695_v1 = vpop.permute.xlu0 %1082  ;;  %v601_v12 = vrot.slane %v4636_v0, %v5681_v11  ;;  %v605_v18 = vrot.slane %v4636_v0, %v5693_v14  ;;  %v539_v0 = vrot.slane %v524_v62, 1  ;;  %v568_v62 = vmul.f32 %v557_v16, %v5393_v53 }
 0x28d   : > { %9259 = vst [vmem:[#allocation58_spill] sm:$0xff] %v5695_v1  ;;  %v5700_v30 = vpop.permute.xlu1 %1005  ;;  %v492_v1 = vrot.slane %v487_v32, %v5681_v11  ;;  %v5764_v32 = vrot.slane %v5742_v7, %v5681_v11 }
 0x28e   : > { %9260 = vst [vmem:[#allocation59_spill] sm:$0xff] %v5700_v30  ;;  %v608_v59 = vmul.f32 %v601_v12, %v5328_v41  ;;  %v5758_v31 = vmul.f32 %v601_v12, %v5356_v48  ;;  %v609_v47 = vmul.f32 %v605_v18, %v5335_v45  ;;  %v611_v55 = vmul.f32 %v605_v18, %v5371_v49 }
 0x28f   : > { %v499_v9 = vmul.f32 %v492_v1, %v5328_v41 }
 0x290   : > { %v5713_v25 = vpop.permute.xlu0 %1144 }
 0x291   : > { %9261 = vst [vmem:[#allocation60_spill] sm:$0xff] %v5713_v25  ;;  %v5717_v35 = vpop.permute.xlu1 %1088  ;;  %v521_v25 = vmul.f32 %v517_v23, %v5335_v45  ;;  %v547_v57 = vadd.f32 %v535_v17, %v499_v9  ;;  %v565_v9 = vmul.f32 %v561_v6, %v5335_v45  ;;  %v567_v17 = vmul.f32 %v561_v6, %v5371_v49 }
 0x292   : > { %9262 = vst [vmem:[#allocation61_spill] sm:$0xff] %v5717_v35  ;;  %v5732_v35 = vrot.slane %v4637_v8, %v5681_v11  ;;  %v583_v6 = vrot.slane %v568_v62, 2 }
 0x293   : > { %v536_v24 = vrot.slane %v521_v25, 1  ;;  %v541_v25 = vrot.slane %v525_v20, 1  ;;  %v500_v20 = vmul.f32 %v496_v10, %v5335_v45  ;;  %v580_v16 = vrot.slane %v565_v9, 2 }
 0x294   : > { %v5729_v2 = vpop.permute.xlu0 %1206  ;;  %v5774_v8 = vmul.f32 %v5732_v35, %v5328_v41  ;;  %v5780_v27 = vmul.f32 %v5732_v35, %v5356_v48  ;;  %v581_v54 = vrot.slane %v567_v17, 2 }
 0x295   : > { %9263 = vst [vmem:[#allocation62_spill] sm:$0xff] %v5729_v2  ;;  %v5737_v30 = vpop.permute.xlu1 %1150  ;;  %v5748_v2 = vld [vmem:[%s9075_s3 + $0x2] ss:$8 sm:$0x3]  ;;  %v538_v41 = vsel %vm532_vm9, %v536_v24, %v537_v63  ;;  %v542_v24 = vsel %vm532_vm9, %v537_v63, %v541_v25  ;;  %v624_v63 = vrot.slane %v609_v47, 3  ;;  %v656_v47 = vmul.f32 %v5732_v35, %v5393_v53 }
 0x296   : > { %9264 = vst [vmem:[#allocation63_spill] sm:$0xff] %v5737_v30  ;;  %v578_v30 = vrot.slane %v5724_v26, 2  ;;  %v5768_v26 = vrot.slane %v5748_v2, %v5681_v11  ;;  %v666_v9 = vrot.slane %v5780_v27, 4 }
 0x298   : > { %v5760_v19 = vpop.permute.xlu0 %1268  ;;  %v579_v4 = vsel %vm576_vm10, %v577_v13, %v578_v30  ;;  %v540_v13 = vsel %vm532_vm9, %v534_v5, %v539_v0  ;;  %v613_v5 = vmul.f32 %v605_v18, %v5550_v61  ;;  %v655_v18 = vmul.f32 %v649_v3, %v5371_v49 }
 0x299   : > { %9265 = vst [vmem:[#allocation64_spill] sm:$0xff] %v5760_v19  ;;  %v5770_v23 = vpop.permute.xlu1 %1212  ;;  %v621_v19 = vrot.slane %v608_v59, 3  ;;  %v591_v60 = vadd.f32 %v579_v4, %v547_v57  ;;  %v501_v57 = vmul.f32 %v492_v1, %v5356_v48  ;;  %v612_v4 = vmul.f32 %v601_v12, %v5393_v53  ;;  %v4653_v12 = vld [vmem:[%s9075_s3 + $0x3] ss:$8 sm:$0x3] }
 0x29a   : > { %9266 = vst [vmem:[#allocation65_spill] sm:$0xff] %v5770_v23  ;;  %v622_v23 = vrot.slane %v5758_v31, 3  ;;  %v548_v31 = vadd.f32 %v538_v41, %v500_v20  ;;  %v584_v27 = vsel %vm576_vm10, %v578_v30, %v583_v6  ;;  %v629_v62 = vrot.slane %v613_v5, 3 }
 0x29b   : > { %v549_v52 = vadd.f32 %v540_v13, %v501_v57  ;;  %v657_v41 = vmul.f32 %v649_v3, %v5550_v61  ;;  %v5821_v45 = vrot.slane %v4653_v12, %v5681_v11  ;;  %v718_v53 = vsel %vm717_vm13, %v5456_v15, %v5466_v22  ;;  %v4661_v61 = vld [vmem:[%s9075_s3 + $0x4] ss:$8 sm:$0x3] }
 0x29c   : > { %v5787_v56 = vpop.permute.xlu0 %1351  ;;  %v623_v44 = vsel %vm620_vm11, %v621_v19, %v622_v23  ;;  %v582_v19 = vsel %vm576_vm10, %v580_v16, %v581_v54  ;;  %v726_v6 = vmul.f32 %v718_v53, %v5764_v32  ;;  %v1033_v5 = vrot.slane %v5748_v2, %v5693_v14 }
 0x29d   : > { %9267 = vst [vmem:[#allocation66_spill] sm:$0xff] %v5787_v56  ;;  %v5793_v59 = vpop.permute.xlu1 %1274  ;;  %v502_v56 = vmul.f32 %v496_v10, %v5371_v49  ;;  %v635_v48 = vadd.f32 %v623_v44, %v591_v60  ;;  %v625_v10 = vrot.slane %v611_v55, 3  ;;  %v592_v25 = vadd.f32 %v582_v19, %v548_v31 }
 0x29e   : > { %v627_v44 = vrot.slane %v612_v4, 3  ;;  %v586_v60 = vsel %vm576_vm10, %v581_v54, %v585_v42  ;;  %v665_v55 = vrot.slane %v5774_v8, 4  ;;  %v696_v49 = vrot.slane %v5742_v7, %v5693_v14 }
 0x29f   : > { %v550_v1 = vadd.f32 %v542_v24, %v502_v56  ;;  %v593_v56 = vadd.f32 %v584_v27, %v549_v52  ;;  %v626_v42 = vsel %vm620_vm11, %v624_v63, %v625_v10  ;;  %v668_v52 = vrot.slane %v653_v58, 4 }
 0x2a0   : > { %v5801_v0 = vpop.permute.xlu0 %1413  ;;  %v669_v54 = vrot.slane %v655_v18, 4  ;;  %v667_v3 = vsel %vm664_vm12, %v665_v55, %v666_v9  ;;  %v636_v35 = vadd.f32 %v626_v42, %v592_v25  ;;  %v628_v7 = vsel %vm620_vm11, %v622_v23, %v627_v44  ;;  %v9281_v42 = vld [vmem:[#allocation14_spill] sm:$0xff] }
 0x2a1   : > { %9268 = vst [vmem:[#allocation67_spill] sm:$0xff] %v5801_v0  ;;  %v5804_v17 = vpop.permute.xlu1 %1357  ;;  %v594_v30 = vadd.f32 %v586_v60, %v550_v1  ;;  %v671_v8 = vrot.slane %v656_v47, 4  ;;  %v679_v16 = vadd.f32 %v667_v3, %v635_v48  ;;  %v637_v57 = vadd.f32 %v628_v7, %v593_v56  ;;  %v9285_v3 = vld [vmem:[#allocation15_spill] sm:$0xff] }
 0x2a2   : > { %v630_v24 = vsel %vm620_vm11, %v625_v10, %v629_v62  ;;  %v673_v31 = vrot.slane %v657_v41, 4  ;;  %v1567_v4 = vrot.slane %v4661_v61, %v5681_v11  ;;  %v670_v23 = vsel %vm664_vm12, %v668_v52, %v669_v54  ;;  %v9276_v41 = vld [vmem:[#allocation9_spill] sm:$0xff]  ;;  %v9282_v52 = vld [vmem:[#allocation11_spill] sm:$0xff] }
 0x2a3   : > { %v638_v63 = vadd.f32 %v630_v24, %v594_v30  ;;  %v719_v48 = vsel %vm717_vm13, %v5466_v22, %v5490_v36  ;;  %v1302_v19 = vrot.slane %v4653_v12, %v5693_v14  ;;  %v1571_v10 = vrot.slane %v4661_v61, %v5693_v14 }
 0x2a4   : > { %v5817_v20 = vpop.permute.xlu0 %1475  ;;  %v1049_v58 = vsel %vm1048_vm14, %v5464_v21, %v5476_v29  ;;  %v680_v18 = vadd.f32 %v670_v23, %v636_v35  ;;  %v672_v2 = vsel %vm664_vm12, %v666_v9, %v671_v8  ;;  %v720_v25 = vsel %vm717_vm13, %v5498_v39, %v5515_v46  ;;  %v793_v8 = vld [vmem:[%s9074_s2] ss:$8 sm:$0x3] }
 0x2a5   : > { %9269 = vst [vmem:[#allocation68_spill] sm:$0xff] %v5817_v20  ;;  %v5825_v13 = vpop.permute.xlu1 %1419  ;;  %v1318_v27 = vsel %vm1317_vm15, %v5474_v28, %v5484_v34  ;;  %v681_v22 = vadd.f32 %v672_v2, %v637_v57  ;;  %v674_v36 = vsel %vm664_vm12, %v669_v54, %v673_v31  ;;  %v721_v12 = vsel %vm717_vm13, %v5515_v46, %v5523_v51  ;;  %v9288_v31 = vld [vmem:[#allocation17_spill] sm:$0xff]  ;;  %v9302_v20 = vld [vmem:[#allocation51_spill] sm:$0xff] }
 0x2a6   : > { %9270 = vst [vmem:[#allocation69_spill] sm:$0xff] %v5825_v13  ;;  %v5867_v21 = vadd.f32 %v726_v6, %v679_v16  ;;  %v727_v9 = vmul.f32 %v719_v48, %v696_v49  ;;  %v1586_v39 = vsel %vm321_vm0, %v5482_v33, %v5492_v37  ;;  %v682_v47 = vadd.f32 %v674_v36, %v638_v63  ;;  %v4640_v63 = vld [vmem:[%s9075_s3 + $0x13] ss:$8 sm:$0x3] }
 0x2a7   : > { %v5875_v28 = vmul.f32 %v1049_v58, %v5768_v26  ;;  %v1050_v60 = vsel %vm1048_vm14, %v5476_v29, %v5496_v38  ;;  %v1319_v46 = vsel %vm1317_vm15, %v5484_v34, %v5502_v40  ;;  %v728_v51 = vmul.f32 %v720_v25, %v5764_v32  ;;  %v9278_v29 = vld [vmem:[#allocation12_spill] sm:$0xff]  ;;  %v9279_v38 = vld [vmem:[#allocation10_spill] sm:$0xff]  ;;  %v9280_v40 = vld [vmem:[#allocation13_spill] sm:$0xff] }
 0x2a8   : > { %v5837_v15 = vpop.permute.xlu0 %1537  ;;  %v5885_v62 = vmul.f32 %v1318_v27, %v5821_v45  ;;  %v1587_v33 = vsel %vm321_vm0, %v5492_v37, %v5508_v43  ;;  %v1051_v55 = vsel %vm1048_vm14, %v9276_v41, %v5521_v50  ;;  %v729_v30 = vmul.f32 %v721_v12, %v696_v49  ;;  %v4642_v2 = vld [vmem:[%s9075_s3 + $0x20] ss:$8 sm:$0x3] }
 0x2a9   : > { %9271 = vst [vmem:[#allocation70_spill] sm:$0xff] %v5837_v15  ;;  %v5843_v1 = vpop.permute.xlu1 %1481  ;;  %v5893_v53 = vmul.f32 %v1586_v39, %v1567_v4  ;;  %v1320_v34 = vsel %vm1317_vm15, %v9279_v38, %v9278_v29  ;;  %v1052_v32 = vsel %vm1048_vm14, %v5521_v50, %v9280_v40  ;;  %v1588_v54 = vsel %vm321_vm0, %v9282_v52, %v9281_v42  ;;  %v4639_v50 = vld [vmem:[%s9075_s3 + $0x6] ss:$8 sm:$0x3]  ;;  %v9301_v15 = vld [vmem:[#allocation19_spill] sm:$0xff] }
 0x2aa   : > { %9272 = vst [vmem:[#allocation71_spill] sm:$0xff] %v5843_v1  ;;  %9275 = vst [vmem:[#allocation74_spill] sm:$0xff] %v5885_v62  ;;  %v5906_v43 = vadd.f32 %v727_v9, %v680_v18  ;;  %v5908_v61 = vmul.f32 %v1050_v60, %v1033_v5  ;;  %v5910_v49 = vmul.f32 %v1319_v46, %v1302_v19  ;;  %v4646_v60 = vld [vmem:[%s9075_s3 + $0x7] ss:$8 sm:$0x3] }
 0x2ab   : > { %9277 = vst [vmem:[#allocation9_spill] sm:$0xff] %v5893_v53  ;;  %v1321_v35 = vsel %vm1317_vm15, %v9278_v29, %v9285_v3  ;;  %v5923_v16 = vmul.f32 %v1587_v33, %v1571_v10  ;;  %v5925_v57 = vadd.f32 %v728_v51, %v681_v22  ;;  %v5928_v24 = vmul.f32 %v1051_v55, %v5768_v26  ;;  %v4641_v26 = vld [vmem:[%s9074_s2 + $0x3] ss:$8 sm:$0x3] }
 0x2ac   : > { %v5865_v44 = vpop.permute.xlu0 %1619  ;;  %9284 = vst [vmem:[#allocation10_spill] sm:$0xff] %v5910_v49  ;;  %v1589_v6 = vsel %vm321_vm0, %v9281_v42, %v9288_v31  ;;  %v5936_v23 = vadd.f32 %v729_v30, %v682_v47  ;;  %v5939_v48 = vmul.f32 %v1320_v34, %v5821_v45  ;;  %v5941_v58 = vmul.f32 %v1052_v32, %v1033_v5  ;;  %v4643_v5 = vld [vmem:[%s9074_s2 + $0x6] ss:$8 sm:$0x3] }
 0x2ad   : > { %9273 = vst [vmem:[#allocation72_spill] sm:$0xff] %v5865_v44  ;;  %v5872_v56 = vpop.permute.xlu1 %1543  ;;  %9287 = vst [vmem:[#allocation14_spill] sm:$0xff] %v5923_v16  ;;  %v5943_v18 = vmul.f32 %v1588_v54, %v1567_v4  ;;  %v5951_v25 = vmul.f32 %v1321_v35, %v1302_v19  ;;  %v5956_v22 = vrot.slane %v4639_v50, %v5681_v11  ;;  %v4644_v19 = vld [vmem:[%s9075_s3 + $0x25] ss:$8 sm:$0x3] }
 0x2ae   : > { %9274 = vst [vmem:[#allocation73_spill] sm:$0xff] %v5872_v56  ;;  %v5959_v45 = vrot.slane %v4639_v50, %v5693_v14  ;;  %v5962_v4 = vrot.slane %v793_v8, %v5681_v11  ;;  %v5970_v36 = vmul.f32 %v1589_v6, %v1571_v10  ;;  %v5975_v9 = vrot.slane %v793_v8, %v5693_v14  ;;  %v4647_v10 = vld [vmem:[%s9074_s2 + $0x1] ss:$8 sm:$0x3] }
 0x2af   : > { %9289 = vst [vmem:[#allocation11_spill] sm:$0xff] %v5943_v18  ;;  %9290 = vst [vmem:[#allocation15_spill] sm:$0xff] %v5951_v25  ;;  %v5978_v39 = vrot.slane %v4640_v63, %v5681_v11  ;;  %v5981_v47 = vrot.slane %v4640_v63, %v5693_v14  ;;  %v5990_v46 = vrot.slane %v4641_v26, %v5681_v11  ;;  %v4648_v55 = vld [vmem:[%s9075_s3 + $0x14] ss:$8 sm:$0x3] }
 0x2b0   : > { %v5904_v37 = vpop.permute.xlu0 %1660  ;;  %9292 = vst [vmem:[#allocation75_spill] sm:$0xff] %v5970_v36  ;;  %v5993_v51 = vrot.slane %v4641_v26, %v5693_v14  ;;  %v5996_v33 = vrot.slane %v4642_v2, %v5681_v11  ;;  %v5999_v41 = vrot.slane %v4642_v2, %v5693_v14  ;;  %v4649_v30 = vld [vmem:[%s9074_s2 + $0x4] ss:$8 sm:$0x3]  ;;  %v6008_v29 = vrot.slane %v4643_v5, %v5681_v11  ;;  %v9323_v25 = vld [vmem:[#allocation23_spill] sm:$0xff] }
 0x2b1   : > { %9283 = vst [vmem:[#allocation12_spill] sm:$0xff] %v5904_v37  ;;  %v5915_v7 = vpop.permute.xlu1 %1625  ;;  %v6011_v38 = vrot.slane %v4643_v5, %v5693_v14  ;;  %v6014_v34 = vrot.slane %v4644_v19, %v5681_v11  ;;  %v6017_v40 = vrot.slane %v4644_v19, %v5693_v14  ;;  %v4650_v32 = vld [vmem:[%s9075_s3 + $0x21] ss:$8 sm:$0x3]  ;;  %v6028_v54 = vrot.slane %v4646_v60, %v5681_v11 }
 0x2b2   : > { %9286 = vst [vmem:[#allocation13_spill] sm:$0xff] %v5915_v7  ;;  %v4651_v42 = vld [vmem:[%s9074_s2 + $0x7] ss:$8 sm:$0x3]  ;;  %v6031_v3 = vrot.slane %v4646_v60, %v5693_v14  ;;  %v6034_v35 = vrot.slane %v4647_v10, %v5681_v11  ;;  %v6037_v50 = vrot.slane %v4647_v10, %v5693_v14  ;;  %v6048_v63 = vrot.slane %v4648_v55, %v5681_v11 }
 0x2b3   : > { %v4652_v8 = vld [vmem:[%s9075_s3 + $0x26] ss:$8 sm:$0x3]  ;;  %v4654_v31 = vld [vmem:[%s9075_s3 + $0x10] ss:$8 sm:$0x3]  ;;  %v6051_v26 = vrot.slane %v4648_v55, %v5693_v14  ;;  %v6054_v2 = vrot.slane %v4649_v30, %v5681_v11  ;;  %v6057_v5 = vrot.slane %v4649_v30, %v5693_v14  ;;  %v6066_v10 = vrot.slane %v4650_v32, %v5681_v11 }
 0x2b4   : > { %v5953_v27 = vpop.permute.xlu0 %1701  ;;  %v4655_v19 = vld [vmem:[%s9074_s2 + $0x2] ss:$8 sm:$0x3]  ;;  %v4656_v60 = vld [vmem:[%s9075_s3 + $0x15] ss:$8 sm:$0x3]  ;;  %v6069_v55 = vrot.slane %v4650_v32, %v5693_v14  ;;  %v6075_v30 = vrot.slane %v4651_v42, %v5693_v14  ;;  %v6084_v37 = vrot.slane %v4652_v8, %v5693_v14  ;;  %v6087_v16 = vrot.slane %v4654_v31, %v5681_v11 }
 0x2b5   : > { %9291 = vst [vmem:[#allocation17_spill] sm:$0xff] %v5953_v27  ;;  %v5972_v12 = vpop.permute.xlu1 %1666  ;;  %v4657_v27 = vld [vmem:[%s9074_s2 + $0x5] ss:$8 sm:$0x3]  ;;  %v6090_v32 = vrot.slane %v4654_v31, %v5693_v14  ;;  %v6096_v44 = vrot.slane %v4655_v19, %v5681_v11  ;;  %v6099_v36 = vrot.slane %v4655_v19, %v5693_v14 }
 0x2b6   : > { %9293 = vst [vmem:[#allocation76_spill] sm:$0xff] %v5972_v12  ;;  %v6105_v12 = vrot.slane %v4656_v60, %v5693_v14  ;;  %v4659_v31 = vld [vmem:[%s9074_s2 + $0x10] ss:$8 sm:$0x3]  ;;  %v6120_v0 = vrot.slane %v4657_v27, %v5681_v11 }
 0x2b7   : > { %9296 = vst [vmem:[#allocation79_spill] sm:$0xff] %v6090_v32  ;;  %9297 = vst [vmem:[#allocation80_spill] sm:$0xff] %v6096_v44  ;;  %v4660_v18 = vld [vmem:[%s9075_s3 + $0x27] ss:$8 sm:$0x3]  ;;  %v6143_v62 = vrot.slane %v4659_v31, %v5681_v11 }
 0x2b8   : > { %v6025_v52 = vpop.permute.xlu0 %1742  ;;  %9298 = vst [vmem:[#allocation81_spill] sm:$0xff] %v6099_v36  ;;  %9300 = vst [vmem:[#allocation83_spill] sm:$0xff] %v6105_v12  ;;  %v4662_v1 = vld [vmem:[%s9075_s3 + $0x11] ss:$8 sm:$0x3]  ;;  %v6152_v12 = vrot.slane %v4660_v18, %v5693_v14 }
 0x2b9   : > { %9294 = vst [vmem:[#allocation77_spill] sm:$0xff] %v6025_v52  ;;  %v6045_v6 = vpop.permute.xlu1 %1707  ;;  %v6072_v52 = vrot.slane %v4651_v42, %v5681_v11  ;;  %v4658_v42 = vld [vmem:[%s9075_s3 + $0x22] ss:$8 sm:$0x3]  ;;  %9304 = vst [vmem:[#allocation51_spill] sm:$0xff] %v6120_v0  ;;  %v6149_v0 = vrot.slane %v4660_v18, %v5681_v11 }
 0x2ba   : > { %9295 = vst [vmem:[#allocation78_spill] sm:$0xff] %v6045_v6  ;;  %v6081_v6 = vrot.slane %v4652_v8, %v5681_v11  ;;  %v6102_v8 = vrot.slane %v4656_v60, %v5681_v11  ;;  %v6123_v60 = vrot.slane %v4657_v27, %v5693_v14  ;;  %v4663_v49 = vld [vmem:[%s9075_s3 + $0x16] ss:$8 sm:$0x3]  ;;  %9308 = vst [vmem:[#allocation87_spill] sm:$0xff] %v6143_v62 }
 0x2bb   : > { %v4664_v27 = vld [vmem:[%s9075_s3 + $0x23] ss:$8 sm:$0x3]  ;;  %9310 = vst [vmem:[#allocation89_spill] sm:$0xff] %v6149_v0  ;;  %9311 = vst [vmem:[#allocation90_spill] sm:$0xff] %v6152_v12  ;;  %v6164_v62 = vrot.slane %v4663_v49, %v5693_v14 }
 0x2bc   : > { %v774_v53 = vpop.permute.xlu0 %773  ;;  %9299 = vst [vmem:[#allocation82_spill] sm:$0xff] %v6102_v8  ;;  %9305 = vst [vmem:[#allocation84_spill] sm:$0xff] %v6123_v60  ;;  %v6146_v60 = vrot.slane %v4659_v31, %v5693_v14  ;;  %v6161_v8 = vrot.slane %v4663_v49, %v5681_v11  ;;  %v9316_v31 = vld [vmem:[#allocation21_spill] sm:$0xff]  ;;  %v6171_v13 = vrot.slane %v4664_v27, %v5681_v11 }
 0x2bd   : > { %v779_v7 = vsel %vm717_vm13, %v9301_v15, %v774_v53  ;;  %v780_v19 = vsel %vm717_vm13, %v774_v53, %v9302_v20  ;;  %v6117_v56 = vpop.permute.xlu1 %1748  ;;  %v6134_v53 = vrot.slane %v4658_v42, %v5681_v11  ;;  %9315 = vst [vmem:[#allocation94_spill] sm:$0xff] %v6164_v62  ;;  %v9317_v0 = vld [vmem:[#allocation53_spill] sm:$0xff] }
 0x2be   : > { %9303 = vst [vmem:[#allocation19_spill] sm:$0xff] %v6117_v56  ;;  %v787_v15 = vmul.f32 %v779_v7, %v5956_v22  ;;  %v788_v20 = vmul.f32 %v780_v19, %v5959_v45  ;;  %v6137_v56 = vrot.slane %v4658_v42, %v5693_v14  ;;  %9309 = vst [vmem:[#allocation88_spill] sm:$0xff] %v6146_v60 }
 0x2bf   : > { %9306 = vst [vmem:[#allocation85_spill] sm:$0xff] %v6134_v53  ;;  %v6155_v42 = vrot.slane %v4662_v1, %v5681_v11  ;;  %9314 = vst [vmem:[#allocation93_spill] sm:$0xff] %v6161_v8  ;;  %v807_v36 = vmul.f32 %v5962_v4, %v779_v7  ;;  %v9324_v7 = vld [vmem:[#allocation56_spill] sm:$0xff] }
 0x2c0   : > { %9307 = vst [vmem:[#allocation86_spill] sm:$0xff] %v6137_v56  ;;  %v850_v53 = vpop.permute.xlu0 %849  ;;  %v6158_v56 = vrot.slane %v4662_v1, %v5693_v14  ;;  %9318 = vst [vmem:[#allocation21_spill] sm:$0xff] %v6171_v13  ;;  %v4665_v1 = vld [vmem:[%s9075_s3 + $0x30] ss:$8 sm:$0x3]  ;;  %v791_v49 = vadd.f32 %v787_v15, %v5925_v57  ;;  %v792_v62 = vadd.f32 %v788_v20, %v5936_v23  ;;  %v9320_v13 = vld [vmem:[#allocation16_spill] sm:$0xff] }
 0x2c1   : > { %9312 = vst [vmem:[#allocation91_spill] sm:$0xff] %v6155_v42  ;;  %v855_v60 = vsel %vm717_vm13, %v9316_v31, %v850_v53  ;;  %v856_v18 = vsel %vm717_vm13, %v850_v53, %v9317_v0  ;;  %v768_v12 = vpop.permute.xlu1 %767  ;;  %v6174_v42 = vrot.slane %v4664_v27, %v5693_v14  ;;  %v808_v57 = vmul.f32 %v5975_v9, %v780_v19 }
 0x2c2   : > { %9313 = vst [vmem:[#allocation92_spill] sm:$0xff] %v6158_v56  ;;  %v863_v31 = vmul.f32 %v855_v60, %v5978_v39  ;;  %v864_v8 = vmul.f32 %v856_v18, %v5981_v47  ;;  %v884_v0 = vmul.f32 %v5990_v46, %v855_v60  ;;  %v885_v53 = vmul.f32 %v5993_v51, %v856_v18 }
 0x2c3   : > { %9319 = vst [vmem:[#allocation53_spill] sm:$0xff] %v6174_v42  ;;  %v777_v27 = vsel %vm717_vm13, %v9320_v13, %v768_v12  ;;  %v9321_v42 = vld [vmem:[#allocation48_spill] sm:$0xff]  ;;  %v6192_v23 = vrot.slane %v4665_v1, %v5681_v11  ;;  %v6195_v20 = vrot.slane %v4665_v1, %v5693_v14 }
 0x2c4   : > { %v778_v56 = vsel %vm717_vm13, %v768_v12, %v9321_v42  ;;  %v927_v15 = vpop.permute.xlu0 %926  ;;  %v867_v60 = vadd.f32 %v863_v31, %v791_v49  ;;  %v868_v44 = vadd.f32 %v864_v8, %v792_v62  ;;  %v785_v18 = vmul.f32 %v777_v27, %v5956_v22  ;;  %v9325_v42 = vld [vmem:[#allocation18_spill] sm:$0xff] }
 0x2c5   : > { %9322 = vst [vmem:[#allocation16_spill] sm:$0xff] %v6192_v23  ;;  %v786_v13 = vmul.f32 %v778_v56, %v5959_v45  ;;  %v844_v32 = vpop.permute.xlu1 %843  ;;  %v932_v12 = vsel %vm717_vm13, %v9323_v25, %v927_v15  ;;  %v933_v19 = vsel %vm717_vm13, %v927_v15, %v9324_v7  ;;  %v9326_v23 = vld [vmem:[#allocation50_spill] sm:$0xff]  ;;  %v888_v14 = vadd.f32 %v884_v0, %v807_v36 }
 0x2c6   : > { %v853_v11 = vsel %vm717_vm13, %v9325_v42, %v844_v32  ;;  %v854_v1 = vsel %vm717_vm13, %v844_v32, %v9326_v23  ;;  %v889_v49 = vadd.f32 %v885_v53, %v808_v57  ;;  %v940_v62 = vmul.f32 %v932_v12, %v5996_v33  ;;  %v9327_v23 = vld [vmem:[#allocation25_spill] sm:$0xff] }
 0x2c7   : > { %v941_v22 = vmul.f32 %v933_v19, %v5999_v41  ;;  %v805_v45 = vmul.f32 %v5962_v4, %v777_v27  ;;  %v806_v8 = vmul.f32 %v5975_v9, %v778_v56  ;;  %v961_v25 = vmul.f32 %v6008_v29, %v932_v12 }
 0x2c8   : > { %v962_v31 = vmul.f32 %v6011_v38, %v933_v19  ;;  %v1004_v15 = vpop.permute.xlu0 %1003  ;;  %v789_v7 = vadd.f32 %v785_v18, %v5867_v21  ;;  %v790_v42 = vadd.f32 %v786_v13, %v5906_v43  ;;  %v861_v36 = vmul.f32 %v853_v11, %v5978_v39  ;;  %v9328_v19 = vld [vmem:[#allocation59_spill] sm:$0xff] }
 0x2c9   : > { %v862_v32 = vmul.f32 %v854_v1, %v5981_v47  ;;  %v921_v0 = vpop.permute.xlu1 %920  ;;  %v944_v53 = vadd.f32 %v940_v62, %v867_v60  ;;  %v945_v57 = vadd.f32 %v941_v22, %v868_v44  ;;  %v882_v4 = vmul.f32 %v5990_v46, %v853_v11  ;;  %v9329_v47 = vld [vmem:[#allocation20_spill] sm:$0xff]  ;;  %v9331_v22 = vld [vmem:[#allocation27_spill] sm:$0xff] }
 0x2ca   : > { %v883_v56 = vmul.f32 %v5993_v51, %v854_v1  ;;  %v965_v9 = vadd.f32 %v961_v25, %v888_v14  ;;  %v966_v27 = vadd.f32 %v962_v31, %v889_v49  ;;  %v1009_v12 = vsel %vm717_vm13, %v9327_v23, %v1004_v15  ;;  %v9330_v44 = vld [vmem:[#allocation52_spill] sm:$0xff]  ;;  %v9332_v31 = vld [vmem:[#allocation61_spill] sm:$0xff] }
 0x2cb   : > { %v1010_v21 = vsel %vm717_vm13, %v1004_v15, %v9328_v19  ;;  %v1017_v43 = vmul.f32 %v1009_v12, %v6014_v34  ;;  %v930_v60 = vsel %vm717_vm13, %v9329_v47, %v921_v0  ;;  %v931_v11 = vsel %vm717_vm13, %v921_v0, %v9330_v44  ;;  %v9334_v47 = vld [vmem:[#allocation55_spill] sm:$0xff] }
 0x2cc   : > { %v1018_v39 = vmul.f32 %v1010_v21, %v6017_v40  ;;  %v1087_v46 = vpop.permute.xlu0 %1086  ;;  %v938_v14 = vmul.f32 %v930_v60, %v5996_v33  ;;  %v939_v51 = vmul.f32 %v931_v11, %v5999_v41  ;;  %v959_v18 = vmul.f32 %v6008_v29, %v930_v60  ;;  %v9336_v60 = vld [vmem:[#allocation63_spill] sm:$0xff] }
 0x2cd   : > { %v960_v13 = vmul.f32 %v6011_v38, %v931_v11  ;;  %v998_v1 = vpop.permute.xlu1 %997  ;;  %v1021_v49 = vadd.f32 %v1017_v43, %v944_v53  ;;  %v1092_v25 = vsel %vm1048_vm14, %v9331_v22, %v1087_v46  ;;  %v1093_v15 = vsel %vm1048_vm14, %v1087_v46, %v9332_v31  ;;  %v9333_v43 = vld [vmem:[#allocation22_spill] sm:$0xff] }
 0x2ce   : > { %v1022_v62 = vadd.f32 %v1018_v39, %v945_v57  ;;  %v865_v23 = vadd.f32 %v861_v36, %v789_v7  ;;  %v866_v0 = vadd.f32 %v862_v32, %v790_v42  ;;  %v886_v12 = vadd.f32 %v882_v4, %v805_v45  ;;  %v9335_v4 = vld [vmem:[#allocation29_spill] sm:$0xff] }
 0x2cf   : > { %v887_v19 = vadd.f32 %v883_v56, %v806_v8  ;;  %v1063_v33 = vadd.f32 %v5928_v24, %v1021_v49  ;;  %v1100_v29 = vmul.f32 %v1092_v25, %v6028_v54  ;;  %v1101_v38 = vmul.f32 %v1093_v15, %v6031_v3  ;;  %v9338_v49 = vld [vmem:[#allocation58_spill] sm:$0xff] }
 0x2d0   : > { %v1064_v41 = vadd.f32 %v5941_v58, %v1022_v62  ;;  %v1149_v53 = vpop.permute.xlu0 %1148  ;;  %v942_v57 = vadd.f32 %v938_v14, %v865_v23  ;;  %v943_v21 = vadd.f32 %v939_v51, %v866_v0  ;;  %v1007_v39 = vsel %vm717_vm13, %v9333_v43, %v998_v1 }
 0x2d1   : > { %v1008_v7 = vsel %vm717_vm13, %v998_v1, %v9334_v47  ;;  %v1081_v42 = vpop.permute.xlu1 %1080  ;;  %v963_v45 = vadd.f32 %v959_v18, %v886_v12  ;;  %v964_v8 = vadd.f32 %v960_v13, %v887_v19  ;;  %v1015_v24 = vmul.f32 %v1007_v39, %v6014_v34 }
 0x2d2   : > { %v1016_v58 = vmul.f32 %v1008_v7, %v6017_v40  ;;  %v1121_v36 = vmul.f32 %v6034_v35, %v1092_v25  ;;  %v1122_v32 = vmul.f32 %v6037_v50, %v1093_v15  ;;  %v1154_v56 = vsel %vm1048_vm14, %v9335_v4, %v1149_v53  ;;  %v9337_v40 = vld [vmem:[#allocation24_spill] sm:$0xff] }
 0x2d3   : > { %v1155_v44 = vsel %vm1048_vm14, %v1149_v53, %v9336_v60  ;;  %v1104_v11 = vadd.f32 %v1100_v29, %v1063_v33  ;;  %v1105_v46 = vadd.f32 %v1101_v38, %v1064_v41  ;;  %v1019_v14 = vadd.f32 %v1015_v24, %v942_v57  ;;  %v9339_v38 = vld [vmem:[#allocation31_spill] sm:$0xff]  ;;  %v9340_v57 = vld [vmem:[#allocation65_spill] sm:$0xff] }
 0x2d4   : > { %v1020_v51 = vadd.f32 %v1016_v58, %v943_v21  ;;  %v1211_v18 = vpop.permute.xlu0 %1210  ;;  %v1162_v13 = vmul.f32 %v1154_v56, %v6048_v63  ;;  %v1163_v34 = vmul.f32 %v1155_v44, %v6051_v26  ;;  %v1090_v1 = vsel %vm1048_vm14, %v9337_v40, %v1081_v42  ;;  %v9342_v58 = vld [vmem:[#allocation60_spill] sm:$0xff] }
 0x2d5   : > { %v1091_v62 = vsel %vm1048_vm14, %v1081_v42, %v9338_v49  ;;  %v1143_v22 = vpop.permute.xlu1 %1142  ;;  %v1183_v25 = vmul.f32 %v6054_v2, %v1154_v56  ;;  %v1184_v31 = vmul.f32 %v6057_v5, %v1155_v44  ;;  %v1061_v15 = vadd.f32 %v5875_v28, %v1019_v14  ;;  %v9341_v42 = vld [vmem:[#allocation26_spill] sm:$0xff]  ;;  %v9343_v14 = vld [vmem:[#allocation33_spill] sm:$0xff] }
 0x2d6   : > { %v1062_v23 = vadd.f32 %v5908_v61, %v1020_v51  ;;  %v1125_v0 = vadd.f32 %v1121_v36, %v965_v9  ;;  %v1126_v12 = vadd.f32 %v1122_v32, %v966_v27  ;;  %v1098_v19 = vmul.f32 %v1090_v1, %v6028_v54 }
 0x2d7   : > { %v1099_v33 = vmul.f32 %v1091_v62, %v6031_v3  ;;  %v1119_v41 = vmul.f32 %v6034_v35, %v1090_v1  ;;  %v1120_v29 = vmul.f32 %v6037_v50, %v1091_v62  ;;  %v1216_v53 = vsel %vm1048_vm14, %v9339_v38, %v1211_v18  ;;  %v9345_v62 = vld [vmem:[#allocation62_spill] sm:$0xff] }
 0x2d8   : > { %v1217_v21 = vsel %vm1048_vm14, %v1211_v18, %v9340_v57  ;;  %v1273_v43 = vpop.permute.xlu0 %1272  ;;  %v1166_v28 = vadd.f32 %v1162_v13, %v1104_v11  ;;  %v1167_v39 = vadd.f32 %v1163_v34, %v1105_v46  ;;  %v1224_v61 = vmul.f32 %v1216_v53, %v6066_v10 }
 0x2d9   : > { %v1225_v9 = vmul.f32 %v1217_v21, %v6069_v55  ;;  %v1205_v54 = vpop.permute.xlu1 %1204  ;;  %v1187_v27 = vadd.f32 %v1183_v25, %v1125_v0  ;;  %v1188_v3 = vadd.f32 %v1184_v31, %v1126_v12  ;;  %v1102_v47 = vadd.f32 %v1098_v19, %v1061_v15  ;;  %v9346_v0 = vld [vmem:[#allocation35_spill] sm:$0xff] }
 0x2da   : > { %v1103_v35 = vadd.f32 %v1099_v33, %v1062_v23  ;;  %v1245_v50 = vmul.f32 %v6072_v52, %v1216_v53  ;;  %v1246_v7 = vmul.f32 %v6075_v30, %v1217_v21  ;;  %v1152_v24 = vsel %vm1048_vm14, %v9341_v42, %v1143_v22 }
 0x2db   : > { %v1153_v36 = vsel %vm1048_vm14, %v1143_v22, %v9342_v58  ;;  %v1123_v32 = vadd.f32 %v1119_v41, %v963_v45  ;;  %v1124_v4 = vadd.f32 %v1120_v29, %v964_v8  ;;  %v1228_v56 = vadd.f32 %v1224_v61, %v1166_v28  ;;  %v9353_v58 = vld [vmem:[#allocation37_spill] sm:$0xff] }
 0x2dc   : > { %v1229_v60 = vadd.f32 %v1225_v9, %v1167_v39  ;;  %v1356_v44 = vpop.permute.xlu0 %1355  ;;  %v1160_v11 = vmul.f32 %v1152_v24, %v6048_v63  ;;  %v1161_v46 = vmul.f32 %v1153_v36, %v6051_v26  ;;  %v1278_v51 = vsel %vm1048_vm14, %v9343_v14, %v1273_v43  ;;  %v9344_v63 = vld [vmem:[#allocation28_spill] sm:$0xff]  ;;  %v9348_v39 = vld [vmem:[#allocation79_spill] sm:$0xff]  ;;  %v9349_v9 = vld [vmem:[#allocation30_spill] sm:$0xff] }
 0x2dd   : > { %v1279_v18 = vsel %vm1048_vm14, %v1273_v43, %v5793_v59  ;;  %v1267_v13 = vpop.permute.xlu1 %1266  ;;  %v1181_v34 = vmul.f32 %v6054_v2, %v1152_v24  ;;  %v1182_v40 = vmul.f32 %v6057_v5, %v1153_v36  ;;  %v1286_v45 = vmul.f32 %v1278_v51, %v6081_v6  ;;  %v9347_v43 = vld [vmem:[#allocation15_spill] sm:$0xff] }
 0x2de   : > { %v1287_v8 = vmul.f32 %v1279_v18, %v6084_v37  ;;  %v1249_v1 = vadd.f32 %v1245_v50, %v1187_v27  ;;  %v1250_v49 = vadd.f32 %v1246_v7, %v1188_v3  ;;  %v1214_v26 = vsel %vm1048_vm14, %v9344_v63, %v1205_v54  ;;  %v9356_v14 = vld [vmem:[#allocation83_spill] sm:$0xff] }
 0x2df   : > { %v1215_v22 = vsel %vm1048_vm14, %v1205_v54, %v9345_v62  ;;  %v1290_v25 = vadd.f32 %v1286_v45, %v1228_v56  ;;  %v1222_v59 = vmul.f32 %v1214_v26, %v6066_v10  ;;  %v1164_v5 = vadd.f32 %v1160_v11, %v1102_v47  ;;  %v9350_v54 = vld [vmem:[#allocation64_spill] sm:$0xff]  ;;  %v9355_v11 = vld [vmem:[#allocation82_spill] sm:$0xff]  ;;  %v9357_v18 = vld [vmem:[#allocation51_spill] sm:$0xff] }
 0x2e0   : > { %v1291_v31 = vadd.f32 %v1287_v8, %v1229_v60  ;;  %v1223_v2 = vmul.f32 %v1215_v22, %v6069_v55  ;;  %v1418_v15 = vpop.permute.xlu0 %1417  ;;  %v1165_v23 = vadd.f32 %v1161_v46, %v1103_v35  ;;  %v1361_v12 = vsel %vm1317_vm15, %v9346_v0, %v1356_v44  ;;  %v9360_v62 = vld [vmem:[#allocation84_spill] sm:$0xff] }
 0x2e1   : > { %v1362_v19 = vsel %vm1317_vm15, %v1356_v44, %v5804_v17  ;;  %v1350_v33 = vpop.permute.xlu1 %1349  ;;  %v1185_v41 = vadd.f32 %v1181_v34, %v1123_v32  ;;  %v1186_v29 = vadd.f32 %v1182_v40, %v1124_v4  ;;  %v1243_v38 = vmul.f32 %v6072_v52, %v1214_v26  ;;  %v9351_v52 = vld [vmem:[#allocation80_spill] sm:$0xff]  ;;  %v9354_v32 = vld [vmem:[#allocation69_spill] sm:$0xff]  ;;  %v9359_v34 = vld [vmem:[#allocation66_spill] sm:$0xff] }
 0x2e2   : > { %v1244_v53 = vmul.f32 %v6075_v30, %v1215_v22  ;;  %v1226_v57 = vadd.f32 %v1222_v59, %v1164_v5  ;;  %v1227_v10 = vadd.f32 %v1223_v2, %v1165_v23  ;;  %v1332_v55 = vadd.f32 %v5939_v48, %v1290_v25  ;;  %v9352_v30 = vld [vmem:[#allocation81_spill] sm:$0xff]  ;;  %v9362_v2 = vld [vmem:[#allocation10_spill] sm:$0xff] }
 0x2e3   : > { %v1369_v21 = vmul.f32 %v1361_v12, %v6087_v16  ;;  %v1333_v28 = vadd.f32 %v9347_v43, %v1291_v31  ;;  %v1370_v61 = vmul.f32 %v1362_v19, %v9348_v39  ;;  %v1276_v17 = vsel %vm1048_vm14, %v9349_v9, %v1267_v13  ;;  %v9361_v31 = vld [vmem:[#allocation74_spill] sm:$0xff]  ;;  %v9367_v43 = vld [vmem:[#allocation87_spill] sm:$0xff] }
 0x2e4   : > { %v1277_v27 = vsel %vm1048_vm14, %v1267_v13, %v9350_v54  ;;  %v1480_v3 = vpop.permute.xlu0 %1479  ;;  %v1390_v47 = vmul.f32 %v9351_v52, %v1361_v12  ;;  %v1391_v35 = vmul.f32 %v9352_v30, %v1362_v19  ;;  %v1284_v50 = vmul.f32 %v1276_v17, %v6081_v6  ;;  %v9358_v13 = vld [vmem:[#allocation32_spill] sm:$0xff]  ;;  %v9363_v19 = vld [vmem:[#allocation39_spill] sm:$0xff] }
 0x2e5   : > { %v1285_v48 = vmul.f32 %v1277_v27, %v6084_v37  ;;  %v1412_v7 = vpop.permute.xlu1 %1411  ;;  %v1247_v42 = vadd.f32 %v1243_v38, %v1185_v41  ;;  %v1248_v24 = vadd.f32 %v1244_v53, %v1186_v29  ;;  %v1423_v36 = vsel %vm1317_vm15, %v9353_v58, %v1418_v15  ;;  %v9365_v53 = vld [vmem:[#allocation85_spill] sm:$0xff]  ;;  %v9369_v27 = vld [vmem:[#allocation34_spill] sm:$0xff] }
 0x2e6   : > { %v1424_v4 = vsel %vm1317_vm15, %v1418_v15, %v9354_v32  ;;  %v1373_v56 = vadd.f32 %v1369_v21, %v1332_v55  ;;  %v1288_v60 = vadd.f32 %v1284_v50, %v1226_v57  ;;  %v1431_v46 = vmul.f32 %v1423_v36, %v9355_v11  ;;  %v9371_v32 = vld [vmem:[#allocation41_spill] sm:$0xff] }
 0x2e7   : > { %v1289_v44 = vadd.f32 %v1285_v48, %v1227_v10  ;;  %v1432_v51 = vmul.f32 %v1424_v4, %v9356_v14  ;;  %v1452_v6 = vmul.f32 %v9357_v18, %v1423_v36  ;;  %v1359_v37 = vsel %vm1317_vm15, %v9358_v13, %v1350_v33  ;;  %v9373_v13 = vld [vmem:[#allocation89_spill] sm:$0xff] }
 0x2e8   : > { %v1360_v40 = vsel %vm1317_vm15, %v1350_v33, %v9359_v34  ;;  %v1542_v45 = vpop.permute.xlu0 %1541  ;;  %v1374_v8 = vadd.f32 %v1370_v61, %v1333_v28  ;;  %v1394_v63 = vadd.f32 %v1390_v47, %v1249_v1  ;;  %v1395_v26 = vadd.f32 %v1391_v35, %v1250_v49  ;;  %v9364_v1 = vld [vmem:[#allocation71_spill] sm:$0xff] }
 0x2e9   : > { %v1453_v22 = vmul.f32 %v9360_v62, %v1424_v4  ;;  %v1474_v25 = vpop.permute.xlu1 %1473  ;;  %v1330_v59 = vadd.f32 %v9361_v31, %v1288_v60  ;;  %v1331_v15 = vadd.f32 %v9362_v2, %v1289_v44  ;;  %v1367_v5 = vmul.f32 %v1359_v37, %v6087_v16  ;;  %v9366_v16 = vld [vmem:[#allocation86_spill] sm:$0xff] }
 0x2ea   : > { %v1368_v23 = vmul.f32 %v1360_v40, %v9348_v39  ;;  %v1388_v0 = vmul.f32 %v9351_v52, %v1359_v37  ;;  %v1389_v12 = vmul.f32 %v9352_v30, %v1360_v40  ;;  %v1485_v33 = vsel %vm1317_vm15, %v9363_v19, %v1480_v3  ;;  %v9368_v39 = vld [vmem:[#allocation88_spill] sm:$0xff]  ;;  %v9374_v37 = vld [vmem:[#allocation90_spill] sm:$0xff] }
 0x2eb   : > { %v1486_v49 = vsel %vm1317_vm15, %v1480_v3, %v9364_v1  ;;  %v1435_v41 = vadd.f32 %v1431_v46, %v1373_v56  ;;  %v1436_v29 = vadd.f32 %v1432_v51, %v1374_v8  ;;  %v1456_v38 = vadd.f32 %v1452_v6, %v1394_v63  ;;  %v9370_v3 = vld [vmem:[#allocation67_spill] sm:$0xff]  ;;  %v9372_v56 = vld [vmem:[#allocation73_spill] sm:$0xff]  ;;  %v9375_v40 = vld [vmem:[#allocation36_spill] sm:$0xff] }
 0x2ec   : > { %v1493_v57 = vmul.f32 %v1485_v33, %v9365_v53  ;;  %v1624_v10 = vpop.permute.xlu0 %1623  ;;  %v1457_v55 = vadd.f32 %v1453_v22, %v1395_v26  ;;  %v1494_v21 = vmul.f32 %v1486_v49, %v9366_v16  ;;  %v1514_v28 = vmul.f32 %v9367_v43, %v1485_v33  ;;  %v9377_v26 = vld [vmem:[#allocation43_spill] sm:$0xff]  ;;  %v9378_v22 = vld [vmem:[#allocation13_spill] sm:$0xff] }
 0x2ed   : > { %v1515_v61 = vmul.f32 %v9368_v39, %v1486_v49  ;;  %v1536_v9 = vpop.permute.xlu1 %1535  ;;  %v1371_v17 = vadd.f32 %v1367_v5, %v1330_v59  ;;  %v1372_v54 = vadd.f32 %v1368_v23, %v1331_v15  ;;  %v1421_v52 = vsel %vm1317_vm15, %v9369_v27, %v1412_v7  ;;  %v9379_v1 = vld [vmem:[#allocation91_spill] sm:$0xff] }
 0x2ee   : > { %v1422_v47 = vsel %vm1317_vm15, %v1412_v7, %v9370_v3  ;;  %v1392_v30 = vadd.f32 %v1388_v0, %v1247_v42  ;;  %v1393_v35 = vadd.f32 %v1389_v12, %v1248_v24  ;;  %v1429_v48 = vmul.f32 %v1421_v52, %v9355_v11 }
 0x2ef   : > { %v6343_v50 = vadd.f32 %v1515_v61, %v1457_v55  ;;  %v1497_v58 = vadd.f32 %v1493_v57, %v1435_v41  ;;  %v1430_v36 = vmul.f32 %v1422_v47, %v9356_v14  ;;  %v1547_v4 = vsel %vm1317_vm15, %v9371_v32, %v1542_v45  ;;  %v9380_v41 = vld [vmem:[#allocation92_spill] sm:$0xff]  ;;  %v9382_v55 = vld [vmem:[#allocation70_spill] sm:$0xff] }
 0x2f0   : > { %v1548_v60 = vsel %vm1317_vm15, %v1542_v45, %v9372_v56  ;;  %v1498_v44 = vadd.f32 %v1494_v21, %v1436_v29  ;;  %v6351_v46 = vadd.f32 %v1514_v28, %v1456_v38  ;;  %v1450_v7 = vmul.f32 %v9357_v18, %v1421_v52  ;;  %v1665_v24 = vpop.permute.xlu0 %1664  ;;  %v9376_v45 = vld [vmem:[#allocation68_spill] sm:$0xff]  ;;  %v9384_v52 = vld [vmem:[#allocation45_spill] sm:$0xff] }
 0x2f1   : > { %v1451_v42 = vmul.f32 %v9360_v62, %v1422_v47  ;;  %v1618_v51 = vpop.permute.xlu1 %1617  ;;  %v1769_v11 = vmax.f32 %v6343_v50, 0.0  ;;  %v1433_v6 = vadd.f32 %v1429_v48, %v1371_v17  ;;  %v1555_v14 = vmul.f32 %v1547_v4, %v9373_v13  ;;  %v9385_v47 = vld [vmem:[#allocation76_spill] sm:$0xff] }
 0x2f2   : > { %v1556_v34 = vmul.f32 %v1548_v60, %v9374_v37  ;;  %v1483_v8 = vsel %vm1317_vm15, %v9375_v40, %v1474_v25  ;;  %v1484_v63 = vsel %vm1317_vm15, %v1474_v25, %v9376_v45  ;;  %v1629_v18 = vsel %vm321_vm0, %v9377_v26, %v1624_v10  ;;  %v9388_v32 = vld [vmem:[#allocation40_spill] sm:$0xff]  ;;  %v9392_v40 = vld [vmem:[#allocation14_spill] sm:$0xff] }
 0x2f3   : > { %v1630_v62 = vsel %vm321_vm0, %v1624_v10, %v9378_v22  ;;  %v1434_v31 = vadd.f32 %v1430_v36, %v1372_v54  ;;  %v1559_v59 = vadd.f32 %v1555_v14, %v1497_v58  ;;  %v1491_v2 = vmul.f32 %v1483_v8, %v9365_v53  ;;  %v9381_v10 = vld [vmem:[#allocation38_spill] sm:$0xff]  ;;  %v9387_v58 = vld [vmem:[#allocation93_spill] sm:$0xff]  ;;  %v9389_v56 = vld [vmem:[#allocation72_spill] sm:$0xff] }
 0x2f4   : > { %v1492_v15 = vmul.f32 %v1484_v63, %v9366_v16  ;;  %v1454_v5 = vadd.f32 %v1450_v7, %v1392_v30  ;;  %v1455_v23 = vadd.f32 %v1451_v42, %v1393_v35  ;;  %v1512_v0 = vmul.f32 %v9367_v43, %v1483_v8  ;;  %v1706_v21 = vpop.permute.xlu0 %1705  ;;  %v9383_v43 = vld [vmem:[#allocation11_spill] sm:$0xff]  ;;  %v9390_v14 = vld [vmem:[#allocation94_spill] sm:$0xff] }
 0x2f5   : > { %v1513_v12 = vmul.f32 %v9368_v39, %v1484_v63  ;;  %v1659_v19 = vpop.permute.xlu1 %1658  ;;  %v1560_v25 = vadd.f32 %v1556_v34, %v1498_v44  ;;  %v1495_v33 = vadd.f32 %v1491_v2, %v1433_v6  ;;  %v1637_v49 = vmul.f32 %v1629_v18, %v9379_v1  ;;  %v9386_v35 = vld [vmem:[#allocation75_spill] sm:$0xff]  ;;  %v9394_v22 = vld [vmem:[#allocation42_spill] sm:$0xff] }
 0x2f6   : > { %v1638_v29 = vmul.f32 %v1630_v62, %v9380_v41  ;;  %v1516_v38 = vadd.f32 %v1512_v0, %v1454_v5  ;;  %v1545_v53 = vsel %vm1317_vm15, %v9381_v10, %v1536_v9  ;;  %v1546_v16 = vsel %vm1317_vm15, %v1536_v9, %v9382_v55  ;;  %v9393_v18 = vld [vmem:[#allocation47_spill] sm:$0xff]  ;;  %v9400_v55 = vld [vmem:[#allocation53_spill] sm:$0xff] }
 0x2f7   : > { %v1517_v57 = vadd.f32 %v1513_v12, %v1455_v23  ;;  %v1496_v28 = vadd.f32 %v1492_v15, %v1434_v31  ;;  %v1600_v61 = vadd.f32 %v9383_v43, %v1559_v59  ;;  %v1553_v39 = vmul.f32 %v1545_v53, %v9373_v13  ;;  %v9395_v31 = vld [vmem:[#allocation12_spill] sm:$0xff]  ;;  %v9396_v15 = vld [vmem:[#allocation78_spill] sm:$0xff]  ;;  %v9402_v43 = vld [vmem:[#allocation17_spill] sm:$0xff] }
 0x2f8   : > { %v1554_v17 = vmul.f32 %v1546_v16, %v9374_v37  ;;  %v1766_v54 = vmax.f32 %v1516_v38, 0.0  ;;  %v1670_v3 = vsel %vm321_vm0, %v9384_v52, %v1665_v24  ;;  %v1671_v30 = vsel %vm321_vm0, %v1665_v24, %v9385_v47  ;;  %v9391_v37 = vld [vmem:[#allocation9_spill] sm:$0xff] }
 0x2f9   : > { %v1767_v27 = vmax.f32 %v1517_v57, 0.0  ;;  %v1601_v50 = vadd.f32 %v9386_v35, %v1560_v25  ;;  %v1557_v48 = vadd.f32 %v1553_v39, %v1495_v33  ;;  %v1678_v36 = vmul.f32 %v1670_v3, %v9387_v58  ;;  %v1700_v42 = vpop.permute.xlu1 %1699  ;;  %v9398_v38 = vld [vmem:[#allocation21_spill] sm:$0xff] }
 0x2fa   : > { %v1558_v9 = vadd.f32 %v1554_v17, %v1496_v28  ;;  %v1627_v4 = vsel %vm321_vm0, %v9388_v32, %v1618_v51  ;;  %v1628_v60 = vsel %vm321_vm0, %v1618_v51, %v9389_v56  ;;  %v1778_v44 = vrot.slane %v1766_v54, 6  ;;  %v1747_v51 = vpop.permute.xlu0 %1746  ;;  %v9403_v17 = vld [vmem:[#allocation16_spill] sm:$0xff] }
 0x2fb   : > { %v1779_v7 = vrot.slane %v1767_v27, 6  ;;  %v1768_v6 = vmax.f32 %v6351_v46, 0.0  ;;  %v1641_v13 = vadd.f32 %v1637_v49, %v1600_v61  ;;  %v1679_v24 = vmul.f32 %v1671_v30, %v9390_v14  ;;  %v9404_v30 = vld [vmem:[#allocation46_spill] sm:$0xff] }
 0x2fc   : > { %v1598_v34 = vadd.f32 %v9391_v37, %v1557_v48  ;;  %v1599_v8 = vadd.f32 %v9392_v40, %v1558_v9  ;;  %v1635_v45 = vmul.f32 %v1627_v4, %v9379_v1  ;;  %v1636_v63 = vmul.f32 %v1628_v60, %v9380_v41  ;;  %1784 = vrot.lane.b32.xlu0 %v1778_v44, %s5122_s21  ;;  %v9397_v1 = vld [vmem:[#allocation49_spill] sm:$0xff] }
 0x2fd   : > { %1786 = vrot.lane.b32.xlu1 %v1779_v7, %s5122_s21  ;;  %v1642_v26 = vadd.f32 %v1638_v29, %v1601_v50  ;;  %v1711_v46 = vsel %vm321_vm0, %v9393_v18, %v1706_v21  ;;  %v1668_v62 = vsel %vm321_vm0, %v9394_v22, %v1659_v19  ;;  %v1669_v59 = vsel %vm321_vm0, %v1659_v19, %v9395_v31  ;;  %v9399_v19 = vld [vmem:[#allocation19_spill] sm:$0xff]  ;;  %v1741_v53 = vpop.permute.xlu1 %1740  ;;  %v9405_v50 = vld [vmem:[#allocation77_spill] sm:$0xff] }
 0x2fe   : > { %v1682_v2 = vadd.f32 %v1678_v36, %v1641_v13  ;;  %v1712_v5 = vsel %vm321_vm0, %v1706_v21, %v9396_v15  ;;  %v1676_v23 = vmul.f32 %v1668_v62, %v9387_v58  ;;  %v1782_v0 = vrot.slane %v1769_v11, 6  ;;  %v9401_v21 = vld [vmem:[#allocation44_spill] sm:$0xff] }
 0x2ff   : > { %v1639_v12 = vadd.f32 %v1635_v45, %v1598_v34  ;;  %v1677_v25 = vmul.f32 %v1669_v59, %v9390_v14  ;;  %v1780_v33 = vrot.slane %v1768_v6, 6  ;;  %v1752_v49 = vsel %vm321_vm0, %v9397_v1, %v1747_v51 }
 0x300   : > { %v1683_v41 = vadd.f32 %v1679_v24, %v1642_v26  ;;  %v1640_v29 = vadd.f32 %v1636_v63, %v1599_v8  ;;  %v1719_v57 = vmul.f32 %v1711_v46, %v9398_v38  ;;  %v1753_v10 = vsel %vm321_vm0, %v1747_v51, %v9399_v19 }
 0x301   : > { %1794 = vrot.lane.b32.xlu1 %v1782_v0, %s5122_s21  ;;  %v1720_v16 = vmul.f32 %v1712_v5, %v9400_v55  ;;  %v1680_v11 = vadd.f32 %v1676_v23, %v1639_v12  ;;  %1792 = vrot.lane.b32.xlu0 %v1780_v33, %s5122_s21  ;;  %v1709_v28 = vsel %vm321_vm0, %v9401_v21, %v1700_v42 }
 0x302   : > { %v1710_v61 = vsel %vm321_vm0, %v1700_v42, %v9402_v43  ;;  %v1681_v39 = vadd.f32 %v1677_v25, %v1640_v29  ;;  %v1760_v54 = vmul.f32 %v1752_v49, %v9403_v17  ;;  %v1717_v27 = vmul.f32 %v1709_v28, %v9398_v38  ;;  %v4667_v28 = vld [vmem:[%s9076_s4 + $0x12] ss:$8 sm:$0x3] }
 0x303   : > { %v1718_v52 = vmul.f32 %v1710_v61, %v9400_v55  ;;  %v1761_v3 = vmul.f32 %v1753_v10, %v6195_v20  ;;  %v1783_v47 = vsel %vm435_vm2, %v1779_v7, %v1782_v0  ;;  %v1750_v35 = vsel %vm321_vm0, %v9404_v30, %v1741_v53  ;;  %v4668_v30 = vld [vmem:[%s9076_s4 + $0x17] ss:$8 sm:$0x3] }
 0x304   : > { %v1751_v48 = vsel %vm321_vm0, %v1741_v53, %v9405_v50  ;;  %v1723_v9 = vadd.f32 %v1719_v57, %v1682_v2  ;;  %v1721_v58 = vadd.f32 %v1717_v27, %v1680_v11  ;;  %v1781_v36 = vsel %vm435_vm2, %v1778_v44, %v1780_v33  ;;  %v9408_v53 = vld [vmem:[#allocation57_spill] sm:$0xff] }
 0x305   : > { %1790 = vrot.lane.b32.xlu1 %v1783_v47, %s5122_s21  ;;  %v1758_v32 = vmul.f32 %v1750_v35, %v9403_v17  ;;  %v1724_v4 = vadd.f32 %v1720_v16, %v1683_v41  ;;  %v1722_v56 = vadd.f32 %v1718_v52, %v1681_v39  ;;  %1788 = vrot.lane.b32.xlu0 %v1781_v36, %s5122_s21  ;;  %v4666_v41 = vld [vmem:[%s9076_s4 + $0x5] ss:$8 sm:$0x3] }
 0x306   : > { %v1759_v60 = vmul.f32 %v1751_v48, %v6195_v20  ;;  %v1764_v7 = vadd.f32 %v1760_v54, %v1723_v9  ;;  %v6489_v55 = vrot.slane %v4666_v41, %v9408_v53  ;;  %v1823_v54 = vld [vmem:[%s9076_s4] ss:$8 sm:$0x3]  ;;  %v1896_v47 = vrot.slane %v4667_v28, %v9408_v53 }
 0x307   : > { %v1762_v42 = vadd.f32 %v1758_v32, %v1721_v58  ;;  %v1765_v6 = vadd.f32 %v1761_v3, %v1724_v4  ;;  %v1832_v9 = vrot.slane %v1823_v54, %v9408_v53  ;;  %v1939_v4 = vrot.slane %v4668_v30, %v9408_v53 }
 0x308   : > { %v1763_v13 = vadd.f32 %v1759_v60, %v1722_v56  ;;  %v1772_v37 = vmax.f32 %v1764_v7, 0.0  ;;  %v4669_v56 = vld [vmem:[%s9076_s4 + $0x24] ss:$8 sm:$0x3] }
 0x309   : > { %v1770_v14 = vmax.f32 %v1762_v42, 0.0  ;;  %v1773_v40 = vmax.f32 %v1765_v6, 0.0 }
 0x30a   : > { %v1771_v24 = vmax.f32 %v1763_v13, 0.0  ;;  %v2913_v44 = vrot.slane %v1772_v37, 6 }
 0x30b   : > { %v2911_v34 = vrot.slane %v1770_v14, 6  ;;  %v2915_v45 = vrot.slane %v1773_v40, 6  ;;  %v1982_v40 = vrot.slane %v4669_v56, %v9408_v53 }
 0x30c   : > { %v2912_v8 = vrot.slane %v1771_v24, 6 }
 0x30d   : > { %2917 = vrot.lane.b32.xlu0 %v2911_v34, %s5122_s21  ;;  %v2914_v20 = vsel %vm435_vm2, %v2911_v34, %v2913_v44 }
 0x30e   : > { %2919 = vrot.lane.b32.xlu1 %v2912_v8, %s5122_s21  ;;  %v2916_v63 = vsel %vm435_vm2, %v2912_v8, %v2915_v45 }
 0x311   : > { %2925 = vrot.lane.b32.xlu0 %v2913_v44, %s5122_s21 }
 0x312   : > { %2927 = vrot.lane.b32.xlu1 %v2915_v45, %s5122_s21 }
 0x315   : > { %2921 = vrot.lane.b32.xlu0 %v2914_v20, %s5122_s21 }
 0x316   : > { %2923 = vrot.lane.b32.xlu1 %v2916_v63, %s5122_s21  ;;  %s311_s21 = sand.u32 1, %s5108_s28  }
 0x317   : > { %s9031_s24 = scalar_lea.sflag [#allocation5], %s311_s21 }
 0x36e   : > { %v1785_v26 = vpop.permute.xlu0 %1784 }
 0x36f   : > { %v1787_v51 = vpop.permute.xlu1 %1786  ;;  %1808 = vst.msk [vmem:[#allocation2] sm:$0xfc] %vm467_vm3, %v1785_v26 }
 0x370   : > { %1810 = vst.msk [vmem:[#allocation2 + $0x10] sm:$0xfc] %vm470_vm5, %v1787_v51  ;;  %v1796_v18 = vsel %vm454_vm4, %v1785_v26, %v1787_v51 }
 0x371   : > { %1809 = vst [vmem:[#allocation2 + $0x8] sm:$0xfc] %v1796_v18 }
 0x373   : > { %v1795_v46 = vpop.permute.xlu1 %1794  ;;  %v1793_v22 = vpop.permute.xlu0 %1792 }
 0x374   : > { %1816 = vst.msk [vmem:[#allocation2 + $0x40] sm:$0x3] %vm479_vm8, %v1795_v46  ;;  %v1798_v62 = vsel %vm454_vm4, %v1793_v22, %v1795_v46 }
 0x375   : > { %1814 = vst.msk [vmem:[#allocation2 + $0x30] sm:$0x3] %vm476_vm7, %v1793_v22  ;;  %1815 = vst [vmem:[#allocation2 + $0x38] sm:$0x3] %v1798_v62 }
 0x376   : > { %v6447_v31 = vld [vmem:[#allocation2] sm:$0xff] }
 0x377   : > { %9406 = vst [vmem:[#allocation48_spill] sm:$0xff] %v6447_v31  ;;  %v1791_v59 = vpop.permute.xlu1 %1790  ;;  %v6449_v2 = vld [vmem:[#allocation2 + $0x10] sm:$0xff]  ;;  %v1789_v5 = vpop.permute.xlu0 %1788  ;;  %2037 = vrot.lane.b32.xlu0 %v6447_v31, %s5123_s22 }
 0x378   : > { %v6451_v15 = vld [vmem:[#allocation2 + $0x8] sm:$0xff]  ;;  %1813 = vst.msk [vmem:[#allocation2 + $0x28] sm:$0xff] %vm454_vm4, %v1791_v59  ;;  %2041 = vrot.lane.b32.xlu1 %v6449_v2, %s5123_s22  ;;  %v6459_v23 = vsel %vm454_vm4, %v1789_v5, %v1791_v59 }
 0x379   : > { %1811 = vst.msk [vmem:[#allocation2 + $0x18] sm:$0xff] %vm472_vm6, %v1789_v5  ;;  %v2084_v0 = vrot.slane %v6451_v15, 1  ;;  %v2085_v12 = vrot.slane %v6459_v23, 1  ;;  %v2140_v25 = vrot.slane %v6451_v15, 2  ;;  %v2141_v33 = vrot.slane %v6459_v23, 2 }
 0x37a   : > { %v2196_v1 = vrot.slane %v6451_v15, 3  ;;  %v2197_v49 = vrot.slane %v6459_v23, 3  ;;  %v1857_v27 = vmul.f32 %v6489_v55, %v6451_v15  ;;  %v1859_v36 = vmul.f32 %v6489_v55, %v6459_v23 }
 0x37b   : > { %2039 = vrot.lane.b32.xlu0 %v6451_v15, %s5123_s22  ;;  %v6476_v29 = vsel %vm532_vm9, %v2084_v0, %v2085_v12  ;;  %v6479_v38 = vsel %vm576_vm10, %v2140_v25, %v2141_v33  ;;  %v6514_v52 = vld [vmem:[#allocation2 + $0x40] sm:$0xf]  ;;  %v1900_v42 = vmul.f32 %v1896_v47, %v6451_v15  ;;  %v1902_v6 = vmul.f32 %v1896_v47, %v6459_v23 }
 0x37c   : > { %2309 = vrot.lane.b32.xlu1 %v6449_v2, %s5124_s17  ;;  %v6484_v57 = vsel %vm620_vm11, %v2196_v1, %v2197_v49  ;;  %v6486_v10 = vld [vmem:[#allocation2 + $0x38] sm:$0xf]  ;;  %v6505_v39 = vld [vmem:[#allocation2 + $0x30] sm:$0xf]  ;;  %v1871_v32 = vrot.slane %v1857_v27, 1  ;;  %v1872_v14 = vrot.slane %v1859_v36, 1  ;;  %v1836_v24 = vmul.f32 %v1832_v9, %v6451_v15 }
 0x37d   : > { %9407 = vst [vmem:[#allocation23_spill] sm:$0xff] %v6484_v57  ;;  %v2092_v43 = vrot.slane %v6486_v10, 1  ;;  %v2148_v61 = vrot.slane %v6486_v10, 2  ;;  %9409 = vst [vmem:[#allocation56_spill] sm:$0xff] %v6505_v39  ;;  %v1914_v37 = vrot.slane %v1900_v42, 2  ;;  %v1915_v34 = vrot.slane %v1902_v6, 2 }
 0x37e   : > { %v1873_v8 = vsel %vm532_vm9, %v1871_v32, %v1872_v14  ;;  %v1943_v44 = vmul.f32 %v1939_v4, %v6451_v15  ;;  %v1945_v63 = vmul.f32 %v1939_v4, %v6459_v23  ;;  %v1986_v18 = vmul.f32 %v1982_v40, %v6451_v15 }
 0x37f   : > { %v2918_v19 = vpop.permute.xlu0 %2917  ;;  %v6526_v50 = vsel %vm532_vm9, %v2085_v12, %v2092_v43  ;;  %v6529_v48 = vsel %vm576_vm10, %v2141_v33, %v2148_v61  ;;  %v6540_v60 = vld [vmem:[#allocation2 + $0x28] sm:$0xff]  ;;  %v1883_v45 = vadd.f32 %v1873_v8, %v1836_v24  ;;  %v1916_v20 = vsel %vm576_vm10, %v1914_v37, %v1915_v34 }
 0x380   : > { %v6491_v16 = vld [vmem:[#allocation2 + $0x18] sm:$0xff]  ;;  %2305 = vrot.lane.b32.xlu1 %v6447_v31, %s5124_s17  ;;  %v2920_v11 = vpop.permute.xlu1 %2919  ;;  %2941 = vst.msk [vmem:[#allocation2] sm:$0xfc] %vm467_vm3, %v2918_v19  ;;  %9410 = vst [vmem:[#allocation18_spill] sm:$0xff] %v6526_v50  ;;  %v1957_v51 = vrot.slane %v1943_v44, 3  ;;  %v1958_v46 = vrot.slane %v1945_v63, 3  ;;  %v1988_v22 = vmul.f32 %v1982_v40, %v6459_v23  ;;  %v1861_v43 = vmul.f32 %v6489_v55, %v6486_v10 }
 0x381   : > { %2043 = vrot.lane.b32.xlu0 %v6491_v16, %s5123_s22  ;;  %2943 = vst.msk [vmem:[#allocation2 + $0x10] sm:$0xfc] %vm470_vm5, %v2920_v11  ;;  %v2929_v21 = vsel %vm454_vm4, %v2918_v19, %v2920_v11  ;;  %9411 = vst [vmem:[#allocation50_spill] sm:$0xff] %v6529_v48  ;;  %v1926_v26 = vadd.f32 %v1916_v20, %v1883_v45  ;;  %v2000_v62 = vrot.slane %v1986_v18, 4  ;;  %v2252_v59 = vrot.slane %v6451_v15, 4 }
 0x382   : > { %2942 = vst [vmem:[#allocation2 + $0x8] sm:$0xfc] %v2929_v21  ;;  %v1959_v5 = vsel %vm620_vm11, %v1957_v51, %v1958_v46  ;;  %v2001_v0 = vrot.slane %v1988_v22, 4  ;;  %v2253_v12 = vrot.slane %v6459_v23, 4  ;;  %v2204_v33 = vrot.slane %v6486_v10, 3 }
 0x383   : > { %v2926_v17 = vpop.permute.xlu0 %2925  ;;  %v1969_v25 = vadd.f32 %v1959_v5, %v1926_v26  ;;  %v2260_v1 = vrot.slane %v6486_v10, 4  ;;  %v1904_v61 = vmul.f32 %v1896_v47, %v6486_v10  ;;  %v1990_v54 = vmul.f32 %v1982_v40, %v6486_v10 }
 0x384   : > { %2514 = vrot.lane.b32.xlu1 %v6449_v2, %s5125_s19  ;;  %v2928_v3 = vpop.permute.xlu1 %2927  ;;  %2947 = vst.msk [vmem:[#allocation2 + $0x30] sm:$0x3] %vm476_vm7, %v2926_v17  ;;  %v2002_v41 = vsel %vm664_vm12, %v2000_v62, %v2001_v0  ;;  %v6575_v19 = vsel %vm664_vm12, %v2252_v59, %v2253_v12  ;;  %v6584_v21 = vsel %vm620_vm11, %v2197_v49, %v2204_v33  ;;  %v1876_v49 = vrot.slane %v1861_v43, 1 }
 0x385   : > { %2307 = vrot.lane.b32.xlu0 %v6451_v15, %s5124_s17  ;;  %2949 = vst.msk [vmem:[#allocation2 + $0x40] sm:$0x3] %vm479_vm8, %v2928_v3  ;;  %v2931_v35 = vsel %vm454_vm4, %v2926_v17, %v2928_v3  ;;  %9412 = vst [vmem:[#allocation25_spill] sm:$0xff] %v6575_v19  ;;  %v6579_v11 = vadd.f32 %v2002_v41, %v1969_v25  ;;  %v6587_v28 = vsel %vm664_vm12, %v2253_v12, %v2260_v1 }
 0x386   : > { %2948 = vst [vmem:[#allocation2 + $0x38] sm:$0x3] %v2931_v35  ;;  %9414 = vst [vmem:[#allocation20_spill] sm:$0xff] %v6584_v21  ;;  %v1947_v17 = vmul.f32 %v1939_v4, %v6486_v10  ;;  %v1919_v27 = vrot.slane %v1904_v61, 2  ;;  %v1838_v3 = vmul.f32 %v1832_v9, %v6459_v23  ;;  %v2005_v30 = vrot.slane %v1990_v54, 4 }
 0x387   : > { %v2922_v58 = vpop.permute.xlu0 %2921  ;;  %9413 = vst [vmem:[#allocation59_spill] sm:$0xff] %v6579_v11  ;;  %9415 = vst [vmem:[#allocation52_spill] sm:$0xff] %v6587_v28  ;;  %v1877_v55 = vsel %vm532_vm9, %v1872_v14, %v1876_v49  ;;  %v2088_v9 = vrot.slane %v6540_v60, 1  ;;  %v2087_v4 = vrot.slane %v6449_v2, 1  ;;  %v2144_v42 = vrot.slane %v6540_v60, 2 }
 0x388   : > { %2510 = vrot.lane.b32.xlu1 %v6447_v31, %s5125_s19  ;;  %v2924_v7 = vpop.permute.xlu1 %2923  ;;  %2944 = vst.msk [vmem:[#allocation2 + $0x18] sm:$0xff] %vm472_vm6, %v2922_v58  ;;  %v1920_v47 = vsel %vm576_vm10, %v1915_v34, %v1919_v27  ;;  %v1885_v35 = vadd.f32 %v1877_v55, %v1838_v3  ;;  %v2006_v10 = vsel %vm664_vm12, %v2001_v0, %v2005_v30  ;;  %v2082_v6 = vrot.slane %v6491_v16, 1 }
 0x389   : > { %2311 = vrot.lane.b32.xlu0 %v6491_v16, %s5124_s17  ;;  %2946 = vst.msk [vmem:[#allocation2 + $0x28] sm:$0xff] %vm454_vm4, %v2924_v7  ;;  %v6549_v13 = vsel %vm454_vm4, %v2922_v58, %v2924_v7  ;;  %v6618_v7 = vsel %vm532_vm9, %v2087_v4, %v2088_v9  ;;  %v2143_v14 = vrot.slane %v6449_v2, 2  ;;  %v2081_v24 = vrot.slane %v6447_v31, 1 }
 0x38a   : > { %2945 = vst [vmem:[#allocation2 + $0x20] sm:$0xff] %v6549_v13  ;;  %v1928_v36 = vadd.f32 %v1920_v47, %v1885_v35  ;;  %v2138_v34 = vrot.slane %v6491_v16, 2  ;;  %v2090_v8 = vrot.slane %v6505_v39, 1  ;;  %v2094_v20 = vrot.slane %v6514_v52, 1 }
 0x38b   : > { %v6629_v37 = vsel %vm576_vm10, %v2143_v14, %v2144_v42  ;;  %v6635_v40 = vsel %vm532_vm9, %v2081_v24, %v2082_v6  ;;  %v2146_v63 = vrot.slane %v6505_v39, 2  ;;  %v2200_v26 = vrot.slane %v6540_v60, 3 }
 0x38c   : > { %2719 = vrot.lane.b32.xlu1 %v6449_v2, %s5126_s20  ;;  %v6647_v45 = vsel %vm532_vm9, %v2082_v6, %v2090_v8  ;;  %v6654_v51 = vsel %vm532_vm9, %v2088_v9, %v2094_v20  ;;  %v2199_v22 = vrot.slane %v6449_v2, 3  ;;  %v2202_v62 = vrot.slane %v6505_v39, 3 }
 0x38d   : > { %2512 = vrot.lane.b32.xlu0 %v6451_v15, %s5125_s19  ;;  %9417 = vst [vmem:[#allocation61_spill] sm:$0xff] %v6647_v45  ;;  %9418 = vst [vmem:[#allocation22_spill] sm:$0xff] %v6654_v51  ;;  %v6660_v18 = vsel %vm576_vm10, %v2138_v34, %v2146_v63  ;;  %v2250_v0 = vrot.slane %v6491_v16, 4  ;;  %v2193_v12 = vrot.slane %v6447_v31, 3  ;;  %v2258_v25 = vrot.slane %v6505_v39, 4 }
 0x38e   : > { %9419 = vst [vmem:[#allocation55_spill] sm:$0xff] %v6660_v18  ;;  %v6668_v59 = vsel %vm620_vm11, %v2199_v22, %v2200_v26  ;;  %v2150_v41 = vrot.slane %v6514_v52, 2  ;;  %v2256_v61 = vrot.slane %v6540_v60, 4  ;;  %v2249_v49 = vrot.slane %v6447_v31, 4 }
 0x38f   : > { %9420 = vst [vmem:[#allocation29_spill] sm:$0xff] %v6668_v59  ;;  %v6686_v1 = vsel %vm664_vm12, %v2250_v0, %v2258_v25  ;;  %v2262_v3 = vrot.slane %v6514_v52, 4 }
 0x390   : > { %2715 = vrot.lane.b32.xlu1 %v6447_v31, %s5126_s20  ;;  %9423 = vst [vmem:[#allocation58_spill] sm:$0xff] %v6686_v1  ;;  %v6692_v43 = vsel %vm576_vm10, %v2144_v42, %v2150_v41 }
 0x391   : > { %2516 = vrot.lane.b32.xlu0 %v6491_v16, %s5125_s19  ;;  %9424 = vst [vmem:[#allocation31_spill] sm:$0xff] %v6692_v43 }
 0x394   : > { %2047 = vrot.lane.b32.xlu1 %v6540_v60, %s5123_s22 }
 0x395   : > { %2717 = vrot.lane.b32.xlu0 %v6451_v15, %s5126_s20  ;;  %v1962_v15 = vrot.slane %v1947_v17, 3  ;;  %v2255_v17 = vrot.slane %v6449_v2, 4  ;;  %v2206_v2 = vrot.slane %v6514_v52, 3 }
 0x397   : > { %v1963_v58 = vsel %vm620_vm11, %v1958_v46, %v1962_v15  ;;  %v2194_v46 = vrot.slane %v6491_v16, 3  ;;  %v6701_v54 = vsel %vm664_vm12, %v2255_v17, %v2256_v61  ;;  %v6717_v27 = vsel %vm620_vm11, %v2200_v26, %v2206_v2 }
 0x398   : > { %2315 = vrot.lane.b32.xlu1 %v6540_v60, %s5124_s17  ;;  %v1971_v32 = vadd.f32 %v1963_v58, %v1928_v36  ;;  %9425 = vst [vmem:[#allocation65_spill] sm:$0xff] %v6701_v54  ;;  %9427 = vst [vmem:[#allocation60_spill] sm:$0xff] %v6717_v27  ;;  %v6725_v15 = vsel %vm664_vm12, %v2256_v61, %v2262_v3 }
 0x399   : > { %2045 = vrot.lane.b32.xlu0 %v6459_v23, %s5123_s22  ;;  %v6673_v5 = vsel %vm620_vm11, %v2194_v46, %v2202_v62  ;;  %v6681_v33 = vsel %vm620_vm11, %v2193_v12, %v2194_v46  ;;  %9428 = vst [vmem:[#allocation33_spill] sm:$0xff] %v6725_v15 }
 0x39a   : > { %v6615_v56 = vadd.f32 %v2006_v10, %v1971_v32  ;;  %9421 = vst [vmem:[#allocation63_spill] sm:$0xff] %v6673_v5  ;;  %9422 = vst [vmem:[#allocation24_spill] sm:$0xff] %v6681_v33 }
 0x39c   : > { %2520 = vrot.lane.b32.xlu1 %v6540_v60, %s5125_s19  ;;  %9416 = vst [vmem:[#allocation27_spill] sm:$0xff] %v6615_v56  ;;  %v6915_v56 = vld [vmem:[#allocation2 + $0x10] sm:$0xff] }
 0x39d   : > { %2313 = vrot.lane.b32.xlu0 %v6459_v23, %s5124_s17 }
 0x3a0   : > { %2725 = vrot.lane.b32.xlu1 %v6540_v60, %s5126_s20  ;;  %v6709_v60 = vsel %vm664_vm12, %v2249_v49, %v2250_v0 }
 0x3a1   : > { %2518 = vrot.lane.b32.xlu0 %v6459_v23, %s5125_s19  ;;  %9426 = vst [vmem:[#allocation26_spill] sm:$0xff] %v6709_v60 }
 0x3a4   : > { %2100 = vrot.lane.b32.xlu1 %v6618_v7, %s5123_s22 }
 0x3a5   : > { %2723 = vrot.lane.b32.xlu0 %v6459_v23, %s5126_s20  ;;  %v2137_v23 = vrot.slane %v6447_v31, 2 }
 0x3a7   : > { %v6642_v44 = vsel %vm576_vm10, %v2137_v23, %v2138_v34 }
 0x3a8   : > { %2156 = vrot.lane.b32.xlu1 %v6629_v37, %s5123_s22 }
 0x3a9   : > { %2096 = vrot.lane.b32.xlu0 %v6635_v40, %s5123_s22 }
 0x3ac   : > { %2152 = vrot.lane.b32.xlu1 %v6642_v44, %s5123_s22 }
 0x3ad   : > { %2102 = vrot.lane.b32.xlu0 %v6647_v45, %s5123_s22 }
 0x3b0   : > { %2106 = vrot.lane.b32.xlu1 %v6654_v51, %s5123_s22 }
 0x3b1   : > { %2158 = vrot.lane.b32.xlu0 %v6660_v18, %s5123_s22 }
 0x3b4   : > { %2212 = vrot.lane.b32.xlu1 %v6668_v59, %s5123_s22 }
 0x3b5   : > { %2214 = vrot.lane.b32.xlu0 %v6673_v5, %s5123_s22 }
 0x3b8   : > { %2208 = vrot.lane.b32.xlu1 %v6681_v33, %s5123_s22 }
 0x3b9   : > { %2270 = vrot.lane.b32.xlu0 %v6686_v1, %s5123_s22 }
 0x3bc   : > { %2162 = vrot.lane.b32.xlu1 %v6692_v43, %s5123_s22 }
 0x3bd   : > { %2352 = vrot.lane.b32.xlu0 %v6647_v45, %s5124_s17 }
 0x3c0   : > { %2268 = vrot.lane.b32.xlu1 %v6701_v54, %s5123_s22 }
 0x3c1   : > { %2393 = vrot.lane.b32.xlu0 %v6660_v18, %s5124_s17 }
 0x3c4   : > { %2264 = vrot.lane.b32.xlu1 %v6709_v60, %s5123_s22 }
 0x3c5   : > { %2434 = vrot.lane.b32.xlu0 %v6673_v5, %s5124_s17 }
 0x3c8   : > { %2218 = vrot.lane.b32.xlu1 %v6717_v27, %s5123_s22 }
 0x3c9   : > { %2475 = vrot.lane.b32.xlu0 %v6686_v1, %s5124_s17 }
 0x3cc   : > { %2274 = vrot.lane.b32.xlu1 %v6725_v15, %s5123_s22 }
 0x3cd   : > { %2557 = vrot.lane.b32.xlu0 %v6647_v45, %s5125_s19 }
 0x3d0   : > { %2350 = vrot.lane.b32.xlu1 %v6618_v7, %s5124_s17 }
 0x3d1   : > { %2598 = vrot.lane.b32.xlu0 %v6660_v18, %s5125_s19 }
 0x3d4   : > { %2346 = vrot.lane.b32.xlu1 %v6635_v40, %s5124_s17 }
 0x3d5   : > { %2639 = vrot.lane.b32.xlu0 %v6673_v5, %s5125_s19 }
 0x3d8   : > { %2391 = vrot.lane.b32.xlu1 %v6629_v37, %s5124_s17 }
 0x3d9   : > { %2680 = vrot.lane.b32.xlu0 %v6686_v1, %s5125_s19 }
 0x3dc   : > { %2387 = vrot.lane.b32.xlu1 %v6642_v44, %s5124_s17 }
 0x3dd   : > { %2098 = vrot.lane.b32.xlu0 %v6476_v29, %s5123_s22 }
 0x3e0   : > { %2356 = vrot.lane.b32.xlu1 %v6654_v51, %s5124_s17 }
 0x3e1   : > { %2154 = vrot.lane.b32.xlu0 %v6479_v38, %s5123_s22 }
 0x3e4   : > { %2432 = vrot.lane.b32.xlu1 %v6668_v59, %s5124_s17 }
 0x3e5   : > { %2104 = vrot.lane.b32.xlu0 %v6526_v50, %s5123_s22 }
 0x3e8   : > { %2428 = vrot.lane.b32.xlu1 %v6681_v33, %s5124_s17 }
 0x3e9   : > { %2210 = vrot.lane.b32.xlu0 %v6484_v57, %s5123_s22  ;;  %v6761_v30 = vpop.permute.xlu0 %2037 }
 0x3ea   : > { %v6759_v52 = vpop.permute.xlu1 %2041  ;;  %9430 = vst [vmem:[#allocation62_spill] sm:$0xff] %v6761_v30  ;;  %v3150_v30 = vld [vmem:[#allocation2 + $0x40] sm:$0xf] }
 0x3eb   : > { %9429 = vst [vmem:[#allocation28_spill] sm:$0xff] %v6759_v52 }
 0x3ec   : > { %2397 = vrot.lane.b32.xlu1 %v6692_v43, %s5124_s17 }
 0x3ed   : > { %2160 = vrot.lane.b32.xlu0 %v6529_v48, %s5123_s22  ;;  %v6769_v47 = vpop.permute.xlu0 %2039 }
 0x3ee   : > { %v6767_v55 = vpop.permute.xlu1 %2309  ;;  %9432 = vst [vmem:[#allocation15_spill] sm:$0xff] %v6769_v47 }
 0x3ef   : > { %9431 = vst [vmem:[#allocation35_spill] sm:$0xff] %v6767_v55 }
 0x3f0   : > { %2473 = vrot.lane.b32.xlu1 %v6701_v54, %s5124_s17 }
 0x3f1   : > { %2266 = vrot.lane.b32.xlu0 %v6575_v19, %s5123_s22 }
 0x3f2   : > { %v6775_v35 = vpop.permute.xlu1 %2305 }
 0x3f3   : > { %9433 = vst [vmem:[#allocation79_spill] sm:$0xff] %v6775_v35  ;;  %v6777_v58 = vpop.permute.xlu0 %2043 }
 0x3f4   : > { %9434 = vst [vmem:[#allocation30_spill] sm:$0xff] %v6777_v58  ;;  %2469 = vrot.lane.b32.xlu1 %v6709_v60, %s5124_s17 }
 0x3f5   : > { %2216 = vrot.lane.b32.xlu0 %v6584_v21, %s5123_s22 }
 0x3f6   : > { %v6783_v10 = vpop.permute.xlu1 %2514 }
 0x3f7   : > { %9435 = vst [vmem:[#allocation64_spill] sm:$0xff] %v6783_v10  ;;  %v6785_v36 = vpop.permute.xlu0 %2307  ;;  %v6937_v10 = vld [vmem:[#allocation2 + $0x8] sm:$0xff] }
 0x3f8   : > { %9436 = vst [vmem:[#allocation80_spill] sm:$0xff] %v6785_v36  ;;  %2438 = vrot.lane.b32.xlu1 %v6717_v27, %s5124_s17  ;;  %v6987_v36 = vld [vmem:[#allocation2 + $0x28] sm:$0xff] }
 0x3f9   : > { %2272 = vrot.lane.b32.xlu0 %v6587_v28, %s5123_s22 }
 0x3fa   : > { %v6791_v9 = vpop.permute.xlu1 %2510 }
 0x3fb   : > { %9437 = vst [vmem:[#allocation81_spill] sm:$0xff] %v6791_v9  ;;  %v6793_v32 = vpop.permute.xlu0 %2311 }
 0x3fc   : > { %9438 = vst [vmem:[#allocation37_spill] sm:$0xff] %v6793_v32  ;;  %2479 = vrot.lane.b32.xlu1 %v6725_v15, %s5124_s17 }
 0x3fd   : > { %2348 = vrot.lane.b32.xlu0 %v6476_v29, %s5124_s17 }
 0x3fe   : > { %v6799_v4 = vpop.permute.xlu1 %2719 }
 0x3ff   : > { %9439 = vst [vmem:[#allocation69_spill] sm:$0xff] %v6799_v4  ;;  %v6801_v42 = vpop.permute.xlu0 %2512 }
 0x400   : > { %9440 = vst [vmem:[#allocation82_spill] sm:$0xff] %v6801_v42  ;;  %2555 = vrot.lane.b32.xlu1 %v6618_v7, %s5125_s19 }
 0x401   : > { %2389 = vrot.lane.b32.xlu0 %v6479_v38, %s5124_s17 }
 0x402   : > { %v6807_v6 = vpop.permute.xlu1 %2715 }
 0x403   : > { %9441 = vst [vmem:[#allocation83_spill] sm:$0xff] %v6807_v6  ;;  %v6809_v14 = vpop.permute.xlu0 %2516 }
 0x404   : > { %9442 = vst [vmem:[#allocation51_spill] sm:$0xff] %v6809_v14  ;;  %2551 = vrot.lane.b32.xlu1 %v6635_v40, %s5125_s19 }
 0x405   : > { %2354 = vrot.lane.b32.xlu0 %v6526_v50, %s5124_s17 }
 0x406   : > { %v6815_v24 = vpop.permute.xlu1 %2047 }
 0x407   : > { %9443 = vst [vmem:[#allocation32_spill] sm:$0xff] %v6815_v24  ;;  %v6817_v34 = vpop.permute.xlu0 %2717  ;;  %v6945_v24 = vld [vmem:[#allocation2 + $0x18] sm:$0xff] }
 0x408   : > { %9444 = vst [vmem:[#allocation66_spill] sm:$0xff] %v6817_v34  ;;  %2596 = vrot.lane.b32.xlu1 %v6629_v37, %s5125_s19 }
 0x409   : > { %2430 = vrot.lane.b32.xlu0 %v6484_v57, %s5124_s17 }
 0x40a   : > { %v6823_v23 = vpop.permute.xlu1 %2315 }
 0x40b   : > { %9445 = vst [vmem:[#allocation84_spill] sm:$0xff] %v6823_v23  ;;  %v6825_v8 = vpop.permute.xlu0 %2045 }
 0x40c   : > { %9446 = vst [vmem:[#allocation74_spill] sm:$0xff] %v6825_v8  ;;  %2592 = vrot.lane.b32.xlu1 %v6642_v44, %s5125_s19 }
 0x40d   : > { %2395 = vrot.lane.b32.xlu0 %v6529_v48, %s5124_s17 }
 0x40e   : > { %v6831_v20 = vpop.permute.xlu1 %2520 }
 0x40f   : > { %9447 = vst [vmem:[#allocation10_spill] sm:$0xff] %v6831_v20  ;;  %v6833_v63 = vpop.permute.xlu0 %2313 }
 0x410   : > { %9448 = vst [vmem:[#allocation39_spill] sm:$0xff] %v6833_v63  ;;  %2561 = vrot.lane.b32.xlu1 %v6654_v51, %s5125_s19 }
 0x411   : > { %2471 = vrot.lane.b32.xlu0 %v6575_v19, %s5124_s17 }
 0x412   : > { %v6839_v26 = vpop.permute.xlu1 %2725 }
 0x413   : > { %9449 = vst [vmem:[#allocation71_spill] sm:$0xff] %v6839_v26  ;;  %v6841_v46 = vpop.permute.xlu0 %2518 }
 0x414   : > { %9450 = vst [vmem:[#allocation85_spill] sm:$0xff] %v6841_v46  ;;  %2637 = vrot.lane.b32.xlu1 %v6668_v59, %s5125_s19 }
 0x415   : > { %2436 = vrot.lane.b32.xlu0 %v6584_v21, %s5124_s17 }
 0x416   : > { %v6847_v22 = vpop.permute.xlu1 %2100 }
 0x417   : > { %9451 = vst [vmem:[#allocation86_spill] sm:$0xff] %v6847_v22  ;;  %v6849_v62 = vpop.permute.xlu0 %2723 }
 0x418   : > { %9452 = vst [vmem:[#allocation87_spill] sm:$0xff] %v6849_v62  ;;  %2633 = vrot.lane.b32.xlu1 %v6681_v33, %s5125_s19 }
 0x419   : > { %2477 = vrot.lane.b32.xlu0 %v6587_v28, %s5124_s17 }
 0x41a   : > { %v6855_v0 = vpop.permute.xlu1 %2156 }
 0x41b   : > { %9453 = vst [vmem:[#allocation88_spill] sm:$0xff] %v6855_v0  ;;  %v6857_v12 = vpop.permute.xlu0 %2096  ;;  %v3277_v0 = vrot.slane %v6987_v36, 2 }
 0x41c   : > { %9454 = vst [vmem:[#allocation34_spill] sm:$0xff] %v6857_v12  ;;  %2602 = vrot.lane.b32.xlu1 %v6692_v43, %s5125_s19  ;;  %v2956_v43 = vld [vmem:[%s9077_s5] ss:$8 sm:$0x3] }
 0x41d   : > { %2553 = vrot.lane.b32.xlu0 %v6476_v29, %s5125_s19 }
 0x41e   : > { %v6863_v25 = vpop.permute.xlu1 %2152 }
 0x41f   : > { %9455 = vst [vmem:[#allocation67_spill] sm:$0xff] %v6863_v25  ;;  %v6865_v41 = vpop.permute.xlu0 %2102 }
 0x420   : > { %9456 = vst [vmem:[#allocation41_spill] sm:$0xff] %v6865_v41  ;;  %2678 = vrot.lane.b32.xlu1 %v6701_v54, %s5125_s19 }
 0x421   : > { %2594 = vrot.lane.b32.xlu0 %v6479_v38, %s5125_s19 }
 0x422   : > { %v6871_v61 = vpop.permute.xlu1 %2106 }
 0x423   : > { %9457 = vst [vmem:[#allocation73_spill] sm:$0xff] %v6871_v61  ;;  %v6873_v17 = vpop.permute.xlu0 %2158  ;;  %v6923_v61 = vld [vmem:[#allocation2] sm:$0xff] }
 0x424   : > { %9458 = vst [vmem:[#allocation89_spill] sm:$0xff] %v6873_v17  ;;  %2674 = vrot.lane.b32.xlu1 %v6709_v60, %s5125_s19 }
 0x425   : > { %2559 = vrot.lane.b32.xlu0 %v6526_v50, %s5125_s19  ;;  %v4042_v50 = vld [vmem:[#allocation3 + $0x10] sm:$0xff] }
 0x426   : > { %v6879_v49 = vpop.permute.xlu1 %2212 }
 0x427   : > { %9459 = vst [vmem:[#allocation90_spill] sm:$0xff] %v6879_v49  ;;  %v6881_v2 = vpop.permute.xlu0 %2214  ;;  %v7019_v49 = vld [vmem:[#allocation2 + $0x30] sm:$0xf] }
 0x428   : > { %9460 = vst [vmem:[#allocation36_spill] sm:$0xff] %v6881_v2  ;;  %2643 = vrot.lane.b32.xlu1 %v6717_v27, %s5125_s19  ;;  %v3335_v52 = vrot.slane %v7019_v49, 3 }
 0x429   : > { %2635 = vrot.lane.b32.xlu0 %v6484_v57, %s5125_s19 }
 0x42a   : > { %v6887_v3 = vpop.permute.xlu1 %2208 }
 0x42b   : > { %9461 = vst [vmem:[#allocation68_spill] sm:$0xff] %v6887_v3  ;;  %v6889_v26 = vpop.permute.xlu0 %2270 }
 0x42c   : > { %9462 = vst [vmem:[#allocation43_spill] sm:$0xff] %v6889_v26  ;;  %2684 = vrot.lane.b32.xlu1 %v6725_v15, %s5125_s19 }
 0x42d   : > { %2600 = vrot.lane.b32.xlu0 %v6529_v48, %s5125_s19 }
 0x42e   : > { %v6895_v20 = vpop.permute.xlu1 %2162 }
 0x42f   : > { %9463 = vst [vmem:[#allocation13_spill] sm:$0xff] %v6895_v20  ;;  %v6897_v23 = vpop.permute.xlu0 %2352 }
 0x430   : > { %9464 = vst [vmem:[#allocation91_spill] sm:$0xff] %v6897_v23  ;;  %2760 = vrot.lane.b32.xlu1 %v6618_v7, %s5126_s20 }
 0x431   : > { %2676 = vrot.lane.b32.xlu0 %v6575_v19, %s5125_s19 }
 0x432   : > { %v6903_v6 = vpop.permute.xlu1 %2268 }
 0x433   : > { %9465 = vst [vmem:[#allocation92_spill] sm:$0xff] %v6903_v6  ;;  %v6905_v34 = vpop.permute.xlu0 %2393  ;;  %v3221_v6 = vrot.slane %v6987_v36, 1 }
 0x434   : > { %9466 = vst [vmem:[#allocation38_spill] sm:$0xff] %v6905_v34  ;;  %2756 = vrot.lane.b32.xlu1 %v6635_v40, %s5126_s20  ;;  %v3391_v34 = vrot.slane %v7019_v49, 4 }
 0x435   : > { %2641 = vrot.lane.b32.xlu0 %v6584_v21, %s5125_s19 }
 0x436   : > { %v6911_v4 = vpop.permute.xlu1 %2264 }
 0x437   : > { %9467 = vst [vmem:[#allocation70_spill] sm:$0xff] %v6911_v4  ;;  %v6913_v20 = vpop.permute.xlu0 %2434 }
 0x438   : > { %9468 = vst [vmem:[#allocation11_spill] sm:$0xff] %v6913_v20  ;;  %3174 = vrot.lane.b32.xlu1 %v6915_v56, %s5123_s22 }
 0x439   : > { %2682 = vrot.lane.b32.xlu0 %v6587_v28, %s5125_s19 }
 0x43a   : > { %v6921_v7 = vpop.permute.xlu1 %2218 }
 0x43b   : > { %9469 = vst [vmem:[#allocation45_spill] sm:$0xff] %v6921_v7  ;;  %v6925_v40 = vpop.permute.xlu0 %2475 }
 0x43c   : > { %9470 = vst [vmem:[#allocation76_spill] sm:$0xff] %v6925_v40  ;;  %3170 = vrot.lane.b32.xlu1 %v6923_v61, %s5123_s22  ;;  %v3383_v40 = vrot.slane %v6945_v24, 4 }
 0x43d   : > { %2758 = vrot.lane.b32.xlu0 %v6476_v29, %s5126_s20 }
 0x43e   : > { %v6931_v9 = vpop.permute.xlu1 %2274 }
 0x43f   : > { %9471 = vst [vmem:[#allocation75_spill] sm:$0xff] %v6931_v9  ;;  %v6933_v42 = vpop.permute.xlu0 %2557 }
 0x440   : > { %9472 = vst [vmem:[#allocation93_spill] sm:$0xff] %v6933_v42  ;;  %3442 = vrot.lane.b32.xlu1 %v6915_v56, %s5124_s17 }
 0x441   : > { %3172 = vrot.lane.b32.xlu0 %v6937_v10, %s5123_s22 }
 0x442   : > { %v6941_v7 = vpop.permute.xlu1 %2350 }
 0x443   : > { %9473 = vst [vmem:[#allocation40_spill] sm:$0xff] %v6941_v7  ;;  %v6943_v35 = vpop.permute.xlu0 %2598 }
 0x444   : > { %9474 = vst [vmem:[#allocation72_spill] sm:$0xff] %v6943_v35  ;;  %3438 = vrot.lane.b32.xlu1 %v6923_v61, %s5124_s17 }
 0x445   : > { %3176 = vrot.lane.b32.xlu0 %v6945_v24, %s5123_s22 }
 0x446   : > { %v6951_v29 = vpop.permute.xlu1 %2346 }
 0x447   : > { %9475 = vst [vmem:[#allocation94_spill] sm:$0xff] %v6951_v29  ;;  %v6953_v9 = vpop.permute.xlu0 %2639 }
 0x448   : > { %9476 = vst [vmem:[#allocation9_spill] sm:$0xff] %v6953_v9  ;;  %3647 = vrot.lane.b32.xlu1 %v6915_v56, %s5125_s19  ;;  %v3214_v9 = vrot.slane %v6923_v61, 1 }
 0x449   : > { %3440 = vrot.lane.b32.xlu0 %v6937_v10, %s5124_s17 }
 0x44a   : > { %v6959_v4 = vpop.permute.xlu1 %2391 }
 0x44b   : > { %9477 = vst [vmem:[#allocation14_spill] sm:$0xff] %v6959_v4  ;;  %v6961_v7 = vpop.permute.xlu0 %2680 }
 0x44c   : > { %9478 = vst [vmem:[#allocation47_spill] sm:$0xff] %v6961_v7  ;;  %3643 = vrot.lane.b32.xlu1 %v6923_v61, %s5125_s19 }
 0x44d   : > { %3444 = vrot.lane.b32.xlu0 %v6945_v24, %s5124_s17 }
 0x44e   : > { %v6967_v3 = vpop.permute.xlu1 %2387 }
 0x44f   : > { %9479 = vst [vmem:[#allocation42_spill] sm:$0xff] %v6967_v3  ;;  %v6969_v29 = vpop.permute.xlu0 %2098 }
 0x450   : > { %9480 = vst [vmem:[#allocation12_spill] sm:$0xff] %v6969_v29  ;;  %3852 = vrot.lane.b32.xlu1 %v6915_v56, %s5126_s20  ;;  %v3271_v29 = vrot.slane %v6945_v24, 2 }
 0x451   : > { %3645 = vrot.lane.b32.xlu0 %v6937_v10, %s5125_s19 }
 0x452   : > { %v6975_v62 = vpop.permute.xlu1 %2356 }
 0x453   : > { %9481 = vst [vmem:[#allocation78_spill] sm:$0xff] %v6975_v62  ;;  %v6977_v4 = vpop.permute.xlu0 %2154 }
 0x454   : > { %9482 = vst [vmem:[#allocation49_spill] sm:$0xff] %v6977_v4  ;;  %3848 = vrot.lane.b32.xlu1 %v6923_v61, %s5126_s20 }
 0x455   : > { %3649 = vrot.lane.b32.xlu0 %v6945_v24, %s5125_s19 }
 0x456   : > { %v6983_v25 = vpop.permute.xlu1 %2432 }
 0x457   : > { %9483 = vst [vmem:[#allocation21_spill] sm:$0xff] %v6983_v25  ;;  %v6985_v3 = vpop.permute.xlu0 %2104 }
 0x458   : > { %9484 = vst [vmem:[#allocation19_spill] sm:$0xff] %v6985_v3  ;;  %3180 = vrot.lane.b32.xlu1 %v6987_v36, %s5123_s22 }
 0x459   : > { %3850 = vrot.lane.b32.xlu0 %v6937_v10, %s5126_s20 }
 0x45a   : > { %v6993_v62 = vpop.permute.xlu1 %2428 }
 0x45b   : > { %9485 = vst [vmem:[#allocation53_spill] sm:$0xff] %v6993_v62  ;;  %v6995_v55 = vpop.permute.xlu0 %2210  ;;  %v3220_v62 = vrot.slane %v6915_v56, 1 }
 0x45c   : > { %9486 = vst [vmem:[#allocation44_spill] sm:$0xff] %v6995_v55  ;;  %3448 = vrot.lane.b32.xlu1 %v6987_v36, %s5124_s17 }
 0x45d   : > { %3178 = vrot.lane.b32.xlu0 %v6549_v13, %s5123_s22  ;;  %v7016_v55 = vsel %vm532_vm9, %v3220_v62, %v3221_v6 }
 0x45e   : > { %v7001_v25 = vpop.permute.xlu1 %2397 }
 0x45f   : > { %9487 = vst [vmem:[#allocation17_spill] sm:$0xff] %v7001_v25  ;;  %v7003_v12 = vpop.permute.xlu0 %2160  ;;  %v3215_v25 = vrot.slane %v6945_v24, 1 }
 0x460   : > { %9488 = vst [vmem:[#allocation16_spill] sm:$0xff] %v7003_v12  ;;  %3653 = vrot.lane.b32.xlu1 %v6987_v36, %s5125_s19 }
 0x461   : > { %3446 = vrot.lane.b32.xlu0 %v6549_v13, %s5124_s17  ;;  %v7032_v62 = vsel %vm532_vm9, %v3214_v9, %v3215_v25  ;;  %v3279_v9 = vrot.slane %v7019_v49, 2 }
 0x462   : > { %v7011_v7 = vpop.permute.xlu1 %2473 }
 0x463   : > { %9489 = vst [vmem:[#allocation46_spill] sm:$0xff] %v7011_v7  ;;  %v7013_v11 = vpop.permute.xlu0 %2266  ;;  %v3223_v7 = vrot.slane %v7019_v49, 1 }
 0x464   : > { %9490 = vst [vmem:[#allocation77_spill] sm:$0xff] %v7013_v11  ;;  %3233 = vrot.lane.b32.xlu1 %v7016_v55, %s5123_s22 }
 0x465   : > { %3651 = vrot.lane.b32.xlu0 %v6549_v13, %s5125_s19  ;;  %v7038_v35 = vsel %vm532_vm9, %v3215_v25, %v3223_v7  ;;  %v7055_v25 = vsel %vm576_vm10, %v3271_v29, %v3279_v9  ;;  %v3327_v7 = vrot.slane %v6945_v24, 3 }
 0x466   : > { %v7026_v4 = vpop.permute.xlu1 %2469  ;;  %9493 = vst [vmem:[#allocation96_spill] sm:$0xff] %v7038_v35  ;;  %9496 = vst [vmem:[#allocation99_spill] sm:$0xff] %v7055_v25 }
 0x467   : > { %9491 = vst [vmem:[#allocation57_spill] sm:$0xff] %v7026_v4  ;;  %v7029_v11 = vpop.permute.xlu0 %2216  ;;  %v3276_v4 = vrot.slane %v6915_v56, 2  ;;  %v7072_v9 = vsel %vm620_vm11, %v3327_v7, %v3335_v52  ;;  %v7089_v52 = vsel %vm664_vm12, %v3383_v40, %v3391_v34  ;;  %v3326_v34 = vrot.slane %v6923_v61, 3 }
 0x468   : > { %9492 = vst [vmem:[#allocation95_spill] sm:$0xff] %v7029_v11  ;;  %3229 = vrot.lane.b32.xlu1 %v7032_v62, %s5123_s22  ;;  %9500 = vst [vmem:[#allocation103_spill] sm:$0xff] %v7072_v9 }
 0x469   : > { %3235 = vrot.lane.b32.xlu0 %v7038_v35, %s5123_s22  ;;  %v7050_v14 = vsel %vm576_vm10, %v3276_v4, %v3277_v0  ;;  %9504 = vst [vmem:[#allocation107_spill] sm:$0xff] %v7089_v52  ;;  %v7111_v63 = vsel %vm620_vm11, %v3326_v34, %v3327_v7  ;;  %v3388_v7 = vrot.slane %v6915_v56, 4 }
 0x46a   : > { %v7044_v22 = vpop.permute.xlu1 %2438  ;;  %9510 = vst [vmem:[#allocation113_spill] sm:$0xff] %v7111_v63 }
 0x46b   : > { %9494 = vst [vmem:[#allocation97_spill] sm:$0xff] %v7044_v22  ;;  %v7047_v42 = vpop.permute.xlu0 %2272  ;;  %v3270_v22 = vrot.slane %v6923_v61, 2 }
 0x46c   : > { %9495 = vst [vmem:[#allocation98_spill] sm:$0xff] %v7047_v42  ;;  %3289 = vrot.lane.b32.xlu1 %v7050_v14, %s5123_s22 }
 0x46d   : > { %3291 = vrot.lane.b32.xlu0 %v7055_v25, %s5123_s22  ;;  %v7067_v47 = vsel %vm576_vm10, %v3270_v22, %v3271_v29  ;;  %v3333_v29 = vrot.slane %v6987_v36, 3 }
 0x46e   : > { %v7061_v46 = vpop.permute.xlu1 %2479  ;;  %9499 = vst [vmem:[#allocation102_spill] sm:$0xff] %v7067_v47 }
 0x46f   : > { %9497 = vst [vmem:[#allocation100_spill] sm:$0xff] %v7061_v46  ;;  %v7064_v4 = vpop.permute.xlu0 %2348  ;;  %v3227_v46 = vrot.slane %v3150_v30, 1 }
 0x470   : > { %9498 = vst [vmem:[#allocation101_spill] sm:$0xff] %v7064_v4  ;;  %3285 = vrot.lane.b32.xlu1 %v7067_v47, %s5123_s22 }
 0x471   : > { %3347 = vrot.lane.b32.xlu0 %v7072_v9, %s5123_s22  ;;  %v7083_v22 = vsel %vm532_vm9, %v3221_v6, %v3227_v46 }
 0x472   : > { %v7077_v20 = vpop.permute.xlu1 %2555  ;;  %9503 = vst [vmem:[#allocation106_spill] sm:$0xff] %v7083_v22 }
 0x473   : > { %9501 = vst [vmem:[#allocation104_spill] sm:$0xff] %v7077_v20  ;;  %v7080_v4 = vpop.permute.xlu0 %2389  ;;  %v3332_v20 = vrot.slane %v6915_v56, 3 }
 0x474   : > { %9502 = vst [vmem:[#allocation105_spill] sm:$0xff] %v7080_v4  ;;  %3239 = vrot.lane.b32.xlu1 %v7083_v22, %s5123_s22 }
 0x475   : > { %3403 = vrot.lane.b32.xlu0 %v7089_v52, %s5123_s22  ;;  %v7099_v6 = vsel %vm620_vm11, %v3332_v20, %v3333_v29  ;;  %v3283_v20 = vrot.slane %v3150_v30, 2 }
 0x476   : > { %v7094_v23 = vpop.permute.xlu1 %2551  ;;  %9507 = vst [vmem:[#allocation110_spill] sm:$0xff] %v7099_v6 }
 0x477   : > { %9505 = vst [vmem:[#allocation108_spill] sm:$0xff] %v7094_v23  ;;  %v7096_v32 = vpop.permute.xlu0 %2354  ;;  %v7122_v26 = vsel %vm576_vm10, %v3277_v0, %v3283_v20  ;;  %v3382_v0 = vrot.slane %v6923_v61, 4 }
 0x478   : > { %9506 = vst [vmem:[#allocation109_spill] sm:$0xff] %v7096_v32  ;;  %3345 = vrot.lane.b32.xlu1 %v7099_v6, %s5123_s22  ;;  %9513 = vst [vmem:[#allocation116_spill] sm:$0xff] %v7122_v26 }
 0x479   : > { %3485 = vrot.lane.b32.xlu0 %v7038_v35, %s5124_s17  ;;  %v7147_v56 = vsel %vm664_vm12, %v3382_v0, %v3383_v40  ;;  %v3395_v40 = vrot.slane %v3150_v30, 4 }
 0x47a   : > { %v7106_v46 = vpop.permute.xlu1 %2596  ;;  %9519 = vst [vmem:[#allocation122_spill] sm:$0xff] %v7147_v56 }
 0x47b   : > { %9508 = vst [vmem:[#allocation111_spill] sm:$0xff] %v7106_v46  ;;  %v7108_v4 = vpop.permute.xlu0 %2430  ;;  %v3389_v46 = vrot.slane %v6987_v36, 4 }
 0x47c   : > { %9509 = vst [vmem:[#allocation112_spill] sm:$0xff] %v7108_v4  ;;  %3341 = vrot.lane.b32.xlu1 %v7111_v63, %s5123_s22 }
 0x47d   : > { %3526 = vrot.lane.b32.xlu0 %v7055_v25, %s5124_s17 }
 0x47e   : > { %v7117_v23 = vpop.permute.xlu1 %2592 }
 0x47f   : > { %9511 = vst [vmem:[#allocation114_spill] sm:$0xff] %v7117_v23  ;;  %v7119_v32 = vpop.permute.xlu0 %2395  ;;  %v7135_v23 = vsel %vm664_vm12, %v3388_v7, %v3389_v46  ;;  %v3339_v7 = vrot.slane %v3150_v30, 3  ;;  %v3217_v30 = vrot.slane %v6937_v10, 1 }
 0x480   : > { %9512 = vst [vmem:[#allocation115_spill] sm:$0xff] %v7119_v32  ;;  %3295 = vrot.lane.b32.xlu1 %v7122_v26, %s5123_s22  ;;  %9516 = vst [vmem:[#allocation119_spill] sm:$0xff] %v7135_v23 }
 0x481   : > { %3567 = vrot.lane.b32.xlu0 %v7072_v9, %s5124_s17  ;;  %v7158_v42 = vsel %vm620_vm11, %v3333_v29, %v3339_v7 }
 0x482   : > { %v7130_v34 = vpop.permute.xlu1 %2561  ;;  %9522 = vst [vmem:[#allocation125_spill] sm:$0xff] %v7158_v42 }
 0x483   : > { %9514 = vst [vmem:[#allocation117_spill] sm:$0xff] %v7130_v34  ;;  %v7132_v4 = vpop.permute.xlu0 %2471 }
 0x484   : > { %9515 = vst [vmem:[#allocation118_spill] sm:$0xff] %v7132_v4  ;;  %3401 = vrot.lane.b32.xlu1 %v7135_v23, %s5123_s22 }
 0x485   : > { %3608 = vrot.lane.b32.xlu0 %v7089_v52, %s5124_s17 }
 0x486   : > { %v7142_v20 = vpop.permute.xlu1 %2637 }
 0x487   : > { %9517 = vst [vmem:[#allocation120_spill] sm:$0xff] %v7142_v20  ;;  %v7144_v32 = vpop.permute.xlu0 %2436 }
 0x488   : > { %9518 = vst [vmem:[#allocation121_spill] sm:$0xff] %v7144_v32  ;;  %3397 = vrot.lane.b32.xlu1 %v7147_v56, %s5123_s22  ;;  %v7169_v32 = vsel %vm664_vm12, %v3389_v46, %v3395_v40 }
 0x489   : > { %3690 = vrot.lane.b32.xlu0 %v7038_v35, %s5125_s19  ;;  %9525 = vst [vmem:[#allocation128_spill] sm:$0xff] %v7169_v32 }
 0x48a   : > { %v7153_v34 = vpop.permute.xlu1 %2633 }
 0x48b   : > { %9520 = vst [vmem:[#allocation123_spill] sm:$0xff] %v7153_v34  ;;  %v7155_v4 = vpop.permute.xlu0 %2477 }
 0x48c   : > { %9521 = vst [vmem:[#allocation124_spill] sm:$0xff] %v7155_v4  ;;  %3351 = vrot.lane.b32.xlu1 %v7158_v42, %s5123_s22 }
 0x48d   : > { %3731 = vrot.lane.b32.xlu0 %v7055_v25, %s5125_s19 }
 0x48e   : > { %v7164_v0 = vpop.permute.xlu1 %2602 }
 0x48f   : > { %9523 = vst [vmem:[#allocation126_spill] sm:$0xff] %v7164_v0  ;;  %v7166_v20 = vpop.permute.xlu0 %2553  ;;  %v3218_v0 = vrot.slane %v6549_v13, 1 }
 0x490   : > { %9524 = vst [vmem:[#allocation127_spill] sm:$0xff] %v7166_v20  ;;  %3407 = vrot.lane.b32.xlu1 %v7169_v32, %s5123_s22  ;;  %v7198_v20 = vld [vmem:[#allocation2 + $0x38] sm:$0xf] }
 0x491   : > { %3772 = vrot.lane.b32.xlu0 %v7072_v9, %s5125_s19  ;;  %v7192_v34 = vsel %vm532_vm9, %v3217_v30, %v3218_v0  ;;  %v3225_v30 = vrot.slane %v7198_v20, 1  ;;  %v3393_v3 = vrot.slane %v7198_v20, 4 }
 0x492   : > { %v7175_v29 = vpop.permute.xlu1 %2678 }
 0x493   : > { %9526 = vst [vmem:[#allocation129_spill] sm:$0xff] %v7175_v29  ;;  %v7177_v7 = vpop.permute.xlu0 %2594  ;;  %v3273_v29 = vrot.slane %v6937_v10, 2 }
 0x494   : > { %9527 = vst [vmem:[#allocation130_spill] sm:$0xff] %v7177_v7  ;;  %3483 = vrot.lane.b32.xlu1 %v7016_v55, %s5124_s17  ;;  %v3274_v7 = vrot.slane %v6549_v13, 2 }
 0x495   : > { %3813 = vrot.lane.b32.xlu0 %v7089_v52, %s5125_s19 }
 0x496   : > { %v7185_v46 = vpop.permute.xlu1 %2674 }
 0x497   : > { %9528 = vst [vmem:[#allocation131_spill] sm:$0xff] %v7185_v46  ;;  %v7187_v40 = vpop.permute.xlu0 %2559 }
 0x498   : > { %9529 = vst [vmem:[#allocation132_spill] sm:$0xff] %v7187_v40  ;;  %3479 = vrot.lane.b32.xlu1 %v7032_v62, %s5124_s17  ;;  %v7207_v40 = vsel %vm576_vm10, %v3273_v29, %v3274_v7  ;;  %v3330_v29 = vrot.slane %v6549_v13, 3 }
 0x499   : > { %3231 = vrot.lane.b32.xlu0 %v7192_v34, %s5123_s22 }
 0x49a   : > { %v7200_v4 = vpop.permute.xlu1 %2643 }
 0x49b   : > { %9530 = vst [vmem:[#allocation133_spill] sm:$0xff] %v7200_v4  ;;  %v7202_v46 = vpop.permute.xlu0 %2635  ;;  %v7219_v4 = vsel %vm532_vm9, %v3218_v0, %v3225_v30  ;;  %v3281_v0 = vrot.slane %v7198_v20, 2 }
 0x49c   : > { %9531 = vst [vmem:[#allocation134_spill] sm:$0xff] %v7202_v46  ;;  %3524 = vrot.lane.b32.xlu1 %v7050_v14, %s5124_s17  ;;  %9534 = vst [vmem:[#allocation137_spill] sm:$0xff] %v7219_v4  ;;  %v3329_v46 = vrot.slane %v6937_v10, 3 }
 0x49d   : > { %3287 = vrot.lane.b32.xlu0 %v7207_v40, %s5123_s22 }
 0x49e   : > { %v7212_v2 = vpop.permute.xlu1 %2684 }
 0x49f   : > { %9532 = vst [vmem:[#allocation135_spill] sm:$0xff] %v7212_v2  ;;  %v7214_v11 = vpop.permute.xlu0 %2600  ;;  %v7232_v2 = vsel %vm620_vm11, %v3329_v46, %v3330_v29  ;;  %v3386_v46 = vrot.slane %v6549_v13, 4 }
 0x4a0   : > { %9533 = vst [vmem:[#allocation136_spill] sm:$0xff] %v7214_v11  ;;  %3520 = vrot.lane.b32.xlu1 %v7067_v47, %s5124_s17  ;;  %9537 = vst [vmem:[#allocation140_spill] sm:$0xff] %v7232_v2 }
 0x4a1   : > { %3237 = vrot.lane.b32.xlu0 %v7219_v4, %s5123_s22 }
 0x4a2   : > { %v7225_v31 = vpop.permute.xlu1 %2760 }
 0x4a3   : > { %9535 = vst [vmem:[#allocation138_spill] sm:$0xff] %v7225_v31  ;;  %v7227_v17 = vpop.permute.xlu0 %2676  ;;  %v7244_v31 = vsel %vm576_vm10, %v3274_v7, %v3281_v0  ;;  %v3337_v7 = vrot.slane %v7198_v20, 3 }
 0x4a4   : > { %9536 = vst [vmem:[#allocation139_spill] sm:$0xff] %v7227_v17  ;;  %3489 = vrot.lane.b32.xlu1 %v7083_v22, %s5124_s17  ;;  %9540 = vst [vmem:[#allocation143_spill] sm:$0xff] %v7244_v31  ;;  %v3385_v17 = vrot.slane %v6937_v10, 4 }
 0x4a5   : > { %3343 = vrot.lane.b32.xlu0 %v7232_v2, %s5123_s22 }
 0x4a6   : > { %v7237_v30 = vpop.permute.xlu1 %2756 }
 0x4a7   : > { %9538 = vst [vmem:[#allocation141_spill] sm:$0xff] %v7237_v30  ;;  %v7239_v11 = vpop.permute.xlu0 %2641  ;;  %v7257_v30 = vsel %vm664_vm12, %v3385_v17, %v3386_v46 }
 0x4a8   : > { %9539 = vst [vmem:[#allocation142_spill] sm:$0xff] %v7239_v11  ;;  %3565 = vrot.lane.b32.xlu1 %v7099_v6, %s5124_s17  ;;  %9542 = vst [vmem:[#allocation145_spill] sm:$0xff] %v7257_v30 }
 0x4a9   : > { %3293 = vrot.lane.b32.xlu0 %v7244_v31, %s5123_s22 }
 0x4aa   : > { %v7250_v12 = vpop.permute.xlu1 %3174 }
 0x4ab   : > { %v7252_v41 = vpop.permute.xlu0 %2682 }
 0x4ac   : > { %9541 = vst [vmem:[#allocation144_spill] sm:$0xff] %v7252_v41  ;;  %3561 = vrot.lane.b32.xlu1 %v7111_v63, %s5124_s17  ;;  %v7269_v41 = vsel %vm620_vm11, %v3330_v29, %v3337_v7 }
 0x4ad   : > { %3399 = vrot.lane.b32.xlu0 %v7257_v30, %s5123_s22  ;;  %9544 = vst [vmem:[#allocation147_spill] sm:$0xff] %v7269_v41 }
 0x4ae   : > { %v7262_v0 = vpop.permute.xlu1 %3170 }
 0x4af   : > { %v7264_v11 = vpop.permute.xlu0 %2758 }
 0x4b0   : > { %9543 = vst [vmem:[#allocation146_spill] sm:$0xff] %v7264_v11  ;;  %3530 = vrot.lane.b32.xlu1 %v7122_v26, %s5124_s17  ;;  %v7281_v11 = vsel %vm664_vm12, %v3386_v46, %v3393_v3 }
 0x4b1   : > { %3349 = vrot.lane.b32.xlu0 %v7269_v41, %s5123_s22  ;;  %9546 = vst [vmem:[#allocation149_spill] sm:$0xff] %v7281_v11 }
 0x4b2   : > { %v7274_v17 = vpop.permute.xlu1 %3442 }
 0x4b3   : > { %9545 = vst [vmem:[#allocation148_spill] sm:$0xff] %v7274_v17  ;;  %v7276_v1 = vpop.permute.xlu0 %3172 }
 0x4b4   : > { %3606 = vrot.lane.b32.xlu1 %v7135_v23, %s5124_s17 }
 0x4b5   : > { %3405 = vrot.lane.b32.xlu0 %v7281_v11, %s5123_s22  ;;  %s4629_s22 = sshll.u32 %s311_s21, 4 }
 0x4b6   : > { %v7285_v29 = vpop.permute.xlu1 %3438 }
 0x4b7   : > { %9547 = vst [vmem:[#allocation150_spill] sm:$0xff] %v7285_v29  ;;  %v7287_v7 = vpop.permute.xlu0 %3176 }
 0x4b8   : > { %3602 = vrot.lane.b32.xlu1 %v7147_v56, %s5124_s17 }
 0x4b9   : > { %3481 = vrot.lane.b32.xlu0 %v7192_v34, %s5124_s17 }
 0x4ba   : > { %v7293_v52 = vpop.permute.xlu1 %3647 }
 0x4bb   : > { %9548 = vst [vmem:[#allocation151_spill] sm:$0xff] %v7293_v52  ;;  %v7295_v58 = vpop.permute.xlu0 %3440 }
 0x4bc   : > { %9549 = vst [vmem:[#allocation152_spill] sm:$0xff] %v7295_v58  ;;  %3571 = vrot.lane.b32.xlu1 %v7158_v42, %s5124_s17 }
 0x4bd   : > { %3522 = vrot.lane.b32.xlu0 %v7207_v40, %s5124_s17 }
 0x4be   : > { %v7301_v3 = vpop.permute.xlu1 %3643 }
 0x4bf   : > { %9550 = vst [vmem:[#allocation153_spill] sm:$0xff] %v7301_v3  ;;  %v7303_v46 = vpop.permute.xlu0 %3444 }
 0x4c0   : > { %9551 = vst [vmem:[#allocation154_spill] sm:$0xff] %v7303_v46  ;;  %3612 = vrot.lane.b32.xlu1 %v7169_v32, %s5124_s17  ;;  %v4691_v46 = vld [vmem:[%s9077_s5 + $0x12] ss:$8 sm:$0x3] }
 0x4c1   : > { %3487 = vrot.lane.b32.xlu0 %v7219_v4, %s5124_s17 }
 0x4c2   : > { %v7309_v8 = vpop.permute.xlu1 %3852 }
 0x4c3   : > { %9552 = vst [vmem:[#allocation155_spill] sm:$0xff] %v7309_v8  ;;  %v7311_v28 = vpop.permute.xlu0 %3645 }
 0x4c4   : > { %9553 = vst [vmem:[#allocation156_spill] sm:$0xff] %v7311_v28  ;;  %3688 = vrot.lane.b32.xlu1 %v7016_v55, %s5125_s19 }
 0x4c5   : > { %3563 = vrot.lane.b32.xlu0 %v7232_v2, %s5124_s17 }
 0x4c6   : > { %v7317_v15 = vpop.permute.xlu1 %3848 }
 0x4c7   : > { %9554 = vst [vmem:[#allocation157_spill] sm:$0xff] %v7317_v15  ;;  %v7319_v5 = vpop.permute.xlu0 %3649 }
 0x4c8   : > { %9555 = vst [vmem:[#allocation158_spill] sm:$0xff] %v7319_v5  ;;  %3684 = vrot.lane.b32.xlu1 %v7032_v62, %s5125_s19 }
 0x4c9   : > { %3528 = vrot.lane.b32.xlu0 %v7244_v31, %s5124_s17 }
 0x4ca   : > { %v7325_v9 = vpop.permute.xlu1 %3180 }
 0x4cb   : > { %v7327_v8 = vpop.permute.xlu0 %3850 }
 0x4cc   : > { %9556 = vst [vmem:[#allocation159_spill] sm:$0xff] %v7327_v8  ;;  %3729 = vrot.lane.b32.xlu1 %v7050_v14, %s5125_s19 }
 0x4cd   : > { %3604 = vrot.lane.b32.xlu0 %v7257_v30, %s5124_s17 }
 0x4ce   : > { %v7333_v52 = vpop.permute.xlu1 %3448 }
 0x4cf   : > { %9557 = vst [vmem:[#allocation160_spill] sm:$0xff] %v7333_v52  ;;  %v7335_v15 = vpop.permute.xlu0 %3178 }
 0x4d0   : > { %3725 = vrot.lane.b32.xlu1 %v7067_v47, %s5125_s19 }
 0x4d1   : > { %3569 = vrot.lane.b32.xlu0 %v7269_v41, %s5124_s17 }
 0x4d2   : > { %v7341_v5 = vpop.permute.xlu1 %3653 }
 0x4d3   : > { %9558 = vst [vmem:[#allocation161_spill] sm:$0xff] %v7341_v5  ;;  %v7343_v3 = vpop.permute.xlu0 %3446 }
 0x4d4   : > { %9559 = vst [vmem:[#allocation162_spill] sm:$0xff] %v7343_v3  ;;  %3694 = vrot.lane.b32.xlu1 %v7083_v22, %s5125_s19 }
 0x4d5   : > { %3610 = vrot.lane.b32.xlu0 %v7281_v11, %s5124_s17  ;;  %s313_s17 = scalar_lea.vmem [#allocation6], %s4629_s22 }
 0x4d6   : > { %v7349_v8 = vpop.permute.xlu1 %3233  ;;  %s4549_s10 = sshll.u32 %s313_s17, 4  ;;  %s9023_s10 = int_to_ptr.vmem [resolvable:$true] %s4549_s10 }
 0x4d7   : > { %v7351_v28 = vpop.permute.xlu0 %3651  ;;  %p5057_p2 = scmp.lt.s32.totalorder %s9023_s10, %s5055_s25 }
 0x4d8   : > { %9560 = vst [vmem:[#allocation163_spill] sm:$0xff] %v7351_v28  ;;  %3770 = vrot.lane.b32.xlu1 %v7099_v6, %s5125_s19  ;;  %v4690_v28 = vld [vmem:[%s9077_s5 + $0x5] ss:$8 sm:$0x3] }
 0x4d9   : > { %3686 = vrot.lane.b32.xlu0 %v7192_v34, %s5125_s19  ;;  %v7381_v60 = vrot.slane %v4690_v28, %v9408_v53 }
 0x4da   : > { %v7357_v21 = vpop.permute.xlu1 %3229 }
 0x4db   : > { %v7359_v5 = vpop.permute.xlu0 %3235  ;;  %v2990_v54 = vmul.f32 %v7381_v60, %v6937_v10  ;;  %v7405_v48 = vmul.f32 %v7381_v60, %v6549_v13 }
 0x4dc   : > { %9561 = vst [vmem:[#allocation164_spill] sm:$0xff] %v7359_v5  ;;  %3766 = vrot.lane.b32.xlu1 %v7111_v63, %s5125_s19 }
 0x4dd   : > { %3727 = vrot.lane.b32.xlu0 %v7207_v40, %s5125_s19  ;;  %v3004_v35 = vrot.slane %v2990_v54, 1  ;;  %v9574_v22 = vrot.slane %v7405_v48, 1 }
 0x4de   : > { %v7365_v27 = vpop.permute.xlu1 %3289 }
 0x4df   : > { %9562 = vst [vmem:[#allocation165_spill] sm:$0xff] %v7365_v27  ;;  %v7367_v39 = vpop.permute.xlu0 %3291 }
 0x4e0   : > { %9563 = vst [vmem:[#allocation166_spill] sm:$0xff] %v7367_v39  ;;  %3735 = vrot.lane.b32.xlu1 %v7122_v26, %s5125_s19  ;;  %v9566_v26 = vld [vmem:[#allocation54_spill] sm:$0xff] }
 0x4e1   : > { %3692 = vrot.lane.b32.xlu0 %v7219_v4, %s5125_s19  ;;  %v7388_v52 = vrot.slane %v4690_v28, %v9566_v26  ;;  %v7410_v28 = vrot.slane %v4691_v46, %v9408_v53  ;;  %v7420_v17 = vrot.slane %v4691_v46, %v9566_v26  ;;  %v4693_v46 = vld [vmem:[%s9077_s5 + $0x24] ss:$8 sm:$0x3]  ;;  %v7441_v45 = vrot.slane %v2956_v43, %v9566_v26 }
 0x4e2   : > { %v7376_v25 = vpop.permute.xlu1 %3285  ;;  %v7465_v6 = vrot.slane %v4693_v46, %v9566_v26  ;;  %v7468_v39 = vrot.slane %v4693_v46, %v9408_v53 }
 0x4e3   : > { %9564 = vst [vmem:[#allocation167_spill] sm:$0xff] %v7376_v25  ;;  %v7378_v18 = vpop.permute.xlu0 %3347  ;;  %v3033_v54 = vmul.f32 %v7410_v28, %v6937_v10  ;;  %v7450_v63 = vmul.f32 %v7410_v28, %v6549_v13  ;;  %v2968_v46 = vmul.f32 %v7441_v45, %v6923_v61 }
 0x4e4   : > { %9565 = vst [vmem:[#allocation168_spill] sm:$0xff] %v7378_v18  ;;  %3811 = vrot.lane.b32.xlu1 %v7135_v23, %s5125_s19  ;;  %v7401_v23 = vmul.f32 %v7388_v52, %v6945_v24  ;;  %v7433_v18 = vmul.f32 %v7420_v17, %v6945_v24 }
 0x4e5   : > { %3768 = vrot.lane.b32.xlu0 %v7232_v2, %s5125_s19 }
 0x4e6   : > { %v7393_v3 = vpop.permute.xlu1 %3239 }
 0x4e7   : > { %9567 = vst [vmem:[#allocation54_spill] sm:$0xff] %v7393_v3  ;;  %v7395_v19 = vpop.permute.xlu0 %3403 }
 0x4e8   : > { %9568 = vst [vmem:[#allocation169_spill] sm:$0xff] %v7395_v19  ;;  %3807 = vrot.lane.b32.xlu1 %v7147_v56, %s5125_s19  ;;  %v2989_v19 = vmul.f32 %v7388_v52, %v6923_v61  ;;  %v4692_v56 = vld [vmem:[%s9077_s5 + $0x17] ss:$8 sm:$0x3] }
 0x4e9   : > { %3733 = vrot.lane.b32.xlu0 %v7244_v31, %s5125_s19  ;;  %v7457_v33 = vrot.slane %v4692_v56, %v9566_v26 }
 0x4ea   : > { %v7422_v29 = vpop.permute.xlu1 %3345  ;;  %v3001_v31 = vrot.slane %v2989_v19, 1  ;;  %v9573_v19 = vrot.slane %v7401_v23, 1 }
 0x4eb   : > { %9569 = vst [vmem:[#allocation170_spill] sm:$0xff] %v7422_v29  ;;  %v7427_v58 = vpop.permute.xlu0 %3485  ;;  %v3006_v29 = vsel %vm532_vm9, %v3004_v35, %v9574_v22  ;;  %v4041_v35 = vld [vmem:[#allocation3 + $0x8] sm:$0xff]  ;;  %v4043_v22 = vld [vmem:[#allocation3 + $0x18] sm:$0xff]  ;;  %v3075_v59 = vmul.f32 %v7457_v33, %v6923_v61 }
 0x4ec   : > { %9570 = vst [vmem:[#allocation171_spill] sm:$0xff] %v7427_v58  ;;  %3776 = vrot.lane.b32.xlu1 %v7158_v42, %s5125_s19  ;;  %v7444_v58 = vrot.slane %v2956_v43, %v9408_v53  ;;  %v3032_v42 = vmul.f32 %v7420_v17, %v6923_v61  ;;  %v7460_v43 = vrot.slane %v4692_v56, %v9408_v53  ;;  %v4040_v56 = vld [vmem:[#allocation3] sm:$0xff] }
 0x4ed   : > { %3809 = vrot.lane.b32.xlu0 %v7257_v30, %s5125_s19  ;;  %v3003_v30 = vsel %vm532_vm9, %v3001_v31, %v9573_v19  ;;  %v3047_v31 = vrot.slane %v3033_v54, 2  ;;  %v4775_v5 = vpack.c.bf16 %v4043_v22, %v4041_v35  ;;  %v4777_v27 = vpack.c.bf16 %v4042_v50, %v4040_v56  ;;  %v7525_v56 = vld [vmem:[#allocation2 + $0x20] sm:$0xff]  ;;  %v4105_v22 = vld [vmem:[#allocation3 + $0x208] sm:$0xff] }
 0x4ee   : > { %v7462_v2 = vpop.permute.xlu1 %3341  ;;  %v3044_v57 = vrot.slane %v3032_v42, 2  ;;  %v3015_v54 = vadd.f32 %v3003_v30, %v2968_v46  ;;  %v7500_v19 = vmul.f32 %v7460_v43, %v6549_v13  ;;  %v9576_v42 = vrot.slane %v7433_v18, 2  ;;  %v4047_v35 = vld [vmem:[#allocation3 + $0x38] sm:$0xff] }
 0x4ef   : > { %9571 = vst [vmem:[#allocation172_spill] sm:$0xff] %v7462_v2  ;;  %v7470_v4 = vpop.permute.xlu0 %3526  ;;  %v7481_v2 = vmul.f32 %v7457_v33, %v6945_v24  ;;  %4776 = vmatprep.subr.bf16.mxu0 %v4775_v5  ;;  %v9577_v13 = vrot.slane %v7450_v63, 2  ;;  %v7519_v50 = vmul.f32 %v7468_v39, %v6937_v10  ;;  %v3087_v30 = vrot.slane %v3075_v59, 3 }
 0x4f0   : > { %9572 = vst [vmem:[#allocation173_spill] sm:$0xff] %v7470_v4  ;;  %3817 = vrot.lane.b32.xlu1 %v7169_v32, %s5125_s19  ;;  %v2969_v4 = vmul.f32 %v7444_v58, %v6937_v10  ;;  %v3076_v32 = vmul.f32 %v7460_v43, %v6937_v10  ;;  %v3046_v25 = vsel %vm576_vm10, %v3044_v57, %v9576_v42 }
 0x4f1   : > { %3774 = vrot.lane.b32.xlu0 %v7269_v41, %s5125_s19  ;;  %v9189_v47 = vrot.slane %v7481_v2, 3  ;;  %v2994_v57 = vmul.f32 %v7381_v60, %v7198_v20  ;;  %4778 = vmatpush1.bf16.msra.mxu0 %v4777_v27  ;;  %v7529_v5 = vmul.f32 %v7525_v56, %v7468_v39  ;;  %v3058_v46 = vadd.f32 %v3046_v25, %v3015_v54  ;;  %v4107_v54 = vld [vmem:[#allocation3 + $0x218] sm:$0xff] }
 0x4f2   : > { %v7496_v3 = vpop.permute.xlu1 %3295  ;;  %v3016_v51 = vadd.f32 %v3006_v29, %v2969_v4  ;;  %v3049_v4 = vsel %vm576_vm10, %v3047_v31, %v9577_v13  ;;  %v3090_v29 = vrot.slane %v3076_v32, 3  ;;  %v3118_v27 = vmul.f32 %v7465_v6, %v6923_v61  ;;  %v4045_v32 = vld [vmem:[#allocation3 + $0x28] sm:$0xff]  ;;  %v4044_v61 = vld [vmem:[#allocation3 + $0x20] sm:$0xff]  ;;  %v4046_v13 = vld [vmem:[#allocation3 + $0x30] sm:$0xff] }
 0x4f3   : > { %9575 = vst [vmem:[#allocation174_spill] sm:$0xff] %v7496_v3  ;;  %v7502_v41 = vpop.permute.xlu0 %3567  ;;  %v7510_v3 = vmul.f32 %v7465_v6, %v6945_v24  ;;  %v3089_v42 = vsel %vm620_vm11, %v3087_v30, %v9189_v47  ;;  %v2970_v25 = vmul.f32 %v7441_v45, %v6945_v24  ;;  %v3009_v60 = vrot.slane %v2994_v57, 1  ;;  %v4104_v47 = vld [vmem:[#allocation3 + $0x200] sm:$0xff] }
 0x4f4   : > { %3893 = vrot.lane.b32.xlu1 %v7016_v55, %s5126_s20  ;;  %v2993_v55 = vmul.f32 %v7388_v52, %v7019_v49  ;;  %v3059_v31 = vadd.f32 %v3049_v4, %v3016_v51  ;;  %v4779_v51 = vpack.c.bf16 %v4047_v35, %v4045_v32  ;;  %v3133_v4 = vrot.slane %v7519_v50, 4  ;;  %v4106_v52 = vld [vmem:[#allocation3 + $0x210] sm:$0xff] }
 0x4f5   : > { %3815 = vrot.lane.b32.xlu0 %v7281_v11, %s5125_s19  ;;  %v4839_v11 = vpack.c.bf16 %v4107_v54, %v4105_v22  ;;  %v4781_v30 = vpack.c.bf16 %v4046_v13, %v4044_v61  ;;  %v4841_v35 = vpack.c.bf16 %v4106_v52, %v4104_v47  ;;  %v9579_v50 = vrot.slane %v7500_v19, 3  ;;  %v4051_v61 = vld [vmem:[#allocation3 + $0x58] sm:$0xff] }
 0x4f6   : > { %v7533_v10 = vpop.permute.xlu1 %3401  ;;  %v3007_v45 = vrot.slane %v2993_v55, 1  ;;  %4780 = vmatprep.subr.bf16.mxu0 %v4779_v51  ;;  %v3036_v22 = vmul.f32 %v7420_v17, %v7019_v49  ;;  %v4049_v55 = vld [vmem:[#allocation3 + $0x48] sm:$0xff]  ;;  %v9580_v47 = vrot.slane %v7401_v23, 1  ;;  %v4111_v17 = vld [vmem:[#allocation3 + $0x238] sm:$0xff]  ;;  %v9581_v51 = vrot.slane %v7405_v48, 1 }
 0x4f7   : > { %v7538_v59 = vpop.permute.xlu0 %3608  ;;  %v3092_v57 = vsel %vm620_vm11, %v3090_v29, %v9579_v50  ;;  %4840 = vmatprep.subr.bf16.mxu1 %v4839_v11  ;;  %4782 = vmatpush1.bf16.msra.mxu0 %v4781_v30  ;;  %v4783_v29 = vpack.c.bf16 %v4051_v61, %v4049_v55  ;;  %v2971_v11 = vmul.f32 %v7525_v56, %v7444_v58  ;;  %v4108_v30 = vld [vmem:[#allocation3 + $0x220] sm:$0xff]  ;;  %v9583_v50 = vrot.slane %v7529_v5, 4 }
 0x4f8   : > { %9578 = vst [vmem:[#allocation175_spill] sm:$0xff] %v7538_v59  ;;  %3889 = vrot.lane.b32.xlu1 %v7032_v62, %s5126_s20  ;;  %v7554_v62 = vmul.f32 %v7410_v28, %v7198_v20  ;;  %v4109_v28 = vld [vmem:[#allocation3 + $0x228] sm:$0xff]  ;;  %v7565_v13 = vadd.f32 %v3092_v57, %v3059_v31  ;;  %v3130_v59 = vrot.slane %v3118_v27, 4  ;;  %v3008_v52 = vsel %vm532_vm9, %v9580_v47, %v3007_v45  ;;  %v4110_v45 = vld [vmem:[#allocation3 + $0x230] sm:$0xff] }
 0x4f9   : > { %3891 = vrot.lane.b32.xlu0 %v7192_v34, %s5126_s20  ;;  %v3101_v34 = vadd.f32 %v3089_v42, %v3058_v46  ;;  %4842 = vmatpush1.bf16.msra.mxu1 %v4841_v35  ;;  %v4048_v46 = vld [vmem:[#allocation3 + $0x40] sm:$0xff]  ;;  %v4050_v42 = vld [vmem:[#allocation3 + $0x50] sm:$0xff]  ;;  %v3010_v31 = vsel %vm532_vm9, %v9581_v51, %v3009_v60  ;;  %v4843_v23 = vpack.c.bf16 %v4111_v17, %v4109_v28  ;;  %v3050_v28 = vrot.slane %v3036_v22, 2  ;;  %v4055_v17 = vld [vmem:[#allocation3 + $0x78] sm:$0xff] }
 0x4fa   : > { %v7556_v32 = vpop.permute.xlu1 %3397  ;;  %v4785_v27 = vpack.c.bf16 %v4050_v42, %v4048_v46  ;;  %v3135_v57 = vsel %vm664_vm12, %v3133_v4, %v9583_v50  ;;  %v4694_v48 = vld [vmem:[%s9077_s5 + $0x1] ss:$8 sm:$0x3]  ;;  %v3052_v58 = vrot.slane %v7554_v62, 2  ;;  %4784 = vmatprep.subr.bf16.mxu0 %v4783_v29  ;;  %v3017_v61 = vadd.f32 %v3008_v52, %v2970_v25  ;;  %v4053_v4 = vld [vmem:[#allocation3 + $0x68] sm:$0xff] }
 0x4fb   : > { %v7563_v54 = vpop.permute.xlu0 %3690  ;;  %4844 = vmatprep.subr.bf16.mxu1 %v4843_v23  ;;  %v4113_v46 = vld [vmem:[#allocation3 + $0x248] sm:$0xff]  ;;  %v3018_v62 = vadd.f32 %v3010_v31, %v2971_v11  ;;  %v3079_v29 = vmul.f32 %v7457_v33, %v7019_v49  ;;  %v4787_v25 = vpack.c.bf16 %v4055_v17, %v4053_v4  ;;  %v4052_v22 = vld [vmem:[#allocation3 + $0x60] sm:$0xff]  ;;  %v9584_v52 = vrot.slane %v7433_v18, 2  ;;  %v4114_v23 = vld [vmem:[#allocation3 + $0x250] sm:$0xff] }
 0x4fc   : > { %2801 = vrot.lane.b32.xlu1 %v6629_v37, %s5126_s20  ;;  %v9582_v37 = vrot.slane %v7510_v3, 4  ;;  %4786 = vmatpush1.bf16.msra.mxu0 %v4785_v27  ;;  %v3122_v51 = vmul.f32 %v7465_v6, %v7019_v49  ;;  %v4112_v31 = vld [vmem:[#allocation3 + $0x240] sm:$0xff]  ;;  %v7614_v27 = vrot.slane %v4694_v48, %v9408_v53  ;;  %v9585_v18 = vrot.slane %v7450_v63, 2  ;;  %v4057_v63 = vld [vmem:[#allocation3 + $0x88] sm:$0xff] }
 0x4fd   : > { %2799 = vrot.lane.b32.xlu0 %v6479_v38, %s5126_s20  ;;  %v4845_v38 = vpack.c.bf16 %v4110_v45, %v4108_v30  ;;  %v3051_v42 = vsel %vm576_vm10, %v9584_v52, %v3050_v28  ;;  %4788 = vmatprep.subr.bf16.mxu0 %v4787_v25  ;;  %v4849_v49 = vpack.c.bf16 %v4114_v23, %v4112_v31  ;;  %v3093_v28 = vrot.slane %v3079_v29, 3  ;;  %v4118_v29 = vld [vmem:[#allocation3 + $0x270] sm:$0xff]  ;;  %v4063_v31 = vld [vmem:[#allocation3 + $0xb8] sm:$0xff]  ;;  %v4121_v23 = vld [vmem:[#allocation3 + $0x288] sm:$0xff] }
 0x4fe   : > { %v3132_v35 = vsel %vm664_vm12, %v3130_v59, %v9582_v37  ;;  %v7589_v60 = vpop.permute.xlu1 %3351  ;;  %v7595_v59 = vmul.f32 %v7460_v43, %v7198_v20  ;;  %v4054_v43 = vld [vmem:[#allocation3 + $0x70] sm:$0xff]  ;;  %v3053_v30 = vsel %vm576_vm10, %v9585_v18, %v3052_v58  ;;  %v3182_v6 = vsel %vm717_vm13, %v7262_v0, %v7276_v1  ;;  %v4117_v58 = vld [vmem:[#allocation3 + $0x268] sm:$0xff]  ;;  %v4056_v0 = vld [vmem:[#allocation3 + $0x80] sm:$0xff] }
 0x4ff   : > { %v7591_v55 = vadd.f32 %v3132_v35, %v3101_v34  ;;  %v7597_v47 = vpop.permute.xlu0 %3731  ;;  %4846 = vmatpush1.bf16.msra.mxu1 %v4845_v38  ;;  %v4115_v34 = vld [vmem:[#allocation3 + $0x258] sm:$0xff]  ;;  %v4789_v33 = vpack.c.bf16 %v4054_v43, %v4052_v22  ;;  %v3060_v37 = vadd.f32 %v3051_v42, %v3017_v61  ;;  %v3061_v38 = vadd.f32 %v3053_v30, %v3018_v62  ;;  %v4058_v61 = vld [vmem:[#allocation3 + $0x90] sm:$0xff]  ;;  %v4116_v62 = vld [vmem:[#allocation3 + $0x260] sm:$0xff] }
 0x500   : > { %3858 = vrot.lane.b32.xlu1 %v6987_v36, %s5126_s20  ;;  %v4847_v11 = vpack.c.bf16 %v4115_v34, %v4113_v46  ;;  %v7611_v36 = vrot.slane %v4694_v48, %v9566_v26  ;;  %v3095_v35 = vrot.slane %v7595_v59, 3  ;;  %v4059_v48 = vld [vmem:[#allocation3 + $0x98] sm:$0xff]  ;;  %v7632_v4 = vmul.f32 %v7468_v39, %v7198_v20 }
 0x501   : > { %3856 = vrot.lane.b32.xlu0 %v7525_v56, %s5126_s20  ;;  %v3183_v56 = vsel %vm717_vm13, %v7276_v1, %v7250_v12  ;;  %4790 = vmatpush1.bf16.msra.mxu0 %v4789_v33  ;;  %v4791_v1 = vpack.c.bf16 %v4059_v48, %v4057_v63  ;;  %v4119_v12 = vld [vmem:[#allocation3 + $0x278] sm:$0xff]  ;;  %v3145_v59 = vadd.f32 %v3135_v57, %v7565_v13  ;;  %v3136_v17 = vrot.slane %v3122_v51, 4  ;;  %v4061_v33 = vld [vmem:[#allocation3 + $0xa8] sm:$0xff] }
 0x502   : > { %v7619_v45 = vpop.permute.xlu1 %3407  ;;  %4848 = vmatprep.subr.bf16.mxu1 %v4847_v11  ;;  %v4695_v46 = vld [vmem:[%s9077_s5 + $0x6] ss:$8 sm:$0x3]  ;;  %v4851_v39 = vpack.c.bf16 %v4119_v12, %v4117_v58  ;;  %v4793_v20 = vpack.c.bf16 %v4058_v61, %v4056_v0  ;;  %v3191_v25 = vmul.f32 %v3183_v56, %v7614_v27  ;;  %v9586_v34 = vrot.slane %v7481_v2, 3  ;;  %v4062_v56 = vld [vmem:[#allocation3 + $0xb0] sm:$0xff]  ;;  %v4065_v0 = vld [vmem:[#allocation3 + $0xc8] sm:$0xff] }
 0x503   : > { %v7628_v50 = vpop.permute.xlu0 %3772  ;;  %4850 = vmatpush1.bf16.msra.mxu1 %v4849_v49  ;;  %4792 = vmatprep.subr.bf16.mxu0 %v4791_v1  ;;  %v4853_v22 = vpack.c.bf16 %v4118_v29, %v4116_v62  ;;  %v9587_v43 = vrot.slane %v7500_v19, 3  ;;  %v9588_v51 = vrot.slane %v7510_v3, 4  ;;  %v3138_v30 = vrot.slane %v7632_v4, 4  ;;  %v4123_v49 = vld [vmem:[#allocation3 + $0x298] sm:$0xff]  ;;  %v4122_v58 = vld [vmem:[#allocation3 + $0x290] sm:$0xff]  ;;  %v4064_v62 = vld [vmem:[#allocation3 + $0xc0] sm:$0xff] }
 0x504   : > { %3934 = vrot.lane.b32.xlu1 %v7050_v14, %s5126_s20  ;;  %v3190_v14 = vmul.f32 %v3182_v6, %v7611_v36  ;;  %v3094_v13 = vsel %vm620_vm11, %v9586_v34, %v3093_v28  ;;  %4852 = vmatprep.subr.bf16.mxu1 %v4851_v39  ;;  %v7664_v19 = vrot.slane %v4695_v46, %v9566_v26  ;;  %v4060_v6 = vld [vmem:[#allocation3 + $0xa0] sm:$0xff]  ;;  %v4067_v61 = vld [vmem:[#allocation3 + $0xd8] sm:$0xff]  ;;  %v4066_v29 = vld [vmem:[#allocation3 + $0xd0] sm:$0xff] }
 0x505   : > { %3932 = vrot.lane.b32.xlu0 %v7207_v40, %s5126_s20  ;;  %v4696_v40 = vld [vmem:[%s9077_s5 + $0x13] ss:$8 sm:$0x3]  ;;  %v3096_v52 = vsel %vm620_vm11, %v9587_v43, %v3095_v35  ;;  %v3103_v42 = vadd.f32 %v3094_v13, %v3060_v37  ;;  %v3137_v11 = vsel %vm664_vm12, %v9588_v51, %v3136_v17  ;;  %4794 = vmatpush1.bf16.msra.mxu0 %v4793_v20  ;;  %v4127_v20 = vld [vmem:[#allocation3 + $0x2b8] sm:$0xff]  ;;  %v4124_v13 = vld [vmem:[#allocation3 + $0x2a0] sm:$0xff] }
 0x506   : > { %v7647_v57 = vpop.permute.xlu1 %3483  ;;  %v3104_v18 = vadd.f32 %v3096_v52, %v3061_v38  ;;  %v4795_v3 = vpack.c.bf16 %v4063_v31, %v4061_v33  ;;  %v7669_v37 = vrot.slane %v4695_v46, %v9408_v53  ;;  %v7672_v35 = vrot.slane %v4696_v40, %v9566_v26  ;;  %v4125_v17 = vld [vmem:[#allocation3 + $0x2a8] sm:$0xff]  ;;  %v4697_v33 = vld [vmem:[%s9077_s5 + $0x20] ss:$8 sm:$0x3] }
 0x507   : > { %v7658_v2 = vpop.permute.xlu0 %3813  ;;  %4854 = vmatpush1.bf16.msra.mxu1 %v4853_v22  ;;  %v4855_v63 = vpack.c.bf16 %v4123_v49, %v4121_v23  ;;  %v4797_v48 = vpack.c.bf16 %v4062_v56, %v4060_v6  ;;  %v3194_v38 = vadd.f32 %v3190_v14, %v7591_v55  ;;  %v3195_v28 = vadd.f32 %v3191_v25, %v3145_v59  ;;  %v9589_v34 = vld [vmem:[#allocation102_spill] sm:$0xff]  ;;  %v9592_v56 = vld [vmem:[#allocation165_spill] sm:$0xff] }
 0x508   : > { %2797 = vrot.lane.b32.xlu1 %v6642_v44, %s5126_s20  ;;  %v4120_v44 = vld [vmem:[#allocation3 + $0x280] sm:$0xff]  ;;  %v7678_v1 = vrot.slane %v4696_v40, %v9408_v53  ;;  %4796 = vmatprep.subr.bf16.mxu0 %v4795_v3  ;;  %v3184_v46 = vsel %vm717_vm13, %v7287_v7, %v7335_v15  ;;  %v3185_v39 = vsel %vm717_vm13, %v7335_v15, %v7325_v9  ;;  %v4126_v15 = vld [vmem:[#allocation3 + $0x2b0] sm:$0xff] }
 0x509   : > { %2721 = vrot.lane.b32.xlu0 %v6491_v16, %s5126_s20  ;;  %v4857_v12 = vpack.c.bf16 %v4122_v58, %v4120_v44  ;;  %4856 = vmatprep.subr.bf16.mxu1 %v4855_v63  ;;  %v4799_v59 = vpack.c.bf16 %v4067_v61, %v4065_v0  ;;  %v4859_v7 = vpack.c.bf16 %v4127_v20, %v4125_v17  ;;  %v4131_v44 = vld [vmem:[#allocation3 + $0x2d8] sm:$0xff]  ;;  %v4070_v58 = vld [vmem:[#allocation3 + $0xf0] sm:$0xff]  ;;  %v4128_v17 = vld [vmem:[#allocation3 + $0x2c0] sm:$0xff] }
 0x50a   : > { %v7675_v4 = vpop.permute.xlu1 %3479  ;;  %4798 = vmatpush1.bf16.msra.mxu0 %v4797_v48  ;;  %v4801_v22 = vpack.c.bf16 %v4066_v29, %v4064_v62  ;;  %v3146_v43 = vadd.f32 %v3137_v11, %v3103_v42  ;;  %v3192_v52 = vmul.f32 %v3184_v46, %v7611_v36  ;;  %v4861_v31 = vpack.c.bf16 %v4126_v15, %v4124_v13  ;;  %v4129_v42 = vld [vmem:[#allocation3 + $0x2c8] sm:$0xff]  ;;  %v9591_v11 = vld [vmem:[#allocation167_spill] sm:$0xff]  ;;  %v4075_v13 = vld [vmem:[#allocation3 + $0x118] sm:$0xff] }
 0x50b   : > { %v3232_v55 = vpop.permute.xlu0 %3231  ;;  %4858 = vmatpush1.bf16.msra.mxu1 %v4857_v12  ;;  %4800 = vmatprep.subr.bf16.mxu0 %v4799_v59  ;;  %v9593_v48 = vld [vmem:[#allocation22_spill] sm:$0xff]  ;;  %v4863_v0 = vpack.c.bf16 %v4131_v44, %v4129_v42  ;;  %v4130_v46 = vld [vmem:[#allocation3 + $0x2d0] sm:$0xff]  ;;  %v7719_v59 = vrot.slane %v4697_v33, %v9566_v26  ;;  %v7722_v20 = vrot.slane %v4697_v33, %v9408_v53  ;;  %v4072_v33 = vld [vmem:[#allocation3 + $0x100] sm:$0xff] }
 0x50c   : > { %v3241_v14 = vsel %vm717_vm13, %v7357_v21, %v3232_v55  ;;  %v3242_v25 = vsel %vm717_vm13, %v3232_v55, %v7349_v8  ;;  %3930 = vrot.lane.b32.xlu1 %v9589_v34, %s5126_s20  ;;  %v9590_v21 = vrot.slane %v7529_v5, 4  ;;  %4860 = vmatprep.subr.bf16.mxu1 %v4859_v7  ;;  %v4069_v5 = vld [vmem:[#allocation3 + $0xe8] sm:$0xff]  ;;  %v4865_v62 = vpack.c.bf16 %v4130_v46, %v4128_v17  ;;  %v9599_v44 = vld [vmem:[#allocation172_spill] sm:$0xff]  ;;  %v4078_v17 = vld [vmem:[#allocation3 + $0x130] sm:$0xff] }
 0x50d   : > { %v3249_v9 = vmul.f32 %v3241_v14, %v7664_v19  ;;  %v3250_v40 = vmul.f32 %v3242_v25, %v7669_v37  ;;  %3854 = vrot.lane.b32.xlu0 %v6945_v24, %s5126_s20  ;;  %v3193_v24 = vmul.f32 %v3185_v39, %v7614_v27  ;;  %v4068_v27 = vld [vmem:[#allocation3 + $0xe0] sm:$0xff]  ;;  %v9594_v12 = vld [vmem:[#allocation18_spill] sm:$0xff]  ;;  %v3196_v39 = vadd.f32 %v3192_v52, %v3146_v43  ;;  %v4135_v52 = vld [vmem:[#allocation3 + $0x2f8] sm:$0xff] }
 0x50e   : > { %v3139_v8 = vsel %vm664_vm12, %v9590_v21, %v3138_v30  ;;  %v7700_v51 = vpop.permute.xlu1 %3524  ;;  %4802 = vmatpush1.bf16.msra.mxu0 %v4801_v22  ;;  %v4071_v30 = vld [vmem:[#allocation3 + $0xf8] sm:$0xff]  ;;  %v4805_v61 = vpack.c.bf16 %v4070_v58, %v4068_v27  ;;  %v4073_v7 = vld [vmem:[#allocation3 + $0x108] sm:$0xff] }
 0x50f   : > { %v3147_v23 = vadd.f32 %v3139_v8, %v3104_v18  ;;  %v3253_v3 = vadd.f32 %v3249_v9, %v3194_v38  ;;  %v3254_v49 = vadd.f32 %v3250_v40, %v3195_v28  ;;  %v3288_v6 = vpop.permute.xlu0 %3287  ;;  %4862 = vmatpush1.bf16.msra.mxu1 %v4861_v31  ;;  %v4803_v18 = vpack.c.bf16 %v4071_v30, %v4069_v5  ;;  %v4133_v15 = vld [vmem:[#allocation3 + $0x2e8] sm:$0xff]  ;;  %v9595_v9 = vld [vmem:[#allocation164_spill] sm:$0xff]  ;;  %v9597_v8 = vld [vmem:[#allocation29_spill] sm:$0xff] }
 0x510   : > { %v3297_v36 = vsel %vm717_vm13, %v9591_v11, %v3288_v6  ;;  %v3298_v63 = vsel %vm717_vm13, %v3288_v6, %v9592_v56  ;;  %2766 = vrot.lane.b32.xlu1 %v9593_v48, %s5126_s20  ;;  %4864 = vmatprep.subr.bf16.mxu1 %v4863_v0  ;;  %v9596_v22 = vld [vmem:[#allocation54_spill] sm:$0xff]  ;;  %v4807_v43 = vpack.c.bf16 %v4075_v13, %v4073_v7  ;;  %v4074_v31 = vld [vmem:[#allocation3 + $0x110] sm:$0xff]  ;;  %v4132_v5 = vld [vmem:[#allocation3 + $0x2e0] sm:$0xff] }
 0x511   : > { %v3305_v38 = vmul.f32 %v3297_v36, %v7672_v35  ;;  %v3306_v28 = vmul.f32 %v3298_v63, %v7678_v1  ;;  %2764 = vrot.lane.b32.xlu0 %v9594_v12, %s5126_s20  ;;  %4804 = vmatprep.subr.bf16.mxu0 %v4803_v18  ;;  %v3197_v29 = vadd.f32 %v3193_v24, %v3147_v23  ;;  %v4134_v30 = vld [vmem:[#allocation3 + $0x2f0] sm:$0xff]  ;;  %v4698_v11 = vld [vmem:[%s9077_s5 + $0x25] ss:$8 sm:$0x3]  ;;  %v4137_v18 = vld [vmem:[#allocation3 + $0x308] sm:$0xff] }
 0x512   : > { %v7716_v55 = vpop.permute.xlu1 %3520  ;;  %4806 = vmatpush1.bf16.msra.mxu0 %v4805_v61  ;;  %v4809_v6 = vpack.c.bf16 %v4074_v31, %v4072_v33  ;;  %v4869_v36 = vpack.c.bf16 %v4134_v30, %v4132_v5  ;;  %v4079_v48 = vld [vmem:[#allocation3 + $0x138] sm:$0xff]  ;;  %v9600_v58 = vld [vmem:[#allocation170_spill] sm:$0xff]  ;;  %v4076_v61 = vld [vmem:[#allocation3 + $0x120] sm:$0xff] }
 0x513   : > { %v3309_v14 = vadd.f32 %v3305_v38, %v3253_v3  ;;  %v3310_v25 = vadd.f32 %v3306_v28, %v3254_v49  ;;  %v3238_v34 = vpop.permute.xlu0 %3237  ;;  %4866 = vmatpush1.bf16.msra.mxu1 %v4865_v62  ;;  %v9598_v3 = vld [vmem:[#allocation23_spill] sm:$0xff]  ;;  %v4867_v49 = vpack.c.bf16 %v4135_v52, %v4133_v15  ;;  %4808 = vmatprep.subr.bf16.mxu0 %v4807_v43  ;;  %v9601_v28 = vld [vmem:[#allocation106_spill] sm:$0xff]  ;;  %v4139_v0 = vld [vmem:[#allocation3 + $0x318] sm:$0xff] }
 0x514   : > { %v3243_v40 = vsel %vm717_vm13, %v9595_v9, %v3238_v34  ;;  %v3244_v21 = vsel %vm717_vm13, %v3238_v34, %v9596_v22  ;;  %2842 = vrot.lane.b32.xlu1 %v9597_v8, %s5126_s20  ;;  %v9602_v62 = vld [vmem:[#allocation137_spill] sm:$0xff]  ;;  %v4813_v34 = vpack.c.bf16 %v4078_v17, %v4076_v61  ;;  %v4138_v13 = vld [vmem:[#allocation3 + $0x310] sm:$0xff]  ;;  %v7752_v9 = vrot.slane %v4698_v11, %v9566_v26  ;;  %v4081_v52 = vld [vmem:[#allocation3 + $0x148] sm:$0xff] }
 0x515   : > { %v3251_v23 = vmul.f32 %v3243_v40, %v7664_v19  ;;  %v3252_v24 = vmul.f32 %v3244_v21, %v7669_v37  ;;  %2840 = vrot.lane.b32.xlu0 %v9598_v3, %s5126_s20  ;;  %4868 = vmatprep.subr.bf16.mxu1 %v4867_v49  ;;  %v4077_v37 = vld [vmem:[#allocation3 + $0x128] sm:$0xff]  ;;  %v4136_v7 = vld [vmem:[#allocation3 + $0x300] sm:$0xff]  ;;  %v7755_v43 = vrot.slane %v4698_v11, %v9408_v53  ;;  %v4083_v33 = vld [vmem:[#allocation3 + $0x158] sm:$0xff] }
 0x516   : > { %v7734_v42 = vpop.permute.xlu1 %3489  ;;  %4810 = vmatpush1.bf16.msra.mxu0 %v4809_v6  ;;  %v4811_v12 = vpack.c.bf16 %v4079_v48, %v4077_v37  ;;  %v4873_v40 = vpack.c.bf16 %v4138_v13, %v4136_v7  ;;  %v4141_v31 = vld [vmem:[#allocation3 + $0x328] sm:$0xff]  ;;  %v4080_v5 = vld [vmem:[#allocation3 + $0x140] sm:$0xff]  ;;  %v4082_v30 = vld [vmem:[#allocation3 + $0x150] sm:$0xff] }
 0x517   : > { %v3255_v56 = vadd.f32 %v3251_v23, %v3196_v39  ;;  %v3256_v63 = vadd.f32 %v3252_v24, %v3197_v29  ;;  %v3344_v19 = vpop.permute.xlu0 %3343  ;;  %4870 = vmatpush1.bf16.msra.mxu1 %v4869_v36  ;;  %v4871_v29 = vpack.c.bf16 %v4139_v0, %v4137_v18  ;;  %v9603_v23 = vld [vmem:[#allocation166_spill] sm:$0xff]  ;;  %v4817_v48 = vpack.c.bf16 %v4082_v30, %v4080_v5  ;;  %v4140_v18 = vld [vmem:[#allocation3 + $0x320] sm:$0xff]  ;;  %v4087_v0 = vld [vmem:[#allocation3 + $0x178] sm:$0xff] }
 0x518   : > { %v3353_v27 = vsel %vm717_vm13, %v9599_v44, %v3344_v19  ;;  %v3354_v38 = vsel %vm717_vm13, %v3344_v19, %v9600_v58  ;;  %3899 = vrot.lane.b32.xlu1 %v9601_v28, %s5126_s20  ;;  %4812 = vmatprep.subr.bf16.mxu0 %v4811_v12  ;;  %v9604_v3 = vld [vmem:[#allocation174_spill] sm:$0xff]  ;;  %v9606_v19 = vld [vmem:[#allocation140_spill] sm:$0xff]  ;;  %v4142_v44 = vld [vmem:[#allocation3 + $0x330] sm:$0xff] }
 0x519   : > { %v3361_v46 = vmul.f32 %v3353_v27, %v7719_v59  ;;  %v3362_v39 = vmul.f32 %v3354_v38, %v7722_v20  ;;  %3897 = vrot.lane.b32.xlu0 %v9602_v62, %s5126_s20  ;;  %4872 = vmatprep.subr.bf16.mxu1 %v4871_v29  ;;  %v9605_v6 = vld [vmem:[#allocation110_spill] sm:$0xff]  ;;  %v4699_v27 = vld [vmem:[%s9077_s5 + $0x2] ss:$8 sm:$0x3]  ;;  %v4877_v38 = vpack.c.bf16 %v4142_v44, %v4140_v18 }
 0x51a   : > { %v7749_v15 = vpop.permute.xlu1 %3565  ;;  %4814 = vmatpush1.bf16.msra.mxu0 %v4813_v34  ;;  %v4145_v61 = vld [vmem:[#allocation3 + $0x348] sm:$0xff]  ;;  %v4147_v62 = vld [vmem:[#allocation3 + $0x358] sm:$0xff]  ;;  %v4084_v29 = vld [vmem:[#allocation3 + $0x160] sm:$0xff] }
 0x51b   : > { %v3365_v22 = vadd.f32 %v3361_v46, %v3309_v14  ;;  %v3366_v21 = vadd.f32 %v3362_v39, %v3310_v25  ;;  %v3294_v8 = vpop.permute.xlu0 %3293  ;;  %4874 = vmatpush1.bf16.msra.mxu1 %v4873_v40  ;;  %v4815_v14 = vpack.c.bf16 %v4083_v33, %v4081_v52  ;;  %v4143_v25 = vld [vmem:[#allocation3 + $0x338] sm:$0xff]  ;;  %v4086_v34 = vld [vmem:[#allocation3 + $0x170] sm:$0xff]  ;;  %v4879_v40 = vpack.c.bf16 %v4147_v62, %v4145_v61  ;;  %v4144_v52 = vld [vmem:[#allocation3 + $0x340] sm:$0xff] }
 0x51c   : > { %v3299_v24 = vsel %vm717_vm13, %v9603_v23, %v3294_v8  ;;  %v3300_v49 = vsel %vm717_vm13, %v3294_v8, %v9604_v3  ;;  %3975 = vrot.lane.b32.xlu1 %v9605_v6, %s5126_s20  ;;  %v4875_v37 = vpack.c.bf16 %v4143_v25, %v4141_v31  ;;  %v9607_v39 = vld [vmem:[#allocation24_spill] sm:$0xff]  ;;  %v4821_v8 = vpack.c.bf16 %v4086_v34, %v4084_v29  ;;  %v4146_v33 = vld [vmem:[#allocation3 + $0x350] sm:$0xff]  ;;  %v4089_v31 = vld [vmem:[#allocation3 + $0x188] sm:$0xff] }
 0x51d   : > { %v3307_v11 = vmul.f32 %v3299_v24, %v7672_v35  ;;  %v3308_v36 = vmul.f32 %v3300_v49, %v7678_v1  ;;  %3973 = vrot.lane.b32.xlu0 %v9606_v19, %s5126_s20  ;;  %4816 = vmatprep.subr.bf16.mxu0 %v4815_v14  ;;  %v4085_v1 = vld [vmem:[#allocation3 + $0x168] sm:$0xff]  ;;  %v7791_v23 = vrot.slane %v4699_v27, %v9566_v26  ;;  %v4091_v6 = vld [vmem:[#allocation3 + $0x198] sm:$0xff]  ;;  %v4088_v19 = vld [vmem:[#allocation3 + $0x180] sm:$0xff] }
 0x51e   : > { %v7770_v58 = vpop.permute.xlu1 %3561  ;;  %4876 = vmatprep.subr.bf16.mxu1 %v4875_v37  ;;  %4818 = vmatpush1.bf16.msra.mxu0 %v4817_v48  ;;  %v7794_v24 = vrot.slane %v4699_v27, %v9408_v53  ;;  %v4881_v49 = vpack.c.bf16 %v4146_v33, %v4144_v52  ;;  %v4149_v14 = vld [vmem:[#allocation3 + $0x368] sm:$0xff]  ;;  %v4151_v25 = vld [vmem:[#allocation3 + $0x378] sm:$0xff]  ;;  %v4090_v37 = vld [vmem:[#allocation3 + $0x190] sm:$0xff] }
 0x51f   : > { %v7772_v28 = vadd.f32 %v3307_v11, %v3255_v56  ;;  %v3312_v35 = vadd.f32 %v3308_v36, %v3256_v63  ;;  %v3400_v12 = vpop.permute.xlu0 %3399  ;;  %v4700_v56 = vld [vmem:[%s9077_s5 + $0x7] ss:$8 sm:$0x3]  ;;  %4878 = vmatpush1.bf16.msra.mxu1 %v4877_v38  ;;  %v4819_v63 = vpack.c.bf16 %v4087_v0, %v4085_v1  ;;  %v4823_v36 = vpack.c.bf16 %v4091_v6, %v4089_v31  ;;  %v9616_v31 = vld [vmem:[#allocation31_spill] sm:$0xff]  ;;  %v4153_v6 = vld [vmem:[#allocation3 + $0x388] sm:$0xff] }
 0x520   : > { %v3409_v17 = vsel %vm717_vm13, %v7556_v32, %v3400_v12  ;;  %v3410_v46 = vsel %vm717_vm13, %v3400_v12, %v7533_v10  ;;  %2838 = vrot.lane.b32.xlu1 %v9607_v39, %s5126_s20  ;;  %v9608_v32 = vld [vmem:[#allocation61_spill] sm:$0xff]  ;;  %v4701_v10 = vld [vmem:[%s9077_s5 + $0x14] ss:$8 sm:$0x3]  ;;  %4880 = vmatprep.subr.bf16.mxu1 %v4879_v40  ;;  %v9609_v18 = vld [vmem:[#allocation168_spill] sm:$0xff]  ;;  %v7813_v61 = vrot.slane %v4700_v56, %v9566_v26 }
 0x521   : > { %v3417_v7 = vmul.f32 %v3409_v17, %v7752_v9  ;;  %v3418_v13 = vmul.f32 %v3410_v46, %v7755_v43  ;;  %2762 = vrot.lane.b32.xlu0 %v9608_v32, %s5126_s20  ;;  %4820 = vmatprep.subr.bf16.mxu0 %v4819_v63  ;;  %v4148_v48 = vld [vmem:[#allocation3 + $0x360] sm:$0xff]  ;;  %v9611_v0 = vld [vmem:[#allocation96_spill] sm:$0xff]  ;;  %v7816_v17 = vrot.slane %v4700_v56, %v9408_v53  ;;  %v4093_v32 = vld [vmem:[#allocation3 + $0x1a8] sm:$0xff] }
 0x522   : > { %v7796_v3 = vpop.permute.xlu1 %3530  ;;  %4822 = vmatpush1.bf16.msra.mxu0 %v4821_v8  ;;  %v9610_v38 = vld [vmem:[#allocation113_spill] sm:$0xff]  ;;  %v7821_v46 = vrot.slane %v4701_v10, %v9566_v26  ;;  %v4825_v39 = vpack.c.bf16 %v4090_v37, %v4088_v19  ;;  %v9612_v63 = vld [vmem:[#allocation152_spill] sm:$0xff]  ;;  %v4154_v37 = vld [vmem:[#allocation3 + $0x390] sm:$0xff] }
 0x523   : > { %v7798_v5 = vadd.f32 %v3417_v7, %v3365_v22  ;;  %v7800_v30 = vadd.f32 %v3418_v13, %v3366_v21  ;;  %v3350_v11 = vpop.permute.xlu0 %3349  ;;  %4882 = vmatpush1.bf16.msra.mxu1 %v4881_v49  ;;  %v4883_v22 = vpack.c.bf16 %v4151_v25, %v4149_v14  ;;  %v4150_v21 = vld [vmem:[#allocation3 + $0x370] sm:$0xff]  ;;  %4824 = vmatprep.subr.bf16.mxu0 %v4823_v36  ;;  %v9614_v29 = vld [vmem:[#allocation148_spill] sm:$0xff]  ;;  %v9615_v8 = vld [vmem:[#allocation169_spill] sm:$0xff] }
 0x524   : > { %v3355_v44 = vsel %vm717_vm13, %v9609_v18, %v3350_v11  ;;  %v3356_v27 = vsel %vm717_vm13, %v3350_v11, %v7589_v60  ;;  %3971 = vrot.lane.b32.xlu1 %v9610_v38, %s5126_s20  ;;  %v3451_v34 = vsel %vm1048_vm14, %v9612_v63, %v9614_v29  ;;  %v4095_v40 = vld [vmem:[#allocation3 + $0x1b8] sm:$0xff]  ;;  %v4092_v25 = vld [vmem:[#allocation3 + $0x1a0] sm:$0xff]  ;;  %v9617_v11 = vld [vmem:[#allocation50_spill] sm:$0xff]  ;;  %v7841_v36 = vrot.slane %v4701_v10, %v9408_v53 }
 0x525   : > { %v3363_v12 = vmul.f32 %v3355_v44, %v7719_v59  ;;  %v3364_v1 = vmul.f32 %v3356_v27, %v7722_v20  ;;  %3895 = vrot.lane.b32.xlu0 %v9611_v0, %s5126_s20  ;;  %4884 = vmatprep.subr.bf16.mxu1 %v4883_v22  ;;  %v4885_v59 = vpack.c.bf16 %v4150_v21, %v4148_v48  ;;  %v9613_v20 = vld [vmem:[#allocation150_spill] sm:$0xff]  ;;  %v4155_v14 = vld [vmem:[#allocation3 + $0x398] sm:$0xff]  ;;  %v4152_v19 = vld [vmem:[#allocation3 + $0x380] sm:$0xff] }
 0x526   : > { %v7818_v60 = vpop.permute.xlu1 %3606  ;;  %v3450_v62 = vsel %vm1048_vm14, %v9613_v20, %v9612_v63  ;;  %4826 = vmatpush1.bf16.msra.mxu0 %v4825_v39  ;;  %v4827_v49 = vpack.c.bf16 %v4095_v40, %v4093_v32  ;;  %v4887_v44 = vpack.c.bf16 %v4155_v14, %v4153_v6  ;;  %v4097_v38 = vld [vmem:[#allocation3 + $0x1c8] sm:$0xff]  ;;  %v3459_v22 = vmul.f32 %v3451_v34, %v7794_v24  ;;  %v4159_v39 = vld [vmem:[#allocation3 + $0x3b8] sm:$0xff]  ;;  %v4098_v34 = vld [vmem:[#allocation3 + $0x1d0] sm:$0xff] }
 0x527   : > { %v3367_v56 = vadd.f32 %v3363_v12, %v7772_v28  ;;  %v3368_v7 = vadd.f32 %v3364_v1, %v3312_v35  ;;  %v3406_v13 = vpop.permute.xlu0 %3405  ;;  %4886 = vmatpush1.bf16.msra.mxu1 %v4885_v59  ;;  %v3458_v48 = vmul.f32 %v3450_v62, %v7791_v23  ;;  %v4157_v0 = vld [vmem:[#allocation3 + $0x3a8] sm:$0xff]  ;;  %v4096_v59 = vld [vmem:[#allocation3 + $0x1c0] sm:$0xff] }
 0x528   : > { %v3411_v52 = vsel %vm717_vm13, %v9615_v8, %v3406_v13  ;;  %v3412_v33 = vsel %vm717_vm13, %v3406_v13, %v7619_v45  ;;  %2807 = vrot.lane.b32.xlu1 %v9616_v31, %s5126_s20  ;;  %v4094_v45 = vld [vmem:[#allocation3 + $0x1b0] sm:$0xff]  ;;  %4828 = vmatprep.subr.bf16.mxu0 %v4827_v49  ;;  %v9618_v62 = vld [vmem:[#allocation65_spill] sm:$0xff]  ;;  %v4891_v29 = vpack.c.bf16 %v4159_v39, %v4157_v0  ;;  %v9621_v49 = vld [vmem:[#allocation154_spill] sm:$0xff] }
 0x529   : > { %v3419_v28 = vmul.f32 %v3411_v52, %v7752_v9  ;;  %v3420_v35 = vmul.f32 %v3412_v33, %v7755_v43  ;;  %2805 = vrot.lane.b32.xlu0 %v9617_v11, %s5126_s20  ;;  %v4829_v27 = vpack.c.bf16 %v4094_v45, %v4092_v25  ;;  %v4889_v9 = vpack.c.bf16 %v4154_v37, %v4152_v19  ;;  %v4099_v43 = vld [vmem:[#allocation3 + $0x1d8] sm:$0xff]  ;;  %v4161_v11 = vld [vmem:[#allocation3 + $0x3c8] sm:$0xff]  ;;  %v4160_v39 = vld [vmem:[#allocation3 + $0x3c0] sm:$0xff] }
 0x52a   : > { %v7844_v18 = vpop.permute.xlu1 %3602  ;;  %v4831_v1 = vpack.c.bf16 %v4099_v43, %v4097_v38  ;;  %4888 = vmatprep.subr.bf16.mxu1 %v4887_v44  ;;  %v3462_v13 = vadd.f32 %v3458_v48, %v7798_v5  ;;  %v3463_v32 = vadd.f32 %v3459_v22, %v7800_v30  ;;  %v4702_v52 = vld [vmem:[%s9077_s5 + $0x21] ss:$8 sm:$0x3]  ;;  %v4833_v33 = vpack.c.bf16 %v4098_v34, %v4096_v59  ;;  %v9620_v5 = vld [vmem:[#allocation162_spill] sm:$0xff]  ;;  %v4102_v43 = vld [vmem:[#allocation3 + $0x1f0] sm:$0xff] }
 0x52b   : > { %v7847_v21 = vadd.f32 %v3419_v28, %v3367_v56  ;;  %v7849_v10 = vadd.f32 %v3420_v35, %v3368_v7  ;;  %v3482_v12 = vpop.permute.xlu0 %3481  ;;  %v4156_v56 = vld [vmem:[#allocation3 + $0x3a0] sm:$0xff]  ;;  %v4158_v7 = vld [vmem:[#allocation3 + $0x3b0] sm:$0xff]  ;;  %4830 = vmatpush1.bf16.msra.mxu0 %v4829_v27  ;;  %4890 = vmatpush1.bf16.msra.mxu1 %v4889_v9  ;;  %v3452_v30 = vsel %vm1048_vm14, %v9621_v49, %v9620_v5  ;;  %v4101_v28 = vld [vmem:[#allocation3 + $0x1e8] sm:$0xff] }
 0x52c   : > { %v3491_v63 = vsel %vm1048_vm14, %v7675_v4, %v3482_v12  ;;  %v3492_v20 = vsel %vm1048_vm14, %v3482_v12, %v7647_v57  ;;  %2883 = vrot.lane.b32.xlu1 %v9618_v62, %s5126_s20  ;;  %v9619_v4 = vld [vmem:[#allocation25_spill] sm:$0xff]  ;;  %v4893_v31 = vpack.c.bf16 %v4158_v7, %v4156_v56  ;;  %4832 = vmatprep.subr.bf16.mxu0 %v4831_v1  ;;  %v4103_v35 = vld [vmem:[#allocation3 + $0x1f8] sm:$0xff]  ;;  %v9624_v1 = vld [vmem:[#allocation143_spill] sm:$0xff] }
 0x52d   : > { %v3499_v40 = vmul.f32 %v3491_v63, %v7813_v61  ;;  %v3500_v8 = vmul.f32 %v3492_v20, %v7816_v17  ;;  %2881 = vrot.lane.b32.xlu0 %v9619_v4, %s5126_s20  ;;  %4892 = vmatprep.subr.bf16.mxu1 %v4891_v29  ;;  %v9622_v45 = vld [vmem:[#allocation160_spill] sm:$0xff]  ;;  %v4835_v27 = vpack.c.bf16 %v4103_v35, %v4101_v28  ;;  %v4100_v38 = vld [vmem:[#allocation3 + $0x1e0] sm:$0xff] }
 0x52e   : > { %v7863_v57 = vpop.permute.xlu1 %3571  ;;  %v3453_v19 = vsel %vm1048_vm14, %v9620_v5, %v9622_v45  ;;  %v9623_v44 = vld [vmem:[#allocation116_spill] sm:$0xff]  ;;  %v7885_v0 = vrot.slane %v4702_v52, %v9566_v26  ;;  %v3460_v59 = vmul.f32 %v3452_v30, %v7791_v23  ;;  %v4837_v20 = vpack.c.bf16 %v4102_v43, %v4100_v38  ;;  %v4166_v5 = vld [vmem:[#allocation3 + $0x3f0] sm:$0xff]  ;;  %v9630_v38 = vld [vmem:[#allocation173_spill] sm:$0xff] }
 0x52f   : > { %v3503_v6 = vadd.f32 %v3499_v40, %v3462_v13  ;;  %v3504_v14 = vadd.f32 %v3500_v8, %v3463_v32  ;;  %v3523_v25 = vpop.permute.xlu0 %3522  ;;  %v4163_v9 = vld [vmem:[#allocation3 + $0x3d8] sm:$0xff]  ;;  %4834 = vmatpush1.bf16.msra.mxu0 %v4833_v33  ;;  %4894 = vmatpush1.bf16.msra.mxu1 %v4893_v31  ;;  %v3461_v29 = vmul.f32 %v3453_v19, %v7794_v24  ;;  %v4165_v13 = vld [vmem:[#allocation3 + $0x3e8] sm:$0xff]  ;;  %v4164_v40 = vld [vmem:[#allocation3 + $0x3e0] sm:$0xff] }
 0x530   : > { %v3532_v37 = vsel %vm1048_vm14, %v7716_v55, %v3523_v25  ;;  %v3533_v48 = vsel %vm1048_vm14, %v3523_v25, %v7700_v51  ;;  %3940 = vrot.lane.b32.xlu1 %v9623_v44, %s5126_s20  ;;  %v4895_v55 = vpack.c.bf16 %v4163_v9, %v4161_v11  ;;  %v4162_v51 = vld [vmem:[#allocation3 + $0x3d0] sm:$0xff]  ;;  %4836 = vmatprep.subr.bf16.mxu0 %v4835_v27  ;;  %v4167_v32 = vld [vmem:[#allocation3 + $0x3f8] sm:$0xff]  ;;  %v9627_v25 = vld [vmem:[#allocation145_spill] sm:$0xff] }
 0x531   : > { %v3540_v22 = vmul.f32 %v3532_v37, %v7821_v46  ;;  %v3541_v12 = vmul.f32 %v3533_v48, %v7841_v36  ;;  %3938 = vrot.lane.b32.xlu0 %v9624_v1, %s5126_s20  ;;  %v4897_v62 = vpack.c.bf16 %v4162_v51, %v4160_v39  ;;  %v9625_v8 = vld [vmem:[#allocation171_spill] sm:$0xff]  ;;  %v7898_v31 = vrot.slane %v4702_v52, %v9408_v53  ;;  %v4703_v48 = vld [vmem:[%s9077_s5 + $0x26] ss:$8 sm:$0x3] }
 0x532   : > { %v7888_v63 = vpop.permute.xlu1 %3612  ;;  %4896 = vmatprep.subr.bf16.mxu1 %v4895_v55  ;;  %v9626_v33 = vld [vmem:[#allocation119_spill] sm:$0xff]  ;;  %v4899_v24 = vpack.c.bf16 %v4167_v32, %v4165_v13  ;;  %v3464_v49 = vadd.f32 %v3460_v59, %v7847_v21  ;;  %v3465_v30 = vadd.f32 %v3461_v29, %v7849_v10  ;;  %v4901_v28 = vpack.c.bf16 %v4166_v5, %v4164_v40  ;;  %v5017_v27 = vld [vmem:[%s9076_s4 + $0x5] ss:$8 sm:$0x3] }
 0x533   : > { %v3544_v34 = vadd.f32 %v3540_v22, %v3503_v6  ;;  %v3545_v56 = vadd.f32 %v3541_v12, %v3504_v14  ;;  %v3488_v7 = vpop.permute.xlu0 %3487  ;;  %4838 = vmatpush1.bf16.msra.mxu0 %v4837_v20  ;;  %4898 = vmatpush1.bf16.msra.mxu1 %v4897_v62  ;;  %v9629_v19 = vld [vmem:[#allocation55_spill] sm:$0xff]  ;;  %v7927_v9 = vrot.slane %v5017_v27, %v9566_v26  ;;  %v9631_v12 = vld [vmem:[#allocation122_spill] sm:$0xff]  ;;  %v9634_v40 = vld [vmem:[#allocation60_spill] sm:$0xff] }
 0x534   : > { %v3493_v4 = vsel %vm1048_vm14, %v9625_v8, %v3488_v7  ;;  %v3494_v23 = vsel %vm1048_vm14, %v3488_v7, %v7734_v42  ;;  %4016 = vrot.lane.b32.xlu1 %v9626_v33, %s5126_s20  ;;  %4900 = vmatprep.subr.bf16.mxu1 %v4899_v24  ;;  %v9632_v39 = vld [vmem:[#allocation99_spill] sm:$0xff]  ;;  %v3595_v51 = vrot.slane %v4703_v48, %v9566_v26  ;;  %v9635_v33 = vld [vmem:[#allocation20_spill] sm:$0xff] }
 0x535   : > { %v3501_v6 = vmul.f32 %v3493_v4, %v7813_v61  ;;  %v3502_v14 = vmul.f32 %v3494_v23, %v7816_v17  ;;  %4014 = vrot.lane.b32.xlu0 %v9627_v25, %s5126_s20  ;;  %v9628_v17 = vld [vmem:[#allocation26_spill] sm:$0xff]  ;;  %v3599_v59 = vrot.slane %v4703_v48, %v9408_v53  ;;  %v7943_v20 = vmul.f32 %v7927_v9, %v6491_v16 }
 0x536   : > { %v7906_v42 = vpop.permute.xlu1 %3688  ;;  %v5020_v25 = vld [vmem:[%s9076_s4 + $0x17] ss:$8 sm:$0x3] }
 0x537   : > { %v3505_v52 = vadd.f32 %v3501_v6, %v3464_v49  ;;  %v3506_v35 = vadd.f32 %v3502_v14, %v3465_v30  ;;  %v3564_v11 = vpop.permute.xlu0 %3563  ;;  %4902 = vmatpush1.bf16.msra.mxu1 %v4901_v28  ;;  %v1869_v24 = vrot.slane %v7943_v20, 1  ;;  %v7982_v28 = vrot.slane %v5020_v25, %v9566_v26  ;;  %v8212_v20 = vld [vmem:[%s9076_s4 + $0x7] ss:$8 sm:$0x3] }
 0x538   : > { %v3573_v21 = vsel %vm1048_vm14, %v7770_v58, %v3564_v11  ;;  %v3574_v61 = vsel %vm1048_vm14, %v3564_v11, %v7749_v15  ;;  %2879 = vrot.lane.b32.xlu1 %v9628_v17, %s5126_s20 }
 0x539   : > { %v3581_v10 = vmul.f32 %v3573_v21, %v7885_v0  ;;  %v3582_v45 = vmul.f32 %v3574_v61, %v7898_v31  ;;  %2803 = vrot.lane.b32.xlu0 %v9629_v19, %s5126_s20  ;;  %v9636_v61 = vld [vmem:[#allocation125_spill] sm:$0xff] }
 0x53a   : > { %v7918_v37 = vpop.permute.xlu1 %3684 }
 0x53b   : > { %v3585_v58 = vadd.f32 %v3581_v10, %v3544_v34  ;;  %v3586_v44 = vadd.f32 %v3582_v45, %v3545_v56  ;;  %v3529_v15 = vpop.permute.xlu0 %3528  ;;  %v9633_v56 = vld [vmem:[#allocation56_spill] sm:$0xff] }
 0x53c   : > { %v3534_v43 = vsel %vm1048_vm14, %v9630_v38, %v3529_v15  ;;  %v3535_v22 = vsel %vm1048_vm14, %v3529_v15, %v7796_v3  ;;  %4012 = vrot.lane.b32.xlu1 %v9631_v12, %s5126_s20  ;;  %v5018_v3 = vld [vmem:[%s9076_s4 + $0x12] ss:$8 sm:$0x3]  ;;  %v1860_v7 = vmul.f32 %v7927_v9, %v9633_v56  ;;  %v5021_v10 = vld [vmem:[%s9076_s4 + $0x24] ss:$8 sm:$0x3] }
 0x53d   : > { %v3542_v1 = vmul.f32 %v3534_v43, %v7821_v46  ;;  %v3543_v55 = vmul.f32 %v3535_v22, %v7841_v36  ;;  %3936 = vrot.lane.b32.xlu0 %v9632_v39, %s5126_s20  ;;  %v7951_v46 = vrot.slane %v5018_v3, %v9566_v26  ;;  %v7998_v45 = vrot.slane %v5021_v10, %v9566_v26  ;;  %v9640_v3 = vld [vmem:[#allocation151_spill] sm:$0xff] }
 0x53e   : > { %v7945_v62 = vpop.permute.xlu1 %3729 }
 0x53f   : > { %v3546_v36 = vadd.f32 %v3542_v1, %v3505_v52  ;;  %v3547_v29 = vadd.f32 %v3543_v55, %v3506_v35  ;;  %v3605_v34 = vpop.permute.xlu0 %3604  ;;  %v7963_v8 = vmul.f32 %v7951_v46, %v6491_v16  ;;  %v1874_v52 = vrot.slane %v1860_v7, 1  ;;  %v4704_v35 = vld [vmem:[%s9077_s5 + $0x3] ss:$8 sm:$0x3]  ;;  %v9641_v7 = vld [vmem:[#allocation175_spill] sm:$0xff] }
 0x540   : > { %v3614_v13 = vsel %vm1048_vm14, %v7844_v18, %v3605_v34  ;;  %v3615_v32 = vsel %vm1048_vm14, %v3605_v34, %v7818_v60  ;;  %2848 = vrot.lane.b32.xlu1 %v9634_v40, %s5126_s20  ;;  %v1903_v18 = vmul.f32 %v7951_v46, %v9633_v56  ;;  %v5019_v60 = vld [vmem:[%s9076_s4] ss:$8 sm:$0x3]  ;;  %v3640_v38 = vrot.slane %v4704_v35, %v9408_v53  ;;  %v9642_v40 = vld [vmem:[#allocation103_spill] sm:$0xff] }
 0x541   : > { %v3622_v4 = vmul.f32 %v3614_v13, %v3595_v51  ;;  %v3623_v23 = vmul.f32 %v3615_v32, %v3599_v59  ;;  %2846 = vrot.lane.b32.xlu0 %v9635_v33, %s5126_s20  ;;  %v7976_v49 = vrot.slane %v5019_v60, %v9566_v26  ;;  %v1912_v17 = vrot.slane %v7963_v8, 2  ;;  %v9638_v1 = vld [vmem:[#allocation156_spill] sm:$0xff]  ;;  %v9639_v55 = vld [vmem:[#allocation153_spill] sm:$0xff] }
 0x542   : > { %v7970_v5 = vpop.permute.xlu1 %3725  ;;  %v1917_v15 = vrot.slane %v1903_v18, 2  ;;  %v3655_v39 = vsel %vm1317_vm15, %v9639_v55, %v9638_v1  ;;  %v3656_v34 = vsel %vm1317_vm15, %v9638_v1, %v9640_v3  ;;  %v4706_v18 = vld [vmem:[%s9077_s5 + $0x15] ss:$8 sm:$0x3] }
 0x543   : > { %v3626_v30 = vadd.f32 %v3622_v4, %v3585_v58  ;;  %v3627_v6 = vadd.f32 %v3623_v23, %v3586_v44  ;;  %v3570_v14 = vpop.permute.xlu0 %3569  ;;  %v1837_v58 = vmul.f32 %v7976_v49, %v6491_v16  ;;  %v1875_v44 = vsel %vm532_vm9, %v1869_v24, %v1874_v52  ;;  %v9643_v4 = vld [vmem:[#allocation63_spill] sm:$0xff]  ;;  %v8260_v8 = vld [vmem:[%s9076_s4 + $0x26] ss:$8 sm:$0x3] }
 0x544   : > { %v3575_v11 = vsel %vm1048_vm14, %v7502_v41, %v3570_v14  ;;  %v3576_v21 = vsel %vm1048_vm14, %v3570_v14, %v7863_v57  ;;  %3981 = vrot.lane.b32.xlu1 %v9636_v61, %s5126_s20  ;;  %v9637_v41 = vld [vmem:[#allocation147_spill] sm:$0xff]  ;;  %v8006_v57 = vmul.f32 %v7982_v28, %v6491_v16  ;;  %v3664_v52 = vmul.f32 %v3656_v34, %v3640_v38  ;;  %v9647_v34 = vld [vmem:[#allocation158_spill] sm:$0xff] }
 0x545   : > { %v3583_v19 = vmul.f32 %v3575_v11, %v7885_v0  ;;  %v3584_v48 = vmul.f32 %v3576_v21, %v7898_v31  ;;  %3979 = vrot.lane.b32.xlu0 %v9637_v41, %s5126_s20  ;;  %v4705_v0 = vld [vmem:[%s9077_s5 + $0x10] ss:$8 sm:$0x3]  ;;  %v3636_v31 = vrot.slane %v4704_v35, %v9566_v26  ;;  %v1884_v14 = vadd.f32 %v1875_v44, %v1837_v58 }
 0x546   : > { %v8013_v27 = vpop.permute.xlu1 %3694  ;;  %v3677_v23 = vrot.slane %v4705_v0, %v9566_v26  ;;  %v3681_v33 = vrot.slane %v4705_v0, %v9408_v53  ;;  %v9191_v60 = vrot.slane %v8006_v57, 3  ;;  %v8057_v41 = vrot.slane %v4706_v18, %v9408_v53  ;;  %v9646_v3 = vld [vmem:[#allocation163_spill] sm:$0xff] }
 0x547   : > { %v3587_v43 = vadd.f32 %v3583_v19, %v3546_v36  ;;  %v3588_v22 = vadd.f32 %v3584_v48, %v3547_v29  ;;  %v3611_v12 = vpop.permute.xlu0 %3610  ;;  %v3663_v25 = vmul.f32 %v3655_v39, %v3636_v31  ;;  %v9644_v19 = vld [vmem:[#allocation33_spill] sm:$0xff]  ;;  %v8054_v48 = vrot.slane %v4706_v18, %v9566_v26 }
 0x548   : > { %v3616_v13 = vsel %vm1048_vm14, %v9641_v7, %v3611_v12  ;;  %v3617_v32 = vsel %vm1048_vm14, %v3611_v12, %v7888_v63  ;;  %3977 = vrot.lane.b32.xlu1 %v9642_v40, %s5126_s20  ;;  %v1918_v63 = vsel %vm576_vm10, %v1912_v17, %v1917_v15  ;;  %v3668_v44 = vadd.f32 %v3664_v52, %v3627_v6  ;;  %v9652_v52 = vld [vmem:[#allocation30_spill] sm:$0xff] }
 0x549   : > { %v3624_v36 = vmul.f32 %v3616_v13, %v3595_v51  ;;  %v3625_v29 = vmul.f32 %v3617_v32, %v3599_v59  ;;  %2844 = vrot.lane.b32.xlu0 %v9643_v4, %s5126_s20  ;;  %v1946_v51 = vmul.f32 %v7982_v28, %v9633_v56  ;;  %v3667_v58 = vadd.f32 %v3663_v25, %v3626_v30  ;;  %v9651_v25 = vld [vmem:[#allocation74_spill] sm:$0xff] }
 0x54a   : > { %v8045_v59 = vpop.permute.xlu1 %3770  ;;  %v1989_v12 = vmul.f32 %v7998_v45, %v9633_v56  ;;  %v3657_v7 = vsel %vm1317_vm15, %v9647_v34, %v9646_v3  ;;  %v9649_v56 = vld [vmem:[#allocation128_spill] sm:$0xff] }
 0x54b   : > { %v3628_v35 = vadd.f32 %v3624_v36, %v3587_v43  ;;  %v3629_v11 = vadd.f32 %v3625_v29, %v3588_v22  ;;  %v3687_v21 = vpop.permute.xlu0 %3686  ;;  %v9645_v43 = vld [vmem:[#allocation52_spill] sm:$0xff]  ;;  %v1927_v22 = vadd.f32 %v1918_v63, %v1884_v14  ;;  %v1960_v6 = vrot.slane %v1946_v51, 3 }
 0x54c   : > { %v3696_v61 = vsel %vm1317_vm15, %v7918_v37, %v3687_v21  ;;  %v3697_v10 = vsel %vm1317_vm15, %v3687_v21, %v7906_v42  ;;  %2889 = vrot.lane.b32.xlu1 %v9644_v19, %s5126_s20  ;;  %v8063_v37 = vmul.f32 %v7998_v45, %v6491_v16  ;;  %v8068_v42 = vld [vmem:[%s9076_s4 + $0x1] ss:$8 sm:$0x3]  ;;  %v2003_v51 = vrot.slane %v1989_v12, 4 }
 0x54d   : > { %v3704_v15 = vmul.f32 %v3696_v61, %v3677_v23  ;;  %v3705_v0 = vmul.f32 %v3697_v10, %v3681_v33  ;;  %2887 = vrot.lane.b32.xlu0 %v9645_v43, %s5126_s20  ;;  %v9648_v16 = vld [vmem:[#allocation161_spill] sm:$0xff]  ;;  %v8086_v36 = vrot.slane %v8068_v42, %v9566_v26  ;;  %v1961_v29 = vsel %vm620_vm11, %v9191_v60, %v1960_v6  ;;  %v9653_v6 = vld [vmem:[#allocation107_spill] sm:$0xff] }
 0x54e   : > { %v3767_v30 = vpop.permute.xlu1 %3766  ;;  %v3658_v13 = vsel %vm1317_vm15, %v9646_v3, %v9648_v16  ;;  %v9190_v14 = vrot.slane %v8063_v37, 4  ;;  %v1970_v63 = vadd.f32 %v1961_v29, %v1927_v22  ;;  %v2051_v21 = vsel %vm717_vm13, %v9652_v52, %v9651_v25  ;;  %v9659_v52 = vld [vmem:[#allocation48_spill] sm:$0xff] }
 0x54f   : > { %v3708_v1 = vadd.f32 %v3704_v15, %v3667_v58  ;;  %v3709_v55 = vadd.f32 %v3705_v0, %v3668_v44  ;;  %v3728_v39 = vpop.permute.xlu0 %3727  ;;  %v3665_v10 = vmul.f32 %v3657_v7, %v3636_v31  ;;  %v3666_v19 = vmul.f32 %v3658_v13, %v3640_v38  ;;  %v9655_v13 = vld [vmem:[#allocation19_spill] sm:$0xff] }
 0x550   : > { %v3737_v32 = vsel %vm1317_vm15, %v7970_v5, %v3728_v39  ;;  %v3738_v40 = vsel %vm1317_vm15, %v3728_v39, %v7945_v62  ;;  %4022 = vrot.lane.b32.xlu1 %v9649_v56, %s5126_s20  ;;  %v9650_v5 = vld [vmem:[#allocation149_spill] sm:$0xff]  ;;  %v9654_v39 = vld [vmem:[#allocation58_spill] sm:$0xff]  ;;  %v2004_v3 = vsel %vm664_vm12, %v9190_v14, %v2003_v51  ;;  %v2059_v34 = vmul.f32 %v2051_v21, %v8086_v36  ;;  %v9678_v14 = vld [vmem:[#allocation76_spill] sm:$0xff] }
 0x551   : > { %v3745_v4 = vmul.f32 %v3737_v32, %v8054_v48  ;;  %v3746_v18 = vmul.f32 %v3738_v40, %v8057_v41  ;;  %4020 = vrot.lane.b32.xlu0 %v9650_v5, %s5126_s20  ;;  %v4707_v62 = vld [vmem:[%s9077_s5 + $0x22] ss:$8 sm:$0x3]  ;;  %v3669_v31 = vadd.f32 %v3665_v10, %v3628_v35  ;;  %v3670_v38 = vadd.f32 %v3666_v19, %v3629_v11  ;;  %v4708_v19 = vld [vmem:[%s9077_s5 + $0x27] ss:$8 sm:$0x3] }
 0x552   : > { %v3736_v61 = vpop.permute.xlu1 %3735  ;;  %v8109_v22 = vrot.slane %v4707_v62, %v9566_v26  ;;  %v8112_v12 = vrot.slane %v4707_v62, %v9408_v53  ;;  %v2013_v16 = vadd.f32 %v2004_v3, %v1970_v63  ;;  %v9656_v32 = vld [vmem:[#allocation41_spill] sm:$0xff]  ;;  %v1856_v21 = vmul.f32 %v7927_v9, %v9659_v52 }
 0x553   : > { %v3749_v58 = vadd.f32 %v3745_v4, %v3708_v1  ;;  %v3750_v44 = vadd.f32 %v3746_v18, %v3709_v55  ;;  %v3693_v15 = vpop.permute.xlu0 %3692  ;;  %v2110_v40 = vsel %vm717_vm13, %v9656_v32, %v9655_v13  ;;  %v9657_v18 = vld [vmem:[#allocation16_spill] sm:$0xff]  ;;  %v9658_v5 = vld [vmem:[#allocation89_spill] sm:$0xff]  ;;  %v3800_v32 = vrot.slane %v4708_v19, %v9566_v26 }
 0x554   : > { %v3698_v0 = vsel %vm1317_vm15, %v7563_v54, %v3693_v15  ;;  %v3699_v43 = vsel %vm1317_vm15, %v3693_v15, %v8013_v27  ;;  %4018 = vrot.lane.b32.xlu1 %v9653_v6, %s5126_s20  ;;  %v8119_v54 = vld [vmem:[%s9076_s4 + $0x6] ss:$8 sm:$0x3]  ;;  %v2166_v62 = vsel %vm717_vm13, %v9658_v5, %v9657_v18  ;;  %v2063_v15 = vadd.f32 %v2059_v34, %v2013_v16  ;;  %v8167_v9 = vld [vmem:[%s9076_s4 + $0x25] ss:$8 sm:$0x3] }
 0x555   : > { %v3706_v1 = vmul.f32 %v3698_v0, %v3677_v23  ;;  %v3707_v55 = vmul.f32 %v3699_v43, %v3681_v33  ;;  %2885 = vrot.lane.b32.xlu0 %v9654_v39, %s5126_s20  ;;  %v8128_v23 = vld [vmem:[%s9076_s4 + $0x13] ss:$8 sm:$0x3]  ;;  %v8133_v33 = vld [vmem:[%s9076_s4 + $0x20] ss:$8 sm:$0x3]  ;;  %v8143_v4 = vrot.slane %v8119_v54, %v9566_v26 }
 0x556   : > { %v3812_v27 = vpop.permute.xlu1 %3811  ;;  %s5050_s20 = scalar_lea.vmem %s9023_s10, 256 }
 0x557   : > { %v3710_v35 = vadd.f32 %v3706_v1, %v3669_v31  ;;  %v3711_v11 = vadd.f32 %v3707_v55, %v3670_v38  ;;  %v3769_v7 = vpop.permute.xlu0 %3768  ;;  %v2118_v0 = vmul.f32 %v2110_v40, %v8143_v4  ;;  %v9660_v1 = vld [vmem:[#allocation95_spill] sm:$0xff]  ;;  %v9661_v55 = vld [vmem:[#allocation36_spill] sm:$0xff]  ;;  %v1899_v40 = vmul.f32 %v7951_v46, %v9659_v52  ;;  %p5051_p6 = scmp.ne.s32.totalorder %s9023_s10, %s5050_s20  ;;  %p5058_p3 = scmp.lt.s32.totalorder %s5056_s26, %s5050_s20 }
 0x558   : > { %v3778_v56 = vsel %vm1317_vm15, %v3767_v30, %v3769_v7  ;;  %v3779_v29 = vsel %vm1317_vm15, %v3769_v7, %v8045_v59  ;;  %v8154_v30 = vrot.slane %v8128_v23, %v9566_v26  ;;  %v8158_v59 = vrot.slane %v8133_v33, %v9566_v26 }
 0x559   : > { %v3786_v51 = vmul.f32 %v3778_v56, %v8109_v22  ;;  %v3787_v63 = vmul.f32 %v3779_v29, %v8112_v12  ;;  %v2222_v39 = vsel %vm717_vm13, %v9661_v55, %v9660_v1  ;;  %v8184_v56 = vrot.slane %v8167_v9, %v9566_v26  ;;  %v9662_v29 = vld [vmem:[#allocation98_spill] sm:$0xff]  ;;  %p5052_p10 = pnand %p5051_p6, %p9814_p9  ;;  %p5059_p4 = por %p5058_p3, %p5057_p2 }
 0x55a   : > { %v3808_v10 = vpop.permute.xlu1 %3807  ;;  %v2174_v38 = vmul.f32 %v2166_v62, %v8154_v30  ;;  %v2230_v62 = vmul.f32 %v2222_v39, %v8158_v59  ;;  %v1911_v39 = vrot.slane %v1899_v40, 2 }
 0x55b   : > { %v3790_v43 = vadd.f32 %v3786_v51, %v3749_v58  ;;  %v3791_v6 = vadd.f32 %v3787_v63, %v3750_v44  ;;  %v3734_v31 = vpop.permute.xlu0 %3733  ;;  %v3804_v58 = vrot.slane %v4708_v19, %v9408_v53  ;;  %v1868_v44 = vrot.slane %v1856_v21, 1  ;;  %p5053_p12 = pneg %p5052_p10 }
 0x55c   : > { %v3739_v3 = vsel %vm1317_vm15, %v7597_v47, %v3734_v31  ;;  %v3740_v34 = vsel %vm1317_vm15, %v3734_v31, %v3736_v61  ;;  %v9663_v47 = vld [vmem:[#allocation43_spill] sm:$0xff]  ;;  %v1835_v21 = vmul.f32 %v7976_v49, %v9659_v52 }
 0x55d   : > { %v3747_v7 = vmul.f32 %v3739_v3, %v8054_v48  ;;  %v3748_v16 = vmul.f32 %v3740_v34, %v8057_v41  ;;  %v2278_v61 = vsel %vm717_vm13, %v9663_v47, %v9662_v29  ;;  %v8192_v48 = vld [vmem:[%s9076_s4 + $0x2] ss:$8 sm:$0x3]  ;;  %v2122_v41 = vadd.f32 %v2118_v0, %v2063_v15  ;;  %p5060_p7 = pnand %p5059_p4, %p5053_p12 }
 0x55e   : > { %v3777_v5 = vpop.permute.xlu1 %3776  ;;  %v1870_v19 = vsel %vm532_vm9, %v1868_v44, %v1869_v24  ;;  %v2286_v34 = vmul.f32 %v2278_v61, %v8184_v56  ;;  %v8207_v49 = vrot.slane %v8192_v48, %v9566_v26  ;;  %v9667_v44 = vld [vmem:[#allocation37_spill] sm:$0xff]  ;;  %v9669_v61 = vld [vmem:[#allocation91_spill] sm:$0xff] }
 0x55f   : > { %v3751_v51 = vadd.f32 %v3747_v7, %v3710_v35  ;;  %v3752_v63 = vadd.f32 %v3748_v16, %v3711_v11  ;;  %v3810_v46 = vpop.permute.xlu0 %3809  ;;  %v2178_v3 = vadd.f32 %v2174_v38, %v2122_v41  ;;  %v1942_v35 = vmul.f32 %v7982_v28, %v9659_v52  ;;  %v9666_v16 = vld [vmem:[#allocation39_spill] sm:$0xff]  ;;  %v9668_v47 = vld [vmem:[#allocation109_spill] sm:$0xff] }
 0x560   : > { %v3819_v31 = vsel %vm1317_vm15, %v3808_v10, %v3810_v46  ;;  %v3820_v55 = vsel %vm1317_vm15, %v3810_v46, %v3812_v27  ;;  %v1882_v27 = vadd.f32 %v1870_v19, %v1835_v21  ;;  %v8217_v10 = vld [vmem:[%s9076_s4 + $0x14] ss:$8 sm:$0x3]  ;;  %v2319_v40 = vsel %vm1048_vm14, %v9667_v44, %v9666_v16 }
 0x561   : > { %v3827_v15 = vmul.f32 %v3819_v31, %v3800_v32  ;;  %v3828_v0 = vmul.f32 %v3820_v55, %v3804_v58  ;;  %v2234_v11 = vadd.f32 %v2230_v62, %v2178_v3  ;;  %v2360_v41 = vsel %vm1048_vm14, %v9669_v61, %v9668_v47  ;;  %v9670_v3 = vld [vmem:[#allocation115_spill] sm:$0xff] }
 0x562   : > { %v3818_v24 = vpop.permute.xlu1 %3817  ;;  %v1954_v55 = vrot.slane %v1942_v35, 3  ;;  %v9675_v44 = vld [vmem:[#allocation11_spill] sm:$0xff] }
 0x563   : > { %v8219_v38 = vadd.f32 %v3827_v15, %v3790_v43  ;;  %v8221_v28 = vadd.f32 %v3828_v0, %v3791_v6  ;;  %v3775_v7 = vpop.permute.xlu0 %3774  ;;  %v2290_v21 = vadd.f32 %v2286_v34, %v2234_v11  ;;  %v8234_v43 = vrot.slane %v8212_v20, %v9566_v26  ;;  %v8239_v6 = vld [vmem:[%s9076_s4 + $0x21] ss:$8 sm:$0x3]  ;;  %v9671_v34 = vld [vmem:[#allocation38_spill] sm:$0xff] }
 0x564   : > { %v3780_v62 = vsel %vm1317_vm15, %v7628_v50, %v3775_v7  ;;  %v3781_v46 = vsel %vm1317_vm15, %v3775_v7, %v3777_v5  ;;  %v1913_v50 = vsel %vm576_vm10, %v1911_v39, %v1912_v17  ;;  %v8248_v5 = vrot.slane %v8217_v10, %v9566_v26  ;;  %v9674_v7 = vld [vmem:[#allocation121_spill] sm:$0xff] }
 0x565   : > { %9664 = vst [vmem:[#allocation102_spill] sm:$0xff] %v8219_v38  ;;  %9665 = vst [vmem:[#allocation167_spill] sm:$0xff] %v8221_v28  ;;  %v3788_v19 = vmul.f32 %v3780_v62, %v8109_v22  ;;  %v3789_v31 = vmul.f32 %v3781_v46, %v8112_v12  ;;  %v2401_v15 = vsel %vm1048_vm14, %v9671_v34, %v9670_v3 }
 0x566   : > { %v8253_v0 = vpop.permute.xlu1 %3893  ;;  %v2327_v11 = vmul.f32 %v2319_v40, %v8207_v49  ;;  %v2368_v22 = vmul.f32 %v2360_v41, %v8234_v43  ;;  %v8264_v35 = vrot.slane %v8239_v6, %v9566_v26  ;;  %v2442_v61 = vsel %vm1048_vm14, %v9675_v44, %v9674_v7  ;;  %v9677_v44 = vld [vmem:[#allocation124_spill] sm:$0xff] }
 0x567   : > { %9672 = vst [vmem:[#allocation165_spill] sm:$0xff] %v8253_v0  ;;  %v3792_v17 = vadd.f32 %v3788_v19, %v3751_v51  ;;  %v3793_v12 = vadd.f32 %v3789_v31, %v3752_v63  ;;  %v3816_v39 = vpop.permute.xlu0 %3815  ;;  %v2409_v46 = vmul.f32 %v2401_v15, %v8248_v5  ;;  %v1925_v63 = vadd.f32 %v1913_v50, %v1882_v27  ;;  %v9699_v0 = vld [vmem:[#allocation49_spill] sm:$0xff] }
 0x568   : > { %9673 = vst [vmem:[#allocation22_spill] sm:$0xff] %v8264_v35  ;;  %v3821_v40 = vsel %vm1317_vm15, %v7658_v2, %v3816_v39  ;;  %v3822_v41 = vsel %vm1317_vm15, %v3816_v39, %v3818_v24  ;;  %v2331_v62 = vadd.f32 %v2327_v11, %v2290_v21  ;;  %v8275_v19 = vmul.f32 %v7998_v45, %v9659_v52 }
 0x569   : > { %v3829_v34 = vmul.f32 %v3821_v40, %v3800_v32  ;;  %v3830_v51 = vmul.f32 %v3822_v41, %v3804_v58  ;;  %v8279_v31 = vrot.slane %v8260_v8, %v9566_v26  ;;  %v2483_v2 = vsel %vm1048_vm14, %v9678_v14, %v9677_v44  ;;  %v8289_v32 = vld [vmem:[%s9076_s4 + $0x3] ss:$8 sm:$0x3] }
 0x56a   : > { %v8284_v60 = vpop.permute.xlu1 %3889  ;;  %v2372_v58 = vadd.f32 %v2368_v22, %v2331_v62  ;;  %v2450_v24 = vmul.f32 %v2442_v61, %v8264_v35  ;;  %v9681_v21 = vrot.slane %v8006_v57, 3  ;;  %v1997_v39 = vrot.slane %v8275_v19, 4  ;;  %v8312_v57 = vld [vmem:[%s9076_s4 + $0x10] ss:$8 sm:$0x3]  ;;  %v9686_v41 = vld [vmem:[#allocation28_spill] sm:$0xff] }
 0x56b   : > { %9676 = vst [vmem:[#allocation18_spill] sm:$0xff] %v8279_v31  ;;  %9679 = vst [vmem:[#allocation164_spill] sm:$0xff] %v8284_v60  ;;  %v8292_v45 = vadd.f32 %v3829_v34, %v3792_v17  ;;  %v3834_v52 = vadd.f32 %v3830_v51, %v3793_v12  ;;  %v8294_v27 = vpop.permute.xlu0 %3891  ;;  %v2491_v15 = vmul.f32 %v2483_v2, %v8279_v31  ;;  %v9684_v12 = vld [vmem:[#allocation15_spill] sm:$0xff]  ;;  %v9685_v61 = vld [vmem:[#allocation62_spill] sm:$0xff] }
 0x56c   : > { %9680 = vst [vmem:[#allocation54_spill] sm:$0xff] %v8294_v27  ;;  %v1956_v50 = vsel %vm620_vm11, %v1954_v55, %v9681_v21  ;;  %v2413_v14 = vadd.f32 %v2409_v46, %v2372_v58  ;;  %v8303_v22 = vrot.slane %v8068_v42, %v9408_v53  ;;  %v8307_v17 = vrot.slane %v8289_v32, %v9566_v26  ;;  %v8329_v34 = vld [vmem:[%s9076_s4 + $0x15] ss:$8 sm:$0x3]  ;;  %v9691_v21 = vld [vmem:[#allocation93_spill] sm:$0xff]  ;;  %v9697_v60 = vld [vmem:[#allocation72_spill] sm:$0xff] }
 0x56d   : > { %v1968_v11 = vadd.f32 %v1956_v50, %v1925_v63  ;;  %v2049_v40 = vsel %vm717_vm13, %v9685_v61, %v9684_v12  ;;  %v2050_v42 = vsel %vm717_vm13, %v9684_v12, %v9686_v41  ;;  %v8324_v62 = vrot.slane %v8119_v54, %v9408_v53  ;;  %v9688_v63 = vld [vmem:[#allocation85_spill] sm:$0xff]  ;;  %v9689_v19 = vld [vmem:[#allocation51_spill] sm:$0xff]  ;;  %v9692_v12 = vld [vmem:[#allocation86_spill] sm:$0xff] }
 0x56e   : > { %9682 = vst [vmem:[#allocation29_spill] sm:$0xff] %v8307_v17  ;;  %v8314_v55 = vpop.permute.xlu1 %2801  ;;  %v2454_v46 = vadd.f32 %v2450_v24, %v2413_v14  ;;  %v2524_v2 = vsel %vm1317_vm15, %v9689_v19, %v9688_v63  ;;  %v8338_v58 = vrot.slane %v8128_v23, %v9408_v53  ;;  %v8342_v54 = vrot.slane %v8133_v33, %v9408_v53  ;;  %v9690_v24 = vld [vmem:[#allocation132_spill] sm:$0xff] }
 0x56f   : > { %9683 = vst [vmem:[#allocation23_spill] sm:$0xff] %v8314_v55  ;;  %v8331_v51 = vpop.permute.xlu0 %2799  ;;  %v2565_v50 = vsel %vm1317_vm15, %v9691_v21, %v9690_v24  ;;  %v8350_v14 = vld [vmem:[%s9077_s5 + $0x4] ss:$8 sm:$0x3]  ;;  %v8357_v23 = vrot.slane %v8167_v9, %v9408_v53  ;;  %v8361_v33 = vrot.slane %v8312_v57, %v9566_v26  ;;  %v2057_v38 = vmul.f32 %v2049_v40, %v8086_v36 }
 0x570   : > { %9687 = vst [vmem:[#allocation172_spill] sm:$0xff] %v8331_v51  ;;  %v9693_v61 = vld [vmem:[#allocation12_spill] sm:$0xff]  ;;  %v2495_v19 = vadd.f32 %v2491_v15, %v2454_v46  ;;  %v2058_v24 = vmul.f32 %v2050_v42, %v8303_v22  ;;  %v2532_v28 = vmul.f32 %v2524_v2, %v8307_v17  ;;  %v8389_v40 = vrot.slane %v8350_v14, %v9408_v53  ;;  %v9704_v51 = vld [vmem:[#allocation90_spill] sm:$0xff] }
 0x571   : > { %v2109_v41 = vsel %vm717_vm13, %v9693_v61, %v9692_v12  ;;  %9694 = vst [vmem:[#allocation170_spill] sm:$0xff] %v8361_v33  ;;  %v8366_v21 = vld [vmem:[%s9076_s4 + $0x22] ss:$8 sm:$0x3]  ;;  %v8372_v12 = vrot.slane %v8329_v34, %v9566_v26  ;;  %v2573_v7 = vmul.f32 %v2565_v50, %v8361_v33 }
 0x572   : > { %v9696_v9 = vld [vmem:[#allocation136_spill] sm:$0xff]  ;;  %v3859_v46 = vpop.permute.xlu1 %3858  ;;  %9701 = vst [vmem:[#allocation166_spill] sm:$0xff] %v8389_v40  ;;  %v8394_v2 = vrot.slane %v8366_v21, %v9566_v26  ;;  %v2536_v33 = vadd.f32 %v2532_v28, %v2495_v19 }
 0x573   : > { %9695 = vst [vmem:[#allocation106_spill] sm:$0xff] %v8372_v12  ;;  %v2606_v15 = vsel %vm1317_vm15, %v9697_v60, %v9696_v9  ;;  %v9698_v27 = vld [vmem:[#allocation88_spill] sm:$0xff]  ;;  %v3857_v42 = vpop.permute.xlu0 %3856  ;;  %v2117_v60 = vmul.f32 %v2109_v41, %v8324_v62  ;;  %v9702_v9 = vld [vmem:[#allocation142_spill] sm:$0xff]  ;;  %v9706_v41 = vld [vmem:[#allocation59_spill] sm:$0xff] }
 0x574   : > { %v2165_v44 = vsel %vm717_vm13, %v9699_v0, %v9698_v27  ;;  %v8385_v36 = vld [vmem:[%s9076_s4 + $0x27] ss:$8 sm:$0x3]  ;;  %v3863_v63 = vsel %vm321_vm0, %v3857_v42, %v3859_v46  ;;  %v2614_v47 = vmul.f32 %v2606_v15, %v8372_v12  ;;  %v2062_v17 = vadd.f32 %v2058_v24, %v9706_v41  ;;  %v8419_v28 = vld [vmem:[%s9076_s4 + $0x4] ss:$8 sm:$0x3] }
 0x575   : > { %9700 = vst [vmem:[#allocation137_spill] sm:$0xff] %v8385_v36  ;;  %v9703_v27 = vld [vmem:[#allocation9_spill] sm:$0xff]  ;;  %v9705_v55 = vld [vmem:[#allocation44_spill] sm:$0xff]  ;;  %v3871_v16 = vmul.f32 %v3863_v63, %v8389_v40  ;;  %v2173_v31 = vmul.f32 %v2165_v44, %v8338_v58  ;;  %v8409_v29 = vrot.slane %v8385_v36, %v9566_v26  ;;  %v2577_v44 = vadd.f32 %v2573_v7, %v2536_v33  ;;  %v9714_v7 = vld [vmem:[#allocation34_spill] sm:$0xff] }
 0x576   : > { %v2647_v50 = vsel %vm1317_vm15, %v9703_v27, %v9702_v9  ;;  %v2221_v3 = vsel %vm717_vm13, %v9705_v55, %v9704_v51  ;;  %v9707_v27 = vld [vmem:[#allocation144_spill] sm:$0xff]  ;;  %v9708_v9 = vld [vmem:[#allocation47_spill] sm:$0xff]  ;;  %v8414_v35 = vpop.permute.xlu1 %3934  ;;  %v9711_v63 = vld [vmem:[#allocation77_spill] sm:$0xff]  ;;  %v2121_v40 = vadd.f32 %v2117_v60, %v2062_v17  ;;  %v2108_v33 = vsel %vm717_vm13, %v9714_v7, %v9693_v61 }
 0x577   : > { %v2688_v46 = vsel %vm1317_vm15, %v9708_v9, %v9707_v27  ;;  %9709 = vst [vmem:[#allocation174_spill] sm:$0xff] %v8414_v35  ;;  %v9710_v51 = vld [vmem:[#allocation92_spill] sm:$0xff]  ;;  %v2655_v19 = vmul.f32 %v2647_v50, %v8394_v2  ;;  %v8425_v15 = vadd.f32 %v3871_v16, %v3834_v52  ;;  %v8427_v41 = vpop.permute.xlu0 %3932  ;;  %v9713_v9 = vrot.slane %v8063_v37, 4  ;;  %v9715_v17 = vld [vmem:[#allocation35_spill] sm:$0xff]  ;;  %v9721_v7 = vld [vmem:[#allocation101_spill] sm:$0xff] }
 0x578   : > { %v2277_v24 = vsel %vm717_vm13, %v9711_v63, %v9710_v51  ;;  %v8434_v35 = vrot.slane %v8192_v48, %v9408_v53  ;;  %v2229_v12 = vmul.f32 %v2221_v3, %v8342_v54  ;;  %v2618_v16 = vadd.f32 %v2614_v47, %v2577_v44  ;;  %v9716_v60 = vld [vmem:[#allocation80_spill] sm:$0xff]  ;;  %v9717_v61 = vld [vmem:[#allocation67_spill] sm:$0xff] }
 0x579   : > { %9712 = vst [vmem:[#allocation110_spill] sm:$0xff] %v8425_v15  ;;  %v1999_v27 = vsel %vm664_vm12, %v1997_v39, %v9713_v9  ;;  %v2696_v52 = vmul.f32 %v2688_v46, %v8409_v29  ;;  %v8443_v37 = vrot.slane %v8419_v28, %v9566_v26  ;;  %v2177_v39 = vadd.f32 %v2173_v31, %v2121_v40  ;;  %v9720_v9 = vld [vmem:[#allocation40_spill] sm:$0xff]  ;;  %v9791_v15 = vld [vmem:[#allocation141_spill] sm:$0xff] }
 0x57a   : > { %v2011_v36 = vadd.f32 %v1999_v27, %v1968_v11  ;;  %v2285_v50 = vmul.f32 %v2277_v24, %v8357_v23  ;;  %v8448_v48 = vrot.slane %v8212_v20, %v9408_v53  ;;  %v8450_v3 = vpop.permute.xlu1 %2797  ;;  %v2318_v47 = vsel %vm1048_vm14, %v9716_v60, %v9715_v17  ;;  %v9718_v24 = vld [vmem:[#allocation87_spill] sm:$0xff] }
 0x57b   : > { %v2164_v27 = vsel %vm717_vm13, %v9717_v61, %v9699_v0  ;;  %v2659_v46 = vadd.f32 %v2655_v19, %v2618_v16  ;;  %v2722_v51 = vpop.permute.xlu0 %2721  ;;  %v2116_v31 = vmul.f32 %v2108_v33, %v8143_v4  ;;  %v2233_v40 = vadd.f32 %v2229_v12, %v2177_v39  ;;  %v9723_v61 = vld [vmem:[#allocation14_spill] sm:$0xff] }
 0x57c   : > { %v2061_v11 = vadd.f32 %v2057_v38, %v2011_v36  ;;  %v8461_v20 = vrot.slane %v8217_v10, %v9408_v53  ;;  %v2729_v38 = vsel %vm321_vm0, %v2722_v51, %v9718_v24  ;;  %v9719_v36 = vld [vmem:[#allocation68_spill] sm:$0xff]  ;;  %v2359_v0 = vsel %vm1048_vm14, %v9721_v7, %v9720_v9  ;;  %v9724_v51 = vld [vmem:[#allocation105_spill] sm:$0xff] }
 0x57d   : > { %v2220_v44 = vsel %vm717_vm13, %v9719_v36, %v9705_v55  ;;  %v2700_v19 = vadd.f32 %v2696_v52, %v2659_v46  ;;  %v2737_v16 = vmul.f32 %v2729_v38, %v8443_v37  ;;  %v2326_v4 = vmul.f32 %v2318_v47, %v8434_v35  ;;  %v9722_v55 = vld [vmem:[#allocation70_spill] sm:$0xff]  ;;  %v9726_v38 = vld [vmem:[#allocation32_spill] sm:$0xff]  ;;  %v9727_v36 = vld [vmem:[#allocation21_spill] sm:$0xff] }
 0x57e   : > { %v2172_v12 = vmul.f32 %v2164_v27, %v8154_v30  ;;  %v2289_v10 = vadd.f32 %v2285_v50, %v2233_v40  ;;  %v8476_v33 = vrot.slane %v8239_v6, %v9408_v53  ;;  %v8478_v39 = vpop.permute.xlu1 %3930  ;;  %v2276_v17 = vsel %vm717_vm13, %v9722_v55, %v9711_v63  ;;  %v9728_v9 = vld [vmem:[#allocation112_spill] sm:$0xff] }
 0x57f   : > { %v2400_v52 = vsel %vm1048_vm14, %v9724_v51, %v9723_v61  ;;  %v8488_v47 = vrot.slane %v8350_v14, %v9566_v26  ;;  %v8490_v30 = vadd.f32 %v2737_v16, %v2700_v19  ;;  %v3855_v50 = vpop.permute.xlu0 %3854  ;;  %v2120_v27 = vadd.f32 %v2116_v31, %v2061_v11  ;;  %v9731_v61 = vld [vmem:[#allocation118_spill] sm:$0xff] }
 0x580   : > { %v2228_v6 = vmul.f32 %v2220_v44, %v8158_v59  ;;  %v2367_v46 = vmul.f32 %v2359_v0, %v8448_v48  ;;  %v3862_v40 = vsel %vm321_vm0, %v3855_v50, %v3857_v42  ;;  %v2052_v63 = vsel %vm717_vm13, %v9651_v25, %v9726_v38  ;;  %v9729_v25 = vld [vmem:[#allocation79_spill] sm:$0xff] }
 0x581   : > { %9725 = vst [vmem:[#allocation140_spill] sm:$0xff] %v8490_v30  ;;  %v2441_v55 = vsel %vm1048_vm14, %v9728_v9, %v9727_v36  ;;  %v8503_v14 = vrot.slane %v8260_v8, %v9408_v53  ;;  %v3870_v11 = vmul.f32 %v3862_v40, %v8488_v47  ;;  %v2176_v31 = vadd.f32 %v2172_v12, %v2120_v27  ;;  %v9730_v8 = vld [vmem:[#allocation46_spill] sm:$0xff] }
 0x582   : > { %v2284_v59 = vmul.f32 %v2276_v17, %v8184_v56  ;;  %v2330_v44 = vadd.f32 %v2326_v4, %v2289_v10  ;;  %v2408_v42 = vmul.f32 %v2400_v52, %v8461_v20  ;;  %v8508_v0 = vpop.permute.xlu1 %2766  ;;  %v2317_v19 = vsel %vm1048_vm14, %v9729_v25, %v9716_v60  ;;  %v9733_v4 = vld [vmem:[#allocation64_spill] sm:$0xff]  ;;  %v9734_v10 = vld [vmem:[#allocation82_spill] sm:$0xff] }
 0x583   : > { %v8515_v16 = vrot.slane %v8289_v32, %v9408_v53  ;;  %v2482_v50 = vsel %vm1048_vm14, %v9731_v61, %v9730_v8  ;;  %v8521_v12 = vadd.f32 %v3870_v11, %v8292_v45  ;;  %v8523_v56 = vpop.permute.xlu0 %2764  ;;  %v2523_v17 = vsel %vm1317_vm15, %v9734_v10, %v9733_v4  ;;  %v9735_v40 = vld [vmem:[#allocation94_spill] sm:$0xff]  ;;  %v9736_v4 = vld [vmem:[#allocation81_spill] sm:$0xff] }
 0x584   : > { %v2232_v52 = vadd.f32 %v2228_v6, %v2176_v31  ;;  %v2371_v27 = vadd.f32 %v2367_v46, %v2330_v44  ;;  %v2449_v60 = vmul.f32 %v2441_v55, %v8476_v33  ;;  %v2060_v32 = vmul.f32 %v2052_v63, %v8303_v22  ;;  %v9737_v22 = vld [vmem:[#allocation42_spill] sm:$0xff] }
 0x585   : > { %9732 = vst [vmem:[#allocation24_spill] sm:$0xff] %v8521_v12  ;;  %v2358_v38 = vsel %vm1048_vm14, %v9735_v40, %v9721_v7  ;;  %v2490_v45 = vmul.f32 %v2482_v50, %v8503_v14  ;;  %v2325_v8 = vmul.f32 %v2317_v19, %v8207_v49  ;;  %v2522_v6 = vsel %vm1317_vm15, %v9736_v4, %v9734_v10  ;;  %v9738_v7 = vld [vmem:[#allocation73_spill] sm:$0xff]  ;;  %v9745_v4 = vld [vmem:[#allocation111_spill] sm:$0xff] }
 0x586   : > { %v2288_v36 = vadd.f32 %v2284_v59, %v2232_v52  ;;  %v2412_v25 = vadd.f32 %v2408_v42, %v2371_v27  ;;  %v8534_v11 = vpop.permute.xlu1 %2842  ;;  %v2531_v46 = vmul.f32 %v2523_v17, %v8515_v16  ;;  %v2399_v63 = vsel %vm1048_vm14, %v9737_v22, %v9724_v51  ;;  %v9739_v42 = vld [vmem:[#allocation27_spill] sm:$0xff]  ;;  %v9740_v50 = vld [vmem:[#allocation53_spill] sm:$0xff]  ;;  %v9741_v51 = vld [vmem:[#allocation104_spill] sm:$0xff] }
 0x587   : > { %v8544_v55 = vpop.permute.xlu0 %2840  ;;  %v2111_v31 = vsel %vm717_vm13, %v9655_v13, %v9738_v7  ;;  %v2366_v59 = vmul.f32 %v2358_v38, %v8234_v43  ;;  %v8552_v49 = vrot.slane %v8312_v57, %v9408_v53  ;;  %v2064_v19 = vadd.f32 %v2060_v32, %v9739_v42  ;;  %v9742_v17 = vld [vmem:[#allocation127_spill] sm:$0xff]  ;;  %v9743_v43 = vld [vmem:[#allocation13_spill] sm:$0xff]  ;;  %v9746_v22 = vld [vmem:[#allocation130_spill] sm:$0xff] }
 0x588   : > { %v2453_v44 = vadd.f32 %v2449_v60, %v2412_v25  ;;  %v2440_v10 = vsel %vm1048_vm14, %v9740_v50, %v9728_v9  ;;  %v2564_v52 = vsel %vm1317_vm15, %v9742_v17, %v9741_v51  ;;  %v8563_v13 = vrot.slane %v8329_v34, %v9408_v53  ;;  %v9744_v38 = vld [vmem:[#allocation57_spill] sm:$0xff]  ;;  %v9751_v50 = vld [vmem:[#allocation120_spill] sm:$0xff] }
 0x589   : > { %v2167_v27 = vsel %vm717_vm13, %v9657_v18, %v9743_v43  ;;  %v2329_v57 = vadd.f32 %v2325_v8, %v2288_v36  ;;  %v2407_v60 = vmul.f32 %v2399_v63, %v8248_v5  ;;  %v2119_v9 = vmul.f32 %v2111_v31, %v8324_v62  ;;  %v9747_v5 = vld [vmem:[#allocation45_spill] sm:$0xff]  ;;  %v9748_v62 = vld [vmem:[#allocation22_spill] sm:$0xff]  ;;  %v9749_v31 = vld [vmem:[#allocation75_spill] sm:$0xff] }
 0x58a   : > { %v2494_v32 = vadd.f32 %v2490_v45, %v2453_v44  ;;  %v8569_v40 = vpop.permute.xlu1 %3899  ;;  %v2481_v25 = vsel %vm1048_vm14, %v9744_v38, %v9731_v61  ;;  %v2605_v34 = vsel %vm1317_vm15, %v9746_v22, %v9745_v4  ;;  %v8580_v7 = vrot.slane %v8366_v21, %v9408_v53  ;;  %v9750_v44 = vld [vmem:[#allocation98_spill] sm:$0xff]  ;;  %v9753_v43 = vld [vmem:[#allocation137_spill] sm:$0xff] }
 0x58b   : > { %v8582_v18 = vpop.permute.xlu0 %3897  ;;  %v2223_v36 = vsel %vm717_vm13, %v9660_v1, %v9747_v5  ;;  %v2370_v45 = vadd.f32 %v2366_v59, %v2329_v57  ;;  %v2448_v8 = vmul.f32 %v2440_v10, %v9748_v62  ;;  %v2572_v63 = vmul.f32 %v2564_v52, %v8552_v49  ;;  %v9752_v21 = vld [vmem:[#allocation134_spill] sm:$0xff]  ;;  %v9755_v5 = vld [vmem:[#allocation129_spill] sm:$0xff]  ;;  %v9756_v62 = vld [vmem:[#allocation139_spill] sm:$0xff] }
 0x58c   : > { %v2175_v61 = vmul.f32 %v2167_v27, %v8338_v58  ;;  %v2279_v42 = vsel %vm717_vm13, %v9750_v44, %v9749_v31  ;;  %v2646_v51 = vsel %vm1317_vm15, %v9752_v21, %v9751_v50  ;;  %v8598_v38 = vrot.slane %v9753_v43, %v9408_v53  ;;  %v9754_v59 = vld [vmem:[#allocation18_spill] sm:$0xff]  ;;  %v9759_v43 = vld [vmem:[#allocation69_spill] sm:$0xff] }
 0x58d   : > { %v2411_v1 = vadd.f32 %v2407_v60, %v2370_v45  ;;  %v2489_v57 = vmul.f32 %v2481_v25, %v9754_v59  ;;  %v2535_v10 = vadd.f32 %v2531_v46, %v2494_v32  ;;  %v2613_v52 = vmul.f32 %v2605_v34, %v8563_v13  ;;  %v9757_v32 = vld [vmem:[#allocation29_spill] sm:$0xff] }
 0x58e   : > { %v8602_v4 = vpop.permute.xlu1 %3975  ;;  %v2123_v58 = vadd.f32 %v2119_v9, %v2064_v19  ;;  %v2231_v27 = vmul.f32 %v2223_v36, %v8342_v54  ;;  %v2687_v31 = vsel %vm1317_vm15, %v9756_v62, %v9755_v5  ;;  %v8612_v50 = vrot.slane %v8419_v28, %v9408_v53  ;;  %v9758_v54 = vld [vmem:[#allocation108_spill] sm:$0xff]  ;;  %v4686_v36 = vld [vmem:[%s9076_s4 + $0x11] ss:$8 sm:$0x3] }
 0x58f   : > { %v8608_v44 = vpop.permute.xlu0 %3973  ;;  %v2452_v60 = vadd.f32 %v2448_v8, %v2411_v1  ;;  %v2576_v25 = vadd.f32 %v2572_v63, %v2535_v10  ;;  %v2654_v46 = vmul.f32 %v2646_v51, %v8580_v7  ;;  %v2530_v34 = vmul.f32 %v2522_v6, %v9757_v32  ;;  %v9760_v28 = vld [vmem:[#allocation66_spill] sm:$0xff] }
 0x590   : > { %v2179_v45 = vadd.f32 %v2175_v61, %v2123_v58  ;;  %v2287_v19 = vmul.f32 %v2279_v42, %v8357_v23  ;;  %v2563_v9 = vsel %vm1317_vm15, %v9758_v54, %v9742_v17  ;;  %v2728_v8 = vsel %vm321_vm0, %v9760_v28, %v9759_v43  ;;  %v9761_v23 = vld [vmem:[#allocation83_spill] sm:$0xff]  ;;  %v9762_v42 = vld [vmem:[#allocation84_spill] sm:$0xff]  ;;  %v9764_v58 = vld [vmem:[#allocation114_spill] sm:$0xff] }
 0x591   : > { %v2493_v63 = vadd.f32 %v2489_v57, %v2452_v60  ;;  %v2617_v1 = vadd.f32 %v2613_v52, %v2576_v25  ;;  %v2695_v51 = vmul.f32 %v2687_v31, %v8598_v38  ;;  %v2727_v61 = vsel %vm321_vm0, %v9761_v23, %v9760_v28  ;;  %v9763_v17 = vld [vmem:[#allocation39_spill] sm:$0xff]  ;;  %v9766_v57 = vld [vmem:[#allocation78_spill] sm:$0xff]  ;;  %v9767_v52 = vld [vmem:[#allocation109_spill] sm:$0xff] }
 0x592   : > { %v8627_v6 = vpop.permute.xlu1 %2838  ;;  %v2320_v59 = vsel %vm1048_vm14, %v9763_v17, %v9762_v42  ;;  %v2235_v10 = vadd.f32 %v2231_v27, %v2179_v45  ;;  %v2604_v5 = vsel %vm1317_vm15, %v9764_v58, %v9746_v22  ;;  %v2361_v31 = vsel %vm1048_vm14, %v9767_v52, %v9766_v57  ;;  %v9768_v60 = vld [vmem:[#allocation170_spill] sm:$0xff]  ;;  %v9769_v28 = vld [vmem:[#allocation123_spill] sm:$0xff] }
 0x593   : > { %v8638_v32 = vpop.permute.xlu0 %2762  ;;  %v2571_v25 = vmul.f32 %v2563_v9, %v9768_v60  ;;  %v2658_v54 = vadd.f32 %v2654_v46, %v2617_v1  ;;  %v8645_v43 = vrot.slane %v4686_v36, %v9408_v53  ;;  %v8650_v27 = vld [vmem:[%s9076_s4 + $0x16] ss:$8 sm:$0x3]  ;;  %v2736_v45 = vmul.f32 %v2728_v8, %v8612_v50  ;;  %v9772_v46 = vld [vmem:[#allocation17_spill] sm:$0xff] }
 0x594   : > { %9765 = vst [vmem:[#allocation61_spill] sm:$0xff] %v8638_v32  ;;  %v2291_v22 = vadd.f32 %v2287_v19, %v2235_v10  ;;  %v2645_v23 = vsel %vm1317_vm15, %v9769_v28, %v9752_v21  ;;  %v9770_v42 = vld [vmem:[#allocation138_spill] sm:$0xff]  ;;  %v9773_v1 = vld [vmem:[#allocation115_spill] sm:$0xff]  ;;  %v2534_v57 = vadd.f32 %v2530_v34, %v2493_v63  ;;  %v8666_v19 = vld [vmem:[%s9076_s4 + $0x23] ss:$8 sm:$0x3]  ;;  %v2328_v21 = vmul.f32 %v2320_v59, %v8434_v35 }
 0x595   : > { %v9771_v17 = vld [vmem:[#allocation146_spill] sm:$0xff]  ;;  %v2402_v58 = vsel %vm1048_vm14, %v9773_v1, %v9772_v46  ;;  %v2699_v30 = vadd.f32 %v2695_v51, %v2658_v54  ;;  %v2369_v10 = vmul.f32 %v2361_v31, %v8448_v48  ;;  %v9775_v28 = vld [vmem:[#allocation131_spill] sm:$0xff]  ;;  %v8677_v34 = vrot.slane %v8650_v27, %v9408_v53  ;;  %v9779_v1 = vld [vmem:[#allocation172_spill] sm:$0xff] }
 0x596   : > { %v2769_v9 = vsel %vm321_vm0, %v9771_v17, %v9770_v42  ;;  %v9774_v52 = vld [vmem:[#allocation106_spill] sm:$0xff]  ;;  %v8668_v8 = vpop.permute.xlu1 %3971  ;;  %v2686_v42 = vsel %vm1317_vm15, %v9775_v28, %v9756_v62  ;;  %v2575_v51 = vadd.f32 %v2571_v25, %v2534_v57  ;;  %v9778_v46 = vld [vmem:[#allocation23_spill] sm:$0xff]  ;;  %v2332_v48 = vadd.f32 %v2328_v21, %v2291_v22 }
 0x597   : > { %v2612_v60 = vmul.f32 %v2604_v5, %v9774_v52  ;;  %9776 = vst [vmem:[#allocation168_spill] sm:$0xff] %v8677_v34  ;;  %v8679_v63 = vpop.permute.xlu0 %3895  ;;  %v2653_v5 = vmul.f32 %v2645_v23, %v8394_v2  ;;  %v2777_v54 = vmul.f32 %v2769_v9, %v8645_v43  ;;  %v2810_v35 = vsel %vm321_vm0, %v9779_v1, %v9778_v46  ;;  %v4710_v2 = vld [vmem:[%s9077_s5 + $0x11] ss:$8 sm:$0x3] }
 0x598   : > { %9777 = vst [vmem:[#allocation113_spill] sm:$0xff] %v8679_v63  ;;  %v2410_v59 = vmul.f32 %v2402_v58, %v8461_v20  ;;  %v8689_v62 = vrot.slane %v8666_v19, %v9408_v53  ;;  %v2694_v52 = vmul.f32 %v2686_v42, %v8409_v29  ;;  %v2851_v25 = vsel %vm321_vm0, %v8544_v55, %v8534_v11  ;;  %v8703_v20 = vld [vmem:[%s9076_s4 + $0x30] ss:$8 sm:$0x3]  ;;  %v9782_v29 = vld [vmem:[#allocation85_spill] sm:$0xff] }
 0x599   : > { %v2616_v31 = vadd.f32 %v2612_v60, %v2575_v51  ;;  %v2740_v22 = vadd.f32 %v2736_v45, %v2699_v30  ;;  %v2735_v9 = vmul.f32 %v2727_v61, %v8443_v37  ;;  %v9781_v58 = vld [vmem:[#allocation10_spill] sm:$0xff]  ;;  %v2373_v60 = vadd.f32 %v2369_v10, %v2332_v48  ;;  %v9783_v11 = vld [vmem:[#allocation97_spill] sm:$0xff]  ;;  %v9785_v45 = vld [vmem:[#allocation100_spill] sm:$0xff] }
 0x59a   : > { %9780 = vst [vmem:[#allocation96_spill] sm:$0xff] %v8689_v62  ;;  %v8698_v23 = vpop.permute.xlu1 %2807  ;;  %v8709_v57 = vsel %vm1317_vm15, %v9782_v29, %v9781_v58  ;;  %v2818_v21 = vmul.f32 %v2810_v35, %v8677_v34  ;;  %v9784_v42 = vld [vmem:[#allocation121_spill] sm:$0xff]  ;;  %v9786_v51 = vld [vmem:[#allocation124_spill] sm:$0xff]  ;;  %v4711_v37 = vld [vmem:[%s9077_s5 + $0x16] ss:$8 sm:$0x3]  ;;  %v8727_v48 = vrot.slane %v4710_v2, %v9408_v53  ;;  %v2859_v29 = vmul.f32 %v2851_v25, %v8689_v62 }
 0x59b   : > { %v8712_v28 = vpop.permute.xlu0 %2805  ;;  %v2443_v30 = vsel %vm1048_vm14, %v9784_v42, %v9783_v11  ;;  %v2484_v46 = vsel %vm1048_vm14, %v9786_v51, %v9785_v45  ;;  %v2657_v12 = vadd.f32 %v2653_v5, %v2616_v31  ;;  %v2781_v61 = vadd.f32 %v2777_v54, %v2740_v22  ;;  %v9787_v58 = vld [vmem:[#allocation155_spill] sm:$0xff]  ;;  %v9789_v45 = vld [vmem:[#allocation165_spill] sm:$0xff]  ;;  %v9790_v54 = vld [vmem:[#allocation54_spill] sm:$0xff] }
 0x59c   : > { %v9788_v10 = vld [vmem:[#allocation159_spill] sm:$0xff]  ;;  %v8732_v11 = vrot.slane %v8703_v20, %v9408_v53  ;;  %v2414_v42 = vadd.f32 %v2410_v59, %v2373_v60  ;;  %v8735_v31 = vrot.slane %v4686_v36, %v9566_v26  ;;  %v3902_v22 = vsel %vm321_vm0, %v9790_v54, %v9789_v45  ;;  %v4712_v51 = vld [vmem:[%s9077_s5 + $0x23] ss:$8 sm:$0x3]  ;;  %v9792_v60 = vld [vmem:[#allocation166_spill] sm:$0xff] }
 0x59d   : > { %v3861_v35 = vsel %vm321_vm0, %v9788_v10, %v9787_v58  ;;  %v2698_v5 = vadd.f32 %v2694_v52, %v2657_v12  ;;  %v2451_v25 = vmul.f32 %v2443_v30, %v8476_v33  ;;  %v2768_v62 = vsel %vm321_vm0, %v9791_v15, %v9771_v17  ;;  %v9793_v63 = vld [vmem:[#allocation174_spill] sm:$0xff] }
 0x59e   : > { %v2884_v58 = vpop.permute.xlu1 %2883  ;;  %v8748_v12 = vrot.slane %v4711_v37, %v9408_v53  ;;  %v2822_v59 = vadd.f32 %v2818_v21, %v2781_v61  ;;  %v2492_v52 = vmul.f32 %v2484_v46, %v8503_v14  ;;  %v3869_v45 = vmul.f32 %v3861_v35, %v9792_v60  ;;  %v4713_v14 = vld [vmem:[%s9077_s5 + $0x30] ss:$8 sm:$0x3]  ;;  %v9796_v60 = vld [vmem:[#allocation164_spill] sm:$0xff] }
 0x59f   : > { %v2882_v36 = vpop.permute.xlu0 %2881  ;;  %v3943_v32 = vsel %vm321_vm0, %v8427_v41, %v9793_v63  ;;  %v3910_v33 = vmul.f32 %v3902_v22, %v8727_v48  ;;  %v8758_v30 = vrot.slane %v4712_v51, %v9408_v53  ;;  %v2739_v21 = vadd.f32 %v2735_v9, %v2698_v5 }
 0x5a0   : > { %v2892_v34 = vsel %vm321_vm0, %v2882_v36, %v2884_v58  ;;  %v2863_v15 = vadd.f32 %v2859_v29, %v2822_v59  ;;  %v2776_v46 = vmul.f32 %v2768_v62, %v8735_v31  ;;  %v8767_v63 = vrot.slane %v8650_v27, %v9566_v26  ;;  %v9794_v29 = vld [vmem:[#allocation167_spill] sm:$0xff]  ;;  %v9795_v27 = vld [vmem:[#allocation157_spill] sm:$0xff] }
 0x5a1   : > { %v2900_v17 = vmul.f32 %v2892_v34, %v8732_v11  ;;  %v3984_v61 = vsel %vm321_vm0, %v8608_v44, %v8602_v4  ;;  %v3873_v22 = vadd.f32 %v3869_v45, %v9794_v29  ;;  %v3951_v34 = vmul.f32 %v3943_v32, %v8748_v12 }
 0x5a2   : > { %v8772_v35 = vpop.permute.xlu1 %3940  ;;  %v2809_v9 = vsel %vm321_vm0, %v8450_v3, %v9779_v1  ;;  %v3860_v58 = vsel %vm321_vm0, %v9795_v27, %v9788_v10  ;;  %v8785_v59 = vrot.slane %v4710_v2, %v9566_v26  ;;  %v8789_v4 = vrot.slane %v8666_v19, %v9566_v26 }
 0x5a3   : > { %v8779_v5 = vpop.permute.xlu0 %3938  ;;  %v2904_v62 = vadd.f32 %v2900_v17, %v2863_v15  ;;  %v8792_v32 = vrot.slane %v4713_v14, %v9408_v53  ;;  %v3901_v3 = vsel %vm321_vm0, %v9796_v60, %v9790_v54  ;;  %v3914_v1 = vadd.f32 %v3910_v33, %v3873_v22  ;;  %v9799_v22 = vld [vmem:[#allocation102_spill] sm:$0xff]  ;;  %v9801_v60 = vld [vmem:[#allocation136_spill] sm:$0xff] }
 0x5a4   : > { %v3992_v45 = vmul.f32 %v3984_v61, %v8758_v30  ;;  %v2850_v10 = vsel %vm321_vm0, %v8627_v6, %v8544_v55  ;;  %v2455_v2 = vadd.f32 %v2451_v25, %v2414_v42  ;;  %v2780_v15 = vadd.f32 %v2776_v46, %v2739_v21  ;;  %v9798_v46 = vld [vmem:[#allocation132_spill] sm:$0xff] }
 0x5a5   : > { %4232 = vmatprep.mubr.f32.mxu0 %v2904_v62  ;;  %v2817_v19 = vmul.f32 %v2809_v9, %v8767_v63  ;;  %v8803_v17 = vrot.slane %v4711_v37, %v9566_v26  ;;  %v3868_v29 = vmul.f32 %v3860_v58, %v8488_v47  ;;  %v3955_v27 = vadd.f32 %v3951_v34, %v3914_v1 }
 0x5a6   : > { %v4017_v53 = vpop.permute.xlu1 %4016  ;;  %v3942_v54 = vsel %vm321_vm0, %v8478_v39, %v8427_v41  ;;  %v8810_v33 = vrot.slane %v4712_v51, %v9566_v26  ;;  %v3909_v6 = vmul.f32 %v3901_v3, %v8785_v59  ;;  %v2858_v42 = vmul.f32 %v2850_v10, %v8789_v4  ;;  %v9797_v51 = vld [vmem:[#allocation117_spill] sm:$0xff] }
 0x5a7   : > { %v4015_v55 = vpop.permute.xlu0 %4014  ;;  %v8817_v37 = vrot.slane %v8703_v20, %v9566_v26  ;;  %v2496_v47 = vadd.f32 %v2492_v52, %v2455_v2  ;;  %v3996_v21 = vadd.f32 %v3992_v45, %v3955_v27  ;;  %v3983_v41 = vsel %vm321_vm0, %v8668_v8, %v8608_v44  ;;  %v9800_v20 = vld [vmem:[#allocation126_spill] sm:$0xff] }
 0x5a8   : > { %v4025_v25 = vsel %vm321_vm0, %v4015_v55, %v4017_v53  ;;  %v2566_v61 = vsel %vm1317_vm15, %v9798_v46, %v9797_v51  ;;  %v3872_v34 = vadd.f32 %v3868_v29, %v9799_v22  ;;  %v2821_v9 = vadd.f32 %v2817_v19, %v2780_v15  ;;  %v9802_v29 = vld [vmem:[#allocation133_spill] sm:$0xff]  ;;  %v9803_v27 = vld [vmem:[#allocation142_spill] sm:$0xff] }
 0x5a9   : > { %v4033_v39 = vmul.f32 %v4025_v25, %v8792_v32  ;;  %v3950_v62 = vmul.f32 %v3942_v54, %v8803_v17  ;;  %v2607_v52 = vsel %vm1317_vm15, %v9801_v60, %v9800_v20  ;;  %v8833_v8 = vrot.slane %v4713_v14, %v9566_v26 }
 0x5aa   : > { %v2880_v58 = vpop.permute.xlu1 %2879  ;;  %v3913_v45 = vadd.f32 %v3909_v6, %v3872_v34  ;;  %v2862_v10 = vadd.f32 %v2858_v42, %v2821_v9  ;;  %v3991_v2 = vmul.f32 %v3983_v41, %v8810_v33  ;;  %v2533_v19 = vmul.f32 %v8709_v57, %v8515_v16  ;;  %v9804_v41 = vld [vmem:[#allocation135_spill] sm:$0xff] }
 0x5ab   : > { %v2891_v3 = vsel %vm321_vm0, %v2880_v58, %v2882_v36  ;;  %v2804_v1 = vpop.permute.xlu0 %2803  ;;  %v4037_v44 = vadd.f32 %v4033_v39, %v3996_v21  ;;  %v2574_v53 = vmul.f32 %v2566_v61, %v8552_v49  ;;  %v2648_v36 = vsel %vm1317_vm15, %v9803_v27, %v9802_v29  ;;  %v9805_v39 = vld [vmem:[#allocation144_spill] sm:$0xff]  ;;  %v9806_v9 = vld [vmem:[#allocation71_spill] sm:$0xff] }
 0x5ac   : > { %v2899_v15 = vmul.f32 %v2891_v3, %v8817_v37  ;;  %v3954_v54 = vadd.f32 %v3950_v62, %v3913_v45  ;;  %v2537_v14 = vadd.f32 %v2533_v19, %v2496_v47  ;;  %v2615_v6 = vmul.f32 %v2607_v52, %v8563_v13  ;;  %v9810_v27 = vld [vmem:[#allocation96_spill] sm:$0xff] }
 0x5ad   : > { %4309 = vmatprep.mubr.f32.mxu1 %v4037_v44  ;;  %v2689_v16 = vsel %vm1317_vm15, %v9805_v39, %v9804_v41  ;;  %v2656_v46 = vmul.f32 %v2648_v36, %v8580_v7  ;;  %v2730_v62 = vsel %vm321_vm0, %v9718_v24, %v9806_v9  ;;  %v2771_v58 = vsel %vm321_vm0, %v8523_v56, %v8508_v0 }
 0x5ae   : > { %v4013_v25 = vpop.permute.xlu1 %4012  ;;  %v2903_v26 = vadd.f32 %v2899_v15, %v2862_v10  ;;  %v3995_v57 = vadd.f32 %v3991_v2, %v3954_v54  ;;  %v2578_v51 = vadd.f32 %v2574_v53, %v2537_v14  ;;  %v2697_v47 = vmul.f32 %v2689_v16, %v8598_v38  ;;  %v9807_v2 = vld [vmem:[#allocation168_spill] sm:$0xff] }
 0x5af   : > { %v4024_v42 = vsel %vm321_vm0, %v4013_v25, %v4015_v55  ;;  %v3937_v21 = vpop.permute.xlu0 %3936  ;;  %v3904_v7 = vsel %vm321_vm0, %v8582_v18, %v8569_v40  ;;  %v2812_v38 = vsel %vm321_vm0, %v8712_v28, %v8698_v23  ;;  %v2738_v3 = vmul.f32 %v2730_v62, %v8612_v50  ;;  %v9808_v23 = vld [vmem:[#allocation61_spill] sm:$0xff]  ;;  %v9811_v25 = vld [vmem:[#allocation110_spill] sm:$0xff] }
 0x5b0   : > { %v4032_v49 = vmul.f32 %v4024_v42, %v8833_v8  ;;  %4233 = vmatmul.mubr.f32.vlgmr.msra.gmra.mrb[0].mxu0 %v2903_v26  ;;  %v2619_v34 = vadd.f32 %v2615_v6, %v2578_v51  ;;  %v2779_v44 = vmul.f32 %v2771_v58, %v8645_v43  ;;  %v3912_v0 = vmul.f32 %v3904_v7, %v8727_v48  ;;  %v9809_v43 = vld [vmem:[#allocation113_spill] sm:$0xff] }
 0x5b1   : > { %v2820_v15 = vmul.f32 %v2812_v38, %v9807_v2  ;;  %v3945_v40 = vsel %vm321_vm0, %v8779_v5, %v8772_v35  ;;  %v2770_v50 = vsel %vm321_vm0, %v9808_v23, %v8523_v56  ;;  %v3903_v29 = vsel %vm321_vm0, %v9809_v43, %v8582_v18  ;;  %v4430_v43 = vld [vmem:[%s9079_s7 + $0x20] sm:$0xff] }
 0x5b2   : > { %v4036_v61 = vadd.f32 %v4032_v49, %v3995_v57  ;;  %v2849_v22 = vpop.permute.xlu1 %2848  ;;  %v2660_v55 = vadd.f32 %v2656_v46, %v2619_v34  ;;  %v3916_v26 = vadd.f32 %v3912_v0, %v9811_v25  ;;  %v3953_v6 = vmul.f32 %v3945_v40, %v8748_v12  ;;  %v9813_v34 = vld [vmem:[#allocation140_spill] sm:$0xff]  ;;  %v4432_v25 = vld [vmem:[%s9079_s7 + $0x30] sm:$0xff] }
 0x5b3   : > { %v2847_v13 = vpop.permute.xlu0 %2846  ;;  %v3944_v35 = vsel %vm321_vm0, %v3937_v21, %v8779_v5  ;;  %v2778_v56 = vmul.f32 %v2770_v50, %v8735_v31  ;;  %v3911_v41 = vmul.f32 %v3903_v29, %v8785_v59  ;;  %v2811_v18 = vsel %vm321_vm0, %v2804_v1, %v8712_v28  ;;  %v9812_v28 = vld [vmem:[#allocation24_spill] sm:$0xff]  ;;  %v4431_v29 = vld [vmem:[%s9079_s7 + $0x28] sm:$0xff] }
 0x5b4   : > { %4310 = vmatmul.mubr.f32.vlgmr.msra.gmra.mrb[4].mxu1 %v4036_v61  ;;  %v2701_v60 = vadd.f32 %v2697_v47, %v2660_v55  ;;  %v2853_v24 = vsel %vm321_vm0, %v2847_v13, %v2849_v22  ;;  %v3952_v51 = vmul.f32 %v3944_v35, %v8803_v17  ;;  %v3957_v31 = vadd.f32 %v3953_v6, %v3916_v26  ;;  %v4446_v40 = vld [vmem:[%s9079_s7 + $0xa0] sm:$0xff]  ;;  %v4433_v26 = vld [vmem:[%s9079_s7 + $0x38] sm:$0xff]  ;;  %v4451_v6 = vld [vmem:[%s9079_s7 + $0xc8] sm:$0xff] }
 0x5b5   : > { %v2861_v36 = vmul.f32 %v2853_v24, %v9810_v27  ;;  %v2819_v59 = vmul.f32 %v2811_v18, %v8767_v63  ;;  %v3915_v1 = vadd.f32 %v3911_v41, %v9812_v28  ;;  %v2782_v47 = vadd.f32 %v2778_v56, %v9813_v34  ;;  %v4448_v27 = vld [vmem:[%s9079_s7 + $0xb0] sm:$0xff]  ;;  %v4434_v56 = vld [vmem:[%s9079_s7 + $0x40] sm:$0xff]  ;;  %v4435_v41 = vld [vmem:[%s9079_s7 + $0x48] sm:$0xff] }
 0x5b6   : > { %v3982_v20 = vpop.permute.xlu1 %3981  ;;  %v2742_v10 = vadd.f32 %v2738_v3, %v2701_v60  ;;  %v4917_v35 = vpack.c.bf16 %v4433_v26, %v4432_v25  ;;  %v4452_v18 = vld [vmem:[%s9079_s7 + $0xd0] sm:$0xff]  ;;  %v4457_v28 = vld [vmem:[%s9079_s7 + $0xf8] sm:$0xff] }
 0x5b7   : > { %v3980_v52 = vpop.permute.xlu0 %3979  ;;  %v2823_v62 = vadd.f32 %v2819_v59, %v2782_v47  ;;  %v4438_v59 = vld [vmem:[%s9079_s7 + $0x60] sm:$0xff]  ;;  %v4441_v34 = vld [vmem:[%s9079_s7 + $0x78] sm:$0xff] }
 0x5b8   : > { %v2783_v53 = vadd.f32 %v2779_v44, %v2742_v10  ;;  %v3986_v48 = vsel %vm321_vm0, %v3980_v52, %v3982_v20  ;;  %v4443_v44 = vld [vmem:[%s9079_s7 + $0x88] sm:$0xff]  ;;  %v4445_v10 = vld [vmem:[%s9079_s7 + $0x98] sm:$0xff] }
 0x5b9   : > { %v3994_v57 = vmul.f32 %v3986_v48, %v8758_v30  ;;  %v4913_v48 = vpack.c.bf16 %v4431_v29, %v4430_v43 }
 0x5ba   : > { %v3978_v45 = vpop.permute.xlu1 %3977  ;;  %v2824_v14 = vadd.f32 %v2820_v15, %v2783_v53  ;;  %v4428_v15 = vld [vmem:[%s9079_s7 + $0x10] sm:$0xff]  ;;  %v4447_v53 = vld [vmem:[%s9079_s7 + $0xa8] sm:$0xff] }
 0x5bb   : > { %v2845_v19 = vpop.permute.xlu0 %2844  ;;  %v3985_v49 = vsel %vm321_vm0, %v3978_v45, %v3980_v52  ;;  %v3998_v55 = vadd.f32 %v3994_v57, %v3957_v31  ;;  %v4444_v45 = vld [vmem:[%s9079_s7 + $0x90] sm:$0xff]  ;;  %v4911_v50 = vpack.c.bf16 %v4447_v53, %v4446_v40 }
 0x5bc   : > { %v2865_v16 = vadd.f32 %v2861_v36, %v2824_v14  ;;  %v2852_v5 = vsel %vm321_vm0, %v2845_v19, %v2847_v13  ;;  %v3993_v22 = vmul.f32 %v3985_v49, %v8810_v33  ;;  %v3956_v13 = vadd.f32 %v3952_v51, %v3915_v1  ;;  %v4429_v19 = vld [vmem:[%s9079_s7 + $0x18] sm:$0xff]  ;;  %v4450_v14 = vld [vmem:[%s9079_s7 + $0xc0] sm:$0xff]  ;;  %v4436_v49 = vld [vmem:[%s9079_s7 + $0x50] sm:$0xff] }
 0x5bd   : > { %v4907_v2 = vpack.c.bf16 %v4445_v10, %v4444_v45  ;;  %v4909_v23 = vpack.c.bf16 %v4429_v19, %v4428_v15  ;;  %v4449_v36 = vld [vmem:[%s9079_s7 + $0xb8] sm:$0xff]  ;;  %v4454_v51 = vld [vmem:[%s9079_s7 + $0xe0] sm:$0xff] }
 0x5be   : > { %v2890_v54 = vpop.permute.xlu1 %2889  ;;  %v3997_v60 = vadd.f32 %v3993_v22, %v3956_v13 }
 0x5bf   : > { %v2888_v42 = vpop.permute.xlu0 %2887 }
 0x5c0   : > { %v2894_v39 = vsel %vm321_vm0, %v2888_v42, %v2890_v54  ;;  %v4915_v54 = vpack.c.bf16 %v4449_v36, %v4448_v27 }
 0x5c1   : > { %v2902_v12 = vmul.f32 %v2894_v39, %v8732_v11  ;;  %v2860_v11 = vmul.f32 %v2852_v5, %v8789_v4  ;;  %v4453_v39 = vld [vmem:[%s9079_s7 + $0xd8] sm:$0xff]  ;;  %v4455_v5 = vld [vmem:[%s9079_s7 + $0xe8] sm:$0xff] }
 0x5c2   : > { %v4023_v21 = vpop.permute.xlu1 %4022  ;;  %v4923_v57 = vpack.c.bf16 %v4453_v39, %v4452_v18  ;;  %v4927_v31 = vpack.c.bf16 %v4455_v5, %v4454_v51 }
 0x5c3   : > { %v4021_v46 = vpop.permute.xlu0 %4020  ;;  %v2906_v61 = vadd.f32 %v2902_v12, %v2865_v16  ;;  %v2864_v7 = vadd.f32 %v2860_v11, %v2823_v62  ;;  %v4921_v16 = vpack.c.bf16 %v4435_v41, %v4434_v56  ;;  %v4437_v12 = vld [vmem:[%s9079_s7 + $0x58] sm:$0xff] }
 0x5c4   : > { %v4027_v30 = vsel %vm321_vm0, %v4021_v46, %v4023_v21  ;;  %v4925_v21 = vpack.c.bf16 %v4437_v12, %v4436_v49 }
 0x5c5   : > { %v4035_v17 = vmul.f32 %v4027_v30, %v8792_v32  ;;  %4238 = vmatprep.mubr.f32.mxu0 %v2906_v61  ;;  %v4442_v32 = vld [vmem:[%s9079_s7 + $0x80] sm:$0xff]  ;;  %v4456_v61 = vld [vmem:[%s9079_s7 + $0xf0] sm:$0xff] }
 0x5c6   : > { %v4019_v9 = vpop.permute.xlu1 %4018  ;;  %v4903_v24 = vpack.c.bf16 %v4443_v44, %v4442_v32  ;;  %v4931_v22 = vpack.c.bf16 %v4457_v28, %v4456_v61  ;;  %v4440_v30 = vld [vmem:[%s9079_s7 + $0x70] sm:$0xff] }
 0x5c7   : > { %v4026_v63 = vsel %vm321_vm0, %v4019_v9, %v4021_v46  ;;  %v2886_v58 = vpop.permute.xlu0 %2885  ;;  %v4039_v20 = vadd.f32 %v4035_v17, %v3998_v55  ;;  %v4439_v46 = vld [vmem:[%s9079_s7 + $0x68] sm:$0xff]  ;;  %v4933_v47 = vpack.c.bf16 %v4441_v34, %v4440_v30 }
 0x5c8   : > { %v4034_v33 = vmul.f32 %v4026_v63, %v8833_v8  ;;  %v2893_v52 = vsel %vm321_vm0, %v2886_v58, %v2888_v42  ;;  %v4426_v8 = vld [vmem:[%s9079_s7] sm:$0xff]  ;;  %4904 = vmatprep.subr.bf16.mxu0 %v4903_v24  ;;  %v4919_v42 = vpack.c.bf16 %v4451_v6, %v4450_v14  ;;  %v4929_v1 = vpack.c.bf16 %v4439_v46, %v4438_v59 }
 0x5c9   : > { %v2901_v38 = vmul.f32 %v2893_v52, %v8817_v37  ;;  %4315 = vmatprep.mubr.f32.mxu1 %v4039_v20  ;;  %v4427_v37 = vld [vmem:[%s9079_s7 + $0x8] sm:$0xff] }
 0x5ca   : > { %v4038_v4 = vadd.f32 %v4034_v33, %v3997_v60  ;;  %v4905_v0 = vpack.c.bf16 %v4427_v37, %v4426_v8 }
 0x5cb   : > { %v2905_v3 = vadd.f32 %v2901_v38, %v2864_v7 }
 0x5cc   : > { %4316 = vmatmul.mubr.f32.gmra.mrb[6].mxu1 %v4038_v4  ;;  %4906 = vmatpush3.bf16.msra.mxu0 %v4905_v0 }
 0x5cd   : > { %4239 = vmatmul.mubr.f32.gmra.mrb[2].mxu0 %v2905_v3  ;;  %4908 = vmatprep.subr.bf16.mxu0 %v4907_v2 }
 0x5d0   : > { %4910 = vmatpush3.bf16.msra.mxu0 %v4909_v23 }
 0x5d1   : > { %4912 = vmatprep.subr.bf16.mxu0 %v4911_v50 }
 0x5d4   : > { %4914 = vmatpush3.bf16.msra.mxu0 %v4913_v48 }
 0x5d5   : > { %4916 = vmatprep.subr.bf16.mxu0 %v4915_v54 }
 0x5d8   : > { %4918 = vmatpush3.bf16.msra.mxu0 %v4917_v35 }
 0x5d9   : > { %4920 = vmatprep.subr.bf16.mxu0 %v4919_v42 }
 0x5dc   : > { %4922 = vmatpush3.bf16.msra.mxu0 %v4921_v16 }
 0x5dd   : > { %4924 = vmatprep.subr.bf16.mxu0 %v4923_v57 }
 0x5e0   : > { %4926 = vmatpush3.bf16.msra.mxu0 %v4925_v21 }
 0x5e1   : > { %4928 = vmatprep.subr.bf16.mxu0 %v4927_v31 }
 0x5e4   : > { %4930 = vmatpush3.bf16.msra.mxu0 %v4929_v1 }
 0x5e5   : > { %4932 = vmatprep.subr.bf16.mxu0 %v4931_v22  ;;  %v5127_v22 = vmov -1.0  }
 0x5e8   : > { %4934 = vmatpush3.bf16.msra.mxu0 %v4933_v47 }
 0x683   : > { %v4234_v55 = vpop.f32.mrb[0].mxu0 }
 0x684   : > { %v4236_v11 = vpop.f32.mrb[1].mxu0 }
 0x687   : > { %v4311_v17 = vpop.f32.mrb[4].mxu1 }
 0x688   : > { %v9000_v13 = vadd.f32 %v4311_v17, %v4234_v55  ;;  %v4313_v9 = vpop.f32.mrb[5].mxu1 }
 0x689   : > { %v9002_v62 = vadd.f32 %v4313_v9, %v4236_v11 }
 0x68a   : > { %v4330_v63 = vand.u32 2147483647, %v9000_v13  ;;  %vm4322_vm1 = vcmp.ge.f32.partialorder %v9000_v13, 0.0 }
 0x68b   : > { %v4331_v58 = vand.u32 2147483647, %v9002_v62  ;;  %vm4323_vm2 = vcmp.ge.f32.partialorder %v9002_v62, 0.0  ;;  %v4326_v30 = vsel %vm4322_vm1, 1.0, %v5127_v22 }
 0x68c   : > { %v4334_v20 = vmul.f32 0.70710677, %v4330_v63  ;;  %v4327_v11 = vsel %vm4323_vm2, 1.0, %v5127_v22 }
 0x68d   : > { %v4335_v60 = vmul.f32 0.70710677, %v4331_v58 }
 0x68e   : > { %v4338_v33 = vmul.f32 0.3275911, %v4334_v20  ;;  %v4386_v4 = vsub.f32 0.0, %v4334_v20 }
 0x68f   : > { %v4339_v52 = vmul.f32 0.3275911, %v4335_v60  ;;  %v4387_v3 = vsub.f32 0.0, %v4335_v60 }
 0x690   : > { %v4342_v7 = vadd.f32 1.0, %v4338_v33  ;;  %v4390_v44 = vmul.f32 %v4386_v4, %v4334_v20  ;;  %v4414_v4 = vmul.f32 0.5, %v9000_v13 }
 0x691   : > { %v4343_v38 = vadd.f32 1.0, %v4339_v52  ;;  %v4391_v37 = vmul.f32 %v4387_v3, %v4335_v60  ;;  %v4415_v52 = vmul.f32 0.5, %v9002_v62 }
 0x692   : > { %5000 = vrcp.f32 %v4342_v7  ;;  %v4394_v2 = vmul.f32 1.442695, %v4390_v44 }
 0x693   : > { %5002 = vrcp.f32 %v4343_v38  ;;  %v4396_v43 = vmul.f32 1.442695, %v4391_v37 }
 0x694   : > { %5004 = vpow2.f32 %v4394_v2 }
 0x695   : > { %5006 = vpow2.f32 %v4396_v43 }
 0x69c   : > { %v5001_v32 = vpop.eup %5000 }
 0x69d   : > { %v5003_v8 = vpop.eup %5002  ;;  %v4350_v24 = vmul.f32 1.0614054, %v5001_v32 }
 0x69e   : > { %v4351_v45 = vmul.f32 1.0614054, %v5003_v8  ;;  %v5005_v21 = vpop.eup %5004 }
 0x69f   : > { %v4354_v10 = vadd.f32 -1.4531521, %v4350_v24  ;;  %v4317_v0 = vpop.f32.mrb[6].mxu1  ;;  %v5007_v46 = vpop.eup %5006 }
 0x6a0   : > { %v4240_v15 = vpop.f32.mrb[2].mxu0  ;;  %v4319_v19 = vpop.f32.mrb[7].mxu1  ;;  %v4355_v40 = vadd.f32 -1.4531521, %v4351_v45 }
 0x6a1   : > { %v4358_v53 = vmul.f32 %v5001_v32, %v4354_v10  ;;  %v9006_v23 = vadd.f32 %v4317_v0, %v4240_v15  ;;  %v4242_v50 = vpop.f32.mrb[3].mxu0 }
 0x6a2   : > { %v9008_v29 = vadd.f32 %v4319_v19, %v4242_v50  ;;  %v4359_v27 = vmul.f32 %v5003_v8, %v4355_v40 }
 0x6a3   : > { %v4362_v36 = vadd.f32 1.4214138, %v4358_v53  ;;  %v4332_v48 = vand.u32 2147483647, %v9006_v23  ;;  %vm4324_vm3 = vcmp.ge.f32.partialorder %v9006_v23, 0.0 }
 0x6a4   : > { %v4333_v54 = vand.u32 2147483647, %v9008_v29  ;;  %v4363_v14 = vadd.f32 1.4214138, %v4359_v27  ;;  %vm4325_vm4 = vcmp.ge.f32.partialorder %v9008_v29, 0.0 }
 0x6a5   : > { %v4366_v25 = vmul.f32 %v5001_v32, %v4362_v36  ;;  %v4336_v26 = vmul.f32 0.70710677, %v4332_v48 }
 0x6a6   : > { %v4337_v6 = vmul.f32 0.70710677, %v4333_v54  ;;  %v4367_v56 = vmul.f32 %v5003_v8, %v4363_v14 }
 0x6a7   : > { %v4370_v35 = vadd.f32 -0.28449672, %v4366_v25  ;;  %v4340_v42 = vmul.f32 0.3275911, %v4336_v26  ;;  %v4388_v28 = vsub.f32 0.0, %v4336_v26 }
 0x6a8   : > { %v4341_v41 = vmul.f32 0.3275911, %v4337_v6  ;;  %v4371_v16 = vadd.f32 -0.28449672, %v4367_v56  ;;  %v4389_v34 = vsub.f32 0.0, %v4337_v6 }
 0x6a9   : > { %v4374_v18 = vmul.f32 %v5001_v32, %v4370_v35  ;;  %v4344_v39 = vadd.f32 1.0, %v4340_v42  ;;  %v4392_v9 = vmul.f32 %v4388_v28, %v4336_v26  ;;  %v4329_v42 = vsel %vm4325_vm4, 1.0, %v5127_v22 }
 0x6aa   : > { %v4345_v57 = vadd.f32 1.0, %v4341_v41  ;;  %v4375_v12 = vmul.f32 %v5003_v8, %v4371_v16  ;;  %v4393_v60 = vmul.f32 %v4389_v34, %v4337_v6  ;;  %v4328_v6 = vsel %vm4324_vm3, 1.0, %v5127_v22 }
 0x6ab   : > { %v4378_v49 = vadd.f32 0.2548296, %v4374_v18  ;;  %5008 = vrcp.f32 %v4344_v39  ;;  %v4417_v39 = vmul.f32 0.5, %v9008_v29 }
 0x6ac   : > { %5010 = vrcp.f32 %v4345_v57  ;;  %v4379_v5 = vadd.f32 0.2548296, %v4375_v12  ;;  %v4400_v37 = vmul.f32 1.442695, %v4393_v60  ;;  %v4416_v57 = vmul.f32 0.5, %v9006_v23 }
 0x6ad   : > { %v4382_v51 = vmul.f32 %v5001_v32, %v4378_v49  ;;  %v4398_v32 = vmul.f32 1.442695, %v4392_v9 }
 0x6ae   : > { %v4383_v59 = vmul.f32 %v5003_v8, %v4379_v5 }
 0x6af   : > { %v4402_v31 = vmul.f32 %v5005_v21, %v4382_v51  ;;  %5012 = vpow2.f32 %v4398_v32 }
 0x6b0   : > { %v4403_v1 = vmul.f32 %v5007_v46, %v4383_v59  ;;  %5014 = vpow2.f32 %v4400_v37 }
 0x6b1   : > { %v4406_v61 = vsub.f32 1.0, %v4402_v31 }
 0x6b2   : > { %v4407_v55 = vsub.f32 1.0, %v4403_v1 }
 0x6b3   : > { %v4410_v47 = vmul.f32 %v4406_v61, %v4326_v30 }
 0x6b4   : > { %v4411_v63 = vmul.f32 %v4407_v55, %v4327_v11 }
 0x6b5   : > { %v5009_v17 = vpop.eup %5008  ;;  %v4418_v20 = vadd.f32 1.0, %v4410_v47 }
 0x6b6   : > { %v5011_v58 = vpop.eup %5010  ;;  %v4352_v33 = vmul.f32 1.0614054, %v5009_v17  ;;  %v4419_v7 = vadd.f32 1.0, %v4411_v63 }
 0x6b7   : > { %v4353_v38 = vmul.f32 1.0614054, %v5011_v58  ;;  %v4422_v24 = vmul.f32 %v4418_v20, %v4414_v4 }
 0x6b8   : > { %v4356_v3 = vadd.f32 -1.4531521, %v4352_v33  ;;  %v4423_v44 = vmul.f32 %v4419_v7, %v4415_v52 }
 0x6b9   : > { %v4357_v8 = vadd.f32 -1.4531521, %v4353_v38  ;;  %v5013_v36 = vpop.eup %5012 }
 0x6ba   : > { %v4360_v45 = vmul.f32 %v5009_v17, %v4356_v3  ;;  %4522 = vmatprep.mubr.f32.mxu0 %v4423_v44  ;;  %v5015_v54 = vpop.eup %5014 }
 0x6bb   : > { %v4361_v10 = vmul.f32 %v5011_v58, %v4357_v8  ;;  %4523 = vmatmul.mubr.f32.vlgmr.msra.gmra.mrb[4].mxu0 %v4422_v24 }
 0x6bc   : > { %v4364_v0 = vadd.f32 1.4214138, %v4360_v45 }
 0x6bd   : > { %v4365_v2 = vadd.f32 1.4214138, %v4361_v10 }
 0x6be   : > { %v4368_v15 = vmul.f32 %v5009_v17, %v4364_v0 }
 0x6bf   : > { %v4369_v62 = vmul.f32 %v5011_v58, %v4365_v2 }
 0x6c0   : > { %v4372_v19 = vadd.f32 -0.28449672, %v4368_v15 }
 0x6c1   : > { %v4373_v40 = vadd.f32 -0.28449672, %v4369_v62 }
 0x6c2   : > { %v4376_v53 = vmul.f32 %v5009_v17, %v4372_v19 }
 0x6c3   : > { %v4377_v13 = vmul.f32 %v5011_v58, %v4373_v40 }
 0x6c4   : > { %v4380_v50 = vadd.f32 0.2548296, %v4376_v53 }
 0x6c5   : > { %v4381_v43 = vadd.f32 0.2548296, %v4377_v13 }
 0x6c6   : > { %v4384_v27 = vmul.f32 %v5009_v17, %v4380_v50 }
 0x6c7   : > { %v4385_v48 = vmul.f32 %v5011_v58, %v4381_v43 }
 0x6c8   : > { %v4404_v25 = vmul.f32 %v5013_v36, %v4384_v27 }
 0x6c9   : > { %v4405_v26 = vmul.f32 %v5015_v54, %v4385_v48 }
 0x6ca   : > { %v4408_v14 = vsub.f32 1.0, %v4404_v25 }
 0x6cb   : > { %v4409_v35 = vsub.f32 1.0, %v4405_v26 }
 0x6cc   : > { %v4412_v56 = vmul.f32 %v4408_v14, %v4328_v6 }
 0x6cd   : > { %v4413_v41 = vmul.f32 %v4409_v35, %v4329_v42 }
 0x6ce   : > { %v4420_v18 = vadd.f32 1.0, %v4412_v56 }
 0x6cf   : > { %v4421_v16 = vadd.f32 1.0, %v4413_v41 }
 0x6d0   : > { %v4424_v12 = vmul.f32 %v4420_v18, %v4416_v57 }
 0x6d1   : > { %v4425_v49 = vmul.f32 %v4421_v16, %v4417_v39 }
 0x6d3   : > { %4527 = vmatprep.mubr.f32.mxu0 %v4425_v49 }
 0x6d4   : > { %4528 = vmatmul.mubr.f32.gmra.mrb[6].mxu0 %v4424_v12 }
 0x78e   : > { %v4753_v51 = vpop.f32.mrb[4].mxu0 }
 0x78f   : > { %v4754_v5 = vpop.f32.mrb[5].mxu0 }
 0x790   : > { %v4755_v21 = vadd.f32 %v4754_v5, %v4753_v51 }
 0x792   : > { %4533 = vst.msk [vmem:[%s313_s17] sm:$0xff] %vm321_vm0, %v4755_v21 }
 0x7a7   : > { %v4756_v31 = vpop.f32.mrb[6].mxu0 }
 0x7a8   : > { %v4757_v23 = vpop.f32.mrb[7].mxu0 }
 0x7a9   : > { %v4758_v29 = vadd.f32 %v4757_v23, %v4756_v31 }
 0x7ab   : > { %4534 = vst.msk [vmem:[%s313_s17 + $0x8] sm:$0xff] %vm321_vm0, %v4758_v29 }
 0x7ac   : > { %5063 = shalt.err (!%p5060_p7)
}
 0x7ad   : > { %s5064_s19 = scalar_lea.hbm %s9028_s23, 256  ;;  %s5068_s17 = scalar_lea.hbm %s9080_s8, 512 }
 0x7ae   : > { %p5065_p8 = scmp.ne.s32.totalorder %s9028_s23, %s5064_s19  ;;  %p5069_p1 = scmp.lt.u32.totalorder %s9028_s23, %s9080_s8 }
 0x7af   : > { %p5070_p0 = scmp.lt.u32.totalorder %s5068_s17, %s5064_s19  ;;  %p5072_p6 = scmp.lt.u32.totalorder %s5064_s19, %s9028_s23 }
 0x7b0   : > { %p5066_p11 = pnand %p5065_p8, %p9814_p9 }
 0x7b1   : > { %p5071_p5 = por %p5070_p0, %p5069_p1 }
 0x7b2   : > { %p5067_p13 = pneg %p5066_p11 }
 0x7b3   : > { %p5073_p10 = por %p5072_p6, %p5071_p5 }
 0x7b5   : > { %p5074_p12 = pnand %p5073_p10, %p5067_p13 }
 0x7b7   : > { %5077 = shalt.err (!%p5074_p12)
}
 0x7b8   : > { %s5129_s18 = smov 128   ;;  %s5130_s20 = smov 8  }
 0x7b9   : > { %4943 = dma.vmem_to_hbm [thread:$0]  (%p9814_p9), %s9023_s10, 256, %s9028_s23, %s9031_s24, %s5129_s18, %s5129_s18, %s5130_s20  }
 0x7ba PF: > { %p4955_p2 = scmp.ge.s32.totalorder %s5116_s30, 2  ;;  %s4564_s9 = sand.u32 1, %s5104_s27  }
 0x7bb   : > { %p9815_p3 = scmp.ne.s32.totalorder %s9204_s16, 0  ;;  %s4565_s25 = scalar_lea.sflag [#allocation5], %s4564_s9 }
 0x7bd   : > { %p4950_p4 = pnand %p4955_p2, %p9815_p3 }
 0x7bf   : > { %5099 = dma.done.wait (!%p4950_p4), %s4565_s25, 256  }
 0x7c0   : > { %5101 = vsyncadd (!%p4950_p4), %s4565_s25, 4294967040  ;;  %p19_p7 = scmp.ge.s32.totalorder %s5201_s11, 4   ;;  %s9816_s27 = smov %s5108_s28 }
 0x7c1   : > { %s9817_s28 = smov %s5112_s29  ;;  %s9818_s29 = smov %s5212_s14 }
 0x7c2   : > { %s9819_s30 = smov %s5201_s11  ;;  %21 = sbr.rel (!%p19_p7) target bundleno = 4 (0x4), region = 172 }
 0x7c9   :  { %4570 = vsyncpa [#allocation4], 1 }
 0x7ca   :  { %4572 = vsyncpa [#allocation4 + $0x1], 1 }
 0x7cb   :  { %4573 = vsyncpa [#allocation5], 1 }
 0x7cc   :  { %4575 = vsyncpa [#allocation5 + $0x1], 1 }

</bundles_post_ra>
